<compile_context>
chip_gen: v5e
topology: v5e:2x2
jax: 0.10.0
libtpu: 0.0.40
codegen_flags: <defaults>
</compile_context>

<pallas_src>
import functools

import jax
import jax.numpy as jnp
from jax.experimental import pallas as pl
from jax.experimental.pallas import tpu as pltpu

# ---- static model dims -----------------------------------------------------
NS = 100            # true node scalar channels
NSP = 128           # lane-padded node scalar channels
NV = 16             # node vector channels
FFS = 400           # true feed-forward hidden scalar channels
FFSP = 512          # padded
NOUT = 33           # logits
NOUTP = 128         # padded logits

TM_MAX = 512        # max row tile (nodes / edges)
EPS_NORM = 1e-8     # _norm_no_nan eps
EPS_LN = 1e-5       # nn.LayerNorm eps
WDT = jnp.bfloat16  # matmul operand dtype (accumulation stays f32)
ADT = jnp.bfloat16  # inter-kernel activation dtype in HBM


# ---------------------------------------------------------------------------
# In-kernel math helpers (traced inside kernels)
# ---------------------------------------------------------------------------
def _mm(a, bT):
    """a[M,K] @ bT[K,N]; K==1 degenerates to a broadcast multiply (no MXU)."""
    if bT.shape[0] == 1:
        return a.astype(jnp.float32) * bT.astype(jnp.float32)
    return jnp.dot(a.astype(WDT), bT.astype(WDT),
                   preferred_element_type=jnp.float32)


def _mm3(v3, bT):
    """[3,M,K] @ [K,N] as a single stacked [3M,K] matmul (one MXU pass)."""
    c, m, k = v3.shape
    return _mm(v3.reshape(c * m, k), bT).reshape(c, m, -1)


def _gvp(s_parts, v_parts, whT_parts, wsT_parts, bs, wvT,
         scalar_act, vector_act):
    """One GVP. Inputs may be split into parts (weights row-split to match).
    wsT_parts has len(s_parts)+1 entries; the last multiplies the vector norm."""
    vh = None
    for vp, wp in zip(v_parts, whT_parts):
        t = _mm3(vp, wp)
        vh = t if vh is None else vh + t                       # [3, m, h]
    vn = jnp.sqrt(jnp.maximum(
        vh[0] * vh[0] + vh[1] * vh[1] + vh[2] * vh[2], EPS_NORM))   # [m, h]
    so = bs
    for sp, wp in zip(list(s_parts) + [vn], wsT_parts):
        so = so + _mm(sp, wp)
    vo = None
    if wvT is not None:
        vo = _mm3(vh, wvT)                                     # [3, m, vo]
        if vector_act:                                         # sigmoid norm gate
            gate = jax.nn.sigmoid(jnp.sqrt(jnp.maximum(
                vo[0] * vo[0] + vo[1] * vo[1] + vo[2] * vo[2], EPS_NORM)))
            vo = vo * gate[None]
    if scalar_act:                                             # relu
        so = jnp.maximum(so, 0.0)
    return so, vo


def _ln(s, v3, gamma, beta, n_true):
    """gvp.LayerNorm over lane-padded scalars (divide by TRUE dim; padded lanes
    are zero so sums exclude them) + RMS-over-channels on vectors."""
    inv_n = 1.0 / float(n_true)
    mu = jnp.sum(s, axis=-1, keepdims=True) * inv_n
    ex2 = jnp.sum(s * s, axis=-1, keepdims=True) * inv_n
    var = jnp.maximum(ex2 - mu * mu, 0.0)
    s_out = (s - mu) * jax.lax.rsqrt(var + EPS_LN) * gamma + beta
    sq = jnp.maximum(v3[0] * v3[0] + v3[1] * v3[1] + v3[2] * v3[2], EPS_NORM)
    inv = jax.lax.rsqrt(jnp.mean(sq, axis=-1, keepdims=True))  # [m, 1]
    return s_out, v3 * inv[None]


# ---------------------------------------------------------------------------
# Fused Pallas kernels
# ---------------------------------------------------------------------------
def _make_embed_kernel(ns_true):
    """GVP (no activations) + LayerNorm — used for W_v and W_e."""
    def kernel(s_ref, v_ref, whT, wsT_s, wsT_v, bs, wvT, g, b,
               os_ref, ov_ref):
        s, v = _gvp([s_ref[...]], [v_ref[...]],
                    [whT[...]], [wsT_s[...], wsT_v[...]], bs[...], wvT[...],
                    scalar_act=False, vector_act=False)
        s, v = _ln(s, v, g[...], b[...], ns_true)
        os_ref[...] = s.astype(os_ref.dtype)
        ov_ref[...] = v.astype(ov_ref.dtype)
    return kernel


def _message_kernel(sj_ref, se_ref, si_ref, vj_ref, ve_ref, vi_ref,
                    wh0j, wh0e, wh0i, ws0j, ws0e, ws0i, ws0v, b0, wv0,
                    wh1, ws1s, ws1v, b1, wv1,
                    wh2, ws2s, ws2v, b2, wv2,
                    os_ref, ov_ref):
    """Fused message chain msg0(relu,sig) -> msg1(relu,sig) -> msg2(None)."""
    s, v = _gvp([sj_ref[...], se_ref[...], si_ref[...]],
                [vj_ref[...], ve_ref[...], vi_ref[...]],
                [wh0j[...], wh0e[...], wh0i[...]],
                [ws0j[...], ws0e[...], ws0i[...], ws0v[...]],
                b0[...], wv0[...], scalar_act=True, vector_act=True)
    s, v = _gvp([s], [v], [wh1[...]], [ws1s[...], ws1v[...]], b1[...], wv1[...],
                scalar_act=True, vector_act=True)
    s, v = _gvp([s], [v], [wh2[...]], [ws2s[...], ws2v[...]], b2[...], wv2[...],
                scalar_act=False, vector_act=False)
    os_ref[...] = s.astype(os_ref.dtype)
    ov_ref[...] = v.astype(ov_ref.dtype)


def _make_node_kernel(with_out, ns_true):
    """Fused per-node update: x + mean(msgs) -> LN -> ff0 -> ff1 -> +res -> LN,
    optionally followed by W_out + masked log_softmax (last decoder layer)."""
    def kernel(hs_ref, hv_ref, ds_ref, dv_ref, ic_ref,
               g0, b0,
               ff0_wh, ff0_ws_s, ff0_ws_v, ff0_b, ff0_wv,
               ff1_wh, ff1_ws_s, ff1_ws_v, ff1_b, ff1_wv,
               g1, b1, *rest):
        if with_out:
            (o_wh, o_ws_s, o_ws_v, o_b,
             os_ref, ov_ref, logit_ref, logp_ref) = rest
        else:
            os_ref, ov_ref = rest

        inv_c = ic_ref[...]                                     # [tm, 1] f32
        s = hs_ref[...].astype(jnp.float32) + ds_ref[...] * inv_c
        v = hv_ref[...].astype(jnp.float32) + dv_ref[...] * inv_c[None]
        s, v = _ln(s, v, g0[...], b0[...], ns_true)
        s0, v0 = s, v

        s, v = _gvp([s0], [v0], [ff0_wh[...]], [ff0_ws_s[...], ff0_ws_v[...]],
                    ff0_b[...], ff0_wv[...], scalar_act=True, vector_act=True)
        s, v = _gvp([s], [v], [ff1_wh[...]], [ff1_ws_s[...], ff1_ws_v[...]],
                    ff1_b[...], ff1_wv[...], scalar_act=False, vector_act=False)
        s, v = _ln(s0 + s, v0 + v, g1[...], b1[...], ns_true)

        os_ref[...] = s.astype(os_ref.dtype)
        ov_ref[...] = v.astype(ov_ref.dtype)

        if with_out:
            lg, _ = _gvp([s], [v], [o_wh[...]], [o_ws_s[...], o_ws_v[...]],
                         o_b[...], None, scalar_act=False, vector_act=False)
            logit_ref[...] = lg
            col = jax.lax.broadcasted_iota(jnp.int32, lg.shape, 1)
            lg_m = jnp.where(col < NOUT, lg, -1e30)             # mask padded lanes
            m = jnp.max(lg_m, axis=-1, keepdims=True)
            lse = jnp.log(jnp.sum(jnp.exp(lg_m - m), axis=-1, keepdims=True)) + m
            logp_ref[...] = lg - lse
    return kernel


# ---------------------------------------------------------------------------
# pallas_call plumbing
# ---------------------------------------------------------------------------
def _round_up(n, m):
    return ((n + m - 1) // m) * m


def _choose_tile(n, tmax=TM_MAX):
    """Pick a row tile: big (<=tmax) but keep the grid >= 2 when possible."""
    if n <= 128:
        return _round_up(max(n, 1), 8)
    return min(tmax, _round_up((n + 1) // 2, 8))


def _row_spec(tm, d):
    return pl.BlockSpec((tm, d), lambda i: (i, 0))


def _vec_spec(tm, c):
    return pl.BlockSpec((3, tm, c), lambda i: (0, i, 0))


def _full_spec(arr):
    nd = arr.ndim
    return pl.BlockSpec(arr.shape, lambda i, _nd=nd: (0,) * _nd)


def _pcall(kernel, rows, tile, ins, in_specs, out_shapes, out_specs):
    return pl.pallas_call(
        kernel,
        grid=(rows // tile,),
        in_specs=in_specs,
        out_specs=out_specs,
        out_shape=out_shapes,
        compiler_params=pltpu.CompilerParams(
            dimension_semantics=("parallel",),
            vmem_limit_bytes=48 * 1024 * 1024),
    )(*ins)


def embed_apply(p, ln_p, s, v, Mp, tile, so_true):
    si, ci = s.shape[1], v.shape[2]
    so, co = p['wsT_s'].shape[1], p['wvT'].shape[1]
    weights = [p['whT'], p['wsT_s'], p['wsT_v'], p['bs'], p['wvT'],
               ln_p['gamma'], ln_p['beta']]
    ins = [s, v] + weights
    in_specs = [_row_spec(tile, si), _vec_spec(tile, ci)] + \
               [_full_spec(a) for a in weights]
    out_shapes = (jax.ShapeDtypeStruct((Mp, so), ADT),
                  jax.ShapeDtypeStruct((3, Mp, co), ADT))
    out_specs = (_row_spec(tile, so), _vec_spec(tile, co))
    return _pcall(_make_embed_kernel(so_true), Mp, tile,
                  ins, in_specs, out_shapes, out_specs)


def message_apply(lp, sj, se, si_, vj, ve, vi_, Ep, tile):
    nsp, nv = sj.shape[1], vj.shape[2]
    se_dim, ve_dim = se.shape[1], ve.shape[2]
    p0, p1, p2 = lp['msg0'], lp['msg1'], lp['msg2']
    weights = [p0['whT_j'], p0['whT_e'], p0['whT_i'],
               p0['wsT_j'], p0['wsT_e'], p0['wsT_i'], p0['wsT_v'],
               p0['bs'], p0['wvT'],
               p1['whT'], p1['wsT_s'], p1['wsT_v'], p1['bs'], p1['wvT'],
               p2['whT'], p2['wsT_s'], p2['wsT_v'], p2['bs'], p2['wvT']]
    ins = [sj, se, si_, vj, ve, vi_] + weights
    in_specs = [_row_spec(tile, nsp), _row_spec(tile, se_dim), _row_spec(tile, nsp),
                _vec_spec(tile, nv), _vec_spec(tile, ve_dim), _vec_spec(tile, nv)] + \
               [_full_spec(a) for a in weights]
    out_shapes = (jax.ShapeDtypeStruct((Ep, nsp), ADT),
                  jax.ShapeDtypeStruct((3, Ep, nv), ADT))
    out_specs = (_row_spec(tile, nsp), _vec_spec(tile, nv))
    return _pcall(_message_kernel, Ep, tile, ins, in_specs, out_shapes, out_specs)


def node_apply(lp, hs, hv, ds, dv, inv_cnt, Np, tile, out_p=None):
    nsp, nv = hs.shape[1], hv.shape[2]
    weights = [lp['norm0']['gamma'], lp['norm0']['beta'],
               lp['ff0']['whT'], lp['ff0']['wsT_s'], lp['ff0']['wsT_v'],
               lp['ff0']['bs'], lp['ff0']['wvT'],
               lp['ff1']['whT'], lp['ff1']['wsT_s'], lp['ff1']['wsT_v'],
               lp['ff1']['bs'], lp['ff1']['wvT'],
               lp['norm1']['gamma'], lp['norm1']['beta']]
    out_shapes = [jax.ShapeDtypeStruct((Np, nsp), ADT),
                  jax.ShapeDtypeStruct((3, Np, nv), ADT)]
    out_specs = [_row_spec(tile, nsp), _vec_spec(tile, nv)]
    if out_p is not None:
        weights += [out_p['whT'], out_p['wsT_s'], out_p['wsT_v'], out_p['bs']]
        no = out_p['wsT_s'].shape[1]
        out_shapes += [jax.ShapeDtypeStruct((Np, no), jnp.float32),
                       jax.ShapeDtypeStruct((Np, no), jnp.float32)]
        out_specs += [_row_spec(tile, no), _row_spec(tile, no)]
    ins = [hs, hv, ds, dv, inv_cnt] + weights
    in_specs = [_row_spec(tile, nsp), _vec_spec(tile, nv),
                _row_spec(tile, nsp), _vec_spec(tile, nv),
                _row_spec(tile, 1)] + [_full_spec(a) for a in weights]
    kernel = _make_node_kernel(out_p is not None, NS)
    return _pcall(kernel, Np, tile, ins, in_specs,
                  tuple(out_shapes), tuple(out_specs))


# ---------------------------------------------------------------------------
# Parameter init (deterministic, synthetic; zero-padded to lane-dense dims)
# ---------------------------------------------------------------------------
def init_ln(dim, dim_pad=None):
    dim_pad = dim if dim_pad is None else dim_pad
    g = jnp.pad(jnp.ones((1, dim), jnp.float32), ((0, 0), (0, dim_pad - dim)))
    return {'gamma': g, 'beta': jnp.zeros((1, dim_pad), jnp.float32)}


def init_gvp(key, si, vi, so, vo, si_pad=None, so_pad=None):
    si_pad = si if si_pad is None else si_pad
    so_pad = so if so_pad is None else so_pad
    h = max(vi, vo) if vo else vi                 # h_dim = max(vi, vo) (vo=0 -> vi)
    k1, k2, k3, k4 = jax.random.split(key, 4)
    whT = jax.random.normal(k1, (vi, h), jnp.float32) / jnp.sqrt(float(vi))
    sc = 1.0 / jnp.sqrt(float(si + h))
    ws_s = jax.random.normal(k2, (si, so), jnp.float32) * sc
    ws_v = jax.random.normal(k3, (h, so), jnp.float32) * sc
    p = {'whT': whT.astype(WDT),
         'wsT_s': jnp.pad(ws_s, ((0, si_pad - si), (0, so_pad - so))).astype(WDT),
         'wsT_v': jnp.pad(ws_v, ((0, 0), (0, so_pad - so))).astype(WDT),
         'bs': jnp.zeros((1, so_pad), jnp.float32)}
    if vo:
        p['wvT'] = (jax.random.normal(k4, (h, vo), jnp.float32)
                    / jnp.sqrt(float(h))).astype(WDT)
    return p


def init_msg0(key, se, ns, nv, ve, nsp):
    """First message GVP: scalar input (s_j | edge_s | s_i | vnorm), row-split
    weights with the node-scalar blocks zero-padded to nsp rows / cols."""
    vi, vo = 2 * nv + ve, nv
    h = max(vi, vo)
    si = 2 * ns + se
    k1, k2, k3 = jax.random.split(key, 3)
    wh = jax.random.normal(k1, (vi, h), jnp.float32) / jnp.sqrt(float(vi))
    ws = jax.random.normal(k2, (si + h, ns), jnp.float32) / jnp.sqrt(float(si + h))

    def padc(w):                                  # pad output cols ns -> nsp
        return jnp.pad(w, ((0, 0), (0, nsp - ns)))

    def padrc(w):                                 # pad rows ns -> nsp and cols
        return jnp.pad(w, ((0, nsp - ns), (0, nsp - ns)))

    return {
        'whT_j': wh[:nv].astype(WDT),
        'whT_e': wh[nv:nv + ve].astype(WDT),
        'whT_i': wh[nv + ve:].astype(WDT),
        'wsT_j': padrc(ws[:ns]).astype(WDT),
        'wsT_e': padc(ws[ns:ns + se]).astype(WDT),
        'wsT_i': padrc(ws[ns + se:2 * ns + se]).astype(WDT),
        'wsT_v': padc(ws[2 * ns + se:]).astype(WDT),
        'bs': jnp.zeros((1, nsp), jnp.float32),
        'wvT': (jax.random.normal(k3, (h, vo), jnp.float32)
                / jnp.sqrt(float(h))).astype(WDT),
    }


def init_conv_layer(key, se):
    ns, nv = NS, NV
    ks = jax.random.split(key, 5)
    return {
        'msg0': init_msg0(ks[0], se, ns, nv, 1, NSP),
        'msg1': init_gvp(ks[1], ns, nv, ns, nv, si_pad=NSP, so_pad=NSP),
        'msg2': init_gvp(ks[2], ns, nv, ns, nv, si_pad=NSP, so_pad=NSP),
        'norm0': init_ln(ns, NSP),
        'ff0': init_gvp(ks[3], ns, nv, FFS, 2 * nv, si_pad=NSP, so_pad=FFSP),
        'ff1': init_gvp(ks[4], FFS, 2 * nv, ns, nv, si_pad=FFSP, so_pad=NSP),
        'norm1': init_ln(ns, NSP),
    }


def init_model(key):
    ks = jax.random.split(key, 10)
    return {
        'W_v_gvp': init_gvp(ks[0], 6, 3, NS, NV, so_pad=NSP),
        'W_v_ln': init_ln(NS, NSP),
        'W_e_gvp': init_gvp(ks[1], 32, 1, 32, 1),
        'W_e_ln': init_ln(32),
        'enc': [init_conv_layer(ks[2 + i], se=32) for i in range(3)],
        'W_s': jax.random.normal(ks[5], (33, 20), jnp.float32),   # nn.Embedding(33,20)
        'dec': [init_conv_layer(ks[6 + i], se=32 + 20) for i in range(3)],
        'W_out': init_gvp(ks[9], NS, NV, NOUT, 0, si_pad=NSP, so_pad=NOUTP),
    }


# ---------------------------------------------------------------------------
# GVP-GNN forward (graph glue in XLA, all GVP/LN math in fused Pallas kernels)
# ---------------------------------------------------------------------------
def conv_layer(lp, hs, hv, src, dst, dst_scatter, inv_cnt, es, ev,
               Np, Ep, tile_n, tile_e, autoregressive=False, enc=None,
               out_p=None):
    if not autoregressive:
        s_j, s_i = hs[src], hs[dst]
        v_j, v_i = hv[:, src], hv[:, dst]
    else:
        # single stacked-table gather: forward edges (src<dst) use current x,
        # backward edges (src>=dst) use the encoder embeddings
        enc_s, enc_v = enc
        off = (src >= dst).astype(src.dtype) * Np
        tab_s = jnp.concatenate([hs, enc_s], axis=0)
        tab_v = jnp.concatenate([hv, enc_v], axis=1)
        s_j, s_i = tab_s[src + off], tab_s[dst + off]
        v_j, v_i = tab_v[:, src + off], tab_v[:, dst + off]

    # fused message chain (GVP x3) on edge tiles
    ms, mv = message_apply(lp, s_j, es, s_i, v_j, ev, v_i, Ep, tile_e)

    # aggregation in f32; padded edges scatter into the extra (sliced-off) row
    seg = functools.partial(jax.ops.segment_sum,
                            segment_ids=dst_scatter, num_segments=Np + 1)
    ds = seg(ms.astype(jnp.float32))[:Np]
    dv = jax.vmap(seg)(mv.astype(jnp.float32))[:, :Np]

    # fused: residual + mean-divide + LN + feed-forward + residual + LN (+ W_out)
    return node_apply(lp, hs, hv, ds, dv, inv_cnt, Np, tile_n, out_p=out_p)


def forward(params, node_s, node_v, edge_s, edge_v, edge_index, seq):
    N = node_s.shape[0]
    E = edge_index.shape[1]
    tile_n = _choose_tile(N)
    tile_e = _choose_tile(E)
    Np = _round_up(N, tile_n)
    Ep = _round_up(E, tile_e)

    # pad rows ONCE; vector features become [3, M, C] (spatial component leading)
    node_s_p = jnp.pad(node_s, ((0, Np - N), (0, 0)))
    node_v_p = jnp.pad(jnp.transpose(node_v, (2, 0, 1)),
                       ((0, 0), (0, Np - N), (0, 0)))
    edge_s_p = jnp.pad(edge_s, ((0, Ep - E), (0, 0)))
    edge_v_p = jnp.pad(jnp.transpose(edge_v, (2, 0, 1)),
                       ((0, 0), (0, Ep - E), (0, 0)))

    src = jnp.pad(edge_index[0], (0, Ep - E))                    # gathers hit row 0
    dst = jnp.pad(edge_index[1], (0, Ep - E))
    dst_scatter = jnp.pad(edge_index[1], (0, Ep - E),
                          constant_values=Np)                    # -> extra segment

    # W_v / W_e: fused GVP + LayerNorm (bf16 activations in HBM)
    hs, hv = embed_apply(params['W_v_gvp'], params['W_v_ln'],
                         node_s_p, node_v_p, Np, tile_n, NS)
    es, ev = embed_apply(params['W_e_gvp'], params['W_e_ln'],
                         edge_s_p, edge_v_p, Ep, tile_e, 32)

    # per-node incident-edge count; 1/count precomputed once and reused
    cnt = jax.ops.segment_sum(jnp.ones((Ep,), jnp.float32), dst_scatter,
                              num_segments=Np + 1)[:Np]
    inv_cnt = (1.0 / jnp.maximum(cnt, 1.0))[:, None]             # [Np, 1] f32

    for lp in params['enc']:
        hs, hv = conv_layer(lp, hs, hv, src, dst, dst_scatter, inv_cnt, es, ev,
                            Np, Ep, tile_n, tile_e, autoregressive=False)
    enc_s, enc_v = hs, hv

    # sequence embedding on edges, zeroed for non-causal (src >= dst) edges
    h_S = jnp.pad(params['W_s'][seq], ((0, Np - N), (0, 0)))     # [Np, 20]
    h_S_edges = h_S[src]
    h_S_edges = jnp.where((src >= dst)[:, None], 0.0, h_S_edges)
    es_dec = jnp.concatenate([es, h_S_edges.astype(ADT)], axis=-1)   # [Ep, 52]

    logits_p = logp_p = None
    for li, lp in enumerate(params['dec']):
        last = li == len(params['dec']) - 1
        out = conv_layer(lp, hs, hv, src, dst, dst_scatter, inv_cnt, es_dec, ev,
                         Np, Ep, tile_n, tile_e, autoregressive=True,
                         enc=(enc_s, enc_v),
                         out_p=params['W_out'] if last else None)
        if last:
            hs, hv, logits_p, logp_p = out
        else:
            hs, hv = out

    return {'log_probs': logp_p[:N, :NOUT], 'logits': logits_p[:N, :NOUT]}


# ---------------------------------------------------------------------------
if __name__ == "__main__":
    key = jax.random.PRNGKey(0)
    kp, kd = jax.random.split(key)
    params = init_model(kp)

    # small synthetic protein graph: N nodes, k-nearest (by index) directed edges
    N, K = 8, 3
    k1, k2, k3, k4, k5 = jax.random.split(kd, 5)
    node_s = jax.random.normal(k1, (N, 6), jnp.float32)
    node_v = jax.random.normal(k2, (N, 3, 3), jnp.float32)
    src = jnp.concatenate([(jnp.arange(N) + d) % N for d in range(1, K + 1)])
    dst = jnp.concatenate([jnp.arange(N)] * K)
    edge_index = jnp.stack([src, dst]).astype(jnp.int32)     # [2, E], E = 24
    E = edge_index.shape[1]
    edge_s = jax.random.normal(k3, (E, 32), jnp.float32)
    edge_v = jax.random.normal(k4, (E, 1, 3), jnp.float32)
    seq = jax.random.randint(k5, (N,), 0, 33, jnp.int32)

    fwd = jax.jit(forward)
    out = fwd(params, node_s, node_v, edge_s, edge_v, edge_index, seq)
    out = jax.block_until_ready(out)

    assert out['logits'].shape == (N, 33)
    assert out['log_probs'].shape == (N, 33)
    assert bool(jnp.all(jnp.isfinite(out['logits'])))
    assert bool(jnp.all(jnp.isfinite(out['log_probs'])))
    print("KERNEL_OK")
</pallas_src>

<mosaic_0001>
module attributes {stable_mosaic.version = 11 : i64} {
  func.func @kernel(%arg0: i32, %arg1: memref<8x6xf32, #tpu.memory_space<vmem>>, %arg2: memref<3x8x3xf32, #tpu.memory_space<vmem>>, %arg3: memref<3x16xbf16, #tpu.memory_space<vmem>>, %arg4: memref<6x128xbf16, #tpu.memory_space<vmem>>, %arg5: memref<16x128xbf16, #tpu.memory_space<vmem>>, %arg6: memref<1x128xf32, #tpu.memory_space<vmem>>, %arg7: memref<16x16xbf16, #tpu.memory_space<vmem>>, %arg8: memref<1x128xf32, #tpu.memory_space<vmem>>, %arg9: memref<1x128xf32, #tpu.memory_space<vmem>>, %arg10: memref<8x128xbf16, #tpu.memory_space<vmem>>, %arg11: memref<3x8x16xbf16, #tpu.memory_space<vmem>>) attributes {dimension_semantics = [#tpu.dimension_semantics<parallel>], iteration_bounds = array<i64: 1>, scalar_prefetch = 0 : i64, scratch_operands = 0 : i64, tpu.core_type = #tpu.core_type<tc>, window_params = [{transform_indices = @transform_0, window_bounds = array<i64: 8, 6>}, {transform_indices = @transform_1, window_bounds = array<i64: 3, 8, 3>}, {pipeline_mode = #tpu.pipeline_mode<synchronous>, transform_indices = @transform_2, window_bounds = array<i64: 3, 16>}, {pipeline_mode = #tpu.pipeline_mode<synchronous>, transform_indices = @transform_3, window_bounds = array<i64: 6, 128>}, {pipeline_mode = #tpu.pipeline_mode<synchronous>, transform_indices = @transform_4, window_bounds = array<i64: 16, 128>}, {pipeline_mode = #tpu.pipeline_mode<synchronous>, transform_indices = @transform_5, window_bounds = array<i64: 1, 128>}, {pipeline_mode = #tpu.pipeline_mode<synchronous>, transform_indices = @transform_6, window_bounds = array<i64: 16, 16>}, {pipeline_mode = #tpu.pipeline_mode<synchronous>, transform_indices = @transform_7, window_bounds = array<i64: 1, 128>}, {pipeline_mode = #tpu.pipeline_mode<synchronous>, transform_indices = @transform_8, window_bounds = array<i64: 1, 128>}, {transform_indices = @transform_9, window_bounds = array<i64: 8, 128>}, {transform_indices = @transform_10, window_bounds = array<i64: 3, 8, 16>}]} {
    %c0 = arith.constant 0 : index
    %c0_0 = arith.constant 0 : index
    %0 = vector.load %arg1[%c0, %c0_0] : memref<8x6xf32, #tpu.memory_space<vmem>>, vector<8x6xf32>
    %c0_1 = arith.constant 0 : index
    %c0_2 = arith.constant 0 : index
    %c0_3 = arith.constant 0 : index
    %1 = vector.load %arg2[%c0_1, %c0_2, %c0_3] : memref<3x8x3xf32, #tpu.memory_space<vmem>>, vector<3x8x3xf32>
    %c0_4 = arith.constant 0 : index
    %c0_5 = arith.constant 0 : index
    %2 = vector.load %arg3[%c0_4, %c0_5] : memref<3x16xbf16, #tpu.memory_space<vmem>>, vector<3x16xbf16>
    %c0_6 = arith.constant 0 : index
    %c0_7 = arith.constant 0 : index
    %3 = vector.load %arg4[%c0_6, %c0_7] : memref<6x128xbf16, #tpu.memory_space<vmem>>, vector<6x128xbf16>
    %c0_8 = arith.constant 0 : index
    %c0_9 = arith.constant 0 : index
    %4 = vector.load %arg5[%c0_8, %c0_9] : memref<16x128xbf16, #tpu.memory_space<vmem>>, vector<16x128xbf16>
    %c0_10 = arith.constant 0 : index
    %c0_11 = arith.constant 0 : index
    %5 = vector.load %arg6[%c0_10, %c0_11] : memref<1x128xf32, #tpu.memory_space<vmem>>, vector<1x128xf32>
    %c0_12 = arith.constant 0 : index
    %c0_13 = arith.constant 0 : index
    %6 = vector.load %arg7[%c0_12, %c0_13] : memref<16x16xbf16, #tpu.memory_space<vmem>>, vector<16x16xbf16>
    %7 = vector.shape_cast %1 : vector<3x8x3xf32> to vector<24x3xf32>
    %8 = arith.truncf %7 : vector<24x3xf32> to vector<24x3xbf16>
    %cst = arith.constant dense<0.000000e+00> : vector<24x16xf32>
    %9 = tpu.matmul %8, %2, %cst {dimension_numbers = #tpu.dot_dimension_numbers<[1], [0], [0], [1], [0, 0, 1, 1], [], []>} : vector<24x3xbf16>, vector<3x16xbf16>, vector<24x16xf32> -> vector<24x16xf32>
    %10 = vector.shape_cast %9 : vector<24x16xf32> to vector<3x8x16xf32>
    %11 = vector.extract_strided_slice %10 {offsets = [0, 0, 0], sizes = [1, 8, 16], strides = [1, 1, 1]} : vector<3x8x16xf32> to vector<1x8x16xf32>
    %12 = vector.shape_cast %11 : vector<1x8x16xf32> to vector<8x16xf32>
    %13 = vector.extract_strided_slice %10 {offsets = [0, 0, 0], sizes = [1, 8, 16], strides = [1, 1, 1]} : vector<3x8x16xf32> to vector<1x8x16xf32>
    %14 = vector.shape_cast %13 : vector<1x8x16xf32> to vector<8x16xf32>
    %15 = arith.mulf %12, %14 : vector<8x16xf32>
    %16 = vector.extract_strided_slice %10 {offsets = [1, 0, 0], sizes = [1, 8, 16], strides = [1, 1, 1]} : vector<3x8x16xf32> to vector<1x8x16xf32>
    %17 = vector.shape_cast %16 : vector<1x8x16xf32> to vector<8x16xf32>
    %18 = vector.extract_strided_slice %10 {offsets = [1, 0, 0], sizes = [1, 8, 16], strides = [1, 1, 1]} : vector<3x8x16xf32> to vector<1x8x16xf32>
    %19 = vector.shape_cast %18 : vector<1x8x16xf32> to vector<8x16xf32>
    %20 = arith.mulf %17, %19 : vector<8x16xf32>
    %21 = arith.addf %15, %20 : vector<8x16xf32>
    %22 = vector.extract_strided_slice %10 {offsets = [2, 0, 0], sizes = [1, 8, 16], strides = [1, 1, 1]} : vector<3x8x16xf32> to vector<1x8x16xf32>
    %23 = vector.shape_cast %22 : vector<1x8x16xf32> to vector<8x16xf32>
    %24 = vector.extract_strided_slice %10 {offsets = [2, 0, 0], sizes = [1, 8, 16], strides = [1, 1, 1]} : vector<3x8x16xf32> to vector<1x8x16xf32>
    %25 = vector.shape_cast %24 : vector<1x8x16xf32> to vector<8x16xf32>
    %26 = arith.mulf %23, %25 : vector<8x16xf32>
    %27 = arith.addf %21, %26 : vector<8x16xf32>
    %cst_14 = arith.constant 9.99999993E-9 : f32
    %28 = vector.broadcast %cst_14 : f32 to vector<8x16xf32>
    %29 = arith.maximumf %27, %28 : vector<8x16xf32>
    %30 = math.sqrt %29 : vector<8x16xf32>
    %31 = arith.truncf %0 : vector<8x6xf32> to vector<8x6xbf16>
    %cst_15 = arith.constant dense<0.000000e+00> : vector<8x128xf32>
    %32 = tpu.matmul %31, %3, %cst_15 {dimension_numbers = #tpu.dot_dimension_numbers<[1], [0], [0], [1], [0, 0, 1, 1], [], []>} : vector<8x6xbf16>, vector<6x128xbf16>, vector<8x128xf32> -> vector<8x128xf32>
    %33 = vector.broadcast %5 : vector<1x128xf32> to vector<8x128xf32>
    %34 = arith.addf %33, %32 : vector<8x128xf32>
    %35 = arith.truncf %30 : vector<8x16xf32> to vector<8x16xbf16>
    %cst_16 = arith.constant dense<0.000000e+00> : vector<8x128xf32>
    %36 = tpu.matmul %35, %4, %cst_16 {dimension_numbers = #tpu.dot_dimension_numbers<[1], [0], [0], [1], [0, 0, 1, 1], [], []>} : vector<8x16xbf16>, vector<16x128xbf16>, vector<8x128xf32> -> vector<8x128xf32>
    %37 = arith.addf %34, %36 : vector<8x128xf32>
    %38 = vector.shape_cast %10 : vector<3x8x16xf32> to vector<24x16xf32>
    %39 = arith.truncf %38 : vector<24x16xf32> to vector<24x16xbf16>
    %cst_17 = arith.constant dense<0.000000e+00> : vector<24x16xf32>
    %40 = tpu.matmul %39, %6, %cst_17 {dimension_numbers = #tpu.dot_dimension_numbers<[1], [0], [0], [1], [0, 0, 1, 1], [], []>} : vector<24x16xbf16>, vector<16x16xbf16>, vector<24x16xf32> -> vector<24x16xf32>
    %41 = vector.shape_cast %40 : vector<24x16xf32> to vector<3x8x16xf32>
    %c0_18 = arith.constant 0 : index
    %c0_19 = arith.constant 0 : index
    %42 = vector.load %arg8[%c0_18, %c0_19] : memref<1x128xf32, #tpu.memory_space<vmem>>, vector<1x128xf32>
    %c0_20 = arith.constant 0 : index
    %c0_21 = arith.constant 0 : index
    %43 = vector.load %arg9[%c0_20, %c0_21] : memref<1x128xf32, #tpu.memory_space<vmem>>, vector<1x128xf32>
    %cst_22 = arith.constant dense<0.000000e+00> : vector<8xf32>
    %44 = vector.multi_reduction <add>, %37, %cst_22 [1] : vector<8x128xf32> to vector<8xf32>
    %45 = vector.shape_cast %44 : vector<8xf32> to vector<8x1xf32>
    %cst_23 = arith.constant 0.00999999977 : f32
    %46 = vector.broadcast %cst_23 : f32 to vector<8x1xf32>
    %47 = arith.mulf %45, %46 : vector<8x1xf32>
    %48 = arith.mulf %37, %37 : vector<8x128xf32>
    %cst_24 = arith.constant dense<0.000000e+00> : vector<8xf32>
    %49 = vector.multi_reduction <add>, %48, %cst_24 [1] : vector<8x128xf32> to vector<8xf32>
    %50 = vector.shape_cast %49 : vector<8xf32> to vector<8x1xf32>
    %cst_25 = arith.constant 0.00999999977 : f32
    %51 = vector.broadcast %cst_25 : f32 to vector<8x1xf32>
    %52 = arith.mulf %50, %51 : vector<8x1xf32>
    %53 = arith.mulf %47, %47 : vector<8x1xf32>
    %54 = arith.subf %52, %53 : vector<8x1xf32>
    %cst_26 = arith.constant 0.000000e+00 : f32
    %55 = vector.broadcast %cst_26 : f32 to vector<8x1xf32>
    %56 = arith.maximumf %54, %55 : vector<8x1xf32>
    %57 = vector.broadcast %47 : vector<8x1xf32> to vector<8x128xf32>
    %58 = arith.subf %37, %57 : vector<8x128xf32>
    %cst_27 = arith.constant 9.99999974E-6 : f32
    %59 = vector.broadcast %cst_27 : f32 to vector<8x1xf32>
    %60 = arith.addf %56, %59 : vector<8x1xf32>
    %61 = math.rsqrt %60 : vector<8x1xf32>
    %62 = vector.broadcast %61 : vector<8x1xf32> to vector<8x128xf32>
    %63 = arith.mulf %58, %62 : vector<8x128xf32>
    %64 = vector.broadcast %42 : vector<1x128xf32> to vector<8x128xf32>
    %65 = arith.mulf %63, %64 : vector<8x128xf32>
    %66 = vector.broadcast %43 : vector<1x128xf32> to vector<8x128xf32>
    %67 = arith.addf %65, %66 : vector<8x128xf32>
    %68 = vector.extract_strided_slice %41 {offsets = [0, 0, 0], sizes = [1, 8, 16], strides = [1, 1, 1]} : vector<3x8x16xf32> to vector<1x8x16xf32>
    %69 = vector.shape_cast %68 : vector<1x8x16xf32> to vector<8x16xf32>
    %70 = vector.extract_strided_slice %41 {offsets = [0, 0, 0], sizes = [1, 8, 16], strides = [1, 1, 1]} : vector<3x8x16xf32> to vector<1x8x16xf32>
    %71 = vector.shape_cast %70 : vector<1x8x16xf32> to vector<8x16xf32>
    %72 = arith.mulf %69, %71 : vector<8x16xf32>
    %73 = vector.extract_strided_slice %41 {offsets = [1, 0, 0], sizes = [1, 8, 16], strides = [1, 1, 1]} : vector<3x8x16xf32> to vector<1x8x16xf32>
    %74 = vector.shape_cast %73 : vector<1x8x16xf32> to vector<8x16xf32>
    %75 = vector.extract_strided_slice %41 {offsets = [1, 0, 0], sizes = [1, 8, 16], strides = [1, 1, 1]} : vector<3x8x16xf32> to vector<1x8x16xf32>
    %76 = vector.shape_cast %75 : vector<1x8x16xf32> to vector<8x16xf32>
    %77 = arith.mulf %74, %76 : vector<8x16xf32>
    %78 = arith.addf %72, %77 : vector<8x16xf32>
    %79 = vector.extract_strided_slice %41 {offsets = [2, 0, 0], sizes = [1, 8, 16], strides = [1, 1, 1]} : vector<3x8x16xf32> to vector<1x8x16xf32>
    %80 = vector.shape_cast %79 : vector<1x8x16xf32> to vector<8x16xf32>
    %81 = vector.extract_strided_slice %41 {offsets = [2, 0, 0], sizes = [1, 8, 16], strides = [1, 1, 1]} : vector<3x8x16xf32> to vector<1x8x16xf32>
    %82 = vector.shape_cast %81 : vector<1x8x16xf32> to vector<8x16xf32>
    %83 = arith.mulf %80, %82 : vector<8x16xf32>
    %84 = arith.addf %78, %83 : vector<8x16xf32>
    %cst_28 = arith.constant 9.99999993E-9 : f32
    %85 = vector.broadcast %cst_28 : f32 to vector<8x16xf32>
    %86 = arith.maximumf %84, %85 : vector<8x16xf32>
    %cst_29 = arith.constant dense<0.000000e+00> : vector<8xf32>
    %87 = vector.multi_reduction <add>, %86, %cst_29 [1] : vector<8x16xf32> to vector<8xf32>
    %88 = vector.shape_cast %87 : vector<8xf32> to vector<8x1xf32>
    %cst_30 = arith.constant 1.600000e+01 : f32
    %89 = vector.broadcast %cst_30 : f32 to vector<8x1xf32>
    %90 = arith.divf %88, %89 : vector<8x1xf32>
    %91 = math.rsqrt %90 : vector<8x1xf32>
    %92 = vector.shape_cast %91 : vector<8x1xf32> to vector<1x8x1xf32>
    %93 = vector.broadcast %92 : vector<1x8x1xf32> to vector<3x8x16xf32>
    %94 = arith.mulf %41, %93 : vector<3x8x16xf32>
    %95 = arith.truncf %67 : vector<8x128xf32> to vector<8x128xbf16>
    %c0_31 = arith.constant 0 : index
    %c0_32 = arith.constant 0 : index
    %96 = vector.load %arg10[%c0_31, %c0_32] : memref<8x128xbf16, #tpu.memory_space<vmem>>, vector<8x128xbf16>
    tpu.vector_store %arg10[%c0_31, %c0_32], %95 {strides = array<i32>} : memref<8x128xbf16, #tpu.memory_space<vmem>>, vector<8x128xbf16>,
    %97 = arith.truncf %94 : vector<3x8x16xf32> to vector<3x8x16xbf16>
    %c0_33 = arith.constant 0 : index
    %c0_34 = arith.constant 0 : index
    %c0_35 = arith.constant 0 : index
    %98 = vector.load %arg11[%c0_33, %c0_34, %c0_35] : memref<3x8x16xbf16, #tpu.memory_space<vmem>>, vector<3x8x16xbf16>
    tpu.vector_store %arg11[%c0_33, %c0_34, %c0_35], %97 {strides = array<i32>} : memref<3x8x16xbf16, #tpu.memory_space<vmem>>, vector<3x8x16xbf16>,
    return
  }
  func.func @transform_0(%arg0: i32) -> (i32, i32) {
    %c0_i32 = arith.constant 0 : i32
    %c0_i32_0 = arith.constant 0 : i32
    return %arg0, %c0_i32 : i32, i32
  }
  func.func @transform_1(%arg0: i32) -> (i32, i32, i32) {
    %c0_i32 = arith.constant 0 : i32
    %c0_i32_0 = arith.constant 0 : i32
    %c0_i32_1 = arith.constant 0 : i32
    return %c0_i32, %arg0, %c0_i32_0 : i32, i32, i32
  }
  func.func @transform_2(%arg0: i32) -> (i32, i32) {
    %c0_i32 = arith.constant 0 : i32
    %c0_i32_0 = arith.constant 0 : i32
    %c0_i32_1 = arith.constant 0 : i32
    return %c0_i32, %c0_i32_0 : i32, i32
  }
  func.func @transform_3(%arg0: i32) -> (i32, i32) {
    %c0_i32 = arith.constant 0 : i32
    %c0_i32_0 = arith.constant 0 : i32
    %c0_i32_1 = arith.constant 0 : i32
    return %c0_i32, %c0_i32_0 : i32, i32
  }
  func.func @transform_4(%arg0: i32) -> (i32, i32) {
    %c0_i32 = arith.constant 0 : i32
    %c0_i32_0 = arith.constant 0 : i32
    %c0_i32_1 = arith.constant 0 : i32
    return %c0_i32, %c0_i32_0 : i32, i32
  }
  func.func @transform_5(%arg0: i32) -> (i32, i32) {
    %c0_i32 = arith.constant 0 : i32
    %c0_i32_0 = arith.constant 0 : i32
    %c0_i32_1 = arith.constant 0 : i32
    return %c0_i32, %c0_i32_0 : i32, i32
  }
  func.func @transform_6(%arg0: i32) -> (i32, i32) {
    %c0_i32 = arith.constant 0 : i32
    %c0_i32_0 = arith.constant 0 : i32
    %c0_i32_1 = arith.constant 0 : i32
    return %c0_i32, %c0_i32_0 : i32, i32
  }
  func.func @transform_7(%arg0: i32) -> (i32, i32) {
    %c0_i32 = arith.constant 0 : i32
    %c0_i32_0 = arith.constant 0 : i32
    %c0_i32_1 = arith.constant 0 : i32
    return %c0_i32, %c0_i32_0 : i32, i32
  }
  func.func @transform_8(%arg0: i32) -> (i32, i32) {
    %c0_i32 = arith.constant 0 : i32
    %c0_i32_0 = arith.constant 0 : i32
    %c0_i32_1 = arith.constant 0 : i32
    return %c0_i32, %c0_i32_0 : i32, i32
  }
  func.func @transform_9(%arg0: i32) -> (i32, i32) {
    %c0_i32 = arith.constant 0 : i32
    %c0_i32_0 = arith.constant 0 : i32
    return %arg0, %c0_i32 : i32, i32
  }
  func.func @transform_10(%arg0: i32) -> (i32, i32, i32) {
    %c0_i32 = arith.constant 0 : i32
    %c0_i32_0 = arith.constant 0 : i32
    %c0_i32_1 = arith.constant 0 : i32
    return %c0_i32, %arg0, %c0_i32_0 : i32, i32, i32
  }
}

module attributes {stable_mosaic.version = 11 : i64} {
  func.func @kernel(%arg0: i32, %arg1: memref<24x32xf32, #tpu.memory_space<vmem>>, %arg2: memref<3x24x1xf32, #tpu.memory_space<vmem>>, %arg3: memref<1x1xbf16, #tpu.memory_space<vmem>>, %arg4: memref<32x32xbf16, #tpu.memory_space<vmem>>, %arg5: memref<1x32xbf16, #tpu.memory_space<vmem>>, %arg6: memref<1x32xf32, #tpu.memory_space<vmem>>, %arg7: memref<1x1xbf16, #tpu.memory_space<vmem>>, %arg8: memref<1x32xf32, #tpu.memory_space<vmem>>, %arg9: memref<1x32xf32, #tpu.memory_space<vmem>>, %arg10: memref<24x32xbf16, #tpu.memory_space<vmem>>, %arg11: memref<3x24x1xbf16, #tpu.memory_space<vmem>>) attributes {dimension_semantics = [#tpu.dimension_semantics<parallel>], iteration_bounds = array<i64: 1>, scalar_prefetch = 0 : i64, scratch_operands = 0 : i64, tpu.core_type = #tpu.core_type<tc>, window_params = [{transform_indices = @transform_0, window_bounds = array<i64: 24, 32>}, {transform_indices = @transform_1, window_bounds = array<i64: 3, 24, 1>}, {pipeline_mode = #tpu.pipeline_mode<synchronous>, transform_indices = @transform_2, window_bounds = array<i64: 1, 1>}, {pipeline_mode = #tpu.pipeline_mode<synchronous>, transform_indices = @transform_3, window_bounds = array<i64: 32, 32>}, {pipeline_mode = #tpu.pipeline_mode<synchronous>, transform_indices = @transform_4, window_bounds = array<i64: 1, 32>}, {pipeline_mode = #tpu.pipeline_mode<synchronous>, transform_indices = @transform_5, window_bounds = array<i64: 1, 32>}, {pipeline_mode = #tpu.pipeline_mode<synchronous>, transform_indices = @transform_6, window_bounds = array<i64: 1, 1>}, {pipeline_mode = #tpu.pipeline_mode<synchronous>, transform_indices = @transform_7, window_bounds = array<i64: 1, 32>}, {pipeline_mode = #tpu.pipeline_mode<synchronous>, transform_indices = @transform_8, window_bounds = array<i64: 1, 32>}, {transform_indices = @transform_9, window_bounds = array<i64: 24, 32>}, {transform_indices = @transform_10, window_bounds = array<i64: 3, 24, 1>}]} {
    %c0 = arith.constant 0 : index
    %c0_0 = arith.constant 0 : index
    %0 = vector.load %arg1[%c0, %c0_0] : memref<24x32xf32, #tpu.memory_space<vmem>>, vector<24x32xf32>
    %c0_1 = arith.constant 0 : index
    %c0_2 = arith.constant 0 : index
    %c0_3 = arith.constant 0 : index
    %1 = vector.load %arg2[%c0_1, %c0_2, %c0_3] : memref<3x24x1xf32, #tpu.memory_space<vmem>>, vector<3x24x1xf32>
    %c0_4 = arith.constant 0 : index
    %c0_5 = arith.constant 0 : index
    %2 = vector.load %arg3[%c0_4, %c0_5] : memref<1x1xbf16, #tpu.memory_space<vmem>>, vector<1x1xbf16>
    %c0_6 = arith.constant 0 : index
    %c0_7 = arith.constant 0 : index
    %3 = vector.load %arg4[%c0_6, %c0_7] : memref<32x32xbf16, #tpu.memory_space<vmem>>, vector<32x32xbf16>
    %c0_8 = arith.constant 0 : index
    %c0_9 = arith.constant 0 : index
    %4 = vector.load %arg5[%c0_8, %c0_9] : memref<1x32xbf16, #tpu.memory_space<vmem>>, vector<1x32xbf16>
    %c0_10 = arith.constant 0 : index
    %c0_11 = arith.constant 0 : index
    %5 = vector.load %arg6[%c0_10, %c0_11] : memref<1x32xf32, #tpu.memory_space<vmem>>, vector<1x32xf32>
    %c0_12 = arith.constant 0 : index
    %c0_13 = arith.constant 0 : index
    %6 = vector.load %arg7[%c0_12, %c0_13] : memref<1x1xbf16, #tpu.memory_space<vmem>>, vector<1x1xbf16>
    %7 = vector.shape_cast %1 : vector<3x24x1xf32> to vector<72x1xf32>
    %8 = arith.extf %2 : vector<1x1xbf16> to vector<1x1xf32>
    %9 = vector.broadcast %8 : vector<1x1xf32> to vector<72x1xf32>
    %10 = arith.mulf %7, %9 : vector<72x1xf32>
    %11 = vector.shape_cast %10 : vector<72x1xf32> to vector<3x24x1xf32>
    %12 = vector.extract_strided_slice %11 {offsets = [0, 0, 0], sizes = [1, 24, 1], strides = [1, 1, 1]} : vector<3x24x1xf32> to vector<1x24x1xf32>
    %13 = vector.shape_cast %12 : vector<1x24x1xf32> to vector<24x1xf32>
    %14 = vector.extract_strided_slice %11 {offsets = [0, 0, 0], sizes = [1, 24, 1], strides = [1, 1, 1]} : vector<3x24x1xf32> to vector<1x24x1xf32>
    %15 = vector.shape_cast %14 : vector<1x24x1xf32> to vector<24x1xf32>
    %16 = arith.mulf %13, %15 : vector<24x1xf32>
    %17 = vector.extract_strided_slice %11 {offsets = [1, 0, 0], sizes = [1, 24, 1], strides = [1, 1, 1]} : vector<3x24x1xf32> to vector<1x24x1xf32>
    %18 = vector.shape_cast %17 : vector<1x24x1xf32> to vector<24x1xf32>
    %19 = vector.extract_strided_slice %11 {offsets = [1, 0, 0], sizes = [1, 24, 1], strides = [1, 1, 1]} : vector<3x24x1xf32> to vector<1x24x1xf32>
    %20 = vector.shape_cast %19 : vector<1x24x1xf32> to vector<24x1xf32>
    %21 = arith.mulf %18, %20 : vector<24x1xf32>
    %22 = arith.addf %16, %21 : vector<24x1xf32>
    %23 = vector.extract_strided_slice %11 {offsets = [2, 0, 0], sizes = [1, 24, 1], strides = [1, 1, 1]} : vector<3x24x1xf32> to vector<1x24x1xf32>
    %24 = vector.shape_cast %23 : vector<1x24x1xf32> to vector<24x1xf32>
    %25 = vector.extract_strided_slice %11 {offsets = [2, 0, 0], sizes = [1, 24, 1], strides = [1, 1, 1]} : vector<3x24x1xf32> to vector<1x24x1xf32>
    %26 = vector.shape_cast %25 : vector<1x24x1xf32> to vector<24x1xf32>
    %27 = arith.mulf %24, %26 : vector<24x1xf32>
    %28 = arith.addf %22, %27 : vector<24x1xf32>
    %cst = arith.constant 9.99999993E-9 : f32
    %29 = vector.broadcast %cst : f32 to vector<24x1xf32>
    %30 = arith.maximumf %28, %29 : vector<24x1xf32>
    %31 = math.sqrt %30 : vector<24x1xf32>
    %32 = arith.truncf %0 : vector<24x32xf32> to vector<24x32xbf16>
    %cst_14 = arith.constant dense<0.000000e+00> : vector<24x32xf32>
    %33 = tpu.matmul %32, %3, %cst_14 {dimension_numbers = #tpu.dot_dimension_numbers<[1], [0], [0], [1], [0, 0, 1, 1], [], []>} : vector<24x32xbf16>, vector<32x32xbf16>, vector<24x32xf32> -> vector<24x32xf32>
    %34 = vector.broadcast %5 : vector<1x32xf32> to vector<24x32xf32>
    %35 = arith.addf %34, %33 : vector<24x32xf32>
    %36 = arith.extf %4 : vector<1x32xbf16> to vector<1x32xf32>
    %37 = vector.broadcast %31 : vector<24x1xf32> to vector<24x32xf32>
    %38 = vector.broadcast %36 : vector<1x32xf32> to vector<24x32xf32>
    %39 = arith.mulf %37, %38 : vector<24x32xf32>
    %40 = arith.addf %35, %39 : vector<24x32xf32>
    %41 = vector.shape_cast %11 : vector<3x24x1xf32> to vector<72x1xf32>
    %42 = arith.extf %6 : vector<1x1xbf16> to vector<1x1xf32>
    %43 = vector.broadcast %42 : vector<1x1xf32> to vector<72x1xf32>
    %44 = arith.mulf %41, %43 : vector<72x1xf32>
    %45 = vector.shape_cast %44 : vector<72x1xf32> to vector<3x24x1xf32>
    %c0_15 = arith.constant 0 : index
    %c0_16 = arith.constant 0 : index
    %46 = vector.load %arg8[%c0_15, %c0_16] : memref<1x32xf32, #tpu.memory_space<vmem>>, vector<1x32xf32>
    %c0_17 = arith.constant 0 : index
    %c0_18 = arith.constant 0 : index
    %47 = vector.load %arg9[%c0_17, %c0_18] : memref<1x32xf32, #tpu.memory_space<vmem>>, vector<1x32xf32>
    %cst_19 = arith.constant dense<0.000000e+00> : vector<24xf32>
    %48 = vector.multi_reduction <add>, %40, %cst_19 [1] : vector<24x32xf32> to vector<24xf32>
    %49 = vector.shape_cast %48 : vector<24xf32> to vector<24x1xf32>
    %cst_20 = arith.constant 3.125000e-02 : f32
    %50 = vector.broadcast %cst_20 : f32 to vector<24x1xf32>
    %51 = arith.mulf %49, %50 : vector<24x1xf32>
    %52 = arith.mulf %40, %40 : vector<24x32xf32>
    %cst_21 = arith.constant dense<0.000000e+00> : vector<24xf32>
    %53 = vector.multi_reduction <add>, %52, %cst_21 [1] : vector<24x32xf32> to vector<24xf32>
    %54 = vector.shape_cast %53 : vector<24xf32> to vector<24x1xf32>
    %cst_22 = arith.constant 3.125000e-02 : f32
    %55 = vector.broadcast %cst_22 : f32 to vector<24x1xf32>
    %56 = arith.mulf %54, %55 : vector<24x1xf32>
    %57 = arith.mulf %51, %51 : vector<24x1xf32>
    %58 = arith.subf %56, %57 : vector<24x1xf32>
    %cst_23 = arith.constant 0.000000e+00 : f32
    %59 = vector.broadcast %cst_23 : f32 to vector<24x1xf32>
    %60 = arith.maximumf %58, %59 : vector<24x1xf32>
    %61 = vector.broadcast %51 : vector<24x1xf32> to vector<24x32xf32>
    %62 = arith.subf %40, %61 : vector<24x32xf32>
    %cst_24 = arith.constant 9.99999974E-6 : f32
    %63 = vector.broadcast %cst_24 : f32 to vector<24x1xf32>
    %64 = arith.addf %60, %63 : vector<24x1xf32>
    %65 = math.rsqrt %64 : vector<24x1xf32>
    %66 = vector.broadcast %65 : vector<24x1xf32> to vector<24x32xf32>
    %67 = arith.mulf %62, %66 : vector<24x32xf32>
    %68 = vector.broadcast %46 : vector<1x32xf32> to vector<24x32xf32>
    %69 = arith.mulf %67, %68 : vector<24x32xf32>
    %70 = vector.broadcast %47 : vector<1x32xf32> to vector<24x32xf32>
    %71 = arith.addf %69, %70 : vector<24x32xf32>
    %72 = vector.extract_strided_slice %45 {offsets = [0, 0, 0], sizes = [1, 24, 1], strides = [1, 1, 1]} : vector<3x24x1xf32> to vector<1x24x1xf32>
    %73 = vector.shape_cast %72 : vector<1x24x1xf32> to vector<24x1xf32>
    %74 = vector.extract_strided_slice %45 {offsets = [0, 0, 0], sizes = [1, 24, 1], strides = [1, 1, 1]} : vector<3x24x1xf32> to vector<1x24x1xf32>
    %75 = vector.shape_cast %74 : vector<1x24x1xf32> to vector<24x1xf32>
    %76 = arith.mulf %73, %75 : vector<24x1xf32>
    %77 = vector.extract_strided_slice %45 {offsets = [1, 0, 0], sizes = [1, 24, 1], strides = [1, 1, 1]} : vector<3x24x1xf32> to vector<1x24x1xf32>
    %78 = vector.shape_cast %77 : vector<1x24x1xf32> to vector<24x1xf32>
    %79 = vector.extract_strided_slice %45 {offsets = [1, 0, 0], sizes = [1, 24, 1], strides = [1, 1, 1]} : vector<3x24x1xf32> to vector<1x24x1xf32>
    %80 = vector.shape_cast %79 : vector<1x24x1xf32> to vector<24x1xf32>
    %81 = arith.mulf %78, %80 : vector<24x1xf32>
    %82 = arith.addf %76, %81 : vector<24x1xf32>
    %83 = vector.extract_strided_slice %45 {offsets = [2, 0, 0], sizes = [1, 24, 1], strides = [1, 1, 1]} : vector<3x24x1xf32> to vector<1x24x1xf32>
    %84 = vector.shape_cast %83 : vector<1x24x1xf32> to vector<24x1xf32>
    %85 = vector.extract_strided_slice %45 {offsets = [2, 0, 0], sizes = [1, 24, 1], strides = [1, 1, 1]} : vector<3x24x1xf32> to vector<1x24x1xf32>
    %86 = vector.shape_cast %85 : vector<1x24x1xf32> to vector<24x1xf32>
    %87 = arith.mulf %84, %86 : vector<24x1xf32>
    %88 = arith.addf %82, %87 : vector<24x1xf32>
    %cst_25 = arith.constant 9.99999993E-9 : f32
    %89 = vector.broadcast %cst_25 : f32 to vector<24x1xf32>
    %90 = arith.maximumf %88, %89 : vector<24x1xf32>
    %cst_26 = arith.constant dense<0.000000e+00> : vector<24xf32>
    %91 = vector.multi_reduction <add>, %90, %cst_26 [1] : vector<24x1xf32> to vector<24xf32>
    %92 = vector.shape_cast %91 : vector<24xf32> to vector<24x1xf32>
    %cst_27 = arith.constant 1.000000e+00 : f32
    %93 = vector.broadcast %cst_27 : f32 to vector<24x1xf32>
    %94 = arith.divf %92, %93 : vector<24x1xf32>
    %95 = math.rsqrt %94 : vector<24x1xf32>
    %96 = vector.shape_cast %95 : vector<24x1xf32> to vector<1x24x1xf32>
    %97 = vector.broadcast %96 : vector<1x24x1xf32> to vector<3x24x1xf32>
    %98 = arith.mulf %45, %97 : vector<3x24x1xf32>
    %99 = arith.truncf %71 : vector<24x32xf32> to vector<24x32xbf16>
    %c0_28 = arith.constant 0 : index
    %c0_29 = arith.constant 0 : index
    %100 = vector.load %arg10[%c0_28, %c0_29] : memref<24x32xbf16, #tpu.memory_space<vmem>>, vector<24x32xbf16>
    tpu.vector_store %arg10[%c0_28, %c0_29], %99 {strides = array<i32>} : memref<24x32xbf16, #tpu.memory_space<vmem>>, vector<24x32xbf16>,
    %101 = arith.truncf %98 : vector<3x24x1xf32> to vector<3x24x1xbf16>
    %c0_30 = arith.constant 0 : index
    %c0_31 = arith.constant 0 : index
    %c0_32 = arith.constant 0 : index
    %102 = vector.load %arg11[%c0_30, %c0_31, %c0_32] : memref<3x24x1xbf16, #tpu.memory_space<vmem>>, vector<3x24x1xbf16>
    tpu.vector_store %arg11[%c0_30, %c0_31, %c0_32], %101 {strides = array<i32>} : memref<3x24x1xbf16, #tpu.memory_space<vmem>>, vector<3x24x1xbf16>,
    return
  }
  func.func @transform_0(%arg0: i32) -> (i32, i32) {
    %c0_i32 = arith.constant 0 : i32
    %c0_i32_0 = arith.constant 0 : i32
    return %arg0, %c0_i32 : i32, i32
  }
  func.func @transform_1(%arg0: i32) -> (i32, i32, i32) {
    %c0_i32 = arith.constant 0 : i32
    %c0_i32_0 = arith.constant 0 : i32
    %c0_i32_1 = arith.constant 0 : i32
    return %c0_i32, %arg0, %c0_i32_0 : i32, i32, i32
  }
  func.func @transform_2(%arg0: i32) -> (i32, i32) {
    %c0_i32 = arith.constant 0 : i32
    %c0_i32_0 = arith.constant 0 : i32
    %c0_i32_1 = arith.constant 0 : i32
    return %c0_i32, %c0_i32_0 : i32, i32
  }
  func.func @transform_3(%arg0: i32) -> (i32, i32) {
    %c0_i32 = arith.constant 0 : i32
    %c0_i32_0 = arith.constant 0 : i32
    %c0_i32_1 = arith.constant 0 : i32
    return %c0_i32, %c0_i32_0 : i32, i32
  }
  func.func @transform_4(%arg0: i32) -> (i32, i32) {
    %c0_i32 = arith.constant 0 : i32
    %c0_i32_0 = arith.constant 0 : i32
    %c0_i32_1 = arith.constant 0 : i32
    return %c0_i32, %c0_i32_0 : i32, i32
  }
  func.func @transform_5(%arg0: i32) -> (i32, i32) {
    %c0_i32 = arith.constant 0 : i32
    %c0_i32_0 = arith.constant 0 : i32
    %c0_i32_1 = arith.constant 0 : i32
    return %c0_i32, %c0_i32_0 : i32, i32
  }
  func.func @transform_6(%arg0: i32) -> (i32, i32) {
    %c0_i32 = arith.constant 0 : i32
    %c0_i32_0 = arith.constant 0 : i32
    %c0_i32_1 = arith.constant 0 : i32
    return %c0_i32, %c0_i32_0 : i32, i32
  }
  func.func @transform_7(%arg0: i32) -> (i32, i32) {
    %c0_i32 = arith.constant 0 : i32
    %c0_i32_0 = arith.constant 0 : i32
    %c0_i32_1 = arith.constant 0 : i32
    return %c0_i32, %c0_i32_0 : i32, i32
  }
  func.func @transform_8(%arg0: i32) -> (i32, i32) {
    %c0_i32 = arith.constant 0 : i32
    %c0_i32_0 = arith.constant 0 : i32
    %c0_i32_1 = arith.constant 0 : i32
    return %c0_i32, %c0_i32_0 : i32, i32
  }
  func.func @transform_9(%arg0: i32) -> (i32, i32) {
    %c0_i32 = arith.constant 0 : i32
    %c0_i32_0 = arith.constant 0 : i32
    return %arg0, %c0_i32 : i32, i32
  }
  func.func @transform_10(%arg0: i32) -> (i32, i32, i32) {
    %c0_i32 = arith.constant 0 : i32
    %c0_i32_0 = arith.constant 0 : i32
    %c0_i32_1 = arith.constant 0 : i32
    return %c0_i32, %arg0, %c0_i32_0 : i32, i32, i32
  }
}

module attributes {stable_mosaic.version = 11 : i64} {
  func.func @_message_kernel(%arg0: i32, %arg1: memref<24x128xbf16, #tpu.memory_space<vmem>>, %arg2: memref<24x32xbf16, #tpu.memory_space<vmem>>, %arg3: memref<24x128xbf16, #tpu.memory_space<vmem>>, %arg4: memref<3x24x16xbf16, #tpu.memory_space<vmem>>, %arg5: memref<3x24x1xbf16, #tpu.memory_space<vmem>>, %arg6: memref<3x24x16xbf16, #tpu.memory_space<vmem>>, %arg7: memref<16x33xbf16, #tpu.memory_space<vmem>>, %arg8: memref<1x33xbf16, #tpu.memory_space<vmem>>, %arg9: memref<16x33xbf16, #tpu.memory_space<vmem>>, %arg10: memref<128x128xbf16, #tpu.memory_space<vmem>>, %arg11: memref<32x128xbf16, #tpu.memory_space<vmem>>, %arg12: memref<128x128xbf16, #tpu.memory_space<vmem>>, %arg13: memref<33x128xbf16, #tpu.memory_space<vmem>>, %arg14: memref<1x128xf32, #tpu.memory_space<vmem>>, %arg15: memref<33x16xbf16, #tpu.memory_space<vmem>>, %arg16: memref<16x16xbf16, #tpu.memory_space<vmem>>, %arg17: memref<128x128xbf16, #tpu.memory_space<vmem>>, %arg18: memref<16x128xbf16, #tpu.memory_space<vmem>>, %arg19: memref<1x128xf32, #tpu.memory_space<vmem>>, %arg20: memref<16x16xbf16, #tpu.memory_space<vmem>>, %arg21: memref<16x16xbf16, #tpu.memory_space<vmem>>, %arg22: memref<128x128xbf16, #tpu.memory_space<vmem>>, %arg23: memref<16x128xbf16, #tpu.memory_space<vmem>>, %arg24: memref<1x128xf32, #tpu.memory_space<vmem>>, %arg25: memref<16x16xbf16, #tpu.memory_space<vmem>>, %arg26: memref<24x128xbf16, #tpu.memory_space<vmem>>, %arg27: memref<3x24x16xbf16, #tpu.memory_space<vmem>>) attributes {dimension_semantics = [#tpu.dimension_semantics<parallel>], iteration_bounds = array<i64: 1>, scalar_prefetch = 0 : i64, scratch_operands = 0 : i64, tpu.core_type = #tpu.core_type<tc>, window_params = [{transform_indices = @transform_0, window_bounds = array<i64: 24, 128>}, {transform_indices = @transform_1, window_bounds = array<i64: 24, 32>}, {transform_indices = @transform_2, window_bounds = array<i64: 24, 128>}, {transform_indices = @transform_3, window_bounds = array<i64: 3, 24, 16>}, {transform_indices = @transform_4, window_bounds = array<i64: 3, 24, 1>}, {transform_indices = @transform_5, window_bounds = array<i64: 3, 24, 16>}, {pipeline_mode = #tpu.pipeline_mode<synchronous>, transform_indices = @transform_6, window_bounds = array<i64: 16, 33>}, {pipeline_mode = #tpu.pipeline_mode<synchronous>, transform_indices = @transform_7, window_bounds = array<i64: 1, 33>}, {pipeline_mode = #tpu.pipeline_mode<synchronous>, transform_indices = @transform_8, window_bounds = array<i64: 16, 33>}, {pipeline_mode = #tpu.pipeline_mode<synchronous>, transform_indices = @transform_9, window_bounds = array<i64: 128, 128>}, {pipeline_mode = #tpu.pipeline_mode<synchronous>, transform_indices = @transform_10, window_bounds = array<i64: 32, 128>}, {pipeline_mode = #tpu.pipeline_mode<synchronous>, transform_indices = @transform_11, window_bounds = array<i64: 128, 128>}, {pipeline_mode = #tpu.pipeline_mode<synchronous>, transform_indices = @transform_12, window_bounds = array<i64: 33, 128>}, {pipeline_mode = #tpu.pipeline_mode<synchronous>, transform_indices = @transform_13, window_bounds = array<i64: 1, 128>}, {pipeline_mode = #tpu.pipeline_mode<synchronous>, transform_indices = @transform_14, window_bounds = array<i64: 33, 16>}, {pipeline_mode = #tpu.pipeline_mode<synchronous>, transform_indices = @transform_15, window_bounds = array<i64: 16, 16>}, {pipeline_mode = #tpu.pipeline_mode<synchronous>, transform_indices = @transform_16, window_bounds = array<i64: 128, 128>}, {pipeline_mode = #tpu.pipeline_mode<synchronous>, transform_indices = @transform_17, window_bounds = array<i64: 16, 128>}, {pipeline_mode = #tpu.pipeline_mode<synchronous>, transform_indices = @transform_18, window_bounds = array<i64: 1, 128>}, {pipeline_mode = #tpu.pipeline_mode<synchronous>, transform_indices = @transform_19, window_bounds = array<i64: 16, 16>}, {pipeline_mode = #tpu.pipeline_mode<synchronous>, transform_indices = @transform_20, window_bounds = array<i64: 16, 16>}, {pipeline_mode = #tpu.pipeline_mode<synchronous>, transform_indices = @transform_21, window_bounds = array<i64: 128, 128>}, {pipeline_mode = #tpu.pipeline_mode<synchronous>, transform_indices = @transform_22, window_bounds = array<i64: 16, 128>}, {pipeline_mode = #tpu.pipeline_mode<synchronous>, transform_indices = @transform_23, window_bounds = array<i64: 1, 128>}, {pipeline_mode = #tpu.pipeline_mode<synchronous>, transform_indices = @transform_24, window_bounds = array<i64: 16, 16>}, {transform_indices = @transform_25, window_bounds = array<i64: 24, 128>}, {transform_indices = @transform_26, window_bounds = array<i64: 3, 24, 16>}]} {
    %c0 = arith.constant 0 : index
    %c0_0 = arith.constant 0 : index
    %0 = vector.load %arg1[%c0, %c0_0] : memref<24x128xbf16, #tpu.memory_space<vmem>>, vector<24x128xbf16>
    %c0_1 = arith.constant 0 : index
    %c0_2 = arith.constant 0 : index
    %1 = vector.load %arg2[%c0_1, %c0_2] : memref<24x32xbf16, #tpu.memory_space<vmem>>, vector<24x32xbf16>
    %c0_3 = arith.constant 0 : index
    %c0_4 = arith.constant 0 : index
    %2 = vector.load %arg3[%c0_3, %c0_4] : memref<24x128xbf16, #tpu.memory_space<vmem>>, vector<24x128xbf16>
    %c0_5 = arith.constant 0 : index
    %c0_6 = arith.constant 0 : index
    %c0_7 = arith.constant 0 : index
    %3 = vector.load %arg4[%c0_5, %c0_6, %c0_7] : memref<3x24x16xbf16, #tpu.memory_space<vmem>>, vector<3x24x16xbf16>
    %c0_8 = arith.constant 0 : index
    %c0_9 = arith.constant 0 : index
    %c0_10 = arith.constant 0 : index
    %4 = vector.load %arg5[%c0_8, %c0_9, %c0_10] : memref<3x24x1xbf16, #tpu.memory_space<vmem>>, vector<3x24x1xbf16>
    %c0_11 = arith.constant 0 : index
    %c0_12 = arith.constant 0 : index
    %c0_13 = arith.constant 0 : index
    %5 = vector.load %arg6[%c0_11, %c0_12, %c0_13] : memref<3x24x16xbf16, #tpu.memory_space<vmem>>, vector<3x24x16xbf16>
    %c0_14 = arith.constant 0 : index
    %c0_15 = arith.constant 0 : index
    %6 = vector.load %arg7[%c0_14, %c0_15] : memref<16x33xbf16, #tpu.memory_space<vmem>>, vector<16x33xbf16>
    %c0_16 = arith.constant 0 : index
    %c0_17 = arith.constant 0 : index
    %7 = vector.load %arg8[%c0_16, %c0_17] : memref<1x33xbf16, #tpu.memory_space<vmem>>, vector<1x33xbf16>
    %c0_18 = arith.constant 0 : index
    %c0_19 = arith.constant 0 : index
    %8 = vector.load %arg9[%c0_18, %c0_19] : memref<16x33xbf16, #tpu.memory_space<vmem>>, vector<16x33xbf16>
    %c0_20 = arith.constant 0 : index
    %c0_21 = arith.constant 0 : index
    %9 = vector.load %arg10[%c0_20, %c0_21] : memref<128x128xbf16, #tpu.memory_space<vmem>>, vector<128x128xbf16>
    %c0_22 = arith.constant 0 : index
    %c0_23 = arith.constant 0 : index
    %10 = vector.load %arg11[%c0_22, %c0_23] : memref<32x128xbf16, #tpu.memory_space<vmem>>, vector<32x128xbf16>
    %c0_24 = arith.constant 0 : index
    %c0_25 = arith.constant 0 : index
    %11 = vector.load %arg12[%c0_24, %c0_25] : memref<128x128xbf16, #tpu.memory_space<vmem>>, vector<128x128xbf16>
    %c0_26 = arith.constant 0 : index
    %c0_27 = arith.constant 0 : index
    %12 = vector.load %arg13[%c0_26, %c0_27] : memref<33x128xbf16, #tpu.memory_space<vmem>>, vector<33x128xbf16>
    %c0_28 = arith.constant 0 : index
    %c0_29 = arith.constant 0 : index
    %13 = vector.load %arg14[%c0_28, %c0_29] : memref<1x128xf32, #tpu.memory_space<vmem>>, vector<1x128xf32>
    %c0_30 = arith.constant 0 : index
    %c0_31 = arith.constant 0 : index
    %14 = vector.load %arg15[%c0_30, %c0_31] : memref<33x16xbf16, #tpu.memory_space<vmem>>, vector<33x16xbf16>
    %15 = vector.shape_cast %3 : vector<3x24x16xbf16> to vector<72x16xbf16>
    %cst = arith.constant dense<0.000000e+00> : vector<72x33xf32>
    %16 = tpu.matmul %15, %6, %cst {dimension_numbers = #tpu.dot_dimension_numbers<[1], [0], [0], [1], [0, 0, 1, 1], [], []>} : vector<72x16xbf16>, vector<16x33xbf16>, vector<72x33xf32> -> vector<72x33xf32>
    %17 = vector.shape_cast %16 : vector<72x33xf32> to vector<3x24x33xf32>
    %18 = vector.shape_cast %4 : vector<3x24x1xbf16> to vector<72x1xbf16>
    %19 = arith.extf %18 : vector<72x1xbf16> to vector<72x1xf32>
    %20 = arith.extf %7 : vector<1x33xbf16> to vector<1x33xf32>
    %21 = vector.broadcast %19 : vector<72x1xf32> to vector<72x33xf32>
    %22 = vector.broadcast %20 : vector<1x33xf32> to vector<72x33xf32>
    %23 = arith.mulf %21, %22 : vector<72x33xf32>
    %24 = vector.shape_cast %23 : vector<72x33xf32> to vector<3x24x33xf32>
    %25 = arith.addf %17, %24 : vector<3x24x33xf32>
    %26 = vector.shape_cast %5 : vector<3x24x16xbf16> to vector<72x16xbf16>
    %cst_32 = arith.constant dense<0.000000e+00> : vector<72x33xf32>
    %27 = tpu.matmul %26, %8, %cst_32 {dimension_numbers = #tpu.dot_dimension_numbers<[1], [0], [0], [1], [0, 0, 1, 1], [], []>} : vector<72x16xbf16>, vector<16x33xbf16>, vector<72x33xf32> -> vector<72x33xf32>
    %28 = vector.shape_cast %27 : vector<72x33xf32> to vector<3x24x33xf32>
    %29 = arith.addf %25, %28 : vector<3x24x33xf32>
    %30 = vector.extract_strided_slice %29 {offsets = [0, 0, 0], sizes = [1, 24, 33], strides = [1, 1, 1]} : vector<3x24x33xf32> to vector<1x24x33xf32>
    %31 = vector.shape_cast %30 : vector<1x24x33xf32> to vector<24x33xf32>
    %32 = vector.extract_strided_slice %29 {offsets = [0, 0, 0], sizes = [1, 24, 33], strides = [1, 1, 1]} : vector<3x24x33xf32> to vector<1x24x33xf32>
    %33 = vector.shape_cast %32 : vector<1x24x33xf32> to vector<24x33xf32>
    %34 = arith.mulf %31, %33 : vector<24x33xf32>
    %35 = vector.extract_strided_slice %29 {offsets = [1, 0, 0], sizes = [1, 24, 33], strides = [1, 1, 1]} : vector<3x24x33xf32> to vector<1x24x33xf32>
    %36 = vector.shape_cast %35 : vector<1x24x33xf32> to vector<24x33xf32>
    %37 = vector.extract_strided_slice %29 {offsets = [1, 0, 0], sizes = [1, 24, 33], strides = [1, 1, 1]} : vector<3x24x33xf32> to vector<1x24x33xf32>
    %38 = vector.shape_cast %37 : vector<1x24x33xf32> to vector<24x33xf32>
    %39 = arith.mulf %36, %38 : vector<24x33xf32>
    %40 = arith.addf %34, %39 : vector<24x33xf32>
    %41 = vector.extract_strided_slice %29 {offsets = [2, 0, 0], sizes = [1, 24, 33], strides = [1, 1, 1]} : vector<3x24x33xf32> to vector<1x24x33xf32>
    %42 = vector.shape_cast %41 : vector<1x24x33xf32> to vector<24x33xf32>
    %43 = vector.extract_strided_slice %29 {offsets = [2, 0, 0], sizes = [1, 24, 33], strides = [1, 1, 1]} : vector<3x24x33xf32> to vector<1x24x33xf32>
    %44 = vector.shape_cast %43 : vector<1x24x33xf32> to vector<24x33xf32>
    %45 = arith.mulf %42, %44 : vector<24x33xf32>
    %46 = arith.addf %40, %45 : vector<24x33xf32>
    %cst_33 = arith.constant 9.99999993E-9 : f32
    %47 = vector.broadcast %cst_33 : f32 to vector<24x33xf32>
    %48 = arith.maximumf %46, %47 : vector<24x33xf32>
    %49 = math.sqrt %48 : vector<24x33xf32>
    %cst_34 = arith.constant dense<0.000000e+00> : vector<24x128xf32>
    %50 = tpu.matmul %0, %9, %cst_34 {dimension_numbers = #tpu.dot_dimension_numbers<[1], [0], [0], [1], [0, 0, 1, 1], [], []>} : vector<24x128xbf16>, vector<128x128xbf16>, vector<24x128xf32> -> vector<24x128xf32>
    %51 = vector.broadcast %13 : vector<1x128xf32> to vector<24x128xf32>
    %52 = arith.addf %51, %50 : vector<24x128xf32>
    %cst_35 = arith.constant dense<0.000000e+00> : vector<24x128xf32>
    %53 = tpu.matmul %1, %10, %cst_35 {dimension_numbers = #tpu.dot_dimension_numbers<[1], [0], [0], [1], [0, 0, 1, 1], [], []>} : vector<24x32xbf16>, vector<32x128xbf16>, vector<24x128xf32> -> vector<24x128xf32>
    %54 = arith.addf %52, %53 : vector<24x128xf32>
    %cst_36 = arith.constant dense<0.000000e+00> : vector<24x128xf32>
    %55 = tpu.matmul %2, %11, %cst_36 {dimension_numbers = #tpu.dot_dimension_numbers<[1], [0], [0], [1], [0, 0, 1, 1], [], []>} : vector<24x128xbf16>, vector<128x128xbf16>, vector<24x128xf32> -> vector<24x128xf32>
    %56 = arith.addf %54, %55 : vector<24x128xf32>
    %57 = arith.truncf %49 : vector<24x33xf32> to vector<24x33xbf16>
    %cst_37 = arith.constant dense<0.000000e+00> : vector<24x128xf32>
    %58 = tpu.matmul %57, %12, %cst_37 {dimension_numbers = #tpu.dot_dimension_numbers<[1], [0], [0], [1], [0, 0, 1, 1], [], []>} : vector<24x33xbf16>, vector<33x128xbf16>, vector<24x128xf32> -> vector<24x128xf32>
    %59 = arith.addf %56, %58 : vector<24x128xf32>
    %60 = vector.shape_cast %29 : vector<3x24x33xf32> to vector<72x33xf32>
    %61 = arith.truncf %60 : vector<72x33xf32> to vector<72x33xbf16>
    %cst_38 = arith.constant dense<0.000000e+00> : vector<72x16xf32>
    %62 = tpu.matmul %61, %14, %cst_38 {dimension_numbers = #tpu.dot_dimension_numbers<[1], [0], [0], [1], [0, 0, 1, 1], [], []>} : vector<72x33xbf16>, vector<33x16xbf16>, vector<72x16xf32> -> vector<72x16xf32>
    %63 = vector.shape_cast %62 : vector<72x16xf32> to vector<3x24x16xf32>
    %64 = vector.extract_strided_slice %63 {offsets = [0, 0, 0], sizes = [1, 24, 16], strides = [1, 1, 1]} : vector<3x24x16xf32> to vector<1x24x16xf32>
    %65 = vector.shape_cast %64 : vector<1x24x16xf32> to vector<24x16xf32>
    %66 = vector.extract_strided_slice %63 {offsets = [0, 0, 0], sizes = [1, 24, 16], strides = [1, 1, 1]} : vector<3x24x16xf32> to vector<1x24x16xf32>
    %67 = vector.shape_cast %66 : vector<1x24x16xf32> to vector<24x16xf32>
    %68 = arith.mulf %65, %67 : vector<24x16xf32>
    %69 = vector.extract_strided_slice %63 {offsets = [1, 0, 0], sizes = [1, 24, 16], strides = [1, 1, 1]} : vector<3x24x16xf32> to vector<1x24x16xf32>
    %70 = vector.shape_cast %69 : vector<1x24x16xf32> to vector<24x16xf32>
    %71 = vector.extract_strided_slice %63 {offsets = [1, 0, 0], sizes = [1, 24, 16], strides = [1, 1, 1]} : vector<3x24x16xf32> to vector<1x24x16xf32>
    %72 = vector.shape_cast %71 : vector<1x24x16xf32> to vector<24x16xf32>
    %73 = arith.mulf %70, %72 : vector<24x16xf32>
    %74 = arith.addf %68, %73 : vector<24x16xf32>
    %75 = vector.extract_strided_slice %63 {offsets = [2, 0, 0], sizes = [1, 24, 16], strides = [1, 1, 1]} : vector<3x24x16xf32> to vector<1x24x16xf32>
    %76 = vector.shape_cast %75 : vector<1x24x16xf32> to vector<24x16xf32>
    %77 = vector.extract_strided_slice %63 {offsets = [2, 0, 0], sizes = [1, 24, 16], strides = [1, 1, 1]} : vector<3x24x16xf32> to vector<1x24x16xf32>
    %78 = vector.shape_cast %77 : vector<1x24x16xf32> to vector<24x16xf32>
    %79 = arith.mulf %76, %78 : vector<24x16xf32>
    %80 = arith.addf %74, %79 : vector<24x16xf32>
    %cst_39 = arith.constant 9.99999993E-9 : f32
    %81 = vector.broadcast %cst_39 : f32 to vector<24x16xf32>
    %82 = arith.maximumf %80, %81 : vector<24x16xf32>
    %83 = math.sqrt %82 : vector<24x16xf32>
    %84 = arith.negf %83 : vector<24x16xf32>
    %85 = math.exp %84 : vector<24x16xf32>
    %cst_40 = arith.constant 1.000000e+00 : f32
    %86 = vector.broadcast %cst_40 : f32 to vector<24x16xf32>
    %87 = arith.addf %86, %85 : vector<24x16xf32>
    %88 = arith.divf %86, %87 : vector<24x16xf32>
    %89 = vector.shape_cast %88 : vector<24x16xf32> to vector<1x24x16xf32>
    %90 = vector.broadcast %89 : vector<1x24x16xf32> to vector<3x24x16xf32>
    %91 = arith.mulf %63, %90 : vector<3x24x16xf32>
    %cst_41 = arith.constant 0.000000e+00 : f32
    %92 = vector.broadcast %cst_41 : f32 to vector<24x128xf32>
    %93 = arith.maximumf %59, %92 : vector<24x128xf32>
    %c0_42 = arith.constant 0 : index
    %c0_43 = arith.constant 0 : index
    %94 = vector.load %arg16[%c0_42, %c0_43] : memref<16x16xbf16, #tpu.memory_space<vmem>>, vector<16x16xbf16>
    %c0_44 = arith.constant 0 : index
    %c0_45 = arith.constant 0 : index
    %95 = vector.load %arg17[%c0_44, %c0_45] : memref<128x128xbf16, #tpu.memory_space<vmem>>, vector<128x128xbf16>
    %c0_46 = arith.constant 0 : index
    %c0_47 = arith.constant 0 : index
    %96 = vector.load %arg18[%c0_46, %c0_47] : memref<16x128xbf16, #tpu.memory_space<vmem>>, vector<16x128xbf16>
    %c0_48 = arith.constant 0 : index
    %c0_49 = arith.constant 0 : index
    %97 = vector.load %arg19[%c0_48, %c0_49] : memref<1x128xf32, #tpu.memory_space<vmem>>, vector<1x128xf32>
    %c0_50 = arith.constant 0 : index
    %c0_51 = arith.constant 0 : index
    %98 = vector.load %arg20[%c0_50, %c0_51] : memref<16x16xbf16, #tpu.memory_space<vmem>>, vector<16x16xbf16>
    %99 = vector.shape_cast %91 : vector<3x24x16xf32> to vector<72x16xf32>
    %100 = arith.truncf %99 : vector<72x16xf32> to vector<72x16xbf16>
    %cst_52 = arith.constant dense<0.000000e+00> : vector<72x16xf32>
    %101 = tpu.matmul %100, %94, %cst_52 {dimension_numbers = #tpu.dot_dimension_numbers<[1], [0], [0], [1], [0, 0, 1, 1], [], []>} : vector<72x16xbf16>, vector<16x16xbf16>, vector<72x16xf32> -> vector<72x16xf32>
    %102 = vector.shape_cast %101 : vector<72x16xf32> to vector<3x24x16xf32>
    %103 = vector.extract_strided_slice %102 {offsets = [0, 0, 0], sizes = [1, 24, 16], strides = [1, 1, 1]} : vector<3x24x16xf32> to vector<1x24x16xf32>
    %104 = vector.shape_cast %103 : vector<1x24x16xf32> to vector<24x16xf32>
    %105 = vector.extract_strided_slice %102 {offsets = [0, 0, 0], sizes = [1, 24, 16], strides = [1, 1, 1]} : vector<3x24x16xf32> to vector<1x24x16xf32>
    %106 = vector.shape_cast %105 : vector<1x24x16xf32> to vector<24x16xf32>
    %107 = arith.mulf %104, %106 : vector<24x16xf32>
    %108 = vector.extract_strided_slice %102 {offsets = [1, 0, 0], sizes = [1, 24, 16], strides = [1, 1, 1]} : vector<3x24x16xf32> to vector<1x24x16xf32>
    %109 = vector.shape_cast %108 : vector<1x24x16xf32> to vector<24x16xf32>
    %110 = vector.extract_strided_slice %102 {offsets = [1, 0, 0], sizes = [1, 24, 16], strides = [1, 1, 1]} : vector<3x24x16xf32> to vector<1x24x16xf32>
    %111 = vector.shape_cast %110 : vector<1x24x16xf32> to vector<24x16xf32>
    %112 = arith.mulf %109, %111 : vector<24x16xf32>
    %113 = arith.addf %107, %112 : vector<24x16xf32>
    %114 = vector.extract_strided_slice %102 {offsets = [2, 0, 0], sizes = [1, 24, 16], strides = [1, 1, 1]} : vector<3x24x16xf32> to vector<1x24x16xf32>
    %115 = vector.shape_cast %114 : vector<1x24x16xf32> to vector<24x16xf32>
    %116 = vector.extract_strided_slice %102 {offsets = [2, 0, 0], sizes = [1, 24, 16], strides = [1, 1, 1]} : vector<3x24x16xf32> to vector<1x24x16xf32>
    %117 = vector.shape_cast %116 : vector<1x24x16xf32> to vector<24x16xf32>
    %118 = arith.mulf %115, %117 : vector<24x16xf32>
    %119 = arith.addf %113, %118 : vector<24x16xf32>
    %cst_53 = arith.constant 9.99999993E-9 : f32
    %120 = vector.broadcast %cst_53 : f32 to vector<24x16xf32>
    %121 = arith.maximumf %119, %120 : vector<24x16xf32>
    %122 = math.sqrt %121 : vector<24x16xf32>
    %123 = arith.truncf %93 : vector<24x128xf32> to vector<24x128xbf16>
    %cst_54 = arith.constant dense<0.000000e+00> : vector<24x128xf32>
    %124 = tpu.matmul %123, %95, %cst_54 {dimension_numbers = #tpu.dot_dimension_numbers<[1], [0], [0], [1], [0, 0, 1, 1], [], []>} : vector<24x128xbf16>, vector<128x128xbf16>, vector<24x128xf32> -> vector<24x128xf32>
    %125 = vector.broadcast %97 : vector<1x128xf32> to vector<24x128xf32>
    %126 = arith.addf %125, %124 : vector<24x128xf32>
    %127 = arith.truncf %122 : vector<24x16xf32> to vector<24x16xbf16>
    %cst_55 = arith.constant dense<0.000000e+00> : vector<24x128xf32>
    %128 = tpu.matmul %127, %96, %cst_55 {dimension_numbers = #tpu.dot_dimension_numbers<[1], [0], [0], [1], [0, 0, 1, 1], [], []>} : vector<24x16xbf16>, vector<16x128xbf16>, vector<24x128xf32> -> vector<24x128xf32>
    %129 = arith.addf %126, %128 : vector<24x128xf32>
    %130 = vector.shape_cast %102 : vector<3x24x16xf32> to vector<72x16xf32>
    %131 = arith.truncf %130 : vector<72x16xf32> to vector<72x16xbf16>
    %cst_56 = arith.constant dense<0.000000e+00> : vector<72x16xf32>
    %132 = tpu.matmul %131, %98, %cst_56 {dimension_numbers = #tpu.dot_dimension_numbers<[1], [0], [0], [1], [0, 0, 1, 1], [], []>} : vector<72x16xbf16>, vector<16x16xbf16>, vector<72x16xf32> -> vector<72x16xf32>
    %133 = vector.shape_cast %132 : vector<72x16xf32> to vector<3x24x16xf32>
    %134 = vector.extract_strided_slice %133 {offsets = [0, 0, 0], sizes = [1, 24, 16], strides = [1, 1, 1]} : vector<3x24x16xf32> to vector<1x24x16xf32>
    %135 = vector.shape_cast %134 : vector<1x24x16xf32> to vector<24x16xf32>
    %136 = vector.extract_strided_slice %133 {offsets = [0, 0, 0], sizes = [1, 24, 16], strides = [1, 1, 1]} : vector<3x24x16xf32> to vector<1x24x16xf32>
    %137 = vector.shape_cast %136 : vector<1x24x16xf32> to vector<24x16xf32>
    %138 = arith.mulf %135, %137 : vector<24x16xf32>
    %139 = vector.extract_strided_slice %133 {offsets = [1, 0, 0], sizes = [1, 24, 16], strides = [1, 1, 1]} : vector<3x24x16xf32> to vector<1x24x16xf32>
    %140 = vector.shape_cast %139 : vector<1x24x16xf32> to vector<24x16xf32>
    %141 = vector.extract_strided_slice %133 {offsets = [1, 0, 0], sizes = [1, 24, 16], strides = [1, 1, 1]} : vector<3x24x16xf32> to vector<1x24x16xf32>
    %142 = vector.shape_cast %141 : vector<1x24x16xf32> to vector<24x16xf32>
    %143 = arith.mulf %140, %142 : vector<24x16xf32>
    %144 = arith.addf %138, %143 : vector<24x16xf32>
    %145 = vector.extract_strided_slice %133 {offsets = [2, 0, 0], sizes = [1, 24, 16], strides = [1, 1, 1]} : vector<3x24x16xf32> to vector<1x24x16xf32>
    %146 = vector.shape_cast %145 : vector<1x24x16xf32> to vector<24x16xf32>
    %147 = vector.extract_strided_slice %133 {offsets = [2, 0, 0], sizes = [1, 24, 16], strides = [1, 1, 1]} : vector<3x24x16xf32> to vector<1x24x16xf32>
    %148 = vector.shape_cast %147 : vector<1x24x16xf32> to vector<24x16xf32>
    %149 = arith.mulf %146, %148 : vector<24x16xf32>
    %150 = arith.addf %144, %149 : vector<24x16xf32>
    %cst_57 = arith.constant 9.99999993E-9 : f32
    %151 = vector.broadcast %cst_57 : f32 to vector<24x16xf32>
    %152 = arith.maximumf %150, %151 : vector<24x16xf32>
    %153 = math.sqrt %152 : vector<24x16xf32>
    %154 = arith.negf %153 : vector<24x16xf32>
    %155 = math.exp %154 : vector<24x16xf32>
    %cst_58 = arith.constant 1.000000e+00 : f32
    %156 = vector.broadcast %cst_58 : f32 to vector<24x16xf32>
    %157 = arith.addf %156, %155 : vector<24x16xf32>
    %158 = arith.divf %156, %157 : vector<24x16xf32>
    %159 = vector.shape_cast %158 : vector<24x16xf32> to vector<1x24x16xf32>
    %160 = vector.broadcast %159 : vector<1x24x16xf32> to vector<3x24x16xf32>
    %161 = arith.mulf %133, %160 : vector<3x24x16xf32>
    %cst_59 = arith.constant 0.000000e+00 : f32
    %162 = vector.broadcast %cst_59 : f32 to vector<24x128xf32>
    %163 = arith.maximumf %129, %162 : vector<24x128xf32>
    %c0_60 = arith.constant 0 : index
    %c0_61 = arith.constant 0 : index
    %164 = vector.load %arg21[%c0_60, %c0_61] : memref<16x16xbf16, #tpu.memory_space<vmem>>, vector<16x16xbf16>
    %c0_62 = arith.constant 0 : index
    %c0_63 = arith.constant 0 : index
    %165 = vector.load %arg22[%c0_62, %c0_63] : memref<128x128xbf16, #tpu.memory_space<vmem>>, vector<128x128xbf16>
    %c0_64 = arith.constant 0 : index
    %c0_65 = arith.constant 0 : index
    %166 = vector.load %arg23[%c0_64, %c0_65] : memref<16x128xbf16, #tpu.memory_space<vmem>>, vector<16x128xbf16>
    %c0_66 = arith.constant 0 : index
    %c0_67 = arith.constant 0 : index
    %167 = vector.load %arg24[%c0_66, %c0_67] : memref<1x128xf32, #tpu.memory_space<vmem>>, vector<1x128xf32>
    %c0_68 = arith.constant 0 : index
    %c0_69 = arith.constant 0 : index
    %168 = vector.load %arg25[%c0_68, %c0_69] : memref<16x16xbf16, #tpu.memory_space<vmem>>, vector<16x16xbf16>
    %169 = vector.shape_cast %161 : vector<3x24x16xf32> to vector<72x16xf32>
    %170 = arith.truncf %169 : vector<72x16xf32> to vector<72x16xbf16>
    %cst_70 = arith.constant dense<0.000000e+00> : vector<72x16xf32>
    %171 = tpu.matmul %170, %164, %cst_70 {dimension_numbers = #tpu.dot_dimension_numbers<[1], [0], [0], [1], [0, 0, 1, 1], [], []>} : vector<72x16xbf16>, vector<16x16xbf16>, vector<72x16xf32> -> vector<72x16xf32>
    %172 = vector.shape_cast %171 : vector<72x16xf32> to vector<3x24x16xf32>
    %173 = vector.extract_strided_slice %172 {offsets = [0, 0, 0], sizes = [1, 24, 16], strides = [1, 1, 1]} : vector<3x24x16xf32> to vector<1x24x16xf32>
    %174 = vector.shape_cast %173 : vector<1x24x16xf32> to vector<24x16xf32>
    %175 = vector.extract_strided_slice %172 {offsets = [0, 0, 0], sizes = [1, 24, 16], strides = [1, 1, 1]} : vector<3x24x16xf32> to vector<1x24x16xf32>
    %176 = vector.shape_cast %175 : vector<1x24x16xf32> to vector<24x16xf32>
    %177 = arith.mulf %174, %176 : vector<24x16xf32>
    %178 = vector.extract_strided_slice %172 {offsets = [1, 0, 0], sizes = [1, 24, 16], strides = [1, 1, 1]} : vector<3x24x16xf32> to vector<1x24x16xf32>
    %179 = vector.shape_cast %178 : vector<1x24x16xf32> to vector<24x16xf32>
    %180 = vector.extract_strided_slice %172 {offsets = [1, 0, 0], sizes = [1, 24, 16], strides = [1, 1, 1]} : vector<3x24x16xf32> to vector<1x24x16xf32>
    %181 = vector.shape_cast %180 : vector<1x24x16xf32> to vector<24x16xf32>
    %182 = arith.mulf %179, %181 : vector<24x16xf32>
    %183 = arith.addf %177, %182 : vector<24x16xf32>
    %184 = vector.extract_strided_slice %172 {offsets = [2, 0, 0], sizes = [1, 24, 16], strides = [1, 1, 1]} : vector<3x24x16xf32> to vector<1x24x16xf32>
    %185 = vector.shape_cast %184 : vector<1x24x16xf32> to vector<24x16xf32>
    %186 = vector.extract_strided_slice %172 {offsets = [2, 0, 0], sizes = [1, 24, 16], strides = [1, 1, 1]} : vector<3x24x16xf32> to vector<1x24x16xf32>
    %187 = vector.shape_cast %186 : vector<1x24x16xf32> to vector<24x16xf32>
    %188 = arith.mulf %185, %187 : vector<24x16xf32>
    %189 = arith.addf %183, %188 : vector<24x16xf32>
    %cst_71 = arith.constant 9.99999993E-9 : f32
    %190 = vector.broadcast %cst_71 : f32 to vector<24x16xf32>
    %191 = arith.maximumf %189, %190 : vector<24x16xf32>
    %192 = math.sqrt %191 : vector<24x16xf32>
    %193 = arith.truncf %163 : vector<24x128xf32> to vector<24x128xbf16>
    %cst_72 = arith.constant dense<0.000000e+00> : vector<24x128xf32>
    %194 = tpu.matmul %193, %165, %cst_72 {dimension_numbers = #tpu.dot_dimension_numbers<[1], [0], [0], [1], [0, 0, 1, 1], [], []>} : vector<24x128xbf16>, vector<128x128xbf16>, vector<24x128xf32> -> vector<24x128xf32>
    %195 = vector.broadcast %167 : vector<1x128xf32> to vector<24x128xf32>
    %196 = arith.addf %195, %194 : vector<24x128xf32>
    %197 = arith.truncf %192 : vector<24x16xf32> to vector<24x16xbf16>
    %cst_73 = arith.constant dense<0.000000e+00> : vector<24x128xf32>
    %198 = tpu.matmul %197, %166, %cst_73 {dimension_numbers = #tpu.dot_dimension_numbers<[1], [0], [0], [1], [0, 0, 1, 1], [], []>} : vector<24x16xbf16>, vector<16x128xbf16>, vector<24x128xf32> -> vector<24x128xf32>
    %199 = arith.addf %196, %198 : vector<24x128xf32>
    %200 = vector.shape_cast %172 : vector<3x24x16xf32> to vector<72x16xf32>
    %201 = arith.truncf %200 : vector<72x16xf32> to vector<72x16xbf16>
    %cst_74 = arith.constant dense<0.000000e+00> : vector<72x16xf32>
    %202 = tpu.matmul %201, %168, %cst_74 {dimension_numbers = #tpu.dot_dimension_numbers<[1], [0], [0], [1], [0, 0, 1, 1], [], []>} : vector<72x16xbf16>, vector<16x16xbf16>, vector<72x16xf32> -> vector<72x16xf32>
    %203 = vector.shape_cast %202 : vector<72x16xf32> to vector<3x24x16xf32>
    %204 = arith.truncf %199 : vector<24x128xf32> to vector<24x128xbf16>
    %c0_75 = arith.constant 0 : index
    %c0_76 = arith.constant 0 : index
    %205 = vector.load %arg26[%c0_75, %c0_76] : memref<24x128xbf16, #tpu.memory_space<vmem>>, vector<24x128xbf16>
    tpu.vector_store %arg26[%c0_75, %c0_76], %204 {strides = array<i32>} : memref<24x128xbf16, #tpu.memory_space<vmem>>, vector<24x128xbf16>,
    %206 = arith.truncf %203 : vector<3x24x16xf32> to vector<3x24x16xbf16>
    %c0_77 = arith.constant 0 : index
    %c0_78 = arith.constant 0 : index
    %c0_79 = arith.constant 0 : index
    %207 = vector.load %arg27[%c0_77, %c0_78, %c0_79] : memref<3x24x16xbf16, #tpu.memory_space<vmem>>, vector<3x24x16xbf16>
    tpu.vector_store %arg27[%c0_77, %c0_78, %c0_79], %206 {strides = array<i32>} : memref<3x24x16xbf16, #tpu.memory_space<vmem>>, vector<3x24x16xbf16>,
    return
  }
  func.func @transform_0(%arg0: i32) -> (i32, i32) {
    %c0_i32 = arith.constant 0 : i32
    %c0_i32_0 = arith.constant 0 : i32
    return %arg0, %c0_i32 : i32, i32
  }
  func.func @transform_1(%arg0: i32) -> (i32, i32) {
    %c0_i32 = arith.constant 0 : i32
    %c0_i32_0 = arith.constant 0 : i32
    return %arg0, %c0_i32 : i32, i32
  }
  func.func @transform_2(%arg0: i32) -> (i32, i32) {
    %c0_i32 = arith.constant 0 : i32
    %c0_i32_0 = arith.constant 0 : i32
    return %arg0, %c0_i32 : i32, i32
  }
  func.func @transform_3(%arg0: i32) -> (i32, i32, i32) {
    %c0_i32 = arith.constant 0 : i32
    %c0_i32_0 = arith.constant 0 : i32
    %c0_i32_1 = arith.constant 0 : i32
    return %c0_i32, %arg0, %c0_i32_0 : i32, i32, i32
  }
  func.func @transform_4(%arg0: i32) -> (i32, i32, i32) {
    %c0_i32 = arith.constant 0 : i32
    %c0_i32_0 = arith.constant 0 : i32
    %c0_i32_1 = arith.constant 0 : i32
    return %c0_i32, %arg0, %c0_i32_0 : i32, i32, i32
  }
  func.func @transform_5(%arg0: i32) -> (i32, i32, i32) {
    %c0_i32 = arith.constant 0 : i32
    %c0_i32_0 = arith.constant 0 : i32
    %c0_i32_1 = arith.constant 0 : i32
    return %c0_i32, %arg0, %c0_i32_0 : i32, i32, i32
  }
  func.func @transform_6(%arg0: i32) -> (i32, i32) {
    %c0_i32 = arith.constant 0 : i32
    %c0_i32_0 = arith.constant 0 : i32
    %c0_i32_1 = arith.constant 0 : i32
    return %c0_i32, %c0_i32_0 : i32, i32
  }
  func.func @transform_7(%arg0: i32) -> (i32, i32) {
    %c0_i32 = arith.constant 0 : i32
    %c0_i32_0 = arith.constant 0 : i32
    %c0_i32_1 = arith.constant 0 : i32
    return %c0_i32, %c0_i32_0 : i32, i32
  }
  func.func @transform_8(%arg0: i32) -> (i32, i32) {
    %c0_i32 = arith.constant 0 : i32
    %c0_i32_0 = arith.constant 0 : i32
    %c0_i32_1 = arith.constant 0 : i32
    return %c0_i32, %c0_i32_0 : i32, i32
  }
  func.func @transform_9(%arg0: i32) -> (i32, i32) {
    %c0_i32 = arith.constant 0 : i32
    %c0_i32_0 = arith.constant 0 : i32
    %c0_i32_1 = arith.constant 0 : i32
    return %c0_i32, %c0_i32_0 : i32, i32
  }
  func.func @transform_10(%arg0: i32) -> (i32, i32) {
    %c0_i32 = arith.constant 0 : i32
    %c0_i32_0 = arith.constant 0 : i32
    %c0_i32_1 = arith.constant 0 : i32
    return %c0_i32, %c0_i32_0 : i32, i32
  }
  func.func @transform_11(%arg0: i32) -> (i32, i32) {
    %c0_i32 = arith.constant 0 : i32
    %c0_i32_0 = arith.constant 0 : i32
    %c0_i32_1 = arith.constant 0 : i32
    return %c0_i32, %c0_i32_0 : i32, i32
  }
  func.func @transform_12(%arg0: i32) -> (i32, i32) {
    %c0_i32 = arith.constant 0 : i32
    %c0_i32_0 = arith.constant 0 : i32
    %c0_i32_1 = arith.constant 0 : i32
    return %c0_i32, %c0_i32_0 : i32, i32
  }
  func.func @transform_13(%arg0: i32) -> (i32, i32) {
    %c0_i32 = arith.constant 0 : i32
    %c0_i32_0 = arith.constant 0 : i32
    %c0_i32_1 = arith.constant 0 : i32
    return %c0_i32, %c0_i32_0 : i32, i32
  }
  func.func @transform_14(%arg0: i32) -> (i32, i32) {
    %c0_i32 = arith.constant 0 : i32
    %c0_i32_0 = arith.constant 0 : i32
    %c0_i32_1 = arith.constant 0 : i32
    return %c0_i32, %c0_i32_0 : i32, i32
  }
  func.func @transform_15(%arg0: i32) -> (i32, i32) {
    %c0_i32 = arith.constant 0 : i32
    %c0_i32_0 = arith.constant 0 : i32
    %c0_i32_1 = arith.constant 0 : i32
    return %c0_i32, %c0_i32_0 : i32, i32
  }
  func.func @transform_16(%arg0: i32) -> (i32, i32) {
    %c0_i32 = arith.constant 0 : i32
    %c0_i32_0 = arith.constant 0 : i32
    %c0_i32_1 = arith.constant 0 : i32
    return %c0_i32, %c0_i32_0 : i32, i32
  }
  func.func @transform_17(%arg0: i32) -> (i32, i32) {
    %c0_i32 = arith.constant 0 : i32
    %c0_i32_0 = arith.constant 0 : i32
    %c0_i32_1 = arith.constant 0 : i32
    return %c0_i32, %c0_i32_0 : i32, i32
  }
  func.func @transform_18(%arg0: i32) -> (i32, i32) {
    %c0_i32 = arith.constant 0 : i32
    %c0_i32_0 = arith.constant 0 : i32
    %c0_i32_1 = arith.constant 0 : i32
    return %c0_i32, %c0_i32_0 : i32, i32
  }
  func.func @transform_19(%arg0: i32) -> (i32, i32) {
    %c0_i32 = arith.constant 0 : i32
    %c0_i32_0 = arith.constant 0 : i32
    %c0_i32_1 = arith.constant 0 : i32
    return %c0_i32, %c0_i32_0 : i32, i32
  }
  func.func @transform_20(%arg0: i32) -> (i32, i32) {
    %c0_i32 = arith.constant 0 : i32
    %c0_i32_0 = arith.constant 0 : i32
    %c0_i32_1 = arith.constant 0 : i32
    return %c0_i32, %c0_i32_0 : i32, i32
  }
  func.func @transform_21(%arg0: i32) -> (i32, i32) {
    %c0_i32 = arith.constant 0 : i32
    %c0_i32_0 = arith.constant 0 : i32
    %c0_i32_1 = arith.constant 0 : i32
    return %c0_i32, %c0_i32_0 : i32, i32
  }
  func.func @transform_22(%arg0: i32) -> (i32, i32) {
    %c0_i32 = arith.constant 0 : i32
    %c0_i32_0 = arith.constant 0 : i32
    %c0_i32_1 = arith.constant 0 : i32
    return %c0_i32, %c0_i32_0 : i32, i32
  }
  func.func @transform_23(%arg0: i32) -> (i32, i32) {
    %c0_i32 = arith.constant 0 : i32
    %c0_i32_0 = arith.constant 0 : i32
    %c0_i32_1 = arith.constant 0 : i32
    return %c0_i32, %c0_i32_0 : i32, i32
  }
  func.func @transform_24(%arg0: i32) -> (i32, i32) {
    %c0_i32 = arith.constant 0 : i32
    %c0_i32_0 = arith.constant 0 : i32
    %c0_i32_1 = arith.constant 0 : i32
    return %c0_i32, %c0_i32_0 : i32, i32
  }
  func.func @transform_25(%arg0: i32) -> (i32, i32) {
    %c0_i32 = arith.constant 0 : i32
    %c0_i32_0 = arith.constant 0 : i32
    return %arg0, %c0_i32 : i32, i32
  }
  func.func @transform_26(%arg0: i32) -> (i32, i32, i32) {
    %c0_i32 = arith.constant 0 : i32
    %c0_i32_0 = arith.constant 0 : i32
    %c0_i32_1 = arith.constant 0 : i32
    return %c0_i32, %arg0, %c0_i32_0 : i32, i32, i32
  }
}

module attributes {stable_mosaic.version = 11 : i64} {
  func.func @kernel(%arg0: i32, %arg1: memref<8x128xbf16, #tpu.memory_space<vmem>>, %arg2: memref<3x8x16xbf16, #tpu.memory_space<vmem>>, %arg3: memref<8x128xf32, #tpu.memory_space<vmem>>, %arg4: memref<3x8x16xf32, #tpu.memory_space<vmem>>, %arg5: memref<8x1xf32, #tpu.memory_space<vmem>>, %arg6: memref<1x128xf32, #tpu.memory_space<vmem>>, %arg7: memref<1x128xf32, #tpu.memory_space<vmem>>, %arg8: memref<16x32xbf16, #tpu.memory_space<vmem>>, %arg9: memref<128x512xbf16, #tpu.memory_space<vmem>>, %arg10: memref<32x512xbf16, #tpu.memory_space<vmem>>, %arg11: memref<1x512xf32, #tpu.memory_space<vmem>>, %arg12: memref<32x32xbf16, #tpu.memory_space<vmem>>, %arg13: memref<32x32xbf16, #tpu.memory_space<vmem>>, %arg14: memref<512x128xbf16, #tpu.memory_space<vmem>>, %arg15: memref<32x128xbf16, #tpu.memory_space<vmem>>, %arg16: memref<1x128xf32, #tpu.memory_space<vmem>>, %arg17: memref<32x16xbf16, #tpu.memory_space<vmem>>, %arg18: memref<1x128xf32, #tpu.memory_space<vmem>>, %arg19: memref<1x128xf32, #tpu.memory_space<vmem>>, %arg20: memref<8x128xbf16, #tpu.memory_space<vmem>>, %arg21: memref<3x8x16xbf16, #tpu.memory_space<vmem>>) attributes {dimension_semantics = [#tpu.dimension_semantics<parallel>], iteration_bounds = array<i64: 1>, scalar_prefetch = 0 : i64, scratch_operands = 0 : i64, tpu.core_type = #tpu.core_type<tc>, window_params = [{transform_indices = @transform_0, window_bounds = array<i64: 8, 128>}, {transform_indices = @transform_1, window_bounds = array<i64: 3, 8, 16>}, {transform_indices = @transform_2, window_bounds = array<i64: 8, 128>}, {transform_indices = @transform_3, window_bounds = array<i64: 3, 8, 16>}, {transform_indices = @transform_4, window_bounds = array<i64: 8, 1>}, {pipeline_mode = #tpu.pipeline_mode<synchronous>, transform_indices = @transform_5, window_bounds = array<i64: 1, 128>}, {pipeline_mode = #tpu.pipeline_mode<synchronous>, transform_indices = @transform_6, window_bounds = array<i64: 1, 128>}, {pipeline_mode = #tpu.pipeline_mode<synchronous>, transform_indices = @transform_7, window_bounds = array<i64: 16, 32>}, {pipeline_mode = #tpu.pipeline_mode<synchronous>, transform_indices = @transform_8, window_bounds = array<i64: 128, 512>}, {pipeline_mode = #tpu.pipeline_mode<synchronous>, transform_indices = @transform_9, window_bounds = array<i64: 32, 512>}, {pipeline_mode = #tpu.pipeline_mode<synchronous>, transform_indices = @transform_10, window_bounds = array<i64: 1, 512>}, {pipeline_mode = #tpu.pipeline_mode<synchronous>, transform_indices = @transform_11, window_bounds = array<i64: 32, 32>}, {pipeline_mode = #tpu.pipeline_mode<synchronous>, transform_indices = @transform_12, window_bounds = array<i64: 32, 32>}, {pipeline_mode = #tpu.pipeline_mode<synchronous>, transform_indices = @transform_13, window_bounds = array<i64: 512, 128>}, {pipeline_mode = #tpu.pipeline_mode<synchronous>, transform_indices = @transform_14, window_bounds = array<i64: 32, 128>}, {pipeline_mode = #tpu.pipeline_mode<synchronous>, transform_indices = @transform_15, window_bounds = array<i64: 1, 128>}, {pipeline_mode = #tpu.pipeline_mode<synchronous>, transform_indices = @transform_16, window_bounds = array<i64: 32, 16>}, {pipeline_mode = #tpu.pipeline_mode<synchronous>, transform_indices = @transform_17, window_bounds = array<i64: 1, 128>}, {pipeline_mode = #tpu.pipeline_mode<synchronous>, transform_indices = @transform_18, window_bounds = array<i64: 1, 128>}, {transform_indices = @transform_19, window_bounds = array<i64: 8, 128>}, {transform_indices = @transform_20, window_bounds = array<i64: 3, 8, 16>}]} {
    %c0 = arith.constant 0 : index
    %c0_0 = arith.constant 0 : index
    %0 = vector.load %arg5[%c0, %c0_0] : memref<8x1xf32, #tpu.memory_space<vmem>>, vector<8x1xf32>
    %c0_1 = arith.constant 0 : index
    %c0_2 = arith.constant 0 : index
    %1 = vector.load %arg1[%c0_1, %c0_2] : memref<8x128xbf16, #tpu.memory_space<vmem>>, vector<8x128xbf16>
    %2 = arith.extf %1 : vector<8x128xbf16> to vector<8x128xf32>
    %c0_3 = arith.constant 0 : index
    %c0_4 = arith.constant 0 : index
    %3 = vector.load %arg3[%c0_3, %c0_4] : memref<8x128xf32, #tpu.memory_space<vmem>>, vector<8x128xf32>
    %4 = vector.broadcast %0 : vector<8x1xf32> to vector<8x128xf32>
    %5 = arith.mulf %3, %4 : vector<8x128xf32>
    %6 = arith.addf %2, %5 : vector<8x128xf32>
    %c0_5 = arith.constant 0 : index
    %c0_6 = arith.constant 0 : index
    %c0_7 = arith.constant 0 : index
    %7 = vector.load %arg2[%c0_5, %c0_6, %c0_7] : memref<3x8x16xbf16, #tpu.memory_space<vmem>>, vector<3x8x16xbf16>
    %8 = arith.extf %7 : vector<3x8x16xbf16> to vector<3x8x16xf32>
    %c0_8 = arith.constant 0 : index
    %c0_9 = arith.constant 0 : index
    %c0_10 = arith.constant 0 : index
    %9 = vector.load %arg4[%c0_8, %c0_9, %c0_10] : memref<3x8x16xf32, #tpu.memory_space<vmem>>, vector<3x8x16xf32>
    %10 = vector.shape_cast %0 : vector<8x1xf32> to vector<1x8x1xf32>
    %11 = vector.broadcast %10 : vector<1x8x1xf32> to vector<3x8x16xf32>
    %12 = arith.mulf %9, %11 : vector<3x8x16xf32>
    %13 = arith.addf %8, %12 : vector<3x8x16xf32>
    %c0_11 = arith.constant 0 : index
    %c0_12 = arith.constant 0 : index
    %14 = vector.load %arg6[%c0_11, %c0_12] : memref<1x128xf32, #tpu.memory_space<vmem>>, vector<1x128xf32>
    %c0_13 = arith.constant 0 : index
    %c0_14 = arith.constant 0 : index
    %15 = vector.load %arg7[%c0_13, %c0_14] : memref<1x128xf32, #tpu.memory_space<vmem>>, vector<1x128xf32>
    %cst = arith.constant dense<0.000000e+00> : vector<8xf32>
    %16 = vector.multi_reduction <add>, %6, %cst [1] : vector<8x128xf32> to vector<8xf32>
    %17 = vector.shape_cast %16 : vector<8xf32> to vector<8x1xf32>
    %cst_15 = arith.constant 0.00999999977 : f32
    %18 = vector.broadcast %cst_15 : f32 to vector<8x1xf32>
    %19 = arith.mulf %17, %18 : vector<8x1xf32>
    %20 = arith.mulf %6, %6 : vector<8x128xf32>
    %cst_16 = arith.constant dense<0.000000e+00> : vector<8xf32>
    %21 = vector.multi_reduction <add>, %20, %cst_16 [1] : vector<8x128xf32> to vector<8xf32>
    %22 = vector.shape_cast %21 : vector<8xf32> to vector<8x1xf32>
    %cst_17 = arith.constant 0.00999999977 : f32
    %23 = vector.broadcast %cst_17 : f32 to vector<8x1xf32>
    %24 = arith.mulf %22, %23 : vector<8x1xf32>
    %25 = arith.mulf %19, %19 : vector<8x1xf32>
    %26 = arith.subf %24, %25 : vector<8x1xf32>
    %cst_18 = arith.constant 0.000000e+00 : f32
    %27 = vector.broadcast %cst_18 : f32 to vector<8x1xf32>
    %28 = arith.maximumf %26, %27 : vector<8x1xf32>
    %29 = vector.broadcast %19 : vector<8x1xf32> to vector<8x128xf32>
    %30 = arith.subf %6, %29 : vector<8x128xf32>
    %cst_19 = arith.constant 9.99999974E-6 : f32
    %31 = vector.broadcast %cst_19 : f32 to vector<8x1xf32>
    %32 = arith.addf %28, %31 : vector<8x1xf32>
    %33 = math.rsqrt %32 : vector<8x1xf32>
    %34 = vector.broadcast %33 : vector<8x1xf32> to vector<8x128xf32>
    %35 = arith.mulf %30, %34 : vector<8x128xf32>
    %36 = vector.broadcast %14 : vector<1x128xf32> to vector<8x128xf32>
    %37 = arith.mulf %35, %36 : vector<8x128xf32>
    %38 = vector.broadcast %15 : vector<1x128xf32> to vector<8x128xf32>
    %39 = arith.addf %37, %38 : vector<8x128xf32>
    %40 = vector.extract_strided_slice %13 {offsets = [0, 0, 0], sizes = [1, 8, 16], strides = [1, 1, 1]} : vector<3x8x16xf32> to vector<1x8x16xf32>
    %41 = vector.shape_cast %40 : vector<1x8x16xf32> to vector<8x16xf32>
    %42 = vector.extract_strided_slice %13 {offsets = [0, 0, 0], sizes = [1, 8, 16], strides = [1, 1, 1]} : vector<3x8x16xf32> to vector<1x8x16xf32>
    %43 = vector.shape_cast %42 : vector<1x8x16xf32> to vector<8x16xf32>
    %44 = arith.mulf %41, %43 : vector<8x16xf32>
    %45 = vector.extract_strided_slice %13 {offsets = [1, 0, 0], sizes = [1, 8, 16], strides = [1, 1, 1]} : vector<3x8x16xf32> to vector<1x8x16xf32>
    %46 = vector.shape_cast %45 : vector<1x8x16xf32> to vector<8x16xf32>
    %47 = vector.extract_strided_slice %13 {offsets = [1, 0, 0], sizes = [1, 8, 16], strides = [1, 1, 1]} : vector<3x8x16xf32> to vector<1x8x16xf32>
    %48 = vector.shape_cast %47 : vector<1x8x16xf32> to vector<8x16xf32>
    %49 = arith.mulf %46, %48 : vector<8x16xf32>
    %50 = arith.addf %44, %49 : vector<8x16xf32>
    %51 = vector.extract_strided_slice %13 {offsets = [2, 0, 0], sizes = [1, 8, 16], strides = [1, 1, 1]} : vector<3x8x16xf32> to vector<1x8x16xf32>
    %52 = vector.shape_cast %51 : vector<1x8x16xf32> to vector<8x16xf32>
    %53 = vector.extract_strided_slice %13 {offsets = [2, 0, 0], sizes = [1, 8, 16], strides = [1, 1, 1]} : vector<3x8x16xf32> to vector<1x8x16xf32>
    %54 = vector.shape_cast %53 : vector<1x8x16xf32> to vector<8x16xf32>
    %55 = arith.mulf %52, %54 : vector<8x16xf32>
    %56 = arith.addf %50, %55 : vector<8x16xf32>
    %cst_20 = arith.constant 9.99999993E-9 : f32
    %57 = vector.broadcast %cst_20 : f32 to vector<8x16xf32>
    %58 = arith.maximumf %56, %57 : vector<8x16xf32>
    %cst_21 = arith.constant dense<0.000000e+00> : vector<8xf32>
    %59 = vector.multi_reduction <add>, %58, %cst_21 [1] : vector<8x16xf32> to vector<8xf32>
    %60 = vector.shape_cast %59 : vector<8xf32> to vector<8x1xf32>
    %cst_22 = arith.constant 1.600000e+01 : f32
    %61 = vector.broadcast %cst_22 : f32 to vector<8x1xf32>
    %62 = arith.divf %60, %61 : vector<8x1xf32>
    %63 = math.rsqrt %62 : vector<8x1xf32>
    %64 = vector.shape_cast %63 : vector<8x1xf32> to vector<1x8x1xf32>
    %65 = vector.broadcast %64 : vector<1x8x1xf32> to vector<3x8x16xf32>
    %66 = arith.mulf %13, %65 : vector<3x8x16xf32>
    %c0_23 = arith.constant 0 : index
    %c0_24 = arith.constant 0 : index
    %67 = vector.load %arg8[%c0_23, %c0_24] : memref<16x32xbf16, #tpu.memory_space<vmem>>, vector<16x32xbf16>
    %c0_25 = arith.constant 0 : index
    %c0_26 = arith.constant 0 : index
    %68 = vector.load %arg9[%c0_25, %c0_26] : memref<128x512xbf16, #tpu.memory_space<vmem>>, vector<128x512xbf16>
    %c0_27 = arith.constant 0 : index
    %c0_28 = arith.constant 0 : index
    %69 = vector.load %arg10[%c0_27, %c0_28] : memref<32x512xbf16, #tpu.memory_space<vmem>>, vector<32x512xbf16>
    %c0_29 = arith.constant 0 : index
    %c0_30 = arith.constant 0 : index
    %70 = vector.load %arg11[%c0_29, %c0_30] : memref<1x512xf32, #tpu.memory_space<vmem>>, vector<1x512xf32>
    %c0_31 = arith.constant 0 : index
    %c0_32 = arith.constant 0 : index
    %71 = vector.load %arg12[%c0_31, %c0_32] : memref<32x32xbf16, #tpu.memory_space<vmem>>, vector<32x32xbf16>
    %72 = vector.shape_cast %66 : vector<3x8x16xf32> to vector<24x16xf32>
    %73 = arith.truncf %72 : vector<24x16xf32> to vector<24x16xbf16>
    %cst_33 = arith.constant dense<0.000000e+00> : vector<24x32xf32>
    %74 = tpu.matmul %73, %67, %cst_33 {dimension_numbers = #tpu.dot_dimension_numbers<[1], [0], [0], [1], [0, 0, 1, 1], [], []>} : vector<24x16xbf16>, vector<16x32xbf16>, vector<24x32xf32> -> vector<24x32xf32>
    %75 = vector.shape_cast %74 : vector<24x32xf32> to vector<3x8x32xf32>
    %76 = vector.extract_strided_slice %75 {offsets = [0, 0, 0], sizes = [1, 8, 32], strides = [1, 1, 1]} : vector<3x8x32xf32> to vector<1x8x32xf32>
    %77 = vector.shape_cast %76 : vector<1x8x32xf32> to vector<8x32xf32>
    %78 = vector.extract_strided_slice %75 {offsets = [0, 0, 0], sizes = [1, 8, 32], strides = [1, 1, 1]} : vector<3x8x32xf32> to vector<1x8x32xf32>
    %79 = vector.shape_cast %78 : vector<1x8x32xf32> to vector<8x32xf32>
    %80 = arith.mulf %77, %79 : vector<8x32xf32>
    %81 = vector.extract_strided_slice %75 {offsets = [1, 0, 0], sizes = [1, 8, 32], strides = [1, 1, 1]} : vector<3x8x32xf32> to vector<1x8x32xf32>
    %82 = vector.shape_cast %81 : vector<1x8x32xf32> to vector<8x32xf32>
    %83 = vector.extract_strided_slice %75 {offsets = [1, 0, 0], sizes = [1, 8, 32], strides = [1, 1, 1]} : vector<3x8x32xf32> to vector<1x8x32xf32>
    %84 = vector.shape_cast %83 : vector<1x8x32xf32> to vector<8x32xf32>
    %85 = arith.mulf %82, %84 : vector<8x32xf32>
    %86 = arith.addf %80, %85 : vector<8x32xf32>
    %87 = vector.extract_strided_slice %75 {offsets = [2, 0, 0], sizes = [1, 8, 32], strides = [1, 1, 1]} : vector<3x8x32xf32> to vector<1x8x32xf32>
    %88 = vector.shape_cast %87 : vector<1x8x32xf32> to vector<8x32xf32>
    %89 = vector.extract_strided_slice %75 {offsets = [2, 0, 0], sizes = [1, 8, 32], strides = [1, 1, 1]} : vector<3x8x32xf32> to vector<1x8x32xf32>
    %90 = vector.shape_cast %89 : vector<1x8x32xf32> to vector<8x32xf32>
    %91 = arith.mulf %88, %90 : vector<8x32xf32>
    %92 = arith.addf %86, %91 : vector<8x32xf32>
    %cst_34 = arith.constant 9.99999993E-9 : f32
    %93 = vector.broadcast %cst_34 : f32 to vector<8x32xf32>
    %94 = arith.maximumf %92, %93 : vector<8x32xf32>
    %95 = math.sqrt %94 : vector<8x32xf32>
    %96 = arith.truncf %39 : vector<8x128xf32> to vector<8x128xbf16>
    %cst_35 = arith.constant dense<0.000000e+00> : vector<8x512xf32>
    %97 = tpu.matmul %96, %68, %cst_35 {dimension_numbers = #tpu.dot_dimension_numbers<[1], [0], [0], [1], [0, 0, 1, 1], [], []>} : vector<8x128xbf16>, vector<128x512xbf16>, vector<8x512xf32> -> vector<8x512xf32>
    %98 = vector.broadcast %70 : vector<1x512xf32> to vector<8x512xf32>
    %99 = arith.addf %98, %97 : vector<8x512xf32>
    %100 = arith.truncf %95 : vector<8x32xf32> to vector<8x32xbf16>
    %cst_36 = arith.constant dense<0.000000e+00> : vector<8x512xf32>
    %101 = tpu.matmul %100, %69, %cst_36 {dimension_numbers = #tpu.dot_dimension_numbers<[1], [0], [0], [1], [0, 0, 1, 1], [], []>} : vector<8x32xbf16>, vector<32x512xbf16>, vector<8x512xf32> -> vector<8x512xf32>
    %102 = arith.addf %99, %101 : vector<8x512xf32>
    %103 = vector.shape_cast %75 : vector<3x8x32xf32> to vector<24x32xf32>
    %104 = arith.truncf %103 : vector<24x32xf32> to vector<24x32xbf16>
    %cst_37 = arith.constant dense<0.000000e+00> : vector<24x32xf32>
    %105 = tpu.matmul %104, %71, %cst_37 {dimension_numbers = #tpu.dot_dimension_numbers<[1], [0], [0], [1], [0, 0, 1, 1], [], []>} : vector<24x32xbf16>, vector<32x32xbf16>, vector<24x32xf32> -> vector<24x32xf32>
    %106 = vector.shape_cast %105 : vector<24x32xf32> to vector<3x8x32xf32>
    %107 = vector.extract_strided_slice %106 {offsets = [0, 0, 0], sizes = [1, 8, 32], strides = [1, 1, 1]} : vector<3x8x32xf32> to vector<1x8x32xf32>
    %108 = vector.shape_cast %107 : vector<1x8x32xf32> to vector<8x32xf32>
    %109 = vector.extract_strided_slice %106 {offsets = [0, 0, 0], sizes = [1, 8, 32], strides = [1, 1, 1]} : vector<3x8x32xf32> to vector<1x8x32xf32>
    %110 = vector.shape_cast %109 : vector<1x8x32xf32> to vector<8x32xf32>
    %111 = arith.mulf %108, %110 : vector<8x32xf32>
    %112 = vector.extract_strided_slice %106 {offsets = [1, 0, 0], sizes = [1, 8, 32], strides = [1, 1, 1]} : vector<3x8x32xf32> to vector<1x8x32xf32>
    %113 = vector.shape_cast %112 : vector<1x8x32xf32> to vector<8x32xf32>
    %114 = vector.extract_strided_slice %106 {offsets = [1, 0, 0], sizes = [1, 8, 32], strides = [1, 1, 1]} : vector<3x8x32xf32> to vector<1x8x32xf32>
    %115 = vector.shape_cast %114 : vector<1x8x32xf32> to vector<8x32xf32>
    %116 = arith.mulf %113, %115 : vector<8x32xf32>
    %117 = arith.addf %111, %116 : vector<8x32xf32>
    %118 = vector.extract_strided_slice %106 {offsets = [2, 0, 0], sizes = [1, 8, 32], strides = [1, 1, 1]} : vector<3x8x32xf32> to vector<1x8x32xf32>
    %119 = vector.shape_cast %118 : vector<1x8x32xf32> to vector<8x32xf32>
    %120 = vector.extract_strided_slice %106 {offsets = [2, 0, 0], sizes = [1, 8, 32], strides = [1, 1, 1]} : vector<3x8x32xf32> to vector<1x8x32xf32>
    %121 = vector.shape_cast %120 : vector<1x8x32xf32> to vector<8x32xf32>
    %122 = arith.mulf %119, %121 : vector<8x32xf32>
    %123 = arith.addf %117, %122 : vector<8x32xf32>
    %cst_38 = arith.constant 9.99999993E-9 : f32
    %124 = vector.broadcast %cst_38 : f32 to vector<8x32xf32>
    %125 = arith.maximumf %123, %124 : vector<8x32xf32>
    %126 = math.sqrt %125 : vector<8x32xf32>
    %127 = arith.negf %126 : vector<8x32xf32>
    %128 = math.exp %127 : vector<8x32xf32>
    %cst_39 = arith.constant 1.000000e+00 : f32
    %129 = vector.broadcast %cst_39 : f32 to vector<8x32xf32>
    %130 = arith.addf %129, %128 : vector<8x32xf32>
    %131 = arith.divf %129, %130 : vector<8x32xf32>
    %132 = vector.shape_cast %131 : vector<8x32xf32> to vector<1x8x32xf32>
    %133 = vector.broadcast %132 : vector<1x8x32xf32> to vector<3x8x32xf32>
    %134 = arith.mulf %106, %133 : vector<3x8x32xf32>
    %cst_40 = arith.constant 0.000000e+00 : f32
    %135 = vector.broadcast %cst_40 : f32 to vector<8x512xf32>
    %136 = arith.maximumf %102, %135 : vector<8x512xf32>
    %c0_41 = arith.constant 0 : index
    %c0_42 = arith.constant 0 : index
    %137 = vector.load %arg13[%c0_41, %c0_42] : memref<32x32xbf16, #tpu.memory_space<vmem>>, vector<32x32xbf16>
    %c0_43 = arith.constant 0 : index
    %c0_44 = arith.constant 0 : index
    %138 = vector.load %arg14[%c0_43, %c0_44] : memref<512x128xbf16, #tpu.memory_space<vmem>>, vector<512x128xbf16>
    %c0_45 = arith.constant 0 : index
    %c0_46 = arith.constant 0 : index
    %139 = vector.load %arg15[%c0_45, %c0_46] : memref<32x128xbf16, #tpu.memory_space<vmem>>, vector<32x128xbf16>
    %c0_47 = arith.constant 0 : index
    %c0_48 = arith.constant 0 : index
    %140 = vector.load %arg16[%c0_47, %c0_48] : memref<1x128xf32, #tpu.memory_space<vmem>>, vector<1x128xf32>
    %c0_49 = arith.constant 0 : index
    %c0_50 = arith.constant 0 : index
    %141 = vector.load %arg17[%c0_49, %c0_50] : memref<32x16xbf16, #tpu.memory_space<vmem>>, vector<32x16xbf16>
    %142 = vector.shape_cast %134 : vector<3x8x32xf32> to vector<24x32xf32>
    %143 = arith.truncf %142 : vector<24x32xf32> to vector<24x32xbf16>
    %cst_51 = arith.constant dense<0.000000e+00> : vector<24x32xf32>
    %144 = tpu.matmul %143, %137, %cst_51 {dimension_numbers = #tpu.dot_dimension_numbers<[1], [0], [0], [1], [0, 0, 1, 1], [], []>} : vector<24x32xbf16>, vector<32x32xbf16>, vector<24x32xf32> -> vector<24x32xf32>
    %145 = vector.shape_cast %144 : vector<24x32xf32> to vector<3x8x32xf32>
    %146 = vector.extract_strided_slice %145 {offsets = [0, 0, 0], sizes = [1, 8, 32], strides = [1, 1, 1]} : vector<3x8x32xf32> to vector<1x8x32xf32>
    %147 = vector.shape_cast %146 : vector<1x8x32xf32> to vector<8x32xf32>
    %148 = vector.extract_strided_slice %145 {offsets = [0, 0, 0], sizes = [1, 8, 32], strides = [1, 1, 1]} : vector<3x8x32xf32> to vector<1x8x32xf32>
    %149 = vector.shape_cast %148 : vector<1x8x32xf32> to vector<8x32xf32>
    %150 = arith.mulf %147, %149 : vector<8x32xf32>
    %151 = vector.extract_strided_slice %145 {offsets = [1, 0, 0], sizes = [1, 8, 32], strides = [1, 1, 1]} : vector<3x8x32xf32> to vector<1x8x32xf32>
    %152 = vector.shape_cast %151 : vector<1x8x32xf32> to vector<8x32xf32>
    %153 = vector.extract_strided_slice %145 {offsets = [1, 0, 0], sizes = [1, 8, 32], strides = [1, 1, 1]} : vector<3x8x32xf32> to vector<1x8x32xf32>
    %154 = vector.shape_cast %153 : vector<1x8x32xf32> to vector<8x32xf32>
    %155 = arith.mulf %152, %154 : vector<8x32xf32>
    %156 = arith.addf %150, %155 : vector<8x32xf32>
    %157 = vector.extract_strided_slice %145 {offsets = [2, 0, 0], sizes = [1, 8, 32], strides = [1, 1, 1]} : vector<3x8x32xf32> to vector<1x8x32xf32>
    %158 = vector.shape_cast %157 : vector<1x8x32xf32> to vector<8x32xf32>
    %159 = vector.extract_strided_slice %145 {offsets = [2, 0, 0], sizes = [1, 8, 32], strides = [1, 1, 1]} : vector<3x8x32xf32> to vector<1x8x32xf32>
    %160 = vector.shape_cast %159 : vector<1x8x32xf32> to vector<8x32xf32>
    %161 = arith.mulf %158, %160 : vector<8x32xf32>
    %162 = arith.addf %156, %161 : vector<8x32xf32>
    %cst_52 = arith.constant 9.99999993E-9 : f32
    %163 = vector.broadcast %cst_52 : f32 to vector<8x32xf32>
    %164 = arith.maximumf %162, %163 : vector<8x32xf32>
    %165 = math.sqrt %164 : vector<8x32xf32>
    %166 = arith.truncf %136 : vector<8x512xf32> to vector<8x512xbf16>
    %cst_53 = arith.constant dense<0.000000e+00> : vector<8x128xf32>
    %167 = tpu.matmul %166, %138, %cst_53 {dimension_numbers = #tpu.dot_dimension_numbers<[1], [0], [0], [1], [0, 0, 1, 1], [], []>} : vector<8x512xbf16>, vector<512x128xbf16>, vector<8x128xf32> -> vector<8x128xf32>
    %168 = vector.broadcast %140 : vector<1x128xf32> to vector<8x128xf32>
    %169 = arith.addf %168, %167 : vector<8x128xf32>
    %170 = arith.truncf %165 : vector<8x32xf32> to vector<8x32xbf16>
    %cst_54 = arith.constant dense<0.000000e+00> : vector<8x128xf32>
    %171 = tpu.matmul %170, %139, %cst_54 {dimension_numbers = #tpu.dot_dimension_numbers<[1], [0], [0], [1], [0, 0, 1, 1], [], []>} : vector<8x32xbf16>, vector<32x128xbf16>, vector<8x128xf32> -> vector<8x128xf32>
    %172 = arith.addf %169, %171 : vector<8x128xf32>
    %173 = vector.shape_cast %145 : vector<3x8x32xf32> to vector<24x32xf32>
    %174 = arith.truncf %173 : vector<24x32xf32> to vector<24x32xbf16>
    %cst_55 = arith.constant dense<0.000000e+00> : vector<24x16xf32>
    %175 = tpu.matmul %174, %141, %cst_55 {dimension_numbers = #tpu.dot_dimension_numbers<[1], [0], [0], [1], [0, 0, 1, 1], [], []>} : vector<24x32xbf16>, vector<32x16xbf16>, vector<24x16xf32> -> vector<24x16xf32>
    %176 = vector.shape_cast %175 : vector<24x16xf32> to vector<3x8x16xf32>
    %177 = arith.addf %39, %172 : vector<8x128xf32>
    %178 = arith.addf %66, %176 : vector<3x8x16xf32>
    %c0_56 = arith.constant 0 : index
    %c0_57 = arith.constant 0 : index
    %179 = vector.load %arg18[%c0_56, %c0_57] : memref<1x128xf32, #tpu.memory_space<vmem>>, vector<1x128xf32>
    %c0_58 = arith.constant 0 : index
    %c0_59 = arith.constant 0 : index
    %180 = vector.load %arg19[%c0_58, %c0_59] : memref<1x128xf32, #tpu.memory_space<vmem>>, vector<1x128xf32>
    %cst_60 = arith.constant dense<0.000000e+00> : vector<8xf32>
    %181 = vector.multi_reduction <add>, %177, %cst_60 [1] : vector<8x128xf32> to vector<8xf32>
    %182 = vector.shape_cast %181 : vector<8xf32> to vector<8x1xf32>
    %cst_61 = arith.constant 0.00999999977 : f32
    %183 = vector.broadcast %cst_61 : f32 to vector<8x1xf32>
    %184 = arith.mulf %182, %183 : vector<8x1xf32>
    %185 = arith.mulf %177, %177 : vector<8x128xf32>
    %cst_62 = arith.constant dense<0.000000e+00> : vector<8xf32>
    %186 = vector.multi_reduction <add>, %185, %cst_62 [1] : vector<8x128xf32> to vector<8xf32>
    %187 = vector.shape_cast %186 : vector<8xf32> to vector<8x1xf32>
    %cst_63 = arith.constant 0.00999999977 : f32
    %188 = vector.broadcast %cst_63 : f32 to vector<8x1xf32>
    %189 = arith.mulf %187, %188 : vector<8x1xf32>
    %190 = arith.mulf %184, %184 : vector<8x1xf32>
    %191 = arith.subf %189, %190 : vector<8x1xf32>
    %cst_64 = arith.constant 0.000000e+00 : f32
    %192 = vector.broadcast %cst_64 : f32 to vector<8x1xf32>
    %193 = arith.maximumf %191, %192 : vector<8x1xf32>
    %194 = vector.broadcast %184 : vector<8x1xf32> to vector<8x128xf32>
    %195 = arith.subf %177, %194 : vector<8x128xf32>
    %cst_65 = arith.constant 9.99999974E-6 : f32
    %196 = vector.broadcast %cst_65 : f32 to vector<8x1xf32>
    %197 = arith.addf %193, %196 : vector<8x1xf32>
    %198 = math.rsqrt %197 : vector<8x1xf32>
    %199 = vector.broadcast %198 : vector<8x1xf32> to vector<8x128xf32>
    %200 = arith.mulf %195, %199 : vector<8x128xf32>
    %201 = vector.broadcast %179 : vector<1x128xf32> to vector<8x128xf32>
    %202 = arith.mulf %200, %201 : vector<8x128xf32>
    %203 = vector.broadcast %180 : vector<1x128xf32> to vector<8x128xf32>
    %204 = arith.addf %202, %203 : vector<8x128xf32>
    %205 = vector.extract_strided_slice %178 {offsets = [0, 0, 0], sizes = [1, 8, 16], strides = [1, 1, 1]} : vector<3x8x16xf32> to vector<1x8x16xf32>
    %206 = vector.shape_cast %205 : vector<1x8x16xf32> to vector<8x16xf32>
    %207 = vector.extract_strided_slice %178 {offsets = [0, 0, 0], sizes = [1, 8, 16], strides = [1, 1, 1]} : vector<3x8x16xf32> to vector<1x8x16xf32>
    %208 = vector.shape_cast %207 : vector<1x8x16xf32> to vector<8x16xf32>
    %209 = arith.mulf %206, %208 : vector<8x16xf32>
    %210 = vector.extract_strided_slice %178 {offsets = [1, 0, 0], sizes = [1, 8, 16], strides = [1, 1, 1]} : vector<3x8x16xf32> to vector<1x8x16xf32>
    %211 = vector.shape_cast %210 : vector<1x8x16xf32> to vector<8x16xf32>
    %212 = vector.extract_strided_slice %178 {offsets = [1, 0, 0], sizes = [1, 8, 16], strides = [1, 1, 1]} : vector<3x8x16xf32> to vector<1x8x16xf32>
    %213 = vector.shape_cast %212 : vector<1x8x16xf32> to vector<8x16xf32>
    %214 = arith.mulf %211, %213 : vector<8x16xf32>
    %215 = arith.addf %209, %214 : vector<8x16xf32>
    %216 = vector.extract_strided_slice %178 {offsets = [2, 0, 0], sizes = [1, 8, 16], strides = [1, 1, 1]} : vector<3x8x16xf32> to vector<1x8x16xf32>
    %217 = vector.shape_cast %216 : vector<1x8x16xf32> to vector<8x16xf32>
    %218 = vector.extract_strided_slice %178 {offsets = [2, 0, 0], sizes = [1, 8, 16], strides = [1, 1, 1]} : vector<3x8x16xf32> to vector<1x8x16xf32>
    %219 = vector.shape_cast %218 : vector<1x8x16xf32> to vector<8x16xf32>
    %220 = arith.mulf %217, %219 : vector<8x16xf32>
    %221 = arith.addf %215, %220 : vector<8x16xf32>
    %cst_66 = arith.constant 9.99999993E-9 : f32
    %222 = vector.broadcast %cst_66 : f32 to vector<8x16xf32>
    %223 = arith.maximumf %221, %222 : vector<8x16xf32>
    %cst_67 = arith.constant dense<0.000000e+00> : vector<8xf32>
    %224 = vector.multi_reduction <add>, %223, %cst_67 [1] : vector<8x16xf32> to vector<8xf32>
    %225 = vector.shape_cast %224 : vector<8xf32> to vector<8x1xf32>
    %cst_68 = arith.constant 1.600000e+01 : f32
    %226 = vector.broadcast %cst_68 : f32 to vector<8x1xf32>
    %227 = arith.divf %225, %226 : vector<8x1xf32>
    %228 = math.rsqrt %227 : vector<8x1xf32>
    %229 = vector.shape_cast %228 : vector<8x1xf32> to vector<1x8x1xf32>
    %230 = vector.broadcast %229 : vector<1x8x1xf32> to vector<3x8x16xf32>
    %231 = arith.mulf %178, %230 : vector<3x8x16xf32>
    %232 = arith.truncf %204 : vector<8x128xf32> to vector<8x128xbf16>
    %c0_69 = arith.constant 0 : index
    %c0_70 = arith.constant 0 : index
    %233 = vector.load %arg20[%c0_69, %c0_70] : memref<8x128xbf16, #tpu.memory_space<vmem>>, vector<8x128xbf16>
    tpu.vector_store %arg20[%c0_69, %c0_70], %232 {strides = array<i32>} : memref<8x128xbf16, #tpu.memory_space<vmem>>, vector<8x128xbf16>,
    %234 = arith.truncf %231 : vector<3x8x16xf32> to vector<3x8x16xbf16>
    %c0_71 = arith.constant 0 : index
    %c0_72 = arith.constant 0 : index
    %c0_73 = arith.constant 0 : index
    %235 = vector.load %arg21[%c0_71, %c0_72, %c0_73] : memref<3x8x16xbf16, #tpu.memory_space<vmem>>, vector<3x8x16xbf16>
    tpu.vector_store %arg21[%c0_71, %c0_72, %c0_73], %234 {strides = array<i32>} : memref<3x8x16xbf16, #tpu.memory_space<vmem>>, vector<3x8x16xbf16>,
    return
  }
  func.func @transform_0(%arg0: i32) -> (i32, i32) {
    %c0_i32 = arith.constant 0 : i32
    %c0_i32_0 = arith.constant 0 : i32
    return %arg0, %c0_i32 : i32, i32
  }
  func.func @transform_1(%arg0: i32) -> (i32, i32, i32) {
    %c0_i32 = arith.constant 0 : i32
    %c0_i32_0 = arith.constant 0 : i32
    %c0_i32_1 = arith.constant 0 : i32
    return %c0_i32, %arg0, %c0_i32_0 : i32, i32, i32
  }
  func.func @transform_2(%arg0: i32) -> (i32, i32) {
    %c0_i32 = arith.constant 0 : i32
    %c0_i32_0 = arith.constant 0 : i32
    return %arg0, %c0_i32 : i32, i32
  }
  func.func @transform_3(%arg0: i32) -> (i32, i32, i32) {
    %c0_i32 = arith.constant 0 : i32
    %c0_i32_0 = arith.constant 0 : i32
    %c0_i32_1 = arith.constant 0 : i32
    return %c0_i32, %arg0, %c0_i32_0 : i32, i32, i32
  }
  func.func @transform_4(%arg0: i32) -> (i32, i32) {
    %c0_i32 = arith.constant 0 : i32
    %c0_i32_0 = arith.constant 0 : i32
    return %arg0, %c0_i32 : i32, i32
  }
  func.func @transform_5(%arg0: i32) -> (i32, i32) {
    %c0_i32 = arith.constant 0 : i32
    %c0_i32_0 = arith.constant 0 : i32
    %c0_i32_1 = arith.constant 0 : i32
    return %c0_i32, %c0_i32_0 : i32, i32
  }
  func.func @transform_6(%arg0: i32) -> (i32, i32) {
    %c0_i32 = arith.constant 0 : i32
    %c0_i32_0 = arith.constant 0 : i32
    %c0_i32_1 = arith.constant 0 : i32
    return %c0_i32, %c0_i32_0 : i32, i32
  }
  func.func @transform_7(%arg0: i32) -> (i32, i32) {
    %c0_i32 = arith.constant 0 : i32
    %c0_i32_0 = arith.constant 0 : i32
    %c0_i32_1 = arith.constant 0 : i32
    return %c0_i32, %c0_i32_0 : i32, i32
  }
  func.func @transform_8(%arg0: i32) -> (i32, i32) {
    %c0_i32 = arith.constant 0 : i32
    %c0_i32_0 = arith.constant 0 : i32
    %c0_i32_1 = arith.constant 0 : i32
    return %c0_i32, %c0_i32_0 : i32, i32
  }
  func.func @transform_9(%arg0: i32) -> (i32, i32) {
    %c0_i32 = arith.constant 0 : i32
    %c0_i32_0 = arith.constant 0 : i32
    %c0_i32_1 = arith.constant 0 : i32
    return %c0_i32, %c0_i32_0 : i32, i32
  }
  func.func @transform_10(%arg0: i32) -> (i32, i32) {
    %c0_i32 = arith.constant 0 : i32
    %c0_i32_0 = arith.constant 0 : i32
    %c0_i32_1 = arith.constant 0 : i32
    return %c0_i32, %c0_i32_0 : i32, i32
  }
  func.func @transform_11(%arg0: i32) -> (i32, i32) {
    %c0_i32 = arith.constant 0 : i32
    %c0_i32_0 = arith.constant 0 : i32
    %c0_i32_1 = arith.constant 0 : i32
    return %c0_i32, %c0_i32_0 : i32, i32
  }
  func.func @transform_12(%arg0: i32) -> (i32, i32) {
    %c0_i32 = arith.constant 0 : i32
    %c0_i32_0 = arith.constant 0 : i32
    %c0_i32_1 = arith.constant 0 : i32
    return %c0_i32, %c0_i32_0 : i32, i32
  }
  func.func @transform_13(%arg0: i32) -> (i32, i32) {
    %c0_i32 = arith.constant 0 : i32
    %c0_i32_0 = arith.constant 0 : i32
    %c0_i32_1 = arith.constant 0 : i32
    return %c0_i32, %c0_i32_0 : i32, i32
  }
  func.func @transform_14(%arg0: i32) -> (i32, i32) {
    %c0_i32 = arith.constant 0 : i32
    %c0_i32_0 = arith.constant 0 : i32
    %c0_i32_1 = arith.constant 0 : i32
    return %c0_i32, %c0_i32_0 : i32, i32
  }
  func.func @transform_15(%arg0: i32) -> (i32, i32) {
    %c0_i32 = arith.constant 0 : i32
    %c0_i32_0 = arith.constant 0 : i32
    %c0_i32_1 = arith.constant 0 : i32
    return %c0_i32, %c0_i32_0 : i32, i32
  }
  func.func @transform_16(%arg0: i32) -> (i32, i32) {
    %c0_i32 = arith.constant 0 : i32
    %c0_i32_0 = arith.constant 0 : i32
    %c0_i32_1 = arith.constant 0 : i32
    return %c0_i32, %c0_i32_0 : i32, i32
  }
  func.func @transform_17(%arg0: i32) -> (i32, i32) {
    %c0_i32 = arith.constant 0 : i32
    %c0_i32_0 = arith.constant 0 : i32
    %c0_i32_1 = arith.constant 0 : i32
    return %c0_i32, %c0_i32_0 : i32, i32
  }
  func.func @transform_18(%arg0: i32) -> (i32, i32) {
    %c0_i32 = arith.constant 0 : i32
    %c0_i32_0 = arith.constant 0 : i32
    %c0_i32_1 = arith.constant 0 : i32
    return %c0_i32, %c0_i32_0 : i32, i32
  }
  func.func @transform_19(%arg0: i32) -> (i32, i32) {
    %c0_i32 = arith.constant 0 : i32
    %c0_i32_0 = arith.constant 0 : i32
    return %arg0, %c0_i32 : i32, i32
  }
  func.func @transform_20(%arg0: i32) -> (i32, i32, i32) {
    %c0_i32 = arith.constant 0 : i32
    %c0_i32_0 = arith.constant 0 : i32
    %c0_i32_1 = arith.constant 0 : i32
    return %c0_i32, %arg0, %c0_i32_0 : i32, i32, i32
  }
}

module attributes {stable_mosaic.version = 11 : i64} {
  func.func @_message_kernel(%arg0: i32, %arg1: memref<24x128xbf16, #tpu.memory_space<vmem>>, %arg2: memref<24x52xbf16, #tpu.memory_space<vmem>>, %arg3: memref<24x128xbf16, #tpu.memory_space<vmem>>, %arg4: memref<3x24x16xbf16, #tpu.memory_space<vmem>>, %arg5: memref<3x24x1xbf16, #tpu.memory_space<vmem>>, %arg6: memref<3x24x16xbf16, #tpu.memory_space<vmem>>, %arg7: memref<16x33xbf16, #tpu.memory_space<vmem>>, %arg8: memref<1x33xbf16, #tpu.memory_space<vmem>>, %arg9: memref<16x33xbf16, #tpu.memory_space<vmem>>, %arg10: memref<128x128xbf16, #tpu.memory_space<vmem>>, %arg11: memref<52x128xbf16, #tpu.memory_space<vmem>>, %arg12: memref<128x128xbf16, #tpu.memory_space<vmem>>, %arg13: memref<33x128xbf16, #tpu.memory_space<vmem>>, %arg14: memref<1x128xf32, #tpu.memory_space<vmem>>, %arg15: memref<33x16xbf16, #tpu.memory_space<vmem>>, %arg16: memref<16x16xbf16, #tpu.memory_space<vmem>>, %arg17: memref<128x128xbf16, #tpu.memory_space<vmem>>, %arg18: memref<16x128xbf16, #tpu.memory_space<vmem>>, %arg19: memref<1x128xf32, #tpu.memory_space<vmem>>, %arg20: memref<16x16xbf16, #tpu.memory_space<vmem>>, %arg21: memref<16x16xbf16, #tpu.memory_space<vmem>>, %arg22: memref<128x128xbf16, #tpu.memory_space<vmem>>, %arg23: memref<16x128xbf16, #tpu.memory_space<vmem>>, %arg24: memref<1x128xf32, #tpu.memory_space<vmem>>, %arg25: memref<16x16xbf16, #tpu.memory_space<vmem>>, %arg26: memref<24x128xbf16, #tpu.memory_space<vmem>>, %arg27: memref<3x24x16xbf16, #tpu.memory_space<vmem>>) attributes {dimension_semantics = [#tpu.dimension_semantics<parallel>], iteration_bounds = array<i64: 1>, scalar_prefetch = 0 : i64, scratch_operands = 0 : i64, tpu.core_type = #tpu.core_type<tc>, window_params = [{transform_indices = @transform_0, window_bounds = array<i64: 24, 128>}, {transform_indices = @transform_1, window_bounds = array<i64: 24, 52>}, {transform_indices = @transform_2, window_bounds = array<i64: 24, 128>}, {transform_indices = @transform_3, window_bounds = array<i64: 3, 24, 16>}, {transform_indices = @transform_4, window_bounds = array<i64: 3, 24, 1>}, {transform_indices = @transform_5, window_bounds = array<i64: 3, 24, 16>}, {pipeline_mode = #tpu.pipeline_mode<synchronous>, transform_indices = @transform_6, window_bounds = array<i64: 16, 33>}, {pipeline_mode = #tpu.pipeline_mode<synchronous>, transform_indices = @transform_7, window_bounds = array<i64: 1, 33>}, {pipeline_mode = #tpu.pipeline_mode<synchronous>, transform_indices = @transform_8, window_bounds = array<i64: 16, 33>}, {pipeline_mode = #tpu.pipeline_mode<synchronous>, transform_indices = @transform_9, window_bounds = array<i64: 128, 128>}, {pipeline_mode = #tpu.pipeline_mode<synchronous>, transform_indices = @transform_10, window_bounds = array<i64: 52, 128>}, {pipeline_mode = #tpu.pipeline_mode<synchronous>, transform_indices = @transform_11, window_bounds = array<i64: 128, 128>}, {pipeline_mode = #tpu.pipeline_mode<synchronous>, transform_indices = @transform_12, window_bounds = array<i64: 33, 128>}, {pipeline_mode = #tpu.pipeline_mode<synchronous>, transform_indices = @transform_13, window_bounds = array<i64: 1, 128>}, {pipeline_mode = #tpu.pipeline_mode<synchronous>, transform_indices = @transform_14, window_bounds = array<i64: 33, 16>}, {pipeline_mode = #tpu.pipeline_mode<synchronous>, transform_indices = @transform_15, window_bounds = array<i64: 16, 16>}, {pipeline_mode = #tpu.pipeline_mode<synchronous>, transform_indices = @transform_16, window_bounds = array<i64: 128, 128>}, {pipeline_mode = #tpu.pipeline_mode<synchronous>, transform_indices = @transform_17, window_bounds = array<i64: 16, 128>}, {pipeline_mode = #tpu.pipeline_mode<synchronous>, transform_indices = @transform_18, window_bounds = array<i64: 1, 128>}, {pipeline_mode = #tpu.pipeline_mode<synchronous>, transform_indices = @transform_19, window_bounds = array<i64: 16, 16>}, {pipeline_mode = #tpu.pipeline_mode<synchronous>, transform_indices = @transform_20, window_bounds = array<i64: 16, 16>}, {pipeline_mode = #tpu.pipeline_mode<synchronous>, transform_indices = @transform_21, window_bounds = array<i64: 128, 128>}, {pipeline_mode = #tpu.pipeline_mode<synchronous>, transform_indices = @transform_22, window_bounds = array<i64: 16, 128>}, {pipeline_mode = #tpu.pipeline_mode<synchronous>, transform_indices = @transform_23, window_bounds = array<i64: 1, 128>}, {pipeline_mode = #tpu.pipeline_mode<synchronous>, transform_indices = @transform_24, window_bounds = array<i64: 16, 16>}, {transform_indices = @transform_25, window_bounds = array<i64: 24, 128>}, {transform_indices = @transform_26, window_bounds = array<i64: 3, 24, 16>}]} {
    %c0 = arith.constant 0 : index
    %c0_0 = arith.constant 0 : index
    %0 = vector.load %arg1[%c0, %c0_0] : memref<24x128xbf16, #tpu.memory_space<vmem>>, vector<24x128xbf16>
    %c0_1 = arith.constant 0 : index
    %c0_2 = arith.constant 0 : index
    %1 = vector.load %arg2[%c0_1, %c0_2] : memref<24x52xbf16, #tpu.memory_space<vmem>>, vector<24x52xbf16>
    %c0_3 = arith.constant 0 : index
    %c0_4 = arith.constant 0 : index
    %2 = vector.load %arg3[%c0_3, %c0_4] : memref<24x128xbf16, #tpu.memory_space<vmem>>, vector<24x128xbf16>
    %c0_5 = arith.constant 0 : index
    %c0_6 = arith.constant 0 : index
    %c0_7 = arith.constant 0 : index
    %3 = vector.load %arg4[%c0_5, %c0_6, %c0_7] : memref<3x24x16xbf16, #tpu.memory_space<vmem>>, vector<3x24x16xbf16>
    %c0_8 = arith.constant 0 : index
    %c0_9 = arith.constant 0 : index
    %c0_10 = arith.constant 0 : index
    %4 = vector.load %arg5[%c0_8, %c0_9, %c0_10] : memref<3x24x1xbf16, #tpu.memory_space<vmem>>, vector<3x24x1xbf16>
    %c0_11 = arith.constant 0 : index
    %c0_12 = arith.constant 0 : index
    %c0_13 = arith.constant 0 : index
    %5 = vector.load %arg6[%c0_11, %c0_12, %c0_13] : memref<3x24x16xbf16, #tpu.memory_space<vmem>>, vector<3x24x16xbf16>
    %c0_14 = arith.constant 0 : index
    %c0_15 = arith.constant 0 : index
    %6 = vector.load %arg7[%c0_14, %c0_15] : memref<16x33xbf16, #tpu.memory_space<vmem>>, vector<16x33xbf16>
    %c0_16 = arith.constant 0 : index
    %c0_17 = arith.constant 0 : index
    %7 = vector.load %arg8[%c0_16, %c0_17] : memref<1x33xbf16, #tpu.memory_space<vmem>>, vector<1x33xbf16>
    %c0_18 = arith.constant 0 : index
    %c0_19 = arith.constant 0 : index
    %8 = vector.load %arg9[%c0_18, %c0_19] : memref<16x33xbf16, #tpu.memory_space<vmem>>, vector<16x33xbf16>
    %c0_20 = arith.constant 0 : index
    %c0_21 = arith.constant 0 : index
    %9 = vector.load %arg10[%c0_20, %c0_21] : memref<128x128xbf16, #tpu.memory_space<vmem>>, vector<128x128xbf16>
    %c0_22 = arith.constant 0 : index
    %c0_23 = arith.constant 0 : index
    %10 = vector.load %arg11[%c0_22, %c0_23] : memref<52x128xbf16, #tpu.memory_space<vmem>>, vector<52x128xbf16>
    %c0_24 = arith.constant 0 : index
    %c0_25 = arith.constant 0 : index
    %11 = vector.load %arg12[%c0_24, %c0_25] : memref<128x128xbf16, #tpu.memory_space<vmem>>, vector<128x128xbf16>
    %c0_26 = arith.constant 0 : index
    %c0_27 = arith.constant 0 : index
    %12 = vector.load %arg13[%c0_26, %c0_27] : memref<33x128xbf16, #tpu.memory_space<vmem>>, vector<33x128xbf16>
    %c0_28 = arith.constant 0 : index
    %c0_29 = arith.constant 0 : index
    %13 = vector.load %arg14[%c0_28, %c0_29] : memref<1x128xf32, #tpu.memory_space<vmem>>, vector<1x128xf32>
    %c0_30 = arith.constant 0 : index
    %c0_31 = arith.constant 0 : index
    %14 = vector.load %arg15[%c0_30, %c0_31] : memref<33x16xbf16, #tpu.memory_space<vmem>>, vector<33x16xbf16>
    %15 = vector.shape_cast %3 : vector<3x24x16xbf16> to vector<72x16xbf16>
    %cst = arith.constant dense<0.000000e+00> : vector<72x33xf32>
    %16 = tpu.matmul %15, %6, %cst {dimension_numbers = #tpu.dot_dimension_numbers<[1], [0], [0], [1], [0, 0, 1, 1], [], []>} : vector<72x16xbf16>, vector<16x33xbf16>, vector<72x33xf32> -> vector<72x33xf32>
    %17 = vector.shape_cast %16 : vector<72x33xf32> to vector<3x24x33xf32>
    %18 = vector.shape_cast %4 : vector<3x24x1xbf16> to vector<72x1xbf16>
    %19 = arith.extf %18 : vector<72x1xbf16> to vector<72x1xf32>
    %20 = arith.extf %7 : vector<1x33xbf16> to vector<1x33xf32>
    %21 = vector.broadcast %19 : vector<72x1xf32> to vector<72x33xf32>
    %22 = vector.broadcast %20 : vector<1x33xf32> to vector<72x33xf32>
    %23 = arith.mulf %21, %22 : vector<72x33xf32>
    %24 = vector.shape_cast %23 : vector<72x33xf32> to vector<3x24x33xf32>
    %25 = arith.addf %17, %24 : vector<3x24x33xf32>
    %26 = vector.shape_cast %5 : vector<3x24x16xbf16> to vector<72x16xbf16>
    %cst_32 = arith.constant dense<0.000000e+00> : vector<72x33xf32>
    %27 = tpu.matmul %26, %8, %cst_32 {dimension_numbers = #tpu.dot_dimension_numbers<[1], [0], [0], [1], [0, 0, 1, 1], [], []>} : vector<72x16xbf16>, vector<16x33xbf16>, vector<72x33xf32> -> vector<72x33xf32>
    %28 = vector.shape_cast %27 : vector<72x33xf32> to vector<3x24x33xf32>
    %29 = arith.addf %25, %28 : vector<3x24x33xf32>
    %30 = vector.extract_strided_slice %29 {offsets = [0, 0, 0], sizes = [1, 24, 33], strides = [1, 1, 1]} : vector<3x24x33xf32> to vector<1x24x33xf32>
    %31 = vector.shape_cast %30 : vector<1x24x33xf32> to vector<24x33xf32>
    %32 = vector.extract_strided_slice %29 {offsets = [0, 0, 0], sizes = [1, 24, 33], strides = [1, 1, 1]} : vector<3x24x33xf32> to vector<1x24x33xf32>
    %33 = vector.shape_cast %32 : vector<1x24x33xf32> to vector<24x33xf32>
    %34 = arith.mulf %31, %33 : vector<24x33xf32>
    %35 = vector.extract_strided_slice %29 {offsets = [1, 0, 0], sizes = [1, 24, 33], strides = [1, 1, 1]} : vector<3x24x33xf32> to vector<1x24x33xf32>
    %36 = vector.shape_cast %35 : vector<1x24x33xf32> to vector<24x33xf32>
    %37 = vector.extract_strided_slice %29 {offsets = [1, 0, 0], sizes = [1, 24, 33], strides = [1, 1, 1]} : vector<3x24x33xf32> to vector<1x24x33xf32>
    %38 = vector.shape_cast %37 : vector<1x24x33xf32> to vector<24x33xf32>
    %39 = arith.mulf %36, %38 : vector<24x33xf32>
    %40 = arith.addf %34, %39 : vector<24x33xf32>
    %41 = vector.extract_strided_slice %29 {offsets = [2, 0, 0], sizes = [1, 24, 33], strides = [1, 1, 1]} : vector<3x24x33xf32> to vector<1x24x33xf32>
    %42 = vector.shape_cast %41 : vector<1x24x33xf32> to vector<24x33xf32>
    %43 = vector.extract_strided_slice %29 {offsets = [2, 0, 0], sizes = [1, 24, 33], strides = [1, 1, 1]} : vector<3x24x33xf32> to vector<1x24x33xf32>
    %44 = vector.shape_cast %43 : vector<1x24x33xf32> to vector<24x33xf32>
    %45 = arith.mulf %42, %44 : vector<24x33xf32>
    %46 = arith.addf %40, %45 : vector<24x33xf32>
    %cst_33 = arith.constant 9.99999993E-9 : f32
    %47 = vector.broadcast %cst_33 : f32 to vector<24x33xf32>
    %48 = arith.maximumf %46, %47 : vector<24x33xf32>
    %49 = math.sqrt %48 : vector<24x33xf32>
    %cst_34 = arith.constant dense<0.000000e+00> : vector<24x128xf32>
    %50 = tpu.matmul %0, %9, %cst_34 {dimension_numbers = #tpu.dot_dimension_numbers<[1], [0], [0], [1], [0, 0, 1, 1], [], []>} : vector<24x128xbf16>, vector<128x128xbf16>, vector<24x128xf32> -> vector<24x128xf32>
    %51 = vector.broadcast %13 : vector<1x128xf32> to vector<24x128xf32>
    %52 = arith.addf %51, %50 : vector<24x128xf32>
    %cst_35 = arith.constant dense<0.000000e+00> : vector<24x128xf32>
    %53 = tpu.matmul %1, %10, %cst_35 {dimension_numbers = #tpu.dot_dimension_numbers<[1], [0], [0], [1], [0, 0, 1, 1], [], []>} : vector<24x52xbf16>, vector<52x128xbf16>, vector<24x128xf32> -> vector<24x128xf32>
    %54 = arith.addf %52, %53 : vector<24x128xf32>
    %cst_36 = arith.constant dense<0.000000e+00> : vector<24x128xf32>
    %55 = tpu.matmul %2, %11, %cst_36 {dimension_numbers = #tpu.dot_dimension_numbers<[1], [0], [0], [1], [0, 0, 1, 1], [], []>} : vector<24x128xbf16>, vector<128x128xbf16>, vector<24x128xf32> -> vector<24x128xf32>
    %56 = arith.addf %54, %55 : vector<24x128xf32>
    %57 = arith.truncf %49 : vector<24x33xf32> to vector<24x33xbf16>
    %cst_37 = arith.constant dense<0.000000e+00> : vector<24x128xf32>
    %58 = tpu.matmul %57, %12, %cst_37 {dimension_numbers = #tpu.dot_dimension_numbers<[1], [0], [0], [1], [0, 0, 1, 1], [], []>} : vector<24x33xbf16>, vector<33x128xbf16>, vector<24x128xf32> -> vector<24x128xf32>
    %59 = arith.addf %56, %58 : vector<24x128xf32>
    %60 = vector.shape_cast %29 : vector<3x24x33xf32> to vector<72x33xf32>
    %61 = arith.truncf %60 : vector<72x33xf32> to vector<72x33xbf16>
    %cst_38 = arith.constant dense<0.000000e+00> : vector<72x16xf32>
    %62 = tpu.matmul %61, %14, %cst_38 {dimension_numbers = #tpu.dot_dimension_numbers<[1], [0], [0], [1], [0, 0, 1, 1], [], []>} : vector<72x33xbf16>, vector<33x16xbf16>, vector<72x16xf32> -> vector<72x16xf32>
    %63 = vector.shape_cast %62 : vector<72x16xf32> to vector<3x24x16xf32>
    %64 = vector.extract_strided_slice %63 {offsets = [0, 0, 0], sizes = [1, 24, 16], strides = [1, 1, 1]} : vector<3x24x16xf32> to vector<1x24x16xf32>
    %65 = vector.shape_cast %64 : vector<1x24x16xf32> to vector<24x16xf32>
    %66 = vector.extract_strided_slice %63 {offsets = [0, 0, 0], sizes = [1, 24, 16], strides = [1, 1, 1]} : vector<3x24x16xf32> to vector<1x24x16xf32>
    %67 = vector.shape_cast %66 : vector<1x24x16xf32> to vector<24x16xf32>
    %68 = arith.mulf %65, %67 : vector<24x16xf32>
    %69 = vector.extract_strided_slice %63 {offsets = [1, 0, 0], sizes = [1, 24, 16], strides = [1, 1, 1]} : vector<3x24x16xf32> to vector<1x24x16xf32>
    %70 = vector.shape_cast %69 : vector<1x24x16xf32> to vector<24x16xf32>
    %71 = vector.extract_strided_slice %63 {offsets = [1, 0, 0], sizes = [1, 24, 16], strides = [1, 1, 1]} : vector<3x24x16xf32> to vector<1x24x16xf32>
    %72 = vector.shape_cast %71 : vector<1x24x16xf32> to vector<24x16xf32>
    %73 = arith.mulf %70, %72 : vector<24x16xf32>
    %74 = arith.addf %68, %73 : vector<24x16xf32>
    %75 = vector.extract_strided_slice %63 {offsets = [2, 0, 0], sizes = [1, 24, 16], strides = [1, 1, 1]} : vector<3x24x16xf32> to vector<1x24x16xf32>
    %76 = vector.shape_cast %75 : vector<1x24x16xf32> to vector<24x16xf32>
    %77 = vector.extract_strided_slice %63 {offsets = [2, 0, 0], sizes = [1, 24, 16], strides = [1, 1, 1]} : vector<3x24x16xf32> to vector<1x24x16xf32>
    %78 = vector.shape_cast %77 : vector<1x24x16xf32> to vector<24x16xf32>
    %79 = arith.mulf %76, %78 : vector<24x16xf32>
    %80 = arith.addf %74, %79 : vector<24x16xf32>
    %cst_39 = arith.constant 9.99999993E-9 : f32
    %81 = vector.broadcast %cst_39 : f32 to vector<24x16xf32>
    %82 = arith.maximumf %80, %81 : vector<24x16xf32>
    %83 = math.sqrt %82 : vector<24x16xf32>
    %84 = arith.negf %83 : vector<24x16xf32>
    %85 = math.exp %84 : vector<24x16xf32>
    %cst_40 = arith.constant 1.000000e+00 : f32
    %86 = vector.broadcast %cst_40 : f32 to vector<24x16xf32>
    %87 = arith.addf %86, %85 : vector<24x16xf32>
    %88 = arith.divf %86, %87 : vector<24x16xf32>
    %89 = vector.shape_cast %88 : vector<24x16xf32> to vector<1x24x16xf32>
    %90 = vector.broadcast %89 : vector<1x24x16xf32> to vector<3x24x16xf32>
    %91 = arith.mulf %63, %90 : vector<3x24x16xf32>
    %cst_41 = arith.constant 0.000000e+00 : f32
    %92 = vector.broadcast %cst_41 : f32 to vector<24x128xf32>
    %93 = arith.maximumf %59, %92 : vector<24x128xf32>
    %c0_42 = arith.constant 0 : index
    %c0_43 = arith.constant 0 : index
    %94 = vector.load %arg16[%c0_42, %c0_43] : memref<16x16xbf16, #tpu.memory_space<vmem>>, vector<16x16xbf16>
    %c0_44 = arith.constant 0 : index
    %c0_45 = arith.constant 0 : index
    %95 = vector.load %arg17[%c0_44, %c0_45] : memref<128x128xbf16, #tpu.memory_space<vmem>>, vector<128x128xbf16>
    %c0_46 = arith.constant 0 : index
    %c0_47 = arith.constant 0 : index
    %96 = vector.load %arg18[%c0_46, %c0_47] : memref<16x128xbf16, #tpu.memory_space<vmem>>, vector<16x128xbf16>
    %c0_48 = arith.constant 0 : index
    %c0_49 = arith.constant 0 : index
    %97 = vector.load %arg19[%c0_48, %c0_49] : memref<1x128xf32, #tpu.memory_space<vmem>>, vector<1x128xf32>
    %c0_50 = arith.constant 0 : index
    %c0_51 = arith.constant 0 : index
    %98 = vector.load %arg20[%c0_50, %c0_51] : memref<16x16xbf16, #tpu.memory_space<vmem>>, vector<16x16xbf16>
    %99 = vector.shape_cast %91 : vector<3x24x16xf32> to vector<72x16xf32>
    %100 = arith.truncf %99 : vector<72x16xf32> to vector<72x16xbf16>
    %cst_52 = arith.constant dense<0.000000e+00> : vector<72x16xf32>
    %101 = tpu.matmul %100, %94, %cst_52 {dimension_numbers = #tpu.dot_dimension_numbers<[1], [0], [0], [1], [0, 0, 1, 1], [], []>} : vector<72x16xbf16>, vector<16x16xbf16>, vector<72x16xf32> -> vector<72x16xf32>
    %102 = vector.shape_cast %101 : vector<72x16xf32> to vector<3x24x16xf32>
    %103 = vector.extract_strided_slice %102 {offsets = [0, 0, 0], sizes = [1, 24, 16], strides = [1, 1, 1]} : vector<3x24x16xf32> to vector<1x24x16xf32>
    %104 = vector.shape_cast %103 : vector<1x24x16xf32> to vector<24x16xf32>
    %105 = vector.extract_strided_slice %102 {offsets = [0, 0, 0], sizes = [1, 24, 16], strides = [1, 1, 1]} : vector<3x24x16xf32> to vector<1x24x16xf32>
    %106 = vector.shape_cast %105 : vector<1x24x16xf32> to vector<24x16xf32>
    %107 = arith.mulf %104, %106 : vector<24x16xf32>
    %108 = vector.extract_strided_slice %102 {offsets = [1, 0, 0], sizes = [1, 24, 16], strides = [1, 1, 1]} : vector<3x24x16xf32> to vector<1x24x16xf32>
    %109 = vector.shape_cast %108 : vector<1x24x16xf32> to vector<24x16xf32>
    %110 = vector.extract_strided_slice %102 {offsets = [1, 0, 0], sizes = [1, 24, 16], strides = [1, 1, 1]} : vector<3x24x16xf32> to vector<1x24x16xf32>
    %111 = vector.shape_cast %110 : vector<1x24x16xf32> to vector<24x16xf32>
    %112 = arith.mulf %109, %111 : vector<24x16xf32>
    %113 = arith.addf %107, %112 : vector<24x16xf32>
    %114 = vector.extract_strided_slice %102 {offsets = [2, 0, 0], sizes = [1, 24, 16], strides = [1, 1, 1]} : vector<3x24x16xf32> to vector<1x24x16xf32>
    %115 = vector.shape_cast %114 : vector<1x24x16xf32> to vector<24x16xf32>
    %116 = vector.extract_strided_slice %102 {offsets = [2, 0, 0], sizes = [1, 24, 16], strides = [1, 1, 1]} : vector<3x24x16xf32> to vector<1x24x16xf32>
    %117 = vector.shape_cast %116 : vector<1x24x16xf32> to vector<24x16xf32>
    %118 = arith.mulf %115, %117 : vector<24x16xf32>
    %119 = arith.addf %113, %118 : vector<24x16xf32>
    %cst_53 = arith.constant 9.99999993E-9 : f32
    %120 = vector.broadcast %cst_53 : f32 to vector<24x16xf32>
    %121 = arith.maximumf %119, %120 : vector<24x16xf32>
    %122 = math.sqrt %121 : vector<24x16xf32>
    %123 = arith.truncf %93 : vector<24x128xf32> to vector<24x128xbf16>
    %cst_54 = arith.constant dense<0.000000e+00> : vector<24x128xf32>
    %124 = tpu.matmul %123, %95, %cst_54 {dimension_numbers = #tpu.dot_dimension_numbers<[1], [0], [0], [1], [0, 0, 1, 1], [], []>} : vector<24x128xbf16>, vector<128x128xbf16>, vector<24x128xf32> -> vector<24x128xf32>
    %125 = vector.broadcast %97 : vector<1x128xf32> to vector<24x128xf32>
    %126 = arith.addf %125, %124 : vector<24x128xf32>
    %127 = arith.truncf %122 : vector<24x16xf32> to vector<24x16xbf16>
    %cst_55 = arith.constant dense<0.000000e+00> : vector<24x128xf32>
    %128 = tpu.matmul %127, %96, %cst_55 {dimension_numbers = #tpu.dot_dimension_numbers<[1], [0], [0], [1], [0, 0, 1, 1], [], []>} : vector<24x16xbf16>, vector<16x128xbf16>, vector<24x128xf32> -> vector<24x128xf32>
    %129 = arith.addf %126, %128 : vector<24x128xf32>
    %130 = vector.shape_cast %102 : vector<3x24x16xf32> to vector<72x16xf32>
    %131 = arith.truncf %130 : vector<72x16xf32> to vector<72x16xbf16>
    %cst_56 = arith.constant dense<0.000000e+00> : vector<72x16xf32>
    %132 = tpu.matmul %131, %98, %cst_56 {dimension_numbers = #tpu.dot_dimension_numbers<[1], [0], [0], [1], [0, 0, 1, 1], [], []>} : vector<72x16xbf16>, vector<16x16xbf16>, vector<72x16xf32> -> vector<72x16xf32>
    %133 = vector.shape_cast %132 : vector<72x16xf32> to vector<3x24x16xf32>
    %134 = vector.extract_strided_slice %133 {offsets = [0, 0, 0], sizes = [1, 24, 16], strides = [1, 1, 1]} : vector<3x24x16xf32> to vector<1x24x16xf32>
    %135 = vector.shape_cast %134 : vector<1x24x16xf32> to vector<24x16xf32>
    %136 = vector.extract_strided_slice %133 {offsets = [0, 0, 0], sizes = [1, 24, 16], strides = [1, 1, 1]} : vector<3x24x16xf32> to vector<1x24x16xf32>
    %137 = vector.shape_cast %136 : vector<1x24x16xf32> to vector<24x16xf32>
    %138 = arith.mulf %135, %137 : vector<24x16xf32>
    %139 = vector.extract_strided_slice %133 {offsets = [1, 0, 0], sizes = [1, 24, 16], strides = [1, 1, 1]} : vector<3x24x16xf32> to vector<1x24x16xf32>
    %140 = vector.shape_cast %139 : vector<1x24x16xf32> to vector<24x16xf32>
    %141 = vector.extract_strided_slice %133 {offsets = [1, 0, 0], sizes = [1, 24, 16], strides = [1, 1, 1]} : vector<3x24x16xf32> to vector<1x24x16xf32>
    %142 = vector.shape_cast %141 : vector<1x24x16xf32> to vector<24x16xf32>
    %143 = arith.mulf %140, %142 : vector<24x16xf32>
    %144 = arith.addf %138, %143 : vector<24x16xf32>
    %145 = vector.extract_strided_slice %133 {offsets = [2, 0, 0], sizes = [1, 24, 16], strides = [1, 1, 1]} : vector<3x24x16xf32> to vector<1x24x16xf32>
    %146 = vector.shape_cast %145 : vector<1x24x16xf32> to vector<24x16xf32>
    %147 = vector.extract_strided_slice %133 {offsets = [2, 0, 0], sizes = [1, 24, 16], strides = [1, 1, 1]} : vector<3x24x16xf32> to vector<1x24x16xf32>
    %148 = vector.shape_cast %147 : vector<1x24x16xf32> to vector<24x16xf32>
    %149 = arith.mulf %146, %148 : vector<24x16xf32>
    %150 = arith.addf %144, %149 : vector<24x16xf32>
    %cst_57 = arith.constant 9.99999993E-9 : f32
    %151 = vector.broadcast %cst_57 : f32 to vector<24x16xf32>
    %152 = arith.maximumf %150, %151 : vector<24x16xf32>
    %153 = math.sqrt %152 : vector<24x16xf32>
    %154 = arith.negf %153 : vector<24x16xf32>
    %155 = math.exp %154 : vector<24x16xf32>
    %cst_58 = arith.constant 1.000000e+00 : f32
    %156 = vector.broadcast %cst_58 : f32 to vector<24x16xf32>
    %157 = arith.addf %156, %155 : vector<24x16xf32>
    %158 = arith.divf %156, %157 : vector<24x16xf32>
    %159 = vector.shape_cast %158 : vector<24x16xf32> to vector<1x24x16xf32>
    %160 = vector.broadcast %159 : vector<1x24x16xf32> to vector<3x24x16xf32>
    %161 = arith.mulf %133, %160 : vector<3x24x16xf32>
    %cst_59 = arith.constant 0.000000e+00 : f32
    %162 = vector.broadcast %cst_59 : f32 to vector<24x128xf32>
    %163 = arith.maximumf %129, %162 : vector<24x128xf32>
    %c0_60 = arith.constant 0 : index
    %c0_61 = arith.constant 0 : index
    %164 = vector.load %arg21[%c0_60, %c0_61] : memref<16x16xbf16, #tpu.memory_space<vmem>>, vector<16x16xbf16>
    %c0_62 = arith.constant 0 : index
    %c0_63 = arith.constant 0 : index
    %165 = vector.load %arg22[%c0_62, %c0_63] : memref<128x128xbf16, #tpu.memory_space<vmem>>, vector<128x128xbf16>
    %c0_64 = arith.constant 0 : index
    %c0_65 = arith.constant 0 : index
    %166 = vector.load %arg23[%c0_64, %c0_65] : memref<16x128xbf16, #tpu.memory_space<vmem>>, vector<16x128xbf16>
    %c0_66 = arith.constant 0 : index
    %c0_67 = arith.constant 0 : index
    %167 = vector.load %arg24[%c0_66, %c0_67] : memref<1x128xf32, #tpu.memory_space<vmem>>, vector<1x128xf32>
    %c0_68 = arith.constant 0 : index
    %c0_69 = arith.constant 0 : index
    %168 = vector.load %arg25[%c0_68, %c0_69] : memref<16x16xbf16, #tpu.memory_space<vmem>>, vector<16x16xbf16>
    %169 = vector.shape_cast %161 : vector<3x24x16xf32> to vector<72x16xf32>
    %170 = arith.truncf %169 : vector<72x16xf32> to vector<72x16xbf16>
    %cst_70 = arith.constant dense<0.000000e+00> : vector<72x16xf32>
    %171 = tpu.matmul %170, %164, %cst_70 {dimension_numbers = #tpu.dot_dimension_numbers<[1], [0], [0], [1], [0, 0, 1, 1], [], []>} : vector<72x16xbf16>, vector<16x16xbf16>, vector<72x16xf32> -> vector<72x16xf32>
    %172 = vector.shape_cast %171 : vector<72x16xf32> to vector<3x24x16xf32>
    %173 = vector.extract_strided_slice %172 {offsets = [0, 0, 0], sizes = [1, 24, 16], strides = [1, 1, 1]} : vector<3x24x16xf32> to vector<1x24x16xf32>
    %174 = vector.shape_cast %173 : vector<1x24x16xf32> to vector<24x16xf32>
    %175 = vector.extract_strided_slice %172 {offsets = [0, 0, 0], sizes = [1, 24, 16], strides = [1, 1, 1]} : vector<3x24x16xf32> to vector<1x24x16xf32>
    %176 = vector.shape_cast %175 : vector<1x24x16xf32> to vector<24x16xf32>
    %177 = arith.mulf %174, %176 : vector<24x16xf32>
    %178 = vector.extract_strided_slice %172 {offsets = [1, 0, 0], sizes = [1, 24, 16], strides = [1, 1, 1]} : vector<3x24x16xf32> to vector<1x24x16xf32>
    %179 = vector.shape_cast %178 : vector<1x24x16xf32> to vector<24x16xf32>
    %180 = vector.extract_strided_slice %172 {offsets = [1, 0, 0], sizes = [1, 24, 16], strides = [1, 1, 1]} : vector<3x24x16xf32> to vector<1x24x16xf32>
    %181 = vector.shape_cast %180 : vector<1x24x16xf32> to vector<24x16xf32>
    %182 = arith.mulf %179, %181 : vector<24x16xf32>
    %183 = arith.addf %177, %182 : vector<24x16xf32>
    %184 = vector.extract_strided_slice %172 {offsets = [2, 0, 0], sizes = [1, 24, 16], strides = [1, 1, 1]} : vector<3x24x16xf32> to vector<1x24x16xf32>
    %185 = vector.shape_cast %184 : vector<1x24x16xf32> to vector<24x16xf32>
    %186 = vector.extract_strided_slice %172 {offsets = [2, 0, 0], sizes = [1, 24, 16], strides = [1, 1, 1]} : vector<3x24x16xf32> to vector<1x24x16xf32>
    %187 = vector.shape_cast %186 : vector<1x24x16xf32> to vector<24x16xf32>
    %188 = arith.mulf %185, %187 : vector<24x16xf32>
    %189 = arith.addf %183, %188 : vector<24x16xf32>
    %cst_71 = arith.constant 9.99999993E-9 : f32
    %190 = vector.broadcast %cst_71 : f32 to vector<24x16xf32>
    %191 = arith.maximumf %189, %190 : vector<24x16xf32>
    %192 = math.sqrt %191 : vector<24x16xf32>
    %193 = arith.truncf %163 : vector<24x128xf32> to vector<24x128xbf16>
    %cst_72 = arith.constant dense<0.000000e+00> : vector<24x128xf32>
    %194 = tpu.matmul %193, %165, %cst_72 {dimension_numbers = #tpu.dot_dimension_numbers<[1], [0], [0], [1], [0, 0, 1, 1], [], []>} : vector<24x128xbf16>, vector<128x128xbf16>, vector<24x128xf32> -> vector<24x128xf32>
    %195 = vector.broadcast %167 : vector<1x128xf32> to vector<24x128xf32>
    %196 = arith.addf %195, %194 : vector<24x128xf32>
    %197 = arith.truncf %192 : vector<24x16xf32> to vector<24x16xbf16>
    %cst_73 = arith.constant dense<0.000000e+00> : vector<24x128xf32>
    %198 = tpu.matmul %197, %166, %cst_73 {dimension_numbers = #tpu.dot_dimension_numbers<[1], [0], [0], [1], [0, 0, 1, 1], [], []>} : vector<24x16xbf16>, vector<16x128xbf16>, vector<24x128xf32> -> vector<24x128xf32>
    %199 = arith.addf %196, %198 : vector<24x128xf32>
    %200 = vector.shape_cast %172 : vector<3x24x16xf32> to vector<72x16xf32>
    %201 = arith.truncf %200 : vector<72x16xf32> to vector<72x16xbf16>
    %cst_74 = arith.constant dense<0.000000e+00> : vector<72x16xf32>
    %202 = tpu.matmul %201, %168, %cst_74 {dimension_numbers = #tpu.dot_dimension_numbers<[1], [0], [0], [1], [0, 0, 1, 1], [], []>} : vector<72x16xbf16>, vector<16x16xbf16>, vector<72x16xf32> -> vector<72x16xf32>
    %203 = vector.shape_cast %202 : vector<72x16xf32> to vector<3x24x16xf32>
    %204 = arith.truncf %199 : vector<24x128xf32> to vector<24x128xbf16>
    %c0_75 = arith.constant 0 : index
    %c0_76 = arith.constant 0 : index
    %205 = vector.load %arg26[%c0_75, %c0_76] : memref<24x128xbf16, #tpu.memory_space<vmem>>, vector<24x128xbf16>
    tpu.vector_store %arg26[%c0_75, %c0_76], %204 {strides = array<i32>} : memref<24x128xbf16, #tpu.memory_space<vmem>>, vector<24x128xbf16>,
    %206 = arith.truncf %203 : vector<3x24x16xf32> to vector<3x24x16xbf16>
    %c0_77 = arith.constant 0 : index
    %c0_78 = arith.constant 0 : index
    %c0_79 = arith.constant 0 : index
    %207 = vector.load %arg27[%c0_77, %c0_78, %c0_79] : memref<3x24x16xbf16, #tpu.memory_space<vmem>>, vector<3x24x16xbf16>
    tpu.vector_store %arg27[%c0_77, %c0_78, %c0_79], %206 {strides = array<i32>} : memref<3x24x16xbf16, #tpu.memory_space<vmem>>, vector<3x24x16xbf16>,
    return
  }
  func.func @transform_0(%arg0: i32) -> (i32, i32) {
    %c0_i32 = arith.constant 0 : i32
    %c0_i32_0 = arith.constant 0 : i32
    return %arg0, %c0_i32 : i32, i32
  }
  func.func @transform_1(%arg0: i32) -> (i32, i32) {
    %c0_i32 = arith.constant 0 : i32
    %c0_i32_0 = arith.constant 0 : i32
    return %arg0, %c0_i32 : i32, i32
  }
  func.func @transform_2(%arg0: i32) -> (i32, i32) {
    %c0_i32 = arith.constant 0 : i32
    %c0_i32_0 = arith.constant 0 : i32
    return %arg0, %c0_i32 : i32, i32
  }
  func.func @transform_3(%arg0: i32) -> (i32, i32, i32) {
    %c0_i32 = arith.constant 0 : i32
    %c0_i32_0 = arith.constant 0 : i32
    %c0_i32_1 = arith.constant 0 : i32
    return %c0_i32, %arg0, %c0_i32_0 : i32, i32, i32
  }
  func.func @transform_4(%arg0: i32) -> (i32, i32, i32) {
    %c0_i32 = arith.constant 0 : i32
    %c0_i32_0 = arith.constant 0 : i32
    %c0_i32_1 = arith.constant 0 : i32
    return %c0_i32, %arg0, %c0_i32_0 : i32, i32, i32
  }
  func.func @transform_5(%arg0: i32) -> (i32, i32, i32) {
    %c0_i32 = arith.constant 0 : i32
    %c0_i32_0 = arith.constant 0 : i32
    %c0_i32_1 = arith.constant 0 : i32
    return %c0_i32, %arg0, %c0_i32_0 : i32, i32, i32
  }
  func.func @transform_6(%arg0: i32) -> (i32, i32) {
    %c0_i32 = arith.constant 0 : i32
    %c0_i32_0 = arith.constant 0 : i32
    %c0_i32_1 = arith.constant 0 : i32
    return %c0_i32, %c0_i32_0 : i32, i32
  }
  func.func @transform_7(%arg0: i32) -> (i32, i32) {
    %c0_i32 = arith.constant 0 : i32
    %c0_i32_0 = arith.constant 0 : i32
    %c0_i32_1 = arith.constant 0 : i32
    return %c0_i32, %c0_i32_0 : i32, i32
  }
  func.func @transform_8(%arg0: i32) -> (i32, i32) {
    %c0_i32 = arith.constant 0 : i32
    %c0_i32_0 = arith.constant 0 : i32
    %c0_i32_1 = arith.constant 0 : i32
    return %c0_i32, %c0_i32_0 : i32, i32
  }
  func.func @transform_9(%arg0: i32) -> (i32, i32) {
    %c0_i32 = arith.constant 0 : i32
    %c0_i32_0 = arith.constant 0 : i32
    %c0_i32_1 = arith.constant 0 : i32
    return %c0_i32, %c0_i32_0 : i32, i32
  }
  func.func @transform_10(%arg0: i32) -> (i32, i32) {
    %c0_i32 = arith.constant 0 : i32
    %c0_i32_0 = arith.constant 0 : i32
    %c0_i32_1 = arith.constant 0 : i32
    return %c0_i32, %c0_i32_0 : i32, i32
  }
  func.func @transform_11(%arg0: i32) -> (i32, i32) {
    %c0_i32 = arith.constant 0 : i32
    %c0_i32_0 = arith.constant 0 : i32
    %c0_i32_1 = arith.constant 0 : i32
    return %c0_i32, %c0_i32_0 : i32, i32
  }
  func.func @transform_12(%arg0: i32) -> (i32, i32) {
    %c0_i32 = arith.constant 0 : i32
    %c0_i32_0 = arith.constant 0 : i32
    %c0_i32_1 = arith.constant 0 : i32
    return %c0_i32, %c0_i32_0 : i32, i32
  }
  func.func @transform_13(%arg0: i32) -> (i32, i32) {
    %c0_i32 = arith.constant 0 : i32
    %c0_i32_0 = arith.constant 0 : i32
    %c0_i32_1 = arith.constant 0 : i32
    return %c0_i32, %c0_i32_0 : i32, i32
  }
  func.func @transform_14(%arg0: i32) -> (i32, i32) {
    %c0_i32 = arith.constant 0 : i32
    %c0_i32_0 = arith.constant 0 : i32
    %c0_i32_1 = arith.constant 0 : i32
    return %c0_i32, %c0_i32_0 : i32, i32
  }
  func.func @transform_15(%arg0: i32) -> (i32, i32) {
    %c0_i32 = arith.constant 0 : i32
    %c0_i32_0 = arith.constant 0 : i32
    %c0_i32_1 = arith.constant 0 : i32
    return %c0_i32, %c0_i32_0 : i32, i32
  }
  func.func @transform_16(%arg0: i32) -> (i32, i32) {
    %c0_i32 = arith.constant 0 : i32
    %c0_i32_0 = arith.constant 0 : i32
    %c0_i32_1 = arith.constant 0 : i32
    return %c0_i32, %c0_i32_0 : i32, i32
  }
  func.func @transform_17(%arg0: i32) -> (i32, i32) {
    %c0_i32 = arith.constant 0 : i32
    %c0_i32_0 = arith.constant 0 : i32
    %c0_i32_1 = arith.constant 0 : i32
    return %c0_i32, %c0_i32_0 : i32, i32
  }
  func.func @transform_18(%arg0: i32) -> (i32, i32) {
    %c0_i32 = arith.constant 0 : i32
    %c0_i32_0 = arith.constant 0 : i32
    %c0_i32_1 = arith.constant 0 : i32
    return %c0_i32, %c0_i32_0 : i32, i32
  }
  func.func @transform_19(%arg0: i32) -> (i32, i32) {
    %c0_i32 = arith.constant 0 : i32
    %c0_i32_0 = arith.constant 0 : i32
    %c0_i32_1 = arith.constant 0 : i32
    return %c0_i32, %c0_i32_0 : i32, i32
  }
  func.func @transform_20(%arg0: i32) -> (i32, i32) {
    %c0_i32 = arith.constant 0 : i32
    %c0_i32_0 = arith.constant 0 : i32
    %c0_i32_1 = arith.constant 0 : i32
    return %c0_i32, %c0_i32_0 : i32, i32
  }
  func.func @transform_21(%arg0: i32) -> (i32, i32) {
    %c0_i32 = arith.constant 0 : i32
    %c0_i32_0 = arith.constant 0 : i32
    %c0_i32_1 = arith.constant 0 : i32
    return %c0_i32, %c0_i32_0 : i32, i32
  }
  func.func @transform_22(%arg0: i32) -> (i32, i32) {
    %c0_i32 = arith.constant 0 : i32
    %c0_i32_0 = arith.constant 0 : i32
    %c0_i32_1 = arith.constant 0 : i32
    return %c0_i32, %c0_i32_0 : i32, i32
  }
  func.func @transform_23(%arg0: i32) -> (i32, i32) {
    %c0_i32 = arith.constant 0 : i32
    %c0_i32_0 = arith.constant 0 : i32
    %c0_i32_1 = arith.constant 0 : i32
    return %c0_i32, %c0_i32_0 : i32, i32
  }
  func.func @transform_24(%arg0: i32) -> (i32, i32) {
    %c0_i32 = arith.constant 0 : i32
    %c0_i32_0 = arith.constant 0 : i32
    %c0_i32_1 = arith.constant 0 : i32
    return %c0_i32, %c0_i32_0 : i32, i32
  }
  func.func @transform_25(%arg0: i32) -> (i32, i32) {
    %c0_i32 = arith.constant 0 : i32
    %c0_i32_0 = arith.constant 0 : i32
    return %arg0, %c0_i32 : i32, i32
  }
  func.func @transform_26(%arg0: i32) -> (i32, i32, i32) {
    %c0_i32 = arith.constant 0 : i32
    %c0_i32_0 = arith.constant 0 : i32
    %c0_i32_1 = arith.constant 0 : i32
    return %c0_i32, %arg0, %c0_i32_0 : i32, i32, i32
  }
}

module attributes {stable_mosaic.version = 11 : i64} {
  func.func @kernel(%arg0: i32, %arg1: memref<8x128xbf16, #tpu.memory_space<vmem>>, %arg2: memref<3x8x16xbf16, #tpu.memory_space<vmem>>, %arg3: memref<8x128xf32, #tpu.memory_space<vmem>>, %arg4: memref<3x8x16xf32, #tpu.memory_space<vmem>>, %arg5: memref<8x1xf32, #tpu.memory_space<vmem>>, %arg6: memref<1x128xf32, #tpu.memory_space<vmem>>, %arg7: memref<1x128xf32, #tpu.memory_space<vmem>>, %arg8: memref<16x32xbf16, #tpu.memory_space<vmem>>, %arg9: memref<128x512xbf16, #tpu.memory_space<vmem>>, %arg10: memref<32x512xbf16, #tpu.memory_space<vmem>>, %arg11: memref<1x512xf32, #tpu.memory_space<vmem>>, %arg12: memref<32x32xbf16, #tpu.memory_space<vmem>>, %arg13: memref<32x32xbf16, #tpu.memory_space<vmem>>, %arg14: memref<512x128xbf16, #tpu.memory_space<vmem>>, %arg15: memref<32x128xbf16, #tpu.memory_space<vmem>>, %arg16: memref<1x128xf32, #tpu.memory_space<vmem>>, %arg17: memref<32x16xbf16, #tpu.memory_space<vmem>>, %arg18: memref<1x128xf32, #tpu.memory_space<vmem>>, %arg19: memref<1x128xf32, #tpu.memory_space<vmem>>, %arg20: memref<16x16xbf16, #tpu.memory_space<vmem>>, %arg21: memref<128x128xbf16, #tpu.memory_space<vmem>>, %arg22: memref<16x128xbf16, #tpu.memory_space<vmem>>, %arg23: memref<1x128xf32, #tpu.memory_space<vmem>>, %arg24: memref<8x128xbf16, #tpu.memory_space<vmem>>, %arg25: memref<3x8x16xbf16, #tpu.memory_space<vmem>>, %arg26: memref<8x128xf32, #tpu.memory_space<vmem>>, %arg27: memref<8x128xf32, #tpu.memory_space<vmem>>) attributes {dimension_semantics = [#tpu.dimension_semantics<parallel>], iteration_bounds = array<i64: 1>, scalar_prefetch = 0 : i64, scratch_operands = 0 : i64, tpu.core_type = #tpu.core_type<tc>, window_params = [{transform_indices = @transform_0, window_bounds = array<i64: 8, 128>}, {transform_indices = @transform_1, window_bounds = array<i64: 3, 8, 16>}, {transform_indices = @transform_2, window_bounds = array<i64: 8, 128>}, {transform_indices = @transform_3, window_bounds = array<i64: 3, 8, 16>}, {transform_indices = @transform_4, window_bounds = array<i64: 8, 1>}, {pipeline_mode = #tpu.pipeline_mode<synchronous>, transform_indices = @transform_5, window_bounds = array<i64: 1, 128>}, {pipeline_mode = #tpu.pipeline_mode<synchronous>, transform_indices = @transform_6, window_bounds = array<i64: 1, 128>}, {pipeline_mode = #tpu.pipeline_mode<synchronous>, transform_indices = @transform_7, window_bounds = array<i64: 16, 32>}, {pipeline_mode = #tpu.pipeline_mode<synchronous>, transform_indices = @transform_8, window_bounds = array<i64: 128, 512>}, {pipeline_mode = #tpu.pipeline_mode<synchronous>, transform_indices = @transform_9, window_bounds = array<i64: 32, 512>}, {pipeline_mode = #tpu.pipeline_mode<synchronous>, transform_indices = @transform_10, window_bounds = array<i64: 1, 512>}, {pipeline_mode = #tpu.pipeline_mode<synchronous>, transform_indices = @transform_11, window_bounds = array<i64: 32, 32>}, {pipeline_mode = #tpu.pipeline_mode<synchronous>, transform_indices = @transform_12, window_bounds = array<i64: 32, 32>}, {pipeline_mode = #tpu.pipeline_mode<synchronous>, transform_indices = @transform_13, window_bounds = array<i64: 512, 128>}, {pipeline_mode = #tpu.pipeline_mode<synchronous>, transform_indices = @transform_14, window_bounds = array<i64: 32, 128>}, {pipeline_mode = #tpu.pipeline_mode<synchronous>, transform_indices = @transform_15, window_bounds = array<i64: 1, 128>}, {pipeline_mode = #tpu.pipeline_mode<synchronous>, transform_indices = @transform_16, window_bounds = array<i64: 32, 16>}, {pipeline_mode = #tpu.pipeline_mode<synchronous>, transform_indices = @transform_17, window_bounds = array<i64: 1, 128>}, {pipeline_mode = #tpu.pipeline_mode<synchronous>, transform_indices = @transform_18, window_bounds = array<i64: 1, 128>}, {pipeline_mode = #tpu.pipeline_mode<synchronous>, transform_indices = @transform_19, window_bounds = array<i64: 16, 16>}, {pipeline_mode = #tpu.pipeline_mode<synchronous>, transform_indices = @transform_20, window_bounds = array<i64: 128, 128>}, {pipeline_mode = #tpu.pipeline_mode<synchronous>, transform_indices = @transform_21, window_bounds = array<i64: 16, 128>}, {pipeline_mode = #tpu.pipeline_mode<synchronous>, transform_indices = @transform_22, window_bounds = array<i64: 1, 128>}, {transform_indices = @transform_23, window_bounds = array<i64: 8, 128>}, {transform_indices = @transform_24, window_bounds = array<i64: 3, 8, 16>}, {transform_indices = @transform_25, window_bounds = array<i64: 8, 128>}, {transform_indices = @transform_26, window_bounds = array<i64: 8, 128>}]} {
    %c0 = arith.constant 0 : index
    %c0_0 = arith.constant 0 : index
    %0 = vector.load %arg5[%c0, %c0_0] : memref<8x1xf32, #tpu.memory_space<vmem>>, vector<8x1xf32>
    %c0_1 = arith.constant 0 : index
    %c0_2 = arith.constant 0 : index
    %1 = vector.load %arg1[%c0_1, %c0_2] : memref<8x128xbf16, #tpu.memory_space<vmem>>, vector<8x128xbf16>
    %2 = arith.extf %1 : vector<8x128xbf16> to vector<8x128xf32>
    %c0_3 = arith.constant 0 : index
    %c0_4 = arith.constant 0 : index
    %3 = vector.load %arg3[%c0_3, %c0_4] : memref<8x128xf32, #tpu.memory_space<vmem>>, vector<8x128xf32>
    %4 = vector.broadcast %0 : vector<8x1xf32> to vector<8x128xf32>
    %5 = arith.mulf %3, %4 : vector<8x128xf32>
    %6 = arith.addf %2, %5 : vector<8x128xf32>
    %c0_5 = arith.constant 0 : index
    %c0_6 = arith.constant 0 : index
    %c0_7 = arith.constant 0 : index
    %7 = vector.load %arg2[%c0_5, %c0_6, %c0_7] : memref<3x8x16xbf16, #tpu.memory_space<vmem>>, vector<3x8x16xbf16>
    %8 = arith.extf %7 : vector<3x8x16xbf16> to vector<3x8x16xf32>
    %c0_8 = arith.constant 0 : index
    %c0_9 = arith.constant 0 : index
    %c0_10 = arith.constant 0 : index
    %9 = vector.load %arg4[%c0_8, %c0_9, %c0_10] : memref<3x8x16xf32, #tpu.memory_space<vmem>>, vector<3x8x16xf32>
    %10 = vector.shape_cast %0 : vector<8x1xf32> to vector<1x8x1xf32>
    %11 = vector.broadcast %10 : vector<1x8x1xf32> to vector<3x8x16xf32>
    %12 = arith.mulf %9, %11 : vector<3x8x16xf32>
    %13 = arith.addf %8, %12 : vector<3x8x16xf32>
    %c0_11 = arith.constant 0 : index
    %c0_12 = arith.constant 0 : index
    %14 = vector.load %arg6[%c0_11, %c0_12] : memref<1x128xf32, #tpu.memory_space<vmem>>, vector<1x128xf32>
    %c0_13 = arith.constant 0 : index
    %c0_14 = arith.constant 0 : index
    %15 = vector.load %arg7[%c0_13, %c0_14] : memref<1x128xf32, #tpu.memory_space<vmem>>, vector<1x128xf32>
    %cst = arith.constant dense<0.000000e+00> : vector<8xf32>
    %16 = vector.multi_reduction <add>, %6, %cst [1] : vector<8x128xf32> to vector<8xf32>
    %17 = vector.shape_cast %16 : vector<8xf32> to vector<8x1xf32>
    %cst_15 = arith.constant 0.00999999977 : f32
    %18 = vector.broadcast %cst_15 : f32 to vector<8x1xf32>
    %19 = arith.mulf %17, %18 : vector<8x1xf32>
    %20 = arith.mulf %6, %6 : vector<8x128xf32>
    %cst_16 = arith.constant dense<0.000000e+00> : vector<8xf32>
    %21 = vector.multi_reduction <add>, %20, %cst_16 [1] : vector<8x128xf32> to vector<8xf32>
    %22 = vector.shape_cast %21 : vector<8xf32> to vector<8x1xf32>
    %cst_17 = arith.constant 0.00999999977 : f32
    %23 = vector.broadcast %cst_17 : f32 to vector<8x1xf32>
    %24 = arith.mulf %22, %23 : vector<8x1xf32>
    %25 = arith.mulf %19, %19 : vector<8x1xf32>
    %26 = arith.subf %24, %25 : vector<8x1xf32>
    %cst_18 = arith.constant 0.000000e+00 : f32
    %27 = vector.broadcast %cst_18 : f32 to vector<8x1xf32>
    %28 = arith.maximumf %26, %27 : vector<8x1xf32>
    %29 = vector.broadcast %19 : vector<8x1xf32> to vector<8x128xf32>
    %30 = arith.subf %6, %29 : vector<8x128xf32>
    %cst_19 = arith.constant 9.99999974E-6 : f32
    %31 = vector.broadcast %cst_19 : f32 to vector<8x1xf32>
    %32 = arith.addf %28, %31 : vector<8x1xf32>
    %33 = math.rsqrt %32 : vector<8x1xf32>
    %34 = vector.broadcast %33 : vector<8x1xf32> to vector<8x128xf32>
    %35 = arith.mulf %30, %34 : vector<8x128xf32>
    %36 = vector.broadcast %14 : vector<1x128xf32> to vector<8x128xf32>
    %37 = arith.mulf %35, %36 : vector<8x128xf32>
    %38 = vector.broadcast %15 : vector<1x128xf32> to vector<8x128xf32>
    %39 = arith.addf %37, %38 : vector<8x128xf32>
    %40 = vector.extract_strided_slice %13 {offsets = [0, 0, 0], sizes = [1, 8, 16], strides = [1, 1, 1]} : vector<3x8x16xf32> to vector<1x8x16xf32>
    %41 = vector.shape_cast %40 : vector<1x8x16xf32> to vector<8x16xf32>
    %42 = vector.extract_strided_slice %13 {offsets = [0, 0, 0], sizes = [1, 8, 16], strides = [1, 1, 1]} : vector<3x8x16xf32> to vector<1x8x16xf32>
    %43 = vector.shape_cast %42 : vector<1x8x16xf32> to vector<8x16xf32>
    %44 = arith.mulf %41, %43 : vector<8x16xf32>
    %45 = vector.extract_strided_slice %13 {offsets = [1, 0, 0], sizes = [1, 8, 16], strides = [1, 1, 1]} : vector<3x8x16xf32> to vector<1x8x16xf32>
    %46 = vector.shape_cast %45 : vector<1x8x16xf32> to vector<8x16xf32>
    %47 = vector.extract_strided_slice %13 {offsets = [1, 0, 0], sizes = [1, 8, 16], strides = [1, 1, 1]} : vector<3x8x16xf32> to vector<1x8x16xf32>
    %48 = vector.shape_cast %47 : vector<1x8x16xf32> to vector<8x16xf32>
    %49 = arith.mulf %46, %48 : vector<8x16xf32>
    %50 = arith.addf %44, %49 : vector<8x16xf32>
    %51 = vector.extract_strided_slice %13 {offsets = [2, 0, 0], sizes = [1, 8, 16], strides = [1, 1, 1]} : vector<3x8x16xf32> to vector<1x8x16xf32>
    %52 = vector.shape_cast %51 : vector<1x8x16xf32> to vector<8x16xf32>
    %53 = vector.extract_strided_slice %13 {offsets = [2, 0, 0], sizes = [1, 8, 16], strides = [1, 1, 1]} : vector<3x8x16xf32> to vector<1x8x16xf32>
    %54 = vector.shape_cast %53 : vector<1x8x16xf32> to vector<8x16xf32>
    %55 = arith.mulf %52, %54 : vector<8x16xf32>
    %56 = arith.addf %50, %55 : vector<8x16xf32>
    %cst_20 = arith.constant 9.99999993E-9 : f32
    %57 = vector.broadcast %cst_20 : f32 to vector<8x16xf32>
    %58 = arith.maximumf %56, %57 : vector<8x16xf32>
    %cst_21 = arith.constant dense<0.000000e+00> : vector<8xf32>
    %59 = vector.multi_reduction <add>, %58, %cst_21 [1] : vector<8x16xf32> to vector<8xf32>
    %60 = vector.shape_cast %59 : vector<8xf32> to vector<8x1xf32>
    %cst_22 = arith.constant 1.600000e+01 : f32
    %61 = vector.broadcast %cst_22 : f32 to vector<8x1xf32>
    %62 = arith.divf %60, %61 : vector<8x1xf32>
    %63 = math.rsqrt %62 : vector<8x1xf32>
    %64 = vector.shape_cast %63 : vector<8x1xf32> to vector<1x8x1xf32>
    %65 = vector.broadcast %64 : vector<1x8x1xf32> to vector<3x8x16xf32>
    %66 = arith.mulf %13, %65 : vector<3x8x16xf32>
    %c0_23 = arith.constant 0 : index
    %c0_24 = arith.constant 0 : index
    %67 = vector.load %arg8[%c0_23, %c0_24] : memref<16x32xbf16, #tpu.memory_space<vmem>>, vector<16x32xbf16>
    %c0_25 = arith.constant 0 : index
    %c0_26 = arith.constant 0 : index
    %68 = vector.load %arg9[%c0_25, %c0_26] : memref<128x512xbf16, #tpu.memory_space<vmem>>, vector<128x512xbf16>
    %c0_27 = arith.constant 0 : index
    %c0_28 = arith.constant 0 : index
    %69 = vector.load %arg10[%c0_27, %c0_28] : memref<32x512xbf16, #tpu.memory_space<vmem>>, vector<32x512xbf16>
    %c0_29 = arith.constant 0 : index
    %c0_30 = arith.constant 0 : index
    %70 = vector.load %arg11[%c0_29, %c0_30] : memref<1x512xf32, #tpu.memory_space<vmem>>, vector<1x512xf32>
    %c0_31 = arith.constant 0 : index
    %c0_32 = arith.constant 0 : index
    %71 = vector.load %arg12[%c0_31, %c0_32] : memref<32x32xbf16, #tpu.memory_space<vmem>>, vector<32x32xbf16>
    %72 = vector.shape_cast %66 : vector<3x8x16xf32> to vector<24x16xf32>
    %73 = arith.truncf %72 : vector<24x16xf32> to vector<24x16xbf16>
    %cst_33 = arith.constant dense<0.000000e+00> : vector<24x32xf32>
    %74 = tpu.matmul %73, %67, %cst_33 {dimension_numbers = #tpu.dot_dimension_numbers<[1], [0], [0], [1], [0, 0, 1, 1], [], []>} : vector<24x16xbf16>, vector<16x32xbf16>, vector<24x32xf32> -> vector<24x32xf32>
    %75 = vector.shape_cast %74 : vector<24x32xf32> to vector<3x8x32xf32>
    %76 = vector.extract_strided_slice %75 {offsets = [0, 0, 0], sizes = [1, 8, 32], strides = [1, 1, 1]} : vector<3x8x32xf32> to vector<1x8x32xf32>
    %77 = vector.shape_cast %76 : vector<1x8x32xf32> to vector<8x32xf32>
    %78 = vector.extract_strided_slice %75 {offsets = [0, 0, 0], sizes = [1, 8, 32], strides = [1, 1, 1]} : vector<3x8x32xf32> to vector<1x8x32xf32>
    %79 = vector.shape_cast %78 : vector<1x8x32xf32> to vector<8x32xf32>
    %80 = arith.mulf %77, %79 : vector<8x32xf32>
    %81 = vector.extract_strided_slice %75 {offsets = [1, 0, 0], sizes = [1, 8, 32], strides = [1, 1, 1]} : vector<3x8x32xf32> to vector<1x8x32xf32>
    %82 = vector.shape_cast %81 : vector<1x8x32xf32> to vector<8x32xf32>
    %83 = vector.extract_strided_slice %75 {offsets = [1, 0, 0], sizes = [1, 8, 32], strides = [1, 1, 1]} : vector<3x8x32xf32> to vector<1x8x32xf32>
    %84 = vector.shape_cast %83 : vector<1x8x32xf32> to vector<8x32xf32>
    %85 = arith.mulf %82, %84 : vector<8x32xf32>
    %86 = arith.addf %80, %85 : vector<8x32xf32>
    %87 = vector.extract_strided_slice %75 {offsets = [2, 0, 0], sizes = [1, 8, 32], strides = [1, 1, 1]} : vector<3x8x32xf32> to vector<1x8x32xf32>
    %88 = vector.shape_cast %87 : vector<1x8x32xf32> to vector<8x32xf32>
    %89 = vector.extract_strided_slice %75 {offsets = [2, 0, 0], sizes = [1, 8, 32], strides = [1, 1, 1]} : vector<3x8x32xf32> to vector<1x8x32xf32>
    %90 = vector.shape_cast %89 : vector<1x8x32xf32> to vector<8x32xf32>
    %91 = arith.mulf %88, %90 : vector<8x32xf32>
    %92 = arith.addf %86, %91 : vector<8x32xf32>
    %cst_34 = arith.constant 9.99999993E-9 : f32
    %93 = vector.broadcast %cst_34 : f32 to vector<8x32xf32>
    %94 = arith.maximumf %92, %93 : vector<8x32xf32>
    %95 = math.sqrt %94 : vector<8x32xf32>
    %96 = arith.truncf %39 : vector<8x128xf32> to vector<8x128xbf16>
    %cst_35 = arith.constant dense<0.000000e+00> : vector<8x512xf32>
    %97 = tpu.matmul %96, %68, %cst_35 {dimension_numbers = #tpu.dot_dimension_numbers<[1], [0], [0], [1], [0, 0, 1, 1], [], []>} : vector<8x128xbf16>, vector<128x512xbf16>, vector<8x512xf32> -> vector<8x512xf32>
    %98 = vector.broadcast %70 : vector<1x512xf32> to vector<8x512xf32>
    %99 = arith.addf %98, %97 : vector<8x512xf32>
    %100 = arith.truncf %95 : vector<8x32xf32> to vector<8x32xbf16>
    %cst_36 = arith.constant dense<0.000000e+00> : vector<8x512xf32>
    %101 = tpu.matmul %100, %69, %cst_36 {dimension_numbers = #tpu.dot_dimension_numbers<[1], [0], [0], [1], [0, 0, 1, 1], [], []>} : vector<8x32xbf16>, vector<32x512xbf16>, vector<8x512xf32> -> vector<8x512xf32>
    %102 = arith.addf %99, %101 : vector<8x512xf32>
    %103 = vector.shape_cast %75 : vector<3x8x32xf32> to vector<24x32xf32>
    %104 = arith.truncf %103 : vector<24x32xf32> to vector<24x32xbf16>
    %cst_37 = arith.constant dense<0.000000e+00> : vector<24x32xf32>
    %105 = tpu.matmul %104, %71, %cst_37 {dimension_numbers = #tpu.dot_dimension_numbers<[1], [0], [0], [1], [0, 0, 1, 1], [], []>} : vector<24x32xbf16>, vector<32x32xbf16>, vector<24x32xf32> -> vector<24x32xf32>
    %106 = vector.shape_cast %105 : vector<24x32xf32> to vector<3x8x32xf32>
    %107 = vector.extract_strided_slice %106 {offsets = [0, 0, 0], sizes = [1, 8, 32], strides = [1, 1, 1]} : vector<3x8x32xf32> to vector<1x8x32xf32>
    %108 = vector.shape_cast %107 : vector<1x8x32xf32> to vector<8x32xf32>
    %109 = vector.extract_strided_slice %106 {offsets = [0, 0, 0], sizes = [1, 8, 32], strides = [1, 1, 1]} : vector<3x8x32xf32> to vector<1x8x32xf32>
    %110 = vector.shape_cast %109 : vector<1x8x32xf32> to vector<8x32xf32>
    %111 = arith.mulf %108, %110 : vector<8x32xf32>
    %112 = vector.extract_strided_slice %106 {offsets = [1, 0, 0], sizes = [1, 8, 32], strides = [1, 1, 1]} : vector<3x8x32xf32> to vector<1x8x32xf32>
    %113 = vector.shape_cast %112 : vector<1x8x32xf32> to vector<8x32xf32>
    %114 = vector.extract_strided_slice %106 {offsets = [1, 0, 0], sizes = [1, 8, 32], strides = [1, 1, 1]} : vector<3x8x32xf32> to vector<1x8x32xf32>
    %115 = vector.shape_cast %114 : vector<1x8x32xf32> to vector<8x32xf32>
    %116 = arith.mulf %113, %115 : vector<8x32xf32>
    %117 = arith.addf %111, %116 : vector<8x32xf32>
    %118 = vector.extract_strided_slice %106 {offsets = [2, 0, 0], sizes = [1, 8, 32], strides = [1, 1, 1]} : vector<3x8x32xf32> to vector<1x8x32xf32>
    %119 = vector.shape_cast %118 : vector<1x8x32xf32> to vector<8x32xf32>
    %120 = vector.extract_strided_slice %106 {offsets = [2, 0, 0], sizes = [1, 8, 32], strides = [1, 1, 1]} : vector<3x8x32xf32> to vector<1x8x32xf32>
    %121 = vector.shape_cast %120 : vector<1x8x32xf32> to vector<8x32xf32>
    %122 = arith.mulf %119, %121 : vector<8x32xf32>
    %123 = arith.addf %117, %122 : vector<8x32xf32>
    %cst_38 = arith.constant 9.99999993E-9 : f32
    %124 = vector.broadcast %cst_38 : f32 to vector<8x32xf32>
    %125 = arith.maximumf %123, %124 : vector<8x32xf32>
    %126 = math.sqrt %125 : vector<8x32xf32>
    %127 = arith.negf %126 : vector<8x32xf32>
    %128 = math.exp %127 : vector<8x32xf32>
    %cst_39 = arith.constant 1.000000e+00 : f32
    %129 = vector.broadcast %cst_39 : f32 to vector<8x32xf32>
    %130 = arith.addf %129, %128 : vector<8x32xf32>
    %131 = arith.divf %129, %130 : vector<8x32xf32>
    %132 = vector.shape_cast %131 : vector<8x32xf32> to vector<1x8x32xf32>
    %133 = vector.broadcast %132 : vector<1x8x32xf32> to vector<3x8x32xf32>
    %134 = arith.mulf %106, %133 : vector<3x8x32xf32>
    %cst_40 = arith.constant 0.000000e+00 : f32
    %135 = vector.broadcast %cst_40 : f32 to vector<8x512xf32>
    %136 = arith.maximumf %102, %135 : vector<8x512xf32>
    %c0_41 = arith.constant 0 : index
    %c0_42 = arith.constant 0 : index
    %137 = vector.load %arg13[%c0_41, %c0_42] : memref<32x32xbf16, #tpu.memory_space<vmem>>, vector<32x32xbf16>
    %c0_43 = arith.constant 0 : index
    %c0_44 = arith.constant 0 : index
    %138 = vector.load %arg14[%c0_43, %c0_44] : memref<512x128xbf16, #tpu.memory_space<vmem>>, vector<512x128xbf16>
    %c0_45 = arith.constant 0 : index
    %c0_46 = arith.constant 0 : index
    %139 = vector.load %arg15[%c0_45, %c0_46] : memref<32x128xbf16, #tpu.memory_space<vmem>>, vector<32x128xbf16>
    %c0_47 = arith.constant 0 : index
    %c0_48 = arith.constant 0 : index
    %140 = vector.load %arg16[%c0_47, %c0_48] : memref<1x128xf32, #tpu.memory_space<vmem>>, vector<1x128xf32>
    %c0_49 = arith.constant 0 : index
    %c0_50 = arith.constant 0 : index
    %141 = vector.load %arg17[%c0_49, %c0_50] : memref<32x16xbf16, #tpu.memory_space<vmem>>, vector<32x16xbf16>
    %142 = vector.shape_cast %134 : vector<3x8x32xf32> to vector<24x32xf32>
    %143 = arith.truncf %142 : vector<24x32xf32> to vector<24x32xbf16>
    %cst_51 = arith.constant dense<0.000000e+00> : vector<24x32xf32>
    %144 = tpu.matmul %143, %137, %cst_51 {dimension_numbers = #tpu.dot_dimension_numbers<[1], [0], [0], [1], [0, 0, 1, 1], [], []>} : vector<24x32xbf16>, vector<32x32xbf16>, vector<24x32xf32> -> vector<24x32xf32>
    %145 = vector.shape_cast %144 : vector<24x32xf32> to vector<3x8x32xf32>
    %146 = vector.extract_strided_slice %145 {offsets = [0, 0, 0], sizes = [1, 8, 32], strides = [1, 1, 1]} : vector<3x8x32xf32> to vector<1x8x32xf32>
    %147 = vector.shape_cast %146 : vector<1x8x32xf32> to vector<8x32xf32>
    %148 = vector.extract_strided_slice %145 {offsets = [0, 0, 0], sizes = [1, 8, 32], strides = [1, 1, 1]} : vector<3x8x32xf32> to vector<1x8x32xf32>
    %149 = vector.shape_cast %148 : vector<1x8x32xf32> to vector<8x32xf32>
    %150 = arith.mulf %147, %149 : vector<8x32xf32>
    %151 = vector.extract_strided_slice %145 {offsets = [1, 0, 0], sizes = [1, 8, 32], strides = [1, 1, 1]} : vector<3x8x32xf32> to vector<1x8x32xf32>
    %152 = vector.shape_cast %151 : vector<1x8x32xf32> to vector<8x32xf32>
    %153 = vector.extract_strided_slice %145 {offsets = [1, 0, 0], sizes = [1, 8, 32], strides = [1, 1, 1]} : vector<3x8x32xf32> to vector<1x8x32xf32>
    %154 = vector.shape_cast %153 : vector<1x8x32xf32> to vector<8x32xf32>
    %155 = arith.mulf %152, %154 : vector<8x32xf32>
    %156 = arith.addf %150, %155 : vector<8x32xf32>
    %157 = vector.extract_strided_slice %145 {offsets = [2, 0, 0], sizes = [1, 8, 32], strides = [1, 1, 1]} : vector<3x8x32xf32> to vector<1x8x32xf32>
    %158 = vector.shape_cast %157 : vector<1x8x32xf32> to vector<8x32xf32>
    %159 = vector.extract_strided_slice %145 {offsets = [2, 0, 0], sizes = [1, 8, 32], strides = [1, 1, 1]} : vector<3x8x32xf32> to vector<1x8x32xf32>
    %160 = vector.shape_cast %159 : vector<1x8x32xf32> to vector<8x32xf32>
    %161 = arith.mulf %158, %160 : vector<8x32xf32>
    %162 = arith.addf %156, %161 : vector<8x32xf32>
    %cst_52 = arith.constant 9.99999993E-9 : f32
    %163 = vector.broadcast %cst_52 : f32 to vector<8x32xf32>
    %164 = arith.maximumf %162, %163 : vector<8x32xf32>
    %165 = math.sqrt %164 : vector<8x32xf32>
    %166 = arith.truncf %136 : vector<8x512xf32> to vector<8x512xbf16>
    %cst_53 = arith.constant dense<0.000000e+00> : vector<8x128xf32>
    %167 = tpu.matmul %166, %138, %cst_53 {dimension_numbers = #tpu.dot_dimension_numbers<[1], [0], [0], [1], [0, 0, 1, 1], [], []>} : vector<8x512xbf16>, vector<512x128xbf16>, vector<8x128xf32> -> vector<8x128xf32>
    %168 = vector.broadcast %140 : vector<1x128xf32> to vector<8x128xf32>
    %169 = arith.addf %168, %167 : vector<8x128xf32>
    %170 = arith.truncf %165 : vector<8x32xf32> to vector<8x32xbf16>
    %cst_54 = arith.constant dense<0.000000e+00> : vector<8x128xf32>
    %171 = tpu.matmul %170, %139, %cst_54 {dimension_numbers = #tpu.dot_dimension_numbers<[1], [0], [0], [1], [0, 0, 1, 1], [], []>} : vector<8x32xbf16>, vector<32x128xbf16>, vector<8x128xf32> -> vector<8x128xf32>
    %172 = arith.addf %169, %171 : vector<8x128xf32>
    %173 = vector.shape_cast %145 : vector<3x8x32xf32> to vector<24x32xf32>
    %174 = arith.truncf %173 : vector<24x32xf32> to vector<24x32xbf16>
    %cst_55 = arith.constant dense<0.000000e+00> : vector<24x16xf32>
    %175 = tpu.matmul %174, %141, %cst_55 {dimension_numbers = #tpu.dot_dimension_numbers<[1], [0], [0], [1], [0, 0, 1, 1], [], []>} : vector<24x32xbf16>, vector<32x16xbf16>, vector<24x16xf32> -> vector<24x16xf32>
    %176 = vector.shape_cast %175 : vector<24x16xf32> to vector<3x8x16xf32>
    %177 = arith.addf %39, %172 : vector<8x128xf32>
    %178 = arith.addf %66, %176 : vector<3x8x16xf32>
    %c0_56 = arith.constant 0 : index
    %c0_57 = arith.constant 0 : index
    %179 = vector.load %arg18[%c0_56, %c0_57] : memref<1x128xf32, #tpu.memory_space<vmem>>, vector<1x128xf32>
    %c0_58 = arith.constant 0 : index
    %c0_59 = arith.constant 0 : index
    %180 = vector.load %arg19[%c0_58, %c0_59] : memref<1x128xf32, #tpu.memory_space<vmem>>, vector<1x128xf32>
    %cst_60 = arith.constant dense<0.000000e+00> : vector<8xf32>
    %181 = vector.multi_reduction <add>, %177, %cst_60 [1] : vector<8x128xf32> to vector<8xf32>
    %182 = vector.shape_cast %181 : vector<8xf32> to vector<8x1xf32>
    %cst_61 = arith.constant 0.00999999977 : f32
    %183 = vector.broadcast %cst_61 : f32 to vector<8x1xf32>
    %184 = arith.mulf %182, %183 : vector<8x1xf32>
    %185 = arith.mulf %177, %177 : vector<8x128xf32>
    %cst_62 = arith.constant dense<0.000000e+00> : vector<8xf32>
    %186 = vector.multi_reduction <add>, %185, %cst_62 [1] : vector<8x128xf32> to vector<8xf32>
    %187 = vector.shape_cast %186 : vector<8xf32> to vector<8x1xf32>
    %cst_63 = arith.constant 0.00999999977 : f32
    %188 = vector.broadcast %cst_63 : f32 to vector<8x1xf32>
    %189 = arith.mulf %187, %188 : vector<8x1xf32>
    %190 = arith.mulf %184, %184 : vector<8x1xf32>
    %191 = arith.subf %189, %190 : vector<8x1xf32>
    %cst_64 = arith.constant 0.000000e+00 : f32
    %192 = vector.broadcast %cst_64 : f32 to vector<8x1xf32>
    %193 = arith.maximumf %191, %192 : vector<8x1xf32>
    %194 = vector.broadcast %184 : vector<8x1xf32> to vector<8x128xf32>
    %195 = arith.subf %177, %194 : vector<8x128xf32>
    %cst_65 = arith.constant 9.99999974E-6 : f32
    %196 = vector.broadcast %cst_65 : f32 to vector<8x1xf32>
    %197 = arith.addf %193, %196 : vector<8x1xf32>
    %198 = math.rsqrt %197 : vector<8x1xf32>
    %199 = vector.broadcast %198 : vector<8x1xf32> to vector<8x128xf32>
    %200 = arith.mulf %195, %199 : vector<8x128xf32>
    %201 = vector.broadcast %179 : vector<1x128xf32> to vector<8x128xf32>
    %202 = arith.mulf %200, %201 : vector<8x128xf32>
    %203 = vector.broadcast %180 : vector<1x128xf32> to vector<8x128xf32>
    %204 = arith.addf %202, %203 : vector<8x128xf32>
    %205 = vector.extract_strided_slice %178 {offsets = [0, 0, 0], sizes = [1, 8, 16], strides = [1, 1, 1]} : vector<3x8x16xf32> to vector<1x8x16xf32>
    %206 = vector.shape_cast %205 : vector<1x8x16xf32> to vector<8x16xf32>
    %207 = vector.extract_strided_slice %178 {offsets = [0, 0, 0], sizes = [1, 8, 16], strides = [1, 1, 1]} : vector<3x8x16xf32> to vector<1x8x16xf32>
    %208 = vector.shape_cast %207 : vector<1x8x16xf32> to vector<8x16xf32>
    %209 = arith.mulf %206, %208 : vector<8x16xf32>
    %210 = vector.extract_strided_slice %178 {offsets = [1, 0, 0], sizes = [1, 8, 16], strides = [1, 1, 1]} : vector<3x8x16xf32> to vector<1x8x16xf32>
    %211 = vector.shape_cast %210 : vector<1x8x16xf32> to vector<8x16xf32>
    %212 = vector.extract_strided_slice %178 {offsets = [1, 0, 0], sizes = [1, 8, 16], strides = [1, 1, 1]} : vector<3x8x16xf32> to vector<1x8x16xf32>
    %213 = vector.shape_cast %212 : vector<1x8x16xf32> to vector<8x16xf32>
    %214 = arith.mulf %211, %213 : vector<8x16xf32>
    %215 = arith.addf %209, %214 : vector<8x16xf32>
    %216 = vector.extract_strided_slice %178 {offsets = [2, 0, 0], sizes = [1, 8, 16], strides = [1, 1, 1]} : vector<3x8x16xf32> to vector<1x8x16xf32>
    %217 = vector.shape_cast %216 : vector<1x8x16xf32> to vector<8x16xf32>
    %218 = vector.extract_strided_slice %178 {offsets = [2, 0, 0], sizes = [1, 8, 16], strides = [1, 1, 1]} : vector<3x8x16xf32> to vector<1x8x16xf32>
    %219 = vector.shape_cast %218 : vector<1x8x16xf32> to vector<8x16xf32>
    %220 = arith.mulf %217, %219 : vector<8x16xf32>
    %221 = arith.addf %215, %220 : vector<8x16xf32>
    %cst_66 = arith.constant 9.99999993E-9 : f32
    %222 = vector.broadcast %cst_66 : f32 to vector<8x16xf32>
    %223 = arith.maximumf %221, %222 : vector<8x16xf32>
    %cst_67 = arith.constant dense<0.000000e+00> : vector<8xf32>
    %224 = vector.multi_reduction <add>, %223, %cst_67 [1] : vector<8x16xf32> to vector<8xf32>
    %225 = vector.shape_cast %224 : vector<8xf32> to vector<8x1xf32>
    %cst_68 = arith.constant 1.600000e+01 : f32
    %226 = vector.broadcast %cst_68 : f32 to vector<8x1xf32>
    %227 = arith.divf %225, %226 : vector<8x1xf32>
    %228 = math.rsqrt %227 : vector<8x1xf32>
    %229 = vector.shape_cast %228 : vector<8x1xf32> to vector<1x8x1xf32>
    %230 = vector.broadcast %229 : vector<1x8x1xf32> to vector<3x8x16xf32>
    %231 = arith.mulf %178, %230 : vector<3x8x16xf32>
    %232 = arith.truncf %204 : vector<8x128xf32> to vector<8x128xbf16>
    %c0_69 = arith.constant 0 : index
    %c0_70 = arith.constant 0 : index
    %233 = vector.load %arg24[%c0_69, %c0_70] : memref<8x128xbf16, #tpu.memory_space<vmem>>, vector<8x128xbf16>
    tpu.vector_store %arg24[%c0_69, %c0_70], %232 {strides = array<i32>} : memref<8x128xbf16, #tpu.memory_space<vmem>>, vector<8x128xbf16>,
    %234 = arith.truncf %231 : vector<3x8x16xf32> to vector<3x8x16xbf16>
    %c0_71 = arith.constant 0 : index
    %c0_72 = arith.constant 0 : index
    %c0_73 = arith.constant 0 : index
    %235 = vector.load %arg25[%c0_71, %c0_72, %c0_73] : memref<3x8x16xbf16, #tpu.memory_space<vmem>>, vector<3x8x16xbf16>
    tpu.vector_store %arg25[%c0_71, %c0_72, %c0_73], %234 {strides = array<i32>} : memref<3x8x16xbf16, #tpu.memory_space<vmem>>, vector<3x8x16xbf16>,
    %c0_74 = arith.constant 0 : index
    %c0_75 = arith.constant 0 : index
    %236 = vector.load %arg20[%c0_74, %c0_75] : memref<16x16xbf16, #tpu.memory_space<vmem>>, vector<16x16xbf16>
    %c0_76 = arith.constant 0 : index
    %c0_77 = arith.constant 0 : index
    %237 = vector.load %arg21[%c0_76, %c0_77] : memref<128x128xbf16, #tpu.memory_space<vmem>>, vector<128x128xbf16>
    %c0_78 = arith.constant 0 : index
    %c0_79 = arith.constant 0 : index
    %238 = vector.load %arg22[%c0_78, %c0_79] : memref<16x128xbf16, #tpu.memory_space<vmem>>, vector<16x128xbf16>
    %c0_80 = arith.constant 0 : index
    %c0_81 = arith.constant 0 : index
    %239 = vector.load %arg23[%c0_80, %c0_81] : memref<1x128xf32, #tpu.memory_space<vmem>>, vector<1x128xf32>
    %240 = vector.shape_cast %231 : vector<3x8x16xf32> to vector<24x16xf32>
    %241 = arith.truncf %240 : vector<24x16xf32> to vector<24x16xbf16>
    %cst_82 = arith.constant dense<0.000000e+00> : vector<24x16xf32>
    %242 = tpu.matmul %241, %236, %cst_82 {dimension_numbers = #tpu.dot_dimension_numbers<[1], [0], [0], [1], [0, 0, 1, 1], [], []>} : vector<24x16xbf16>, vector<16x16xbf16>, vector<24x16xf32> -> vector<24x16xf32>
    %243 = vector.shape_cast %242 : vector<24x16xf32> to vector<3x8x16xf32>
    %244 = vector.extract_strided_slice %243 {offsets = [0, 0, 0], sizes = [1, 8, 16], strides = [1, 1, 1]} : vector<3x8x16xf32> to vector<1x8x16xf32>
    %245 = vector.shape_cast %244 : vector<1x8x16xf32> to vector<8x16xf32>
    %246 = vector.extract_strided_slice %243 {offsets = [0, 0, 0], sizes = [1, 8, 16], strides = [1, 1, 1]} : vector<3x8x16xf32> to vector<1x8x16xf32>
    %247 = vector.shape_cast %246 : vector<1x8x16xf32> to vector<8x16xf32>
    %248 = arith.mulf %245, %247 : vector<8x16xf32>
    %249 = vector.extract_strided_slice %243 {offsets = [1, 0, 0], sizes = [1, 8, 16], strides = [1, 1, 1]} : vector<3x8x16xf32> to vector<1x8x16xf32>
    %250 = vector.shape_cast %249 : vector<1x8x16xf32> to vector<8x16xf32>
    %251 = vector.extract_strided_slice %243 {offsets = [1, 0, 0], sizes = [1, 8, 16], strides = [1, 1, 1]} : vector<3x8x16xf32> to vector<1x8x16xf32>
    %252 = vector.shape_cast %251 : vector<1x8x16xf32> to vector<8x16xf32>
    %253 = arith.mulf %250, %252 : vector<8x16xf32>
    %254 = arith.addf %248, %253 : vector<8x16xf32>
    %255 = vector.extract_strided_slice %243 {offsets = [2, 0, 0], sizes = [1, 8, 16], strides = [1, 1, 1]} : vector<3x8x16xf32> to vector<1x8x16xf32>
    %256 = vector.shape_cast %255 : vector<1x8x16xf32> to vector<8x16xf32>
    %257 = vector.extract_strided_slice %243 {offsets = [2, 0, 0], sizes = [1, 8, 16], strides = [1, 1, 1]} : vector<3x8x16xf32> to vector<1x8x16xf32>
    %258 = vector.shape_cast %257 : vector<1x8x16xf32> to vector<8x16xf32>
    %259 = arith.mulf %256, %258 : vector<8x16xf32>
    %260 = arith.addf %254, %259 : vector<8x16xf32>
    %cst_83 = arith.constant 9.99999993E-9 : f32
    %261 = vector.broadcast %cst_83 : f32 to vector<8x16xf32>
    %262 = arith.maximumf %260, %261 : vector<8x16xf32>
    %263 = math.sqrt %262 : vector<8x16xf32>
    %264 = arith.truncf %204 : vector<8x128xf32> to vector<8x128xbf16>
    %cst_84 = arith.constant dense<0.000000e+00> : vector<8x128xf32>
    %265 = tpu.matmul %264, %237, %cst_84 {dimension_numbers = #tpu.dot_dimension_numbers<[1], [0], [0], [1], [0, 0, 1, 1], [], []>} : vector<8x128xbf16>, vector<128x128xbf16>, vector<8x128xf32> -> vector<8x128xf32>
    %266 = vector.broadcast %239 : vector<1x128xf32> to vector<8x128xf32>
    %267 = arith.addf %266, %265 : vector<8x128xf32>
    %268 = arith.truncf %263 : vector<8x16xf32> to vector<8x16xbf16>
    %cst_85 = arith.constant dense<0.000000e+00> : vector<8x128xf32>
    %269 = tpu.matmul %268, %238, %cst_85 {dimension_numbers = #tpu.dot_dimension_numbers<[1], [0], [0], [1], [0, 0, 1, 1], [], []>} : vector<8x16xbf16>, vector<16x128xbf16>, vector<8x128xf32> -> vector<8x128xf32>
    %270 = arith.addf %267, %269 : vector<8x128xf32>
    %c0_86 = arith.constant 0 : index
    %c0_87 = arith.constant 0 : index
    %271 = vector.load %arg26[%c0_86, %c0_87] : memref<8x128xf32, #tpu.memory_space<vmem>>, vector<8x128xf32>
    tpu.vector_store %arg26[%c0_86, %c0_87], %270 {strides = array<i32>} : memref<8x128xf32, #tpu.memory_space<vmem>>, vector<8x128xf32>,
    %272 = tpu.iota {dimensions = array<i32: 1>} : vector<8x128xi32>
    %c33_i32 = arith.constant 33 : i32
    %273 = vector.broadcast %c33_i32 : i32 to vector<8x128xi32>
    %274 = arith.cmpi slt, %272, %273 : vector<8x128xi32>
    %cst_88 = arith.constant -1.000000e+30 : f32
    %275 = vector.broadcast %cst_88 : f32 to vector<8x128xf32>
    %276 = arith.select %274, %270, %275 : vector<8x128xi1>, vector<8x128xf32>
    %cst_89 = arith.constant dense<0xFF800000> : vector<8xf32>
    %277 = vector.multi_reduction <maximumf>, %276, %cst_89 [1] : vector<8x128xf32> to vector<8xf32>
    %278 = vector.shape_cast %277 : vector<8xf32> to vector<8x1xf32>
    %279 = vector.broadcast %278 : vector<8x1xf32> to vector<8x128xf32>
    %280 = arith.subf %276, %279 : vector<8x128xf32>
    %281 = math.exp %280 : vector<8x128xf32>
    %cst_90 = arith.constant dense<0.000000e+00> : vector<8xf32>
    %282 = vector.multi_reduction <add>, %281, %cst_90 [1] : vector<8x128xf32> to vector<8xf32>
    %283 = vector.shape_cast %282 : vector<8xf32> to vector<8x1xf32>
    %284 = math.log %283 : vector<8x1xf32>
    %285 = arith.addf %284, %278 : vector<8x1xf32>
    %286 = vector.broadcast %285 : vector<8x1xf32> to vector<8x128xf32>
    %287 = arith.subf %270, %286 : vector<8x128xf32>
    %c0_91 = arith.constant 0 : index
    %c0_92 = arith.constant 0 : index
    %288 = vector.load %arg27[%c0_91, %c0_92] : memref<8x128xf32, #tpu.memory_space<vmem>>, vector<8x128xf32>
    tpu.vector_store %arg27[%c0_91, %c0_92], %287 {strides = array<i32>} : memref<8x128xf32, #tpu.memory_space<vmem>>, vector<8x128xf32>,
    return
  }
  func.func @transform_0(%arg0: i32) -> (i32, i32) {
    %c0_i32 = arith.constant 0 : i32
    %c0_i32_0 = arith.constant 0 : i32
    return %arg0, %c0_i32 : i32, i32
  }
  func.func @transform_1(%arg0: i32) -> (i32, i32, i32) {
    %c0_i32 = arith.constant 0 : i32
    %c0_i32_0 = arith.constant 0 : i32
    %c0_i32_1 = arith.constant 0 : i32
    return %c0_i32, %arg0, %c0_i32_0 : i32, i32, i32
  }
  func.func @transform_2(%arg0: i32) -> (i32, i32) {
    %c0_i32 = arith.constant 0 : i32
    %c0_i32_0 = arith.constant 0 : i32
    return %arg0, %c0_i32 : i32, i32
  }
  func.func @transform_3(%arg0: i32) -> (i32, i32, i32) {
    %c0_i32 = arith.constant 0 : i32
    %c0_i32_0 = arith.constant 0 : i32
    %c0_i32_1 = arith.constant 0 : i32
    return %c0_i32, %arg0, %c0_i32_0 : i32, i32, i32
  }
  func.func @transform_4(%arg0: i32) -> (i32, i32) {
    %c0_i32 = arith.constant 0 : i32
    %c0_i32_0 = arith.constant 0 : i32
    return %arg0, %c0_i32 : i32, i32
  }
  func.func @transform_5(%arg0: i32) -> (i32, i32) {
    %c0_i32 = arith.constant 0 : i32
    %c0_i32_0 = arith.constant 0 : i32
    %c0_i32_1 = arith.constant 0 : i32
    return %c0_i32, %c0_i32_0 : i32, i32
  }
  func.func @transform_6(%arg0: i32) -> (i32, i32) {
    %c0_i32 = arith.constant 0 : i32
    %c0_i32_0 = arith.constant 0 : i32
    %c0_i32_1 = arith.constant 0 : i32
    return %c0_i32, %c0_i32_0 : i32, i32
  }
  func.func @transform_7(%arg0: i32) -> (i32, i32) {
    %c0_i32 = arith.constant 0 : i32
    %c0_i32_0 = arith.constant 0 : i32
    %c0_i32_1 = arith.constant 0 : i32
    return %c0_i32, %c0_i32_0 : i32, i32
  }
  func.func @transform_8(%arg0: i32) -> (i32, i32) {
    %c0_i32 = arith.constant 0 : i32
    %c0_i32_0 = arith.constant 0 : i32
    %c0_i32_1 = arith.constant 0 : i32
    return %c0_i32, %c0_i32_0 : i32, i32
  }
  func.func @transform_9(%arg0: i32) -> (i32, i32) {
    %c0_i32 = arith.constant 0 : i32
    %c0_i32_0 = arith.constant 0 : i32
    %c0_i32_1 = arith.constant 0 : i32
    return %c0_i32, %c0_i32_0 : i32, i32
  }
  func.func @transform_10(%arg0: i32) -> (i32, i32) {
    %c0_i32 = arith.constant 0 : i32
    %c0_i32_0 = arith.constant 0 : i32
    %c0_i32_1 = arith.constant 0 : i32
    return %c0_i32, %c0_i32_0 : i32, i32
  }
  func.func @transform_11(%arg0: i32) -> (i32, i32) {
    %c0_i32 = arith.constant 0 : i32
    %c0_i32_0 = arith.constant 0 : i32
    %c0_i32_1 = arith.constant 0 : i32
    return %c0_i32, %c0_i32_0 : i32, i32
  }
  func.func @transform_12(%arg0: i32) -> (i32, i32) {
    %c0_i32 = arith.constant 0 : i32
    %c0_i32_0 = arith.constant 0 : i32
    %c0_i32_1 = arith.constant 0 : i32
    return %c0_i32, %c0_i32_0 : i32, i32
  }
  func.func @transform_13(%arg0: i32) -> (i32, i32) {
    %c0_i32 = arith.constant 0 : i32
    %c0_i32_0 = arith.constant 0 : i32
    %c0_i32_1 = arith.constant 0 : i32
    return %c0_i32, %c0_i32_0 : i32, i32
  }
  func.func @transform_14(%arg0: i32) -> (i32, i32) {
    %c0_i32 = arith.constant 0 : i32
    %c0_i32_0 = arith.constant 0 : i32
    %c0_i32_1 = arith.constant 0 : i32
    return %c0_i32, %c0_i32_0 : i32, i32
  }
  func.func @transform_15(%arg0: i32) -> (i32, i32) {
    %c0_i32 = arith.constant 0 : i32
    %c0_i32_0 = arith.constant 0 : i32
    %c0_i32_1 = arith.constant 0 : i32
    return %c0_i32, %c0_i32_0 : i32, i32
  }
  func.func @transform_16(%arg0: i32) -> (i32, i32) {
    %c0_i32 = arith.constant 0 : i32
    %c0_i32_0 = arith.constant 0 : i32
    %c0_i32_1 = arith.constant 0 : i32
    return %c0_i32, %c0_i32_0 : i32, i32
  }
  func.func @transform_17(%arg0: i32) -> (i32, i32) {
    %c0_i32 = arith.constant 0 : i32
    %c0_i32_0 = arith.constant 0 : i32
    %c0_i32_1 = arith.constant 0 : i32
    return %c0_i32, %c0_i32_0 : i32, i32
  }
  func.func @transform_18(%arg0: i32) -> (i32, i32) {
    %c0_i32 = arith.constant 0 : i32
    %c0_i32_0 = arith.constant 0 : i32
    %c0_i32_1 = arith.constant 0 : i32
    return %c0_i32, %c0_i32_0 : i32, i32
  }
  func.func @transform_19(%arg0: i32) -> (i32, i32) {
    %c0_i32 = arith.constant 0 : i32
    %c0_i32_0 = arith.constant 0 : i32
    %c0_i32_1 = arith.constant 0 : i32
    return %c0_i32, %c0_i32_0 : i32, i32
  }
  func.func @transform_20(%arg0: i32) -> (i32, i32) {
    %c0_i32 = arith.constant 0 : i32
    %c0_i32_0 = arith.constant 0 : i32
    %c0_i32_1 = arith.constant 0 : i32
    return %c0_i32, %c0_i32_0 : i32, i32
  }
  func.func @transform_21(%arg0: i32) -> (i32, i32) {
    %c0_i32 = arith.constant 0 : i32
    %c0_i32_0 = arith.constant 0 : i32
    %c0_i32_1 = arith.constant 0 : i32
    return %c0_i32, %c0_i32_0 : i32, i32
  }
  func.func @transform_22(%arg0: i32) -> (i32, i32) {
    %c0_i32 = arith.constant 0 : i32
    %c0_i32_0 = arith.constant 0 : i32
    %c0_i32_1 = arith.constant 0 : i32
    return %c0_i32, %c0_i32_0 : i32, i32
  }
  func.func @transform_23(%arg0: i32) -> (i32, i32) {
    %c0_i32 = arith.constant 0 : i32
    %c0_i32_0 = arith.constant 0 : i32
    return %arg0, %c0_i32 : i32, i32
  }
  func.func @transform_24(%arg0: i32) -> (i32, i32, i32) {
    %c0_i32 = arith.constant 0 : i32
    %c0_i32_0 = arith.constant 0 : i32
    %c0_i32_1 = arith.constant 0 : i32
    return %c0_i32, %arg0, %c0_i32_0 : i32, i32, i32
  }
  func.func @transform_25(%arg0: i32) -> (i32, i32) {
    %c0_i32 = arith.constant 0 : i32
    %c0_i32_0 = arith.constant 0 : i32
    return %arg0, %c0_i32 : i32, i32
  }
  func.func @transform_26(%arg0: i32) -> (i32, i32) {
    %c0_i32 = arith.constant 0 : i32
    %c0_i32_0 = arith.constant 0 : i32
    return %arg0, %c0_i32 : i32, i32
  }
}

</mosaic_0001>

<bundles_post_ra>
// kernel: forward.15
= control target key start
LH: loop header
LB: loop body
LE: loop exit
PB: predicated region body
PF: predicated region fallthrough
CT: control target
= control target key end

     0   :  { %v424_v1 = vmov 0   ;;  %vm138_vm0 = vcmask 261120   ;;  %vm368_vm6 = vcmask 3072   ;;  %s704_s3 = inlined_call_operand.vmem [shape: bf16[32,32], index: 3, kind: input, shape index: {}]   ;;  %s705_s0 = inlined_call_operand.vmem [shape: f32[24,32], index: 0, kind: input, shape index: {}]   ;;  %s706_s2 = inlined_call_operand.<no memory space> [shape: bf16[1,1], index: 2, kind: input, shape index: {}]   ;;  %s707_s6 = inlined_call_operand.<no memory space> [shape: bf16[1,1], index: 6, kind: input, shape index: {}]   ;;  %s708_s5 = inlined_call_operand.vmem [shape: f32[1,32], index: 5, kind: input, shape index: {}]   ;;  %s709_s1 = inlined_call_operand.vmem [shape: f32[3,24,1], index: 1, kind: input, shape index: {}]   ;;  %s710_s10 = inlined_call_operand.vmem [shape: bf16[3,24,1], index: 10, kind: output, shape index: {1}]   ;;  %s711_s4 = inlined_call_operand.vmem [shape: bf16[1,32], index: 4, kind: input, shape index: {}]   ;;  %s712_s7 = inlined_call_operand.vmem [shape: f32[1,32], index: 7, kind: input, shape index: {}]   ;;  %s713_s8 = inlined_call_operand.vmem [shape: f32[1,32], index: 8, kind: input, shape index: {}]   ;;  %s714_s9 = inlined_call_operand.vmem [shape: bf16[24,32], index: 9, kind: output, shape index: {0}]  }
   0x1   :  { %v397_v0 = vld [vmem:[%s704_s3 + $0x8] sm:$0xff]  ;;  %401 = vset.pattern.permute.xlu0 %v424_v1  ;;  %v16_v2 = vstv %s706_s2  ;;  %402 = vset.pattern.permute.xlu1 %v424_v1  ;;  %v396_v3 = vld [vmem:[%s704_s3] sm:$0xff]  ;;  %v18_v4 = vstv %s707_s6 }
   0x2   :  { %17 = vst [vmem:[#allocation2] sm:$0x1] %v16_v2  ;;  %151 = vmatpush.bf16.msra.mxu0 %v397_v0  ;;  %v39_v5 = vld [vmem:[%s705_s0] sm:$0xff]  ;;  %v40_v6 = vld [vmem:[%s705_s0 + $0x8] sm:$0xff]  ;;  %398 = vmatpush.bf16.msra.mxu1 %v397_v0  ;;  %v41_v7 = vld [vmem:[%s705_s0 + $0x10] sm:$0xff] }
   0x3   :  { %19 = vst [vmem:[#allocation3] sm:$0x1] %v18_v4  ;;  %v124_v8 = vpack.c.bf16 %v40_v6, %v39_v5  ;;  %v125_v9 = vpack.c.bf16 %v41_v7, %v41_v7  ;;  %v42_v13 = vld [vmem:[%s709_s1] sm:$0xff]  ;;  %v45_v14 = vld [vmem:[%s709_s1 + $0x18] sm:$0xff]  ;;  %v48_v15 = vld [vmem:[%s709_s1 + $0x30] sm:$0xff] }
   0x4   :  { %v43_v18 = vld [vmem:[%s709_s1 + $0x8] sm:$0xff]  ;;  %v46_v19 = vld [vmem:[%s709_s1 + $0x20] sm:$0xff]  ;;  %v49_v20 = vld [vmem:[%s709_s1 + $0x38] sm:$0xff] }
   0x5   :  { %v44_v28 = vld [vmem:[%s709_s1 + $0x10] sm:$0xff]  ;;  %v47_v37 = vld [vmem:[%s709_s1 + $0x28] sm:$0xff]  ;;  %v50_v41 = vld [vmem:[%s709_s1 + $0x40] sm:$0xff] }
   0x6   :  { %152 = vmatpush.bf16.msra.mxu0 %v396_v3  ;;  %399 = vmatpush.bf16.msra.mxu1 %v396_v3 }
   0x9   :  { %v51_v10 = vld [vmem:[#allocation2] sm:$0x1]  ;;  %394 = vmatmul.msk.bf16.vlgmr.msra.gmra.mxu0 %vm138_vm0, %v124_v8  ;;  %395 = vmatmul.msk.bf16.vlgmr.msra.gmra.mxu1 %vm138_vm0, %v125_v9 }
   0xa   :  { %v58_v11 = vld [vmem:[#allocation3] sm:$0x1]  ;;  %v59_v12 = vunpack.c.l.bf16 %v51_v10 }
   0xb   :  { %v192_v17 = vunpack.c.l.bf16 %v58_v11 }
   0xc   :  { %v60_v16 = vperm.slane %v59_v12, 0 }
   0xd   :  { %v193_v24 = vperm.slane %v192_v17, 0 }
   0xe   :  { %v61_v21 = vmul.f32 %v60_v16, %v42_v13  ;;  %v64_v22 = vmul.f32 %v60_v16, %v45_v14  ;;  %v67_v23 = vmul.f32 %v60_v16, %v48_v15  ;;  %v62_v25 = vmul.f32 %v60_v16, %v43_v18 }
   0xf   :  { %v65_v26 = vmul.f32 %v60_v16, %v46_v19  ;;  %v68_v27 = vmul.f32 %v60_v16, %v49_v20  ;;  %v63_v42 = vmul.f32 %v60_v16, %v44_v28  ;;  %v66_v50 = vmul.f32 %v60_v16, %v47_v37 }
  0x10   :  { %v70_v29 = vmul.f32 %v61_v21, %v61_v21  ;;  %v73_v30 = vmul.f32 %v64_v22, %v64_v22  ;;  %v79_v31 = vmul.f32 %v67_v23, %v67_v23  ;;  %v524_v32 = vmul.f32 %v193_v24, %v61_v21 }
  0x11   :  { %v526_v33 = vmul.f32 %v193_v24, %v64_v22  ;;  %v528_v34 = vmul.f32 %v193_v24, %v67_v23  ;;  %v71_v35 = vmul.f32 %v62_v25, %v62_v25  ;;  %v74_v36 = vmul.f32 %v65_v26, %v65_v26 }
  0x12   :  { %v76_v38 = vadd.f32 %v73_v30, %v70_v29  ;;  %v292_v39 = vmul.f32 %v524_v32, %v524_v32  ;;  %v80_v40 = vmul.f32 %v68_v27, %v68_v27  ;;  %v542_v46 = vmul.f32 %v193_v24, %v62_v25 }
  0x13   :  { %v295_v43 = vmul.f32 %v526_v33, %v526_v33  ;;  %v301_v44 = vmul.f32 %v528_v34, %v528_v34  ;;  %v77_v45 = vadd.f32 %v74_v36, %v71_v35  ;;  %v544_v48 = vmul.f32 %v193_v24, %v65_v26 }
  0x14   :  { %v82_v47 = vadd.f32 %v79_v31, %v76_v38  ;;  %v546_v49 = vmul.f32 %v193_v24, %v68_v27  ;;  %v69_v53 = vmul.f32 %v60_v16, %v50_v41  ;;  %v293_v55 = vmul.f32 %v542_v46, %v542_v46 }
  0x15   :  { %v298_v51 = vadd.f32 %v295_v43, %v292_v39  ;;  %v83_v52 = vadd.f32 %v80_v40, %v77_v45  ;;  %v296_v56 = vmul.f32 %v544_v48, %v544_v48  ;;  %v72_v57 = vmul.f32 %v63_v42, %v63_v42 }
  0x16   :  { %v548_v54 = vmax.f32 %v82_v47, 1e-08  ;;  %v75_v60 = vmul.f32 %v66_v50, %v66_v50  ;;  %v302_v61 = vmul.f32 %v546_v49, %v546_v49  ;;  %v81_v62 = vmul.f32 %v69_v53, %v69_v53 }
  0x17   :  { %v304_v58 = vadd.f32 %v301_v44, %v298_v51  ;;  %v554_v59 = vmax.f32 %v83_v52, 1e-08  ;;  %v299_v0 = vadd.f32 %v296_v56, %v293_v55  ;;  %v560_v2 = vmul.f32 %v193_v24, %v63_v42 }
  0x18   :  { %406 = vrsqrt.f32 %v548_v54  ;;  %v78_v1 = vadd.f32 %v75_v60, %v72_v57  ;;  %v562_v3 = vmul.f32 %v193_v24, %v66_v50  ;;  %v564_v4 = vmul.f32 %v193_v24, %v69_v53 }
  0x19   :  { %v307_v63 = vmax.f32 %v304_v58, 1e-08  ;;  %408 = vrsqrt.f32 %v554_v59  ;;  %v305_v5 = vadd.f32 %v302_v61, %v299_v0  ;;  %v294_v7 = vmul.f32 %v560_v2, %v560_v2 }
  0x1a   :  { %v84_v6 = vadd.f32 %v81_v62, %v78_v1  ;;  %v297_v8 = vmul.f32 %v562_v3, %v562_v3  ;;  %v303_v12 = vmul.f32 %v564_v4, %v564_v4  ;;  %vm95_vm3 = vcmp.eq.f32.partialorder %v548_v54, inf }
  0x1b   :  { %410 = vrsqrt.f32 %v307_v63  ;;  %v570_v10 = vmax.f32 %v305_v5, 1e-08  ;;  %vm319_vm1 = vweird.f32 %v307_v63  ;;  %v98_v36 = vand.u32 2147483648, %v548_v54 }
  0x1c   :  { %v572_v11 = vmax.f32 %v84_v6, 1e-08  ;;  %v300_v15 = vadd.f32 %v297_v8, %v294_v7  ;;  %vm97_vm4 = vcmp.eq.f32.partialorder %v548_v54, 0.0  ;;  %vm107_vm7 = vcmp.eq.f32.partialorder %v554_v59, inf }
  0x1d   :  { %412 = vrsqrt.f32 %v570_v10  ;;  %vm109_vm8 = vcmp.eq.f32.partialorder %v554_v59, 0.0  ;;  %vm329_vm9 = vweird.f32 %v570_v10  ;;  %v110_v58 = vand.u32 2147483648, %v554_v59 }
  0x1e   :  { %v407_v9 = vpop.eup %406  ;;  %414 = vrsqrt.f32 %v572_v11  ;;  %v306_v21 = vadd.f32 %v303_v12, %v300_v15  ;;  %vm119_vm12 = vcmp.eq.f32.partialorder %v572_v11, inf  ;;  %vm121_vm13 = vcmp.eq.f32.partialorder %v572_v11, 0.0 }
  0x1f   :  { %v409_v13 = vpop.eup %408  ;;  %v89_v14 = vmul.f32 %v407_v9, %v548_v54  ;;  %v122_v6 = vand.u32 2147483648, %v572_v11 }
  0x20   :  { %v101_v16 = vmul.f32 %v409_v13, %v554_v59  ;;  %v580_v25 = vmax.f32 %v306_v21, 1e-08 }
  0x21   :  { %v411_v17 = vpop.eup %410  ;;  %v90_v18 = vmul.f32 %v407_v9, %v89_v14 }
  0x22   :  { %v314_v19 = vmul.f32 %v411_v17, %v307_v63  ;;  %v102_v20 = vmul.f32 %v409_v13, %v101_v16  ;;  %vm320_vm2 = vweird.f32 %v411_v17  ;;  %416 = vrsqrt.f32 %v580_v25 }
  0x23   :  { %v91_v22 = vmul.f32 0.5, %v90_v18  ;;  %v413_v27 = vpop.eup %412  ;;  %vm321_vm5 = vmor %vm319_vm1, %vm320_vm2  ;;  %vm339_vm14 = vweird.f32 %v580_v25 }
  0x24   :  { %v315_v23 = vmul.f32 %v411_v17, %v314_v19  ;;  %v103_v24 = vmul.f32 0.5, %v102_v20  ;;  %v415_v30 = vpop.eup %414  ;;  %v324_v35 = vmul.f32 %v413_v27, %v570_v10  ;;  %vm330_vm10 = vweird.f32 %v413_v27 }
  0x25   :  { %v92_v26 = vsub.f32 1.5, %v91_v22  ;;  %v113_v39 = vmul.f32 %v415_v30, %v572_v11  ;;  %vm331_vm11 = vmor %vm329_vm9, %vm330_vm10 }
  0x26   :  { %v316_v28 = vmul.f32 0.5, %v315_v23  ;;  %v104_v29 = vsub.f32 1.5, %v103_v24  ;;  %v325_v41 = vmul.f32 %v413_v27, %v324_v35  ;;  %v403_v24 = vld [vmem:[%s708_s5] ss:$0 sm:$0xff] }
  0x27   :  { %v93_v31 = vmul.f32 %v407_v9, %v92_v26  ;;  %v114_v44 = vmul.f32 %v415_v30, %v113_v39 }
  0x28   :  { %v317_v37 = vsub.f32 1.5, %v316_v28  ;;  %v105_v38 = vmul.f32 %v409_v13, %v104_v29  ;;  %v326_v47 = vmul.f32 0.5, %v325_v41  ;;  %v417_v50 = vpop.eup %416 }
  0x29   :  { %v94_v40 = vmul.f32 %v93_v31, %v548_v54  ;;  %v115_v53 = vmul.f32 0.5, %v114_v44  ;;  %v334_v62 = vmul.f32 %v417_v50, %v580_v25  ;;  %vm340_vm15 = vweird.f32 %v417_v50 }
  0x2a   :  { %v318_v42 = vmul.f32 %v411_v17, %v317_v37  ;;  %v106_v43 = vmul.f32 %v105_v38, %v554_v59  ;;  %v327_v60 = vsub.f32 1.5, %v326_v47  ;;  %vm341_vm1 = vmor %vm339_vm14, %vm340_vm15 }
  0x2b   :  { %v96_v45 = vsel %vm95_vm3, %v548_v54, %v94_v40  ;;  %v116_v61 = vsub.f32 1.5, %v115_v53 }
  0x2c   :  { %v99_v51 = vsel %vm97_vm4, %v98_v36, %v96_v45  ;;  %v322_v52 = vsel %vm321_vm5, %v411_v17, %v318_v42  ;;  %v108_v54 = vsel %vm107_vm7, %v554_v59, %v106_v43  ;;  %vm355_vm4 = vcmask 257024  }
  0x2d   :  { %v343_v55 = vmul.f32 %v322_v52, %v524_v32  ;;  %v346_v56 = vmul.f32 %v322_v52, %v526_v33  ;;  %v349_v57 = vmul.f32 %v322_v52, %v528_v34  ;;  %172 = vperm.xlu0 %401, %v99_v51   ;;  %v328_v32 = vmul.f32 %v413_v27, %v327_v60 }
  0x2e   :  { %v117_v33 = vmul.f32 %v415_v30, %v116_v61  ;;  %v335_v34 = vmul.f32 %v417_v50, %v334_v62  ;;  %v111_v5 = vsel %vm109_vm8, %v110_v58, %v108_v54 }
  0x2f   :  { %v359_v63 = vpack.c.bf16 %v343_v55, %v343_v55  ;;  %v362_v0 = vpack.c.bf16 %v346_v56, %v346_v56  ;;  %v365_v1 = vpack.c.bf16 %v349_v57, %v349_v57  ;;  %v332_v7 = vsel %vm331_vm11, %v413_v27, %v328_v32 }
  0x30   :  { %v118_v8 = vmul.f32 %v117_v33, %v572_v11  ;;  %v336_v9 = vmul.f32 0.5, %v335_v34  ;;  %v344_v59 = vmul.f32 %v332_v7, %v542_v46  ;;  %v347_v10 = vmul.f32 %v332_v7, %v544_v48 }
  0x31   :  { %369 = vst.msk [vmem:[%s710_s10] sm:$0xf] %vm368_vm6, %v359_v63  ;;  %v350_v12 = vmul.f32 %v332_v7, %v546_v49 }
  0x32   :  { %372 = vst.msk [vmem:[%s710_s10 + $0xc] sm:$0xf] %vm368_vm6, %v362_v0  ;;  %v120_v13 = vsel %vm119_vm12, %v572_v11, %v118_v8  ;;  %v337_v14 = vsub.f32 1.5, %v336_v9  ;;  %v360_v15 = vpack.c.bf16 %v344_v59, %v344_v59  ;;  %v363_v16 = vpack.c.bf16 %v347_v10, %v347_v10 }
  0x33   :  { %375 = vst.msk [vmem:[%s710_s10 + $0x18] sm:$0xf] %vm368_vm6, %v365_v1  ;;  %v366_v17 = vpack.c.bf16 %v350_v12, %v350_v12  ;;  %v123_v18 = vsel %vm121_vm13, %v122_v6, %v120_v13  ;;  %v404_v13 = vld [vmem:[%s712_s7] ss:$0 sm:$0xff] }
  0x34   :  { %v338_v46 = vmul.f32 %v417_v50, %v337_v14  ;;  %182 = vperm.xlu1 %402, %v123_v18   ;;  %370 = vst.msk [vmem:[%s710_s10 + $0x4] sm:$0xf] %vm368_vm6, %v360_v15 }
  0x35   :  { %177 = vperm.xlu0 %401, %v111_v5   ;;  %373 = vst.msk [vmem:[%s710_s10 + $0x10] sm:$0xf] %vm368_vm6, %v363_v16  ;;  %v405_v16 = vld [vmem:[%s713_s8] ss:$0 sm:$0xff] }
  0x36   :  { %v342_v48 = vsel %vm341_vm1, %v417_v50, %v338_v46  ;;  %376 = vst.msk [vmem:[%s710_s10 + $0x1c] sm:$0xf] %vm368_vm6, %v366_v17 }
  0x37   :  { %v345_v49 = vmul.f32 %v342_v48, %v560_v2  ;;  %v348_v11 = vmul.f32 %v342_v48, %v562_v3  ;;  %v351_v19 = vmul.f32 %v342_v48, %v564_v4  ;;  %v56_v4 = vld [vmem:[%s711_s4] sm:$0x1] }
  0x38   :  { %v169_v23 = vunpack.c.l.bf16 %v56_v4 }
  0x39   :  { %v361_v20 = vpack.c.bf16 %v345_v49, %v345_v49  ;;  %v364_v21 = vpack.c.bf16 %v348_v11, %v348_v11  ;;  %v367_v22 = vpack.c.bf16 %v351_v19, %v351_v19 }
  0x3a   :  { %v185_v26 = vperm.slane %v169_v23, 0 }
  0x3b   :  { %371 = vst.msk [vmem:[%s710_s10 + $0x8] sm:$0xf] %vm368_vm6, %v361_v20 }
  0x3c   :  { %374 = vst.msk [vmem:[%s710_s10 + $0x14] sm:$0xf] %vm368_vm6, %v364_v21 }
  0x3d   :  { %377 = vst.msk [vmem:[%s710_s10 + $0x20] sm:$0xf] %vm368_vm6, %v367_v22 }
  0x86   :  { %v159_v2 = vpop.f32.mrf.mxu1  ;;  %v154_v25 = vpop.f32.mrf.mxu0 }
  0x87   :  { %v166_v27 = vadd.f32 %v403_v24, %v154_v25  ;;  %v168_v43 = vadd.f32 %v403_v24, %v159_v2 }
  0x8e   :  { %v161_v3 = vpop.f32.mrf.mxu1  ;;  %v156_v36 = vpop.f32.mrf.mxu0 }
  0x8f   :  { %v167_v39 = vadd.f32 %v403_v24, %v156_v36 }
  0x9f   :  { %v173_v28 = vpop.permute.xlu0 %172 }
  0xa0   :  { %v186_v29 = vmul.f32 %v185_v26, %v173_v28 }
  0xa2   :  { %v189_v30 = vadd.f32 %v186_v29, %v166_v27 }
  0xa4   :  { %v205_v31 = vsel %vm138_vm0, %v189_v30, 0.0  ;;  %v217_v35 = vmul.f32 %v189_v30, %v189_v30 }
  0xa5   :  { %206 = vadd.xlane.f32.xlu1 %v205_v31 }
  0xa6   :  { %v220_v37 = vsel %vm138_vm0, %v217_v35, 0.0  ;;  %v183_v41 = vpop.permute.xlu1 %182 }
  0xa7   :  { %v178_v38 = vpop.permute.xlu0 %177  ;;  %221 = vadd.xlane.f32.xlu0 %v220_v37  ;;  %v188_v44 = vmul.f32 %v185_v26, %v183_v41 }
  0xa8   :  { %v187_v40 = vmul.f32 %v185_v26, %v178_v38 }
  0xa9   :  { %v674_v47 = vadd.f32 %v188_v44, %v168_v43 }
  0xaa   :  { %v670_v42 = vadd.f32 %v187_v40, %v167_v39 }
  0xab   :  { %v211_v50 = vsel %vm138_vm0, %v674_v47, 0.0  ;;  %v219_v53 = vmul.f32 %v674_v47, %v674_v47 }
  0xac   :  { %v208_v45 = vsel %vm138_vm0, %v670_v42, 0.0  ;;  %v218_v51 = vmul.f32 %v670_v42, %v670_v42 }
  0xad   :  { %209 = vadd.xlane.f32.xlu2 %v208_v45  ;;  %v226_v55 = vsel %vm138_vm0, %v219_v53, 0.0 }
  0xae   :  { %v223_v52 = vsel %vm138_vm0, %v218_v51, 0.0 }
  0xb5   :  { %212 = vadd.xlane.f32.xlu2 %v211_v50 }
  0xbd   :  { %224 = vadd.xlane.f32.xlu2 %v223_v52 }
  0xc5   :  { %227 = vadd.xlane.f32.xlu2 %v226_v55 }
 0x118   :  { %v207_v56 = vpop.xlane.xlu1 %206 }
 0x119   :  { %v214_v57 = vmul.f32 0.03125, %v207_v56 }
 0x11a   :  { %v222_v58 = vpop.xlane.xlu0 %221 }
 0x11b   :  { %v232_v54 = vmul.f32 %v214_v57, %v214_v57  ;;  %v229_v60 = vmul.f32 0.03125, %v222_v58  ;;  %v241_v12 = vsub.f32 %v189_v30, %v214_v57 }
 0x11d   :  { %v235_v61 = vsub.f32 %v229_v60, %v232_v54 }
 0x11f   :  { %v238_v62 = vmax.f32 %v235_v61, 0.0 }
 0x120   :  { %v210_v63 = vpop.xlane.xlu2 %209 }
 0x121   :  { %v244_v0 = vadd.f32 1e-05, %v238_v62  ;;  %v215_v5 = vmul.f32 0.03125, %v210_v63 }
 0x123   :  { %418 = vrsqrt.f32 %v244_v0  ;;  %v233_v9 = vmul.f32 %v215_v5, %v215_v5  ;;  %vm253_vm0 = vweird.f32 %v244_v0  ;;  %v242_v31 = vsub.f32 %v670_v42, %v215_v5 }
 0x128   :  { %v213_v1 = vpop.xlane.xlu2 %212 }
 0x129   :  { %v419_v32 = vpop.eup %418  ;;  %v216_v18 = vmul.f32 0.03125, %v213_v1 }
 0x12a   :  { %v248_v33 = vmul.f32 %v419_v32, %v244_v0  ;;  %vm254_vm2 = vweird.f32 %v419_v32 }
 0x12b   :  { %vm255_vm3 = vmor %vm253_vm0, %vm254_vm2  ;;  %v234_v20 = vmul.f32 %v216_v18, %v216_v18  ;;  %v243_v44 = vsub.f32 %v674_v47, %v216_v18 }
 0x12c   :  { %v249_v34 = vmul.f32 %v419_v32, %v248_v33 }
 0x12e   :  { %v250_v6 = vmul.f32 0.5, %v249_v34 }
 0x130   :  { %v251_v7 = vsub.f32 1.5, %v250_v6  ;;  %v225_v8 = vpop.xlane.xlu2 %224 }
 0x131   :  { %v230_v59 = vmul.f32 0.03125, %v225_v8 }
 0x132   :  { %v252_v10 = vmul.f32 %v419_v32, %v251_v7 }
 0x133   :  { %v236_v14 = vsub.f32 %v230_v59, %v233_v9 }
 0x134   :  { %v256_v15 = vsel %vm255_vm3, %v419_v32, %v252_v10 }
 0x135   :  { %v277_v17 = vmul.f32 %v256_v15, %v241_v12  ;;  %v239_v46 = vmax.f32 %v236_v14, 0.0 }
 0x137   :  { %v283_v48 = vmul.f32 %v404_v13, %v277_v17  ;;  %v245_v49 = vadd.f32 1e-05, %v239_v46 }
 0x138   :  { %v228_v11 = vpop.xlane.xlu2 %227 }
 0x139   :  { %v289_v19 = vadd.f32 %v405_v16, %v283_v48  ;;  %420 = vrsqrt.f32 %v245_v49  ;;  %v231_v21 = vmul.f32 0.03125, %v228_v11  ;;  %vm263_vm6 = vweird.f32 %v245_v49 }
 0x13b   :  { %v352_v22 = vpack.c.bf16 %v289_v19, %v289_v19  ;;  %v237_v2 = vsub.f32 %v231_v21, %v234_v20 }
 0x13d   :  { %356 = vst.msk [vmem:[%s714_s9] sm:$0xf] %vm355_vm4, %v352_v22  ;;  %v240_v3 = vmax.f32 %v237_v2, 0.0 }
 0x13f   :  { %v421_v4 = vpop.eup %420  ;;  %v246_v23 = vadd.f32 1e-05, %v240_v3 }
 0x140   :  { %v258_v24 = vmul.f32 %v421_v4, %v245_v49  ;;  %vm264_vm5 = vweird.f32 %v421_v4 }
 0x141   :  { %422 = vrsqrt.f32 %v246_v23  ;;  %vm265_vm7 = vmor %vm263_vm6, %vm264_vm5  ;;  %vm273_vm9 = vweird.f32 %v246_v23 }
 0x142   :  { %v259_v25 = vmul.f32 %v421_v4, %v258_v24 }
 0x144   :  { %v260_v26 = vmul.f32 0.5, %v259_v25 }
 0x146   :  { %v261_v27 = vsub.f32 1.5, %v260_v26 }
 0x147   :  { %v423_v28 = vpop.eup %422 }
 0x148   :  { %v262_v29 = vmul.f32 %v421_v4, %v261_v27  ;;  %v268_v30 = vmul.f32 %v423_v28, %v246_v23  ;;  %vm274_vm8 = vweird.f32 %v423_v28 }
 0x149   :  { %vm275_vm10 = vmor %vm273_vm9, %vm274_vm8 }
 0x14a   :  { %v266_v35 = vsel %vm265_vm7, %v421_v4, %v262_v29  ;;  %v269_v36 = vmul.f32 %v423_v28, %v268_v30 }
 0x14b   :  { %v278_v37 = vmul.f32 %v266_v35, %v242_v31 }
 0x14c   :  { %v270_v38 = vmul.f32 0.5, %v269_v36 }
 0x14d   :  { %v284_v39 = vmul.f32 %v404_v13, %v278_v37 }
 0x14e   :  { %v271_v40 = vsub.f32 1.5, %v270_v38 }
 0x14f   :  { %v290_v41 = vadd.f32 %v405_v16, %v284_v39 }
 0x150   :  { %v272_v43 = vmul.f32 %v423_v28, %v271_v40 }
 0x151   :  { %v353_v45 = vpack.c.bf16 %v290_v41, %v290_v41 }
 0x152   :  { %v276_v50 = vsel %vm275_vm10, %v423_v28, %v272_v43 }
 0x153   :  { %357 = vst.msk [vmem:[%s714_s9 + $0x4] sm:$0xf] %vm355_vm4, %v353_v45  ;;  %v279_v42 = vmul.f32 %v276_v50, %v243_v44 }
 0x155   :  { %v285_v51 = vmul.f32 %v404_v13, %v279_v42 }
 0x157   :  { %v291_v52 = vadd.f32 %v405_v16, %v285_v51 }
 0x159   :  { %v354_v53 = vpack.c.bf16 %v291_v52, %v291_v52 }
 0x15b   :  { %358 = vst.msk [vmem:[%s714_s9 + $0x8] sm:$0xf] %vm355_vm4, %v354_v53 }

// kernel: forward.14
= control target key start
LH: loop header
LB: loop body
LE: loop exit
PB: predicated region body
PF: predicated region fallthrough
CT: control target
= control target key end

     0   :  { %vm55_vm0 = vcmask 1040384   ;;  %vm56_vm1 = vcmask 1041408   ;;  %v290_v1 = vmov 65535   ;;  %vm48_vm2 = vcmask 23552   ;;  %s402_s2 = inlined_call_operand.vmem [shape: bf16[3,16], index: 2, kind: input, shape index: {}]   ;;  %s403_s1 = inlined_call_operand.vmem [shape: f32[3,8,3], index: 1, kind: input, shape index: {}]   ;;  %s404_s6 = inlined_call_operand.vmem [shape: bf16[16,16], index: 6, kind: input, shape index: {}]   ;;  %s405_s3 = inlined_call_operand.vmem [shape: bf16[6,128], index: 3, kind: input, shape index: {}]   ;;  %s406_s0 = inlined_call_operand.vmem [shape: f32[8,6], index: 0, kind: input, shape index: {}]   ;;  %s407_s4 = inlined_call_operand.vmem [shape: bf16[16,128], index: 4, kind: input, shape index: {}]   ;;  %s408_s5 = inlined_call_operand.vmem [shape: f32[1,128], index: 5, kind: input, shape index: {}]   ;;  %s409_s7 = inlined_call_operand.vmem [shape: f32[1,128], index: 7, kind: input, shape index: {}]   ;;  %s410_s8 = inlined_call_operand.vmem [shape: f32[1,128], index: 8, kind: input, shape index: {}]   ;;  %s411_s10 = inlined_call_operand.vmem [shape: bf16[3,8,16], index: 10, kind: output, shape index: {1}]   ;;  %s412_s9 = inlined_call_operand.vmem [shape: bf16[8,128], index: 9, kind: output, shape index: {0}]  }
   0x1   :  { %v39_v0 = vld [vmem:[%s402_s2] sm:$0x3]  ;;  %v57_v2 = vsel %vm55_vm0, 4294967295, %v290_v1  ;;  %v37_v4 = vld [vmem:[%s403_s1 + $0x8] sm:$0xff]  ;;  %v38_v8 = vld [vmem:[%s403_s1 + $0x10] sm:$0xff]  ;;  %vm103_vm3 = vcmask 1042432  }
   0x2   :  { %v36_v3 = vld [vmem:[%s403_s1] sm:$0xff]  ;;  %v58_v5 = vsel %vm56_vm1, %v57_v2, 0  ;;  %v47_v9 = vpack.c.bf16 %v38_v8, %v38_v8  ;;  %vm99_vm4 = vcmask 48128   ;;  %vm131_vm5 = vcmask 130048  }
   0x3   :  { %v60_v6 = vand.u32 %v58_v5, %v39_v0  ;;  %v46_v7 = vpack.c.bf16 %v37_v4, %v36_v3  ;;  %v276_v10 = vld [vmem:[%s404_s6] sm:$0xff]  ;;  %v291_v58 = vmov 16.0   ;;  %vm249_vm12 = vcmask 125952  }
   0x4   :  { %170 = vmatpush.bf16.msra.mxu3 %v276_v10  ;;  %v40_v11 = vld [vmem:[%s405_s3] sm:$0x7] }
   0x5   :  { %69 = vmatpush.bf16.msra.mxu0 %v60_v6  ;;  %v35_v12 = vld [vmem:[%s406_s0] sm:$0xff]  ;;  %v105_v14 = vsel %vm103_vm3, %v40_v11, 0 }
   0x6   :  { %v275_v13 = vld [vmem:[%s407_s4] sm:$0xff]  ;;  %v98_v15 = vpack.c.bf16 %v35_v12, %v35_v12  ;;  %114 = vmatpush.bf16.msra.mxu1 %v105_v14 }
   0x7   :  { %142 = vmatpush.bf16.msra.mxu2 %v275_v13  ;;  %v279_v52 = vld [vmem:[%s408_s5] ss:$0 sm:$0xff] }
   0x8   :  { %261 = vmatmul.msk.bf16.vlgmr.msra.gmra.mxu0 %vm48_vm2, %v46_v7 }
   0x9   :  { %263 = vmatmul.msk.bf16.vlgmr.msra.gmra.mxu1 %vm99_vm4, %v98_v15 }
  0x18   :  { %262 = vmatmul.msk.bf16.gmra.mxu0 %vm48_vm2, %v47_v9 }
  0x85   :  { %v71_v16 = vpop.f32.mrf.mxu0 }
  0x86   :  { %v80_v20 = vmul.f32 %v71_v16, %v71_v16  ;;  %v116_v39 = vpop.f32.mrf.mxu1 }
  0x87   :  { %v123_v53 = vadd.f32 %v279_v52, %v116_v39 }
  0x8d   :  { %v73_v17 = vpop.f32.mrf.mxu0 }
  0x8e   :  { %v149_v18 = vpack.c.bf16 %v73_v17, %v71_v16  ;;  %v81_v19 = vmul.f32 %v73_v17, %v73_v17  ;;  %v118_v41 = vpop.f32.mrf.mxu1 }
  0x90   :  { %273 = vmatmul.msk.bf16.vlgmr.msra.gmra.mxu3 %vm131_vm5, %v149_v18  ;;  %v82_v22 = vadd.f32 %v81_v19, %v80_v20 }
  0x95   :  { %v76_v21 = vpop.f32.mrf.mxu0 }
  0x96   :  { %v83_v23 = vmul.f32 %v76_v21, %v76_v21  ;;  %v150_v27 = vpack.c.bf16 %v76_v21, %v76_v21 }
  0x98   :  { %v84_v24 = vadd.f32 %v83_v23, %v82_v22 }
  0x9a   :  { %v85_v25 = vmax.f32 %v84_v24, 1e-08 }
  0x9c   :  { %282 = vrsqrt.f32 %v85_v25  ;;  %vm93_vm6 = vcmp.eq.f32.partialorder %v85_v25, inf  ;;  %v96_v35 = vand.u32 2147483648, %v85_v25  ;;  %vm95_vm7 = vcmp.eq.f32.partialorder %v85_v25, 0.0 }
  0x9d   :  { %v78_v26 = vpop.f32.mrf.mxu0  ;;  %284 = vrcp.f32 %v291_v58 }
  0xa0   :  { %274 = vmatmul.msk.bf16.gmra.mxu3 %vm131_vm5, %v150_v27 }
  0xa2   :  { %v283_v28 = vpop.eup %282 }
  0xa3   :  { %v87_v29 = vmul.f32 %v283_v28, %v85_v25  ;;  %v285_v59 = vpop.eup %284 }
  0xa4   :  { %v224_v60 = vmul.f32 16.0, %v285_v59  ;;  %vm228_vm8 = vweird.f32 %v285_v59 }
  0xa5   :  { %v88_v30 = vmul.f32 %v283_v28, %v87_v29 }
  0xa6   :  { %v225_v61 = vsub.f32 1.0, %v224_v60 }
  0xa7   :  { %v89_v31 = vmul.f32 0.5, %v88_v30 }
  0xa8   :  { %v226_v62 = vmul.f32 %v285_v59, %v225_v61 }
  0xa9   :  { %v90_v32 = vsub.f32 1.5, %v89_v31  ;;  %v280_v31 = vld [vmem:[%s409_s7] ss:$0 sm:$0xff] }
  0xaa   :  { %v227_v63 = vadd.f32 %v285_v59, %v226_v62 }
  0xab   :  { %v91_v33 = vmul.f32 %v283_v28, %v90_v32 }
  0xac   :  { %v229_v0 = vsel %vm228_vm8, %v285_v59, %v227_v63 }
  0xad   :  { %v92_v34 = vmul.f32 %v91_v33, %v85_v25  ;;  %v281_v33 = vld [vmem:[%s410_s8] ss:$0 sm:$0xff] }
  0xaf   :  { %v94_v36 = vsel %vm93_vm6, %v85_v25, %v92_v34 }
  0xb0   :  { %v97_v37 = vsel %vm95_vm7, %v96_v35, %v94_v36 }
  0xb1   :  { %v124_v38 = vpack.c.bf16 %v97_v37, %v97_v37 }
  0xb3   :  { %268 = vmatmul.msk.bf16.vlgmr.msra.gmra.mxu2 %vm131_vm5, %v124_v38 }
 0x113   :  { %v172_v40 = vpop.f32.mrf.mxu3 }
 0x114   :  { %v214_v44 = vmul.f32 %v172_v40, %v172_v40 }
 0x11b   :  { %v174_v42 = vpop.f32.mrf.mxu3 }
 0x11c   :  { %v215_v43 = vmul.f32 %v174_v42, %v174_v42 }
 0x11e   :  { %v216_v46 = vadd.f32 %v215_v43, %v214_v44 }
 0x123   :  { %v177_v45 = vpop.f32.mrf.mxu3 }
 0x124   :  { %v217_v47 = vmul.f32 %v177_v45, %v177_v45 }
 0x126   :  { %v218_v48 = vadd.f32 %v217_v47, %v216_v46 }
 0x128   :  { %v219_v49 = vmax.f32 %v218_v48, 1e-08 }
 0x12a   :  { %v220_v50 = vsel %vm131_vm5, %v219_v49, 0.0 }
 0x12b   :  { %221 = vadd.xlane.f32.xlu1 %v220_v50  ;;  %v179_v51 = vpop.f32.mrf.mxu3 }
 0x136   :  { %v144_v54 = vpop.f32.mrf.mxu2 }
 0x137   :  { %v378_v55 = vadd.f32 %v144_v54, %v123_v53 }
 0x139   :  { %183 = vadd.xlane.f32.xlu0 %v378_v55  ;;  %v186_v57 = vmul.f32 %v378_v55, %v378_v55 }
 0x13e   :  { %v146_v56 = vpop.f32.mrf.mxu2 }
 0x141   :  { %187 = vadd.xlane.f32.xlu0 %v186_v57 }
 0x19e   :  { %v222_v1 = vpop.xlane.xlu1 %221 }
 0x19f   :  { %v230_v2 = vmul.f32 %v229_v0, %v222_v1 }
 0x1a1   :  { %286 = vrsqrt.f32 %v230_v2  ;;  %vm237_vm10 = vweird.f32 %v230_v2 }
 0x1a7   :  { %v287_v3 = vpop.eup %286 }
 0x1a8   :  { %v232_v4 = vmul.f32 %v287_v3, %v230_v2  ;;  %vm238_vm9 = vweird.f32 %v287_v3 }
 0x1a9   :  { %vm239_vm11 = vmor %vm237_vm10, %vm238_vm9 }
 0x1aa   :  { %v233_v5 = vmul.f32 %v287_v3, %v232_v4 }
 0x1ac   :  { %v234_v6 = vmul.f32 0.5, %v233_v5  ;;  %v184_v7 = vpop.xlane.xlu0 %183 }
 0x1ad   :  { %v185_v10 = vmul.f32 0.01, %v184_v7 }
 0x1ae   :  { %v235_v8 = vsub.f32 1.5, %v234_v6 }
 0x1af   :  { %v190_v15 = vmul.f32 %v185_v10, %v185_v10  ;;  %v193_v30 = vsub.f32 %v378_v55, %v185_v10 }
 0x1b0   :  { %v236_v9 = vmul.f32 %v287_v3, %v235_v8 }
 0x1b2   :  { %v240_v11 = vsel %vm239_vm11, %v287_v3, %v236_v9 }
 0x1b3   :  { %v241_v12 = vmul.f32 %v240_v11, %v172_v40  ;;  %v242_v13 = vmul.f32 %v240_v11, %v174_v42  ;;  %v243_v14 = vmul.f32 %v240_v11, %v177_v45 }
 0x1b4   :  { %v188_v16 = vpop.xlane.xlu0 %187 }
 0x1b5   :  { %v246_v17 = vpack.c.bf16 %v241_v12, %v241_v12  ;;  %v247_v18 = vpack.c.bf16 %v242_v13, %v242_v13  ;;  %v248_v19 = vpack.c.bf16 %v243_v14, %v243_v14  ;;  %v189_v20 = vmul.f32 0.01, %v188_v16 }
 0x1b7   :  { %250 = vst.msk [vmem:[%s411_s10] sm:$0xf] %vm249_vm12, %v246_v17  ;;  %v191_v21 = vsub.f32 %v189_v20, %v190_v15 }
 0x1b8   :  { %251 = vst.msk [vmem:[%s411_s10 + $0x4] sm:$0xf] %vm249_vm12, %v247_v18 }
 0x1b9   :  { %252 = vst.msk [vmem:[%s411_s10 + $0x8] sm:$0xf] %vm249_vm12, %v248_v19  ;;  %v192_v22 = vmax.f32 %v191_v21, 0.0 }
 0x1bb   :  { %v194_v23 = vadd.f32 1e-05, %v192_v22 }
 0x1bd   :  { %288 = vrsqrt.f32 %v194_v23  ;;  %vm201_vm14 = vweird.f32 %v194_v23 }
 0x1c3   :  { %v289_v24 = vpop.eup %288 }
 0x1c4   :  { %v196_v25 = vmul.f32 %v289_v24, %v194_v23  ;;  %vm202_vm13 = vweird.f32 %v289_v24 }
 0x1c5   :  { %vm203_vm15 = vmor %vm201_vm14, %vm202_vm13 }
 0x1c6   :  { %v197_v26 = vmul.f32 %v289_v24, %v196_v25 }
 0x1c8   :  { %v198_v27 = vmul.f32 0.5, %v197_v26 }
 0x1ca   :  { %v199_v28 = vsub.f32 1.5, %v198_v27 }
 0x1cc   :  { %v200_v29 = vmul.f32 %v289_v24, %v199_v28 }
 0x1ce   :  { %v204_v32 = vsel %vm203_vm15, %v289_v24, %v200_v29 }
 0x1cf   :  { %v205_v34 = vmul.f32 %v204_v32, %v193_v30 }
 0x1d1   :  { %v209_v35 = vmul.f32 %v280_v31, %v205_v34 }
 0x1d3   :  { %v213_v36 = vadd.f32 %v281_v33, %v209_v35 }
 0x1d5   :  { %v244_v37 = vpack.c.bf16 %v213_v36, %v213_v36 }
 0x1d7   :  { %245 = vst [vmem:[%s412_s9] sm:$0xf] %v244_v37 }

// kernel: forward.16
= control target key start
LH: loop header
LB: loop body
LE: loop exit
PB: predicated region body
PF: predicated region fallthrough
CT: control target
= control target key end

     0   :  { %v2136_v2 = vmov 0   ;;  %vm200_vm0 = vcmask 130048   ;;  %vm565_vm1 = vcmask 261120   ;;  %vm696_vm2 = vcmask 1040384   ;;  %s2719_s6 = inlined_call_operand.vmem [shape: bf16[16,33], index: 6, kind: input, shape index: {}]   ;;  %s2720_s8 = inlined_call_operand.vmem [shape: bf16[16,33], index: 8, kind: input, shape index: {}]   ;;  %s2721_s3 = inlined_call_operand.vmem [shape: bf16[3,24,16], index: 3, kind: input, shape index: {}]   ;;  %s2722_s5 = inlined_call_operand.vmem [shape: bf16[3,24,16], index: 5, kind: input, shape index: {}]   ;;  %s2723_s4 = inlined_call_operand.vmem [shape: bf16[3,24,1], index: 4, kind: input, shape index: {}]   ;;  %s2724_s9 = inlined_call_operand.vmem [shape: bf16[128,128], index: 9, kind: input, shape index: {}]   ;;  %s2725_s11 = inlined_call_operand.vmem [shape: bf16[128,128], index: 11, kind: input, shape index: {}]   ;;  %s2726_s10 = inlined_call_operand.vmem [shape: bf16[32,128], index: 10, kind: input, shape index: {}]   ;;  %s2727_s1 = inlined_call_operand.vmem [shape: bf16[24,32], index: 1, kind: input, shape index: {}]   ;;  %s2728_s14 = inlined_call_operand.vmem [shape: bf16[33,16], index: 14, kind: input, shape index: {}]   ;;  %s2729_s0 = inlined_call_operand.vmem [shape: bf16[24,128], index: 0, kind: input, shape index: {}]   ;;  %s2730_s12 = inlined_call_operand.vmem [shape: bf16[33,128], index: 12, kind: input, shape index: {}]   ;;  %s2731_s2 = inlined_call_operand.vmem [shape: bf16[24,128], index: 2, kind: input, shape index: {}]   ;;  %s2732_s13 = inlined_call_operand.vmem [shape: f32[1,128], index: 13, kind: input, shape index: {}]   ;;  %s2733_s7 = inlined_call_operand.vmem [shape: bf16[1,33], index: 7, kind: input, shape index: {}]   ;;  %s2734_s16 = inlined_call_operand.vmem [shape: bf16[128,128], index: 16, kind: input, shape index: {}]   ;;  %s2735_s18 = inlined_call_operand.vmem [shape: f32[1,128], index: 18, kind: input, shape index: {}]   ;;  %s2736_s15 = inlined_call_operand.vmem [shape: bf16[16,16], index: 15, kind: input, shape index: {}]   ;;  %s2737_s19 = inlined_call_operand.vmem [shape: bf16[16,16], index: 19, kind: input, shape index: {}]   ;;  %s2738_s17 = inlined_call_operand.vmem [shape: bf16[16,128], index: 17, kind: input, shape index: {}]   ;;  %s2739_s21 = inlined_call_operand.vmem [shape: bf16[128,128], index: 21, kind: input, shape index: {}]   ;;  %s2740_s23 = inlined_call_operand.vmem [shape: f32[1,128], index: 23, kind: input, shape index: {}]   ;;  %s2741_s20 = inlined_call_operand.vmem [shape: bf16[16,16], index: 20, kind: input, shape index: {}]   ;;  %s2742_s22 = inlined_call_operand.vmem [shape: bf16[16,128], index: 22, kind: input, shape index: {}]   ;;  %s2743_s24 = inlined_call_operand.vmem [shape: bf16[16,16], index: 24, kind: input, shape index: {}]   ;;  %s2744_s26 = inlined_call_operand.vmem [shape: bf16[3,24,16], index: 26, kind: output, shape index: {1}]   ;;  %s2745_s25 = inlined_call_operand.vmem [shape: bf16[24,128], index: 25, kind: output, shape index: {0}]  }
   0x1   :  { %2755 = sst [smem:[#allocation2_spill]] %s2719_s6  ;;  %2056 = vset.pattern.permute.xlu0 %v2136_v2  ;;  %2067 = vset.pattern.permute.xlu1 %v2136_v2  ;;  %v698_v47 = vsel %vm696_vm2, 65535, %v2136_v2  ;;  %vm689_vm3 = vcmask 269312  }
   0x2   :  { %2756 = sst [smem:[#allocation3_spill]] %s2720_s8  ;;  %2078 = vset.pattern.permute.xlu2 %v2136_v2  ;;  %v164_v2 = vld [vmem:[%s2730_s12 + $0x10] sm:$0x1] }
   0x3   :  { %2757 = sst [smem:[#allocation4_spill]] %s2721_s3 }
   0x4   :  { %2758 = sst [smem:[#allocation5_spill]] %s2722_s5 }
   0x5   :  { %2759 = sst [smem:[#allocation6_spill]] %s2723_s4 }
   0x6   :  { %2760 = sst [smem:[#allocation7_spill]] %s2724_s9 }
   0x7   :  { %2761 = sst [smem:[#allocation8_spill]] %s2725_s11 }
   0x8   :  { %2762 = sst [smem:[#allocation9_spill]] %s2726_s10 }
   0x9   :  { %2763 = sst [smem:[#allocation10_spill]] %s2727_s1 }
   0xa   :  { %2764 = sst [smem:[#allocation11_spill]] %s2728_s14 }
   0xb   :  { %2765 = sst [smem:[#allocation12_spill]] %s2729_s0 }
   0xc   :  { %2766 = sst [smem:[#allocation13_spill]] %s2740_s23 }
   0xd   :  { %s2767_s10 = sld [smem:[#allocation2_spill]] }
   0xe   :  { %s2768_s23 = sld [smem:[#allocation3_spill]] }
   0xf   :  { %s2769_s3 = sld [smem:[#allocation4_spill]] }
  0x10   :  { %s2770_s0 = sld [smem:[#allocation5_spill]] }
  0x11   :  { %s2771_s11 = sld [smem:[#allocation6_spill]] }
  0x12   :  { %s2772_s6 = sld [smem:[#allocation7_spill]] }
  0x13   :  { %v1969_v0 = vld [vmem:[%s2767_s10] sm:$0xff]  ;;  %s2773_s29 = sld [smem:[#allocation8_spill]] }
  0x14   :  { %v1970_v1 = vld [vmem:[%s2768_s23] sm:$0xff]  ;;  %223 = vmatpush.bf16.msra.mxu0 %v1969_v0  ;;  %s2774_s8 = sld [smem:[#allocation9_spill]] }
  0x15   :  { %v1961_v3 = vld [vmem:[%s2769_s3] sm:$0xff]  ;;  %374 = vmatpush.bf16.msra.mxu1 %v1970_v1  ;;  %v1962_v21 = vld [vmem:[%s2769_s3 + $0x8] sm:$0xff]  ;;  %v1963_v24 = vld [vmem:[%s2769_s3 + $0x10] sm:$0xff]  ;;  %s2775_s10 = sld [smem:[#allocation10_spill]] }
  0x16   :  { %v1965_v4 = vld [vmem:[%s2770_s0] sm:$0xff]  ;;  %v1966_v22 = vld [vmem:[%s2770_s0 + $0x8] sm:$0xff]  ;;  %v1967_v25 = vld [vmem:[%s2770_s0 + $0x10] sm:$0xff]  ;;  %s2776_s1 = sld [smem:[#allocation11_spill]] }
  0x17   :  { %v2016_v5 = vld [vmem:[%s2771_s11] sm:$0xff]   ;;  %v2036_v8 = vld [vmem:[%s2771_s11 + $0x8] sm:$0xff]   ;;  %1701 = vmatmul.msk.bf16.vlgmr.msra.gmra.mxu0 %vm200_vm0, %v1961_v3  ;;  %v2037_v10 = vld [vmem:[%s2771_s11 + $0x10] sm:$0xff]   ;;  %s2777_s23 = sld [smem:[#allocation12_spill]] }
  0x18   :  { %v2017_v6 = vunpack.c.l.bf16 %v2016_v5  ;;  %v2018_v7 = vunpack.c.h.bf16 %v2016_v5  ;;  %1726 = vmatmul.msk.bf16.vlgmr.msra.gmra.mxu1 %vm200_vm0, %v1965_v4  ;;  %v2021_v11 = vunpack.c.l.bf16 %v2036_v8  ;;  %v2022_v12 = vunpack.c.h.bf16 %v2036_v8  ;;  %v2038_v15 = vld [vmem:[%s2771_s11 + $0x18] sm:$0xff]   ;;  %v1977_v26 = vld [vmem:[%s2772_s6 + $0x30] sm:$0xff]  ;;  %v1976_v28 = vld [vmem:[%s2772_s6 + $0x28] sm:$0xff] }
  0x19   :  { %v2025_v13 = vunpack.c.l.bf16 %v2037_v10  ;;  %v2026_v14 = vunpack.c.h.bf16 %v2037_v10  ;;  %v2029_v18 = vunpack.c.l.bf16 %v2038_v15  ;;  %v2030_v19 = vunpack.c.h.bf16 %v2038_v15  ;;  %v1978_v23 = vld [vmem:[%s2772_s6 + $0x38] sm:$0xff]  ;;  %v1987_v29 = vld [vmem:[%s2773_s29 + $0x30] sm:$0xff]  ;;  %v109_v32 = vld [vmem:[%s2771_s11 + $0x20] sm:$0xf] }
  0x1a   :  { %v2057_v9 = vpack.i.bf16 %v2018_v7, %v2017_v6  ;;  %v2062_v17 = vpack.i.bf16 %v2022_v12, %v2021_v11  ;;  %521 = vmatpush.bf16.msra.mxu2 %v1978_v23  ;;  %v1988_v27 = vld [vmem:[%s2773_s29 + $0x38] sm:$0xff]  ;;  %v1980_v30 = vld [vmem:[%s2774_s8 + $0x8] sm:$0xff]  ;;  %v1979_v31 = vld [vmem:[%s2774_s8] sm:$0xff]  ;;  %v257_v34 = vunpack.c.l.bf16 %v109_v32  ;;  %v683_v5 = vunpack.c.l.b16 %v164_v2 }
  0x1b   :  { %v2068_v16 = vpack.i.bf16 %v2026_v14, %v2025_v13  ;;  %v2073_v20 = vpack.i.bf16 %v2030_v19, %v2029_v18  ;;  %651 = vmatpush.bf16.msrb.mxu0 %v1988_v27  ;;  %578 = vmatpush.bf16.msra.mxu3 %v1980_v30  ;;  %v1975_v33 = vld [vmem:[%s2772_s6 + $0x20] sm:$0xff]  ;;  %v1986_v35 = vld [vmem:[%s2773_s29 + $0x28] sm:$0xff]  ;;  %v1974_v37 = vld [vmem:[%s2772_s6 + $0x18] sm:$0xff] }
  0x1c   :  { %2058 = vperm.xlu0 %2056, %v2057_v9   ;;  %301 = vperm.xlu2 %2078, %v257_v34   ;;  %v1959_v36 = vld [vmem:[%s2775_s10] sm:$0xff]  ;;  %v1964_v39 = vld [vmem:[%s2769_s3 + $0x18] sm:$0xff]  ;;  %v1973_v41 = vld [vmem:[%s2772_s6 + $0x10] sm:$0xff]  ;;  %v686_v6 = vpack.c.b16 %v683_v5, %v683_v5 }
  0x1d   :  { %2069 = vperm.xlu1 %2067, %v2068_v16   ;;  %v1985_v38 = vld [vmem:[%s2773_s29 + $0x20] sm:$0xff]  ;;  %v1968_v40 = vld [vmem:[%s2770_s0 + $0x18] sm:$0xff]  ;;  %v170_v43 = vld [vmem:[%s2776_s1 + $0x10] sm:$0x1] }
  0x1e   :  { %522 = vmatpush.bf16.msra.mxu2 %v1977_v26  ;;  %v1984_v42 = vld [vmem:[%s2773_s29 + $0x18] sm:$0xff]  ;;  %v737_v44 = vunpack.c.l.b16 %v170_v43  ;;  %v88_v45 = vld [vmem:[%s2775_s10 + $0x8] sm:$0xf]  ;;  %v1983_v48 = vld [vmem:[%s2773_s29 + $0x10] sm:$0xff]  ;;  %v700_v7 = vand.u32 %v698_v47, %v686_v6 }
  0x1f   :  { %652 = vmatpush.bf16.msrb.mxu0 %v1987_v29  ;;  %579 = vmatpush.bf16.msra.mxu3 %v1979_v31  ;;  %v1972_v46 = vld [vmem:[%s2772_s6 + $0x8] sm:$0xff]  ;;  %v550_v50 = vunpack.c.l.b16 %v88_v45  ;;  %v100_v51 = vld [vmem:[%s2769_s3 + $0x20] sm:$0xf] }
  0x20   :  { %v740_v49 = vpack.c.b16 %v737_v44, %v737_v44  ;;  %v118_v52 = vld [vmem:[%s2770_s0 + $0x20] sm:$0xf]  ;;  %v1982_v55 = vld [vmem:[%s2773_s29 + $0x8] sm:$0xff]  ;;  %v188_v56 = vunpack.c.l.b16 %v100_v51  ;;  %s2778_s0 = sld [smem:[#allocation13_spill]] }
  0x21   :  { %v1971_v54 = vld [vmem:[%s2772_s6] sm:$0xff]  ;;  %v340_v57 = vunpack.c.l.b16 %v118_v52  ;;  %v552_v58 = vpack.c.b16 %v550_v50, %v550_v50  ;;  %v1992_v60 = vld [vmem:[%s2776_s1 + $0x8] sm:$0xff] }
  0x22   :  { %523 = vmatpush.bf16.msra.mxu2 %v1976_v28  ;;  %1779 = vmatmul.msk.bf16.vlgmr.msra.gmra.mxu3 %vm565_vm1, %v1959_v36  ;;  %v759_v53 = vand.u32 %v740_v49, %v698_v47  ;;  %v1958_v59 = vld [vmem:[%s2777_s23] sm:$0xff]  ;;  %v193_v62 = vpack.c.b16 %v188_v56, %v188_v56  ;;  %v85_v0 = vld [vmem:[%s2777_s23 + $0x8] sm:$0xf] }
  0x23   :  { %653 = vmatpush.bf16.msrb.mxu0 %v1986_v35  ;;  %v1981_v61 = vld [vmem:[%s2773_s29] sm:$0xff]  ;;  %v345_v63 = vpack.c.b16 %v340_v57, %v340_v57  ;;  %v468_v1 = vunpack.c.l.b16 %v85_v0  ;;  %v91_v8 = vld [vmem:[%s2731_s2 + $0x8] sm:$0xf] }
  0x24   :  { %2063 = vperm.xlu0 %2056, %v2062_v17   ;;  %766 = vmatpush.bf16.msrb.mxu3 %v759_v53  ;;  %v1960_v4 = vld [vmem:[%s2731_s2] sm:$0xff]  ;;  %v598_v9 = vunpack.c.l.b16 %v91_v8 }
  0x25   :  { %2074 = vperm.xlu1 %2067, %v2073_v20   ;;  %v470_v3 = vpack.c.b16 %v468_v1, %v468_v1  ;;  %v1991_v11 = vld [vmem:[%s2776_s1] sm:$0xff] }
  0x26   :  { %524 = vmatpush.bf16.msra.mxu2 %v1975_v33  ;;  %v600_v10 = vpack.c.b16 %v598_v9, %v598_v9  ;;  %v121_v12 = vld [vmem:[%s2733_s7] sm:$0x1] }
  0x27   :  { %1702 = vmatmul.msk.bf16.gmra.mxu0 %vm200_vm0, %v1962_v21  ;;  %v258_v13 = vunpack.c.l.bf16 %v121_v12  ;;  %v1989_v1 = vld [vmem:[%s2730_s12] sm:$0xff] }
  0x28   :  { %1727 = vmatmul.msk.bf16.gmra.mxu1 %vm200_vm0, %v1966_v22  ;;  %654 = vmatpush.bf16.msrb.mxu0 %v1985_v38 }
  0x29   :  { %767 = vmatpush.bf16.msrb.mxu3 %v1992_v60  ;;  %v2426_v16 = vperm.slane %v258_v13, 0  ;;  %v1990_v60 = vld [vmem:[%s2730_s12 + $0x8] sm:$0xff] }
  0x2a   :  { %525 = vmatpush.bf16.msra.mxu2 %v1974_v37 }
  0x2c   :  { %655 = vmatpush.bf16.msrb.mxu0 %v1984_v42 }
  0x2d   :  { %768 = vmatpush.bf16.msrb.mxu3 %v1991_v11 }
  0x2e   :  { %526 = vmatpush.bf16.msra.mxu2 %v1973_v41 }
  0x30   :  { %656 = vmatpush.bf16.msrb.mxu0 %v1983_v48 }
  0x32   :  { %527 = vmatpush.bf16.msra.mxu2 %v1972_v46  ;;  %1780 = vmatmul.msk.bf16.gmra.mxu3 %vm565_vm1, %v552_v58 }
  0x34   :  { %657 = vmatpush.bf16.msrb.mxu0 %v1982_v55 }
  0x36   :  { %528 = vmatpush.bf16.msra.mxu2 %v1971_v54 }
  0x37   :  { %1703 = vmatmul.msk.bf16.gmra.mxu0 %vm200_vm0, %v1963_v24 }
  0x38   :  { %1728 = vmatmul.msk.bf16.gmra.mxu1 %vm200_vm0, %v1967_v25  ;;  %658 = vmatpush.bf16.msrb.mxu0 %v1981_v61 }
  0x39   :  { %529 = vmatmul.bf16.vlgmr.msra.gmra.mxu2 %v1958_v59 }
  0x3a   :  { %2039 = vmatpush.bf16.msrb.mxu2 %v1988_v27 }
  0x3e   :  { %2040 = vmatpush.bf16.msrb.mxu2 %v1987_v29 }
  0x42   :  { %2041 = vmatpush.bf16.msrb.mxu2 %v1986_v35 }
  0x46   :  { %2042 = vmatpush.bf16.msrb.mxu2 %v1985_v38 }
  0x47   :  { %1704 = vmatmul.msk.bf16.gmra.mxu0 %vm200_vm0, %v1964_v39 }
  0x48   :  { %1729 = vmatmul.msk.bf16.gmra.mxu1 %vm200_vm0, %v1968_v40 }
  0x49   :  { %534 = vmatmul.bf16.gmra.mxu2 %v470_v3 }
  0x4a   :  { %2043 = vmatpush.bf16.msrb.mxu2 %v1984_v42 }
  0x4e   :  { %2044 = vmatpush.bf16.msrb.mxu2 %v1983_v48 }
  0x52   :  { %2045 = vmatpush.bf16.msrb.mxu2 %v1982_v55 }
  0x56   :  { %2046 = vmatpush.bf16.msrb.mxu2 %v1981_v61 }
  0x57   :  { %1705 = vmatmul.msk.bf16.gmra.mxu0 %vm200_vm0, %v193_v62 }
  0x58   :  { %1730 = vmatmul.msk.bf16.gmra.mxu1 %vm200_vm0, %v345_v63 }
  0x59   :  { %664 = vmatmul.bf16.vlgmr.msrb.gmra.mxu2 %v600_v10 }
  0x5a   :  { %707 = vmatpush.bf16.msra.mxu2 %v700_v7 }
  0x5e   :  { %708 = vmatpush.bf16.msra.mxu2 %v1990_v60 }
  0x62   :  { %709 = vmatpush.bf16.msra.mxu2 %v1989_v1 }
  0x67   :  { %659 = vmatmul.bf16.vlgmr.msrb.gmra.mxu0 %v1960_v4 }
  0x8e   :  { %v2059_v14 = vpop.permute.xlu0 %2058 }
  0x8f   :  { %v2060_v15 = vunpack.i.l.bf16 %v2059_v14  ;;  %v2061_v19 = vunpack.i.h.bf16 %v2059_v14  ;;  %v2070_v42 = vpop.permute.xlu1 %2069  ;;  %v302_v14 = vpop.permute.xlu2 %301 }
  0x90   :  { %v2071_v44 = vunpack.i.l.bf16 %v2070_v42  ;;  %v2072_v47 = vunpack.i.h.bf16 %v2070_v42 }
  0x91   :  { %v305_v20 = vmul.f32 %v2060_v15, %v2426_v16  ;;  %v306_v21 = vmul.f32 %v2061_v19, %v2426_v16 }
  0x92   :  { %v309_v48 = vmul.f32 %v2071_v44, %v2426_v16  ;;  %v310_v49 = vmul.f32 %v2072_v47, %v2426_v16 }
  0x94   :  { %v225_v17 = vpop.f32.mrf.mxu0 }
  0x95   :  { %v376_v18 = vpop.f32.mrf.mxu1  ;;  %v314_v22 = vadd.f32 %v305_v20, %v225_v17 }
  0x96   :  { %v2064_v29 = vpop.permute.xlu0 %2063 }
  0x97   :  { %v400_v26 = vadd.f32 %v376_v18, %v314_v22  ;;  %v2065_v32 = vunpack.i.l.bf16 %v2064_v29  ;;  %v2066_v33 = vunpack.i.h.bf16 %v2064_v29  ;;  %v2075_v51 = vpop.permute.xlu1 %2074 }
  0x98   :  { %v2076_v56 = vunpack.i.l.bf16 %v2075_v51  ;;  %v2077_v3 = vunpack.i.h.bf16 %v2075_v51 }
  0x99   :  { %v307_v34 = vmul.f32 %v2065_v32, %v2426_v16  ;;  %v308_v36 = vmul.f32 %v2066_v33, %v2426_v16  ;;  %v409_v2 = vmul.f32 %v400_v26, %v400_v26 }
  0x9a   :  { %v311_v59 = vmul.f32 %v2076_v56, %v2426_v16  ;;  %v312_v8 = vmul.f32 %v2077_v3, %v2426_v16 }
  0x9c   :  { %v227_v23 = vpop.f32.mrf.mxu0 }
  0x9d   :  { %v378_v24 = vpop.f32.mrf.mxu1  ;;  %v315_v25 = vadd.f32 %v306_v21, %v227_v23  ;;  %v313_v21 = vmul.f32 %v2426_v16, %v302_v14 }
  0x9f   :  { %v401_v27 = vadd.f32 %v378_v24, %v315_v25 }
  0xa1   :  { %v723_v28 = vpack.c.bf16 %v401_v27, %v400_v26  ;;  %v410_v15 = vmul.f32 %v401_v27, %v401_v27  ;;  %v2453_v26 = vld [vmem:[%s2732_s13] ss:$0 sm:$0xff] }
  0xa3   :  { %1835 = vmatmul.msk.bf16.vlgmr.msrb.gmra.mxu3 %vm689_vm3, %v723_v28 }
  0xa4   :  { %v230_v30 = vpop.f32.mrf.mxu0 }
  0xa5   :  { %v381_v31 = vpop.f32.mrf.mxu1  ;;  %v316_v35 = vadd.f32 %v307_v34, %v230_v30  ;;  %v581_v23 = vpop.f32.mrf.mxu3 }
  0xa7   :  { %v402_v40 = vadd.f32 %v381_v31, %v316_v35 }
  0xa9   :  { %v411_v32 = vmul.f32 %v402_v40, %v402_v40 }
  0xac   :  { %v232_v37 = vpop.f32.mrf.mxu0 }
  0xad   :  { %v383_v38 = vpop.f32.mrf.mxu1  ;;  %v317_v39 = vadd.f32 %v308_v36, %v232_v37 }
  0xaf   :  { %v403_v41 = vadd.f32 %v383_v38, %v317_v39 }
  0xb1   :  { %v724_v43 = vpack.c.bf16 %v403_v41, %v402_v40  ;;  %v412_v63 = vmul.f32 %v403_v41, %v403_v41 }
  0xb3   :  { %1836 = vmatmul.msk.bf16.gmra.mxu3 %vm689_vm3, %v724_v43  ;;  %v415_v5 = vadd.f32 %v412_v63, %v409_v2 }
  0xb4   :  { %v235_v45 = vpop.f32.mrf.mxu0 }
  0xb5   :  { %v386_v46 = vpop.f32.mrf.mxu1  ;;  %v318_v50 = vadd.f32 %v309_v48, %v235_v45  ;;  %v2459_v48 = vpop.f32.mrf.mxu3 }
  0xb7   :  { %v404_v55 = vadd.f32 %v386_v46, %v318_v50 }
  0xb9   :  { %v413_v11 = vmul.f32 %v404_v55, %v404_v55 }
  0xbb   :  { %v416_v18 = vadd.f32 %v413_v11, %v410_v15 }
  0xbc   :  { %v237_v52 = vpop.f32.mrf.mxu0  ;;  %v530_v33 = vpop.f32.mrf.mxu2 }
  0xbd   :  { %v388_v53 = vpop.f32.mrf.mxu1  ;;  %v319_v54 = vadd.f32 %v310_v49, %v237_v52  ;;  %v542_v35 = vadd.f32 %v2453_v26, %v530_v33  ;;  %v1996_v33 = vld [vmem:[%s2734_s16 + $0x10] sm:$0xff] }
  0xbf   :  { %v405_v57 = vadd.f32 %v388_v53, %v319_v54  ;;  %v2457_v39 = vadd.f32 %v581_v23, %v542_v35 }
  0xc1   :  { %v725_v58 = vpack.c.bf16 %v405_v57, %v404_v55  ;;  %v414_v28 = vmul.f32 %v405_v57, %v405_v57 }
  0xc3   :  { %1837 = vmatmul.msk.bf16.gmra.mxu3 %vm689_vm3, %v725_v58  ;;  %v417_v36 = vadd.f32 %v414_v28, %v411_v32  ;;  %v586_v58 = vpop.f32.mrf.mxu3  ;;  %v1997_v32 = vld [vmem:[%s2734_s16 + $0x18] sm:$0xff] }
  0xc4   :  { %v240_v61 = vpop.f32.mrf.mxu0  ;;  %v2461_v49 = vpop.f32.mrf.mxu2 }
  0xc5   :  { %v391_v62 = vpop.f32.mrf.mxu1  ;;  %v320_v0 = vadd.f32 %v311_v59, %v240_v61 }
  0xc7   :  { %v406_v4 = vadd.f32 %v391_v62, %v320_v0 }
  0xc9   :  { %v418_v6 = vmul.f32 %v406_v4, %v406_v4 }
  0xcb   :  { %v421_v7 = vadd.f32 %v418_v6, %v415_v5 }
  0xcc   :  { %v242_v9 = vpop.f32.mrf.mxu0  ;;  %v535_v59 = vpop.f32.mrf.mxu2 }
  0xcd   :  { %v393_v10 = vpop.f32.mrf.mxu1  ;;  %v2445_v12 = vmax.f32 %v421_v7, 1e-08  ;;  %v321_v13 = vadd.f32 %v312_v8, %v242_v9  ;;  %v544_v63 = vadd.f32 %v2453_v26, %v535_v59 }
  0xcf   :  { %2082 = vrsqrt.f32 %v2445_v12  ;;  %v407_v17 = vadd.f32 %v393_v10, %v321_v13  ;;  %vm434_vm4 = vcmp.eq.f32.partialorder %v2445_v12, inf  ;;  %vm436_vm5 = vcmp.eq.f32.partialorder %v2445_v12, 0.0  ;;  %v588_v10 = vpop.f32.mrf.mxu3 }
  0xd0   :  { %v437_v0 = vand.u32 2147483648, %v2445_v12 }
  0xd1   :  { %v419_v19 = vmul.f32 %v407_v17, %v407_v17  ;;  %v726_v20 = vpack.c.bf16 %v407_v17, %v406_v4  ;;  %v592_v4 = vadd.f32 %v586_v58, %v544_v63 }
  0xd3   :  { %v422_v22 = vadd.f32 %v419_v19, %v416_v18  ;;  %1838 = vmatmul.msk.bf16.gmra.mxu3 %vm689_vm3, %v726_v20 }
  0xd4   :  { %v245_v24 = vpop.f32.mrf.mxu0  ;;  %v537_v11 = vpop.f32.mrf.mxu2 }
  0xd5   :  { %v396_v25 = vpop.f32.mrf.mxu1  ;;  %v2083_v27 = vpop.eup %2082  ;;  %v425_v29 = vmax.f32 %v422_v22, 1e-08  ;;  %v322_v30 = vadd.f32 %v313_v21, %v245_v24 }
  0xd6   :  { %v428_v31 = vmul.f32 %v2083_v27, %v2445_v12 }
  0xd7   :  { %2084 = vrsqrt.f32 %v425_v29  ;;  %v408_v16 = vadd.f32 %v396_v25, %v322_v30  ;;  %vm446_vm6 = vcmp.eq.f32.partialorder %v425_v29, inf  ;;  %v449_v1 = vand.u32 2147483648, %v425_v29  ;;  %v2001_v25 = vld [vmem:[%s2734_s16 + $0x38] sm:$0xff]  ;;  %v1998_v30 = vld [vmem:[%s2734_s16 + $0x20] sm:$0xff] }
  0xd8   :  { %v429_v34 = vmul.f32 %v2083_v27, %v428_v31  ;;  %vm448_vm7 = vcmp.eq.f32.partialorder %v425_v29, 0.0  ;;  %1103 = vmatpush.bf16.msrb.mxu1 %v2001_v25 }
  0xd9   :  { %v420_v37 = vmul.f32 %v408_v16, %v408_v16  ;;  %v727_v40 = vpack.c.bf16 %v408_v16, %v408_v16 }
  0xda   :  { %v430_v38 = vmul.f32 0.5, %v429_v34 }
  0xdb   :  { %v423_v41 = vadd.f32 %v420_v37, %v417_v36 }
  0xdc   :  { %v247_v42 = vpop.f32.mrf.mxu0  ;;  %v431_v44 = vsub.f32 1.5, %v430_v38  ;;  %v1995_v38 = vld [vmem:[%s2734_s16 + $0x8] sm:$0xff] }
  0xdd   :  { %v398_v43 = vpop.f32.mrf.mxu1  ;;  %v2085_v45 = vpop.eup %2084  ;;  %v426_v46 = vmax.f32 %v423_v41, 1e-08 }
  0xde   :  { %v440_v47 = vmul.f32 %v2085_v45, %v425_v29  ;;  %v432_v50 = vmul.f32 %v2083_v27, %v431_v44  ;;  %v2000_v27 = vld [vmem:[%s2734_s16 + $0x30] sm:$0xff]  ;;  %v1994_v44 = vld [vmem:[%s2734_s16] sm:$0xff] }
  0xdf   :  { %2086 = vrsqrt.f32 %v426_v46  ;;  %vm458_vm8 = vcmp.eq.f32.partialorder %v426_v46, inf  ;;  %v461_v15 = vand.u32 2147483648, %v426_v46  ;;  %vm460_vm9 = vcmp.eq.f32.partialorder %v426_v46, 0.0  ;;  %1104 = vmatpush.bf16.msrb.mxu1 %v2000_v27 }
  0xe0   :  { %v441_v51 = vmul.f32 %v2085_v45, %v440_v47  ;;  %v433_v53 = vmul.f32 %v432_v50, %v2445_v12 }
  0xe2   :  { %v442_v52 = vmul.f32 0.5, %v441_v51  ;;  %v435_v60 = vsel %vm434_vm4, %v2445_v12, %v433_v53  ;;  %v665_v12 = vpop.f32.mrf.mxu2 }
  0xe3   :  { %1839 = vmatmul.msk.bf16.gmra.mxu3 %vm689_vm3, %v727_v40  ;;  %v438_v5 = vsel %vm436_vm5, %v437_v0, %v435_v60  ;;  %v2471_v18 = vadd.f32 %v665_v12, %v592_v4 }
  0xe4   :  { %v443_v54 = vsub.f32 1.5, %v442_v52 }
  0xe5   :  { %v2087_v55 = vpop.eup %2086 }
  0xe6   :  { %v444_v56 = vmul.f32 %v2085_v45, %v443_v54  ;;  %v452_v57 = vmul.f32 %v2087_v55, %v426_v46 }
  0xe8   :  { %v445_v61 = vmul.f32 %v444_v56, %v425_v29  ;;  %v453_v62 = vmul.f32 %v2087_v55, %v452_v57 }
  0xea   :  { %v447_v2 = vsel %vm446_vm6, %v425_v29, %v445_v61  ;;  %v454_v3 = vmul.f32 0.5, %v453_v62  ;;  %v667_v20 = vpop.f32.mrf.mxu2  ;;  %v1999_v29 = vld [vmem:[%s2734_s16 + $0x28] sm:$0xff]  ;;  %v660_v62 = vpop.f32.mrf.mxu0 }
  0xeb   :  { %v450_v6 = vsel %vm448_vm7, %v449_v1, %v447_v2  ;;  %1105 = vmatpush.bf16.msrb.mxu1 %v1999_v29  ;;  %v669_v27 = vadd.f32 %v660_v62, %v2457_v39 }
  0xec   :  { %v672_v7 = vpack.c.bf16 %v450_v6, %v438_v5  ;;  %v455_v8 = vsub.f32 1.5, %v454_v3 }
  0xee   :  { %1825 = vmatmul.msk.bf16.vlgmr.msra.gmra.mxu2 %vm689_vm3, %v672_v7  ;;  %v456_v9 = vmul.f32 %v2087_v55, %v455_v8  ;;  %v543_v7 = vadd.f32 %v2453_v26, %v2461_v49  ;;  %v1993_v49 = vld [vmem:[%s2736_s15] sm:$0xff] }
  0xef   :  { %1106 = vmatpush.bf16.msrb.mxu1 %v1998_v30  ;;  %973 = vmatpush.bf16.msra.mxu0 %v1993_v49 }
  0xf0   :  { %v457_v13 = vmul.f32 %v456_v9, %v426_v46 }
  0xf2   :  { %v459_v14 = vsel %vm458_vm8, %v426_v46, %v457_v13 }
  0xf3   :  { %v462_v17 = vsel %vm460_vm9, %v461_v15, %v459_v14  ;;  %1107 = vmatpush.bf16.msrb.mxu1 %v1997_v32 }
  0xf4   :  { %v673_v19 = vpack.c.bf16 %v462_v17, %v462_v17  ;;  %v591_v17 = vadd.f32 %v2459_v48, %v543_v7 }
  0xf7   :  { %1108 = vmatpush.bf16.msrb.mxu1 %v1996_v33 }
  0xfb   :  { %1109 = vmatpush.bf16.msrb.mxu1 %v1995_v38 }
  0xfe   :  { %1826 = vmatmul.msk.bf16.gmra.mxu2 %vm689_vm3, %v673_v19  ;;  %v662_v19 = vpop.f32.mrf.mxu0 }
  0xff   :  { %1110 = vmatpush.bf16.msrb.mxu1 %v1994_v44  ;;  %v670_v30 = vadd.f32 %v662_v19, %v591_v17 }
 0x126   :  { %v2474_v21 = vpop.f32.mrf.mxu3 }
 0x127   :  { %v794_v34 = vmul.f32 %v2474_v21, %v2474_v21 }
 0x12e   :  { %v2476_v22 = vpop.f32.mrf.mxu3 }
 0x12f   :  { %v795_v45 = vmul.f32 %v2476_v22, %v2476_v22 }
 0x136   :  { %v2478_v23 = vpop.f32.mrf.mxu3 }
 0x137   :  { %v796_v55 = vmul.f32 %v2478_v23, %v2478_v23 }
 0x13e   :  { %v2480_v24 = vpop.f32.mrf.mxu3 }
 0x13f   :  { %v797_v16 = vmul.f32 %v2480_v24, %v2480_v24 }
 0x141   :  { %v800_v36 = vadd.f32 %v797_v16, %v794_v34 }
 0x146   :  { %v2488_v28 = vpop.f32.mrf.mxu3 }
 0x147   :  { %v798_v42 = vmul.f32 %v2488_v28, %v2488_v28 }
 0x149   :  { %v801_v47 = vadd.f32 %v798_v42, %v795_v45 }
 0x14e   :  { %v2496_v31 = vpop.f32.mrf.mxu3 }
 0x14f   :  { %v799_v52 = vmul.f32 %v2496_v31, %v2496_v31 }
 0x151   :  { %v802_v58 = vadd.f32 %v799_v52, %v796_v55 }
 0x156   :  { %v2508_v35 = vpop.f32.mrf.mxu3 }
 0x157   :  { %v803_v37 = vmul.f32 %v2508_v35, %v2508_v35 }
 0x159   :  { %v806_v41 = vadd.f32 %v803_v37, %v800_v36 }
 0x15b   :  { %v809_v43 = vmax.f32 %v806_v41, 1e-08 }
 0x15d   :  { %2088 = vrsqrt.f32 %v809_v43  ;;  %vm819_vm10 = vcmp.eq.f32.partialorder %v809_v43, inf  ;;  %v822_v8 = vand.u32 2147483648, %v809_v43  ;;  %vm821_vm11 = vcmp.eq.f32.partialorder %v809_v43, 0.0 }
 0x15e   :  { %v2522_v46 = vpop.f32.mrf.mxu3 }
 0x15f   :  { %v804_v40 = vmul.f32 %v2522_v46, %v2522_v46 }
 0x161   :  { %v807_v50 = vadd.f32 %v804_v40, %v801_v47 }
 0x163   :  { %v2089_v51 = vpop.eup %2088  ;;  %v810_v53 = vmax.f32 %v807_v50, 1e-08 }
 0x164   :  { %v813_v54 = vmul.f32 %v2089_v51, %v809_v43 }
 0x165   :  { %2090 = vrsqrt.f32 %v810_v53  ;;  %vm831_vm12 = vcmp.eq.f32.partialorder %v810_v53, inf  ;;  %v834_v32 = vand.u32 2147483648, %v810_v53  ;;  %vm833_vm13 = vcmp.eq.f32.partialorder %v810_v53, 0.0 }
 0x166   :  { %v814_v56 = vmul.f32 %v2089_v51, %v813_v54  ;;  %v2530_v57 = vpop.f32.mrf.mxu3 }
 0x167   :  { %v805_v59 = vmul.f32 %v2530_v57, %v2530_v57 }
 0x168   :  { %v815_v60 = vmul.f32 0.5, %v814_v56 }
 0x169   :  { %v808_v61 = vadd.f32 %v805_v59, %v802_v58 }
 0x16a   :  { %v816_v63 = vsub.f32 1.5, %v815_v60 }
 0x16b   :  { %v2091_v0 = vpop.eup %2090  ;;  %v811_v1 = vmax.f32 %v808_v61, 1e-08 }
 0x16c   :  { %v817_v2 = vmul.f32 %v2089_v51, %v816_v63  ;;  %v825_v3 = vmul.f32 %v2091_v0, %v810_v53 }
 0x16d   :  { %2092 = vrsqrt.f32 %v811_v1  ;;  %vm843_vm14 = vcmp.eq.f32.partialorder %v811_v1, inf  ;;  %v846_v50 = vand.u32 2147483648, %v811_v1  ;;  %vm845_vm15 = vcmp.eq.f32.partialorder %v811_v1, 0.0 }
 0x16e   :  { %v818_v4 = vmul.f32 %v817_v2, %v809_v43  ;;  %v826_v5 = vmul.f32 %v2091_v0, %v825_v3  ;;  %v792_v6 = vpop.f32.mrf.mxu3 }
 0x170   :  { %v820_v9 = vsel %vm819_vm10, %v809_v43, %v818_v4  ;;  %v827_v10 = vmul.f32 0.5, %v826_v5 }
 0x171   :  { %v823_v11 = vsel %vm821_vm11, %v822_v8, %v820_v9  ;;  %v711_v13 = vpop.f32.mrf.mxu2 }
 0x172   :  { %v1840_v14 = vmul.f32 -1.442695, %v823_v11  ;;  %v828_v15 = vsub.f32 1.5, %v827_v10  ;;  %v720_v34 = vadd.f32 %v711_v13, %v669_v27 }
 0x173   :  { %v2093_v12 = vpop.eup %2092 }
 0x174   :  { %2094 = vpow2.f32 %v1840_v14  ;;  %v829_v20 = vmul.f32 %v2091_v0, %v828_v15  ;;  %v837_v25 = vmul.f32 %v2093_v12, %v811_v1  ;;  %v914_v44 = vmax.f32 %v720_v34, 0.0 }
 0x176   :  { %v830_v29 = vmul.f32 %v829_v20, %v810_v53  ;;  %v838_v26 = vmul.f32 %v2093_v12, %v837_v25 }
 0x178   :  { %v832_v16 = vsel %vm831_vm12, %v810_v53, %v830_v29  ;;  %v839_v33 = vmul.f32 0.5, %v838_v26 }
 0x179   :  { %v835_v48 = vsel %vm833_vm13, %v834_v32, %v832_v16  ;;  %v713_v36 = vpop.f32.mrf.mxu2 }
 0x17a   :  { %v2095_v37 = vpop.eup %2094  ;;  %v1841_v38 = vmul.f32 -1.442695, %v835_v48  ;;  %v840_v41 = vsub.f32 1.5, %v839_v33  ;;  %v721_v39 = vadd.f32 %v713_v36, %v670_v30 }
 0x17b   :  { %v857_v42 = vadd.f32 1.0, %v2095_v37 }
 0x17c   :  { %2096 = vpow2.f32 %v1841_v38  ;;  %v841_v43 = vmul.f32 %v2093_v12, %v840_v41  ;;  %v915_v45 = vmax.f32 %v721_v39, 0.0 }
 0x17d   :  { %2098 = vrcp.f32 %v857_v42  ;;  %v871_v5 = vand.u32 2147483648, %v857_v42  ;;  %vm865_vm2 = vweird.f32 %v857_v42  ;;  %v869_v7 = vand.u32 2147483647, %v857_v42 }
 0x17e   :  { %v842_v47 = vmul.f32 %v841_v43, %v811_v1  ;;  %v1053_v40 = vpack.c.bf16 %v915_v45, %v914_v44 }
 0x17f   :  { %v872_v13 = vor.u32 1.1754944e-38, %v871_v5  ;;  %vm870_vm5 = vcmp.eq.f32.partialorder %v869_v7, 8.507059e+37 }
 0x180   :  { %v844_v51 = vsel %vm843_vm14, %v811_v1, %v842_v47  ;;  %1111 = vmatmul.bf16.vlgmr.msrb.gmra.mxu1 %v1053_v40 }
 0x181   :  { %v847_v52 = vsel %vm845_vm15, %v846_v50, %v844_v51  ;;  %v716_v53 = vpop.f32.mrf.mxu2 }
 0x182   :  { %v2097_v54 = vpop.eup %2096  ;;  %v1842_v55 = vmul.f32 -1.442695, %v847_v52  ;;  %v722_v61 = vadd.f32 %v716_v53, %v2471_v18 }
 0x183   :  { %v2099_v56 = vpop.eup %2098  ;;  %v858_v58 = vadd.f32 1.0, %v2097_v54 }
 0x184   :  { %v861_v59 = vmul.f32 %v2099_v56, %v857_v42  ;;  %2100 = vpow2.f32 %v1842_v55  ;;  %v916_v2 = vmax.f32 %v722_v61, 0.0  ;;  %vm866_vm1 = vweird.f32 %v2099_v56 }
 0x185   :  { %2102 = vrcp.f32 %v858_v58  ;;  %vm867_vm3 = vmor %vm865_vm2, %vm866_vm1  ;;  %v886_v11 = vand.u32 2147483648, %v858_v58  ;;  %v884_v14 = vand.u32 2147483647, %v858_v58  ;;  %vm880_vm6 = vweird.f32 %v858_v58 }
 0x186   :  { %v862_v60 = vsub.f32 1.0, %v861_v59  ;;  %v1054_v9 = vpack.c.bf16 %v916_v2, %v916_v2 }
 0x187   :  { %v887_v19 = vor.u32 1.1754944e-38, %v886_v11  ;;  %vm885_vm8 = vcmp.eq.f32.partialorder %v884_v14, 8.507059e+37 }
 0x188   :  { %v863_v62 = vmul.f32 %v2099_v56, %v862_v60 }
 0x189   :  { %v718_v63 = vpop.f32.mrf.mxu2 }
 0x18a   :  { %v2101_v0 = vpop.eup %2100  ;;  %v864_v4 = vadd.f32 %v2099_v56, %v863_v62 }
 0x18b   :  { %v2103_v3 = vpop.eup %2102  ;;  %v859_v1 = vadd.f32 1.0, %v2101_v0 }
 0x18c   :  { %v876_v6 = vmul.f32 %v2103_v3, %v858_v58  ;;  %v868_v10 = vsel %vm867_vm3, %v2099_v56, %v864_v4  ;;  %vm881_vm4 = vweird.f32 %v2103_v3  ;;  %v2002_v58 = vld [vmem:[%s2738_s17] sm:$0xff] }
 0x18d   :  { %2104 = vrcp.f32 %v859_v1  ;;  %v873_v15 = vsel %vm870_vm5, %v872_v13, %v868_v10  ;;  %vm882_vm7 = vmor %vm880_vm6, %vm881_vm4  ;;  %v901_v36 = vand.u32 2147483648, %v859_v1  ;;  %vm895_vm10 = vweird.f32 %v859_v1  ;;  %1148 = vmatpush.bf16.msrb.mxu2 %v2002_v58 }
 0x18e   :  { %v877_v8 = vsub.f32 1.0, %v876_v6  ;;  %v905_v27 = vmul.f32 %v873_v15, %v2474_v21  ;;  %v911_v26 = vmul.f32 %v873_v15, %v2508_v35  ;;  %v899_v37 = vand.u32 2147483647, %v859_v1 }
 0x18f   :  { %v902_v38 = vor.u32 1.1754944e-38, %v901_v36 }
 0x190   :  { %v878_v18 = vmul.f32 %v2103_v3, %v877_v8  ;;  %1116 = vmatmul.bf16.gmra.mxu1 %v1054_v9  ;;  %vm900_vm12 = vcmp.eq.f32.partialorder %v899_v37, 8.507059e+37 }
 0x192   :  { %v879_v12 = vadd.f32 %v2103_v3, %v878_v18 }
 0x193   :  { %v2105_v17 = vpop.eup %2104 }
 0x194   :  { %v883_v20 = vsel %vm882_vm7, %v2103_v3, %v879_v12  ;;  %v891_v25 = vmul.f32 %v2105_v17, %v859_v1  ;;  %vm896_vm9 = vweird.f32 %v2105_v17 }
 0x195   :  { %v888_v29 = vsel %vm885_vm8, %v887_v19, %v883_v20  ;;  %vm897_vm11 = vmor %vm895_vm10, %vm896_vm9 }
 0x196   :  { %v906_v49 = vmul.f32 %v888_v29, %v2476_v22  ;;  %v912_v30 = vmul.f32 %v888_v29, %v2522_v46  ;;  %v892_v32 = vsub.f32 1.0, %v891_v25  ;;  %v908_v46 = vmul.f32 %v873_v15, %v2480_v24 }
 0x197   :  { %v909_v42 = vmul.f32 %v888_v29, %v2488_v28 }
 0x198   :  { %v940_v16 = vpack.c.bf16 %v906_v49, %v905_v27  ;;  %v943_v33 = vpack.c.bf16 %v912_v30, %v911_v26  ;;  %v893_v34 = vmul.f32 %v2105_v17, %v892_v32 }
 0x19a   :  { %v894_v48 = vadd.f32 %v2105_v17, %v893_v34  ;;  %1847 = vmatmul.msk.bf16.vlgmr.msra.gmra.mxu0 %vm200_vm0, %v940_v16 }
 0x19c   :  { %v898_v21 = vsel %vm897_vm11, %v2105_v17, %v894_v48 }
 0x19d   :  { %v903_v35 = vsel %vm900_vm12, %v902_v38, %v898_v21 }
 0x19e   :  { %v907_v22 = vmul.f32 %v903_v35, %v2478_v23  ;;  %v910_v39 = vmul.f32 %v903_v35, %v2496_v31  ;;  %v913_v44 = vmul.f32 %v903_v35, %v2530_v57  ;;  %v2003_v23 = vld [vmem:[%s2737_s19] sm:$0xff] }
 0x19f   :  { %1195 = vmatpush.bf16.msra.mxu1 %v2003_v23 }
 0x1a0   :  { %v941_v41 = vpack.c.bf16 %v908_v46, %v907_v22  ;;  %v942_v43 = vpack.c.bf16 %v910_v39, %v909_v42  ;;  %v944_v45 = vpack.c.bf16 %v913_v44, %v913_v44 }
 0x1aa   :  { %1848 = vmatmul.msk.bf16.gmra.mxu0 %vm200_vm0, %v941_v41 }
 0x1ba   :  { %1849 = vmatmul.msk.bf16.gmra.mxu0 %vm200_vm0, %v942_v43 }
 0x1ca   :  { %1850 = vmatmul.msk.bf16.gmra.mxu0 %vm200_vm0, %v943_v33 }
 0x1da   :  { %1851 = vmatmul.msk.bf16.gmra.mxu0 %vm200_vm0, %v944_v45 }
 0x1fd   :  { %v2559_v24 = vpop.f32.mrf.mxu1 }
 0x205   :  { %v2561_v31 = vpop.f32.mrf.mxu1 }
 0x20d   :  { %v2563_v28 = vpop.f32.mrf.mxu1 }
 0x215   :  { %v1119_v47 = vpop.f32.mrf.mxu1 }
 0x217   :  { %v975_v40 = vpop.f32.mrf.mxu0 }
 0x218   :  { %v999_v60 = vmul.f32 %v975_v40, %v975_v40 }
 0x21f   :  { %v977_v50 = vpop.f32.mrf.mxu0 }
 0x220   :  { %v1162_v51 = vpack.c.bf16 %v977_v50, %v975_v40  ;;  %v1000_v4 = vmul.f32 %v977_v50, %v977_v50 }
 0x222   :  { %1894 = vmatmul.msk.bf16.vlgmr.msra.gmra.mxu1 %vm200_vm0, %v1162_v51 }
 0x227   :  { %v980_v57 = vpop.f32.mrf.mxu0 }
 0x228   :  { %v1001_v18 = vmul.f32 %v980_v57, %v980_v57 }
 0x22f   :  { %v982_v52 = vpop.f32.mrf.mxu0 }
 0x230   :  { %v1163_v53 = vpack.c.bf16 %v982_v52, %v980_v57  ;;  %v1002_v59 = vmul.f32 %v982_v52, %v982_v52 }
 0x232   :  { %1895 = vmatmul.msk.bf16.gmra.mxu1 %vm200_vm0, %v1163_v53  ;;  %v1005_v62 = vadd.f32 %v1002_v59, %v999_v60  ;;  %v2012_v59 = vld [vmem:[%s2739_s21 + $0x38] sm:$0xff]  ;;  %v2011_v60 = vld [vmem:[%s2739_s21 + $0x30] sm:$0xff] }
 0x233   :  { %1530 = vmatpush.bf16.msrb.mxu1 %v2012_v59  ;;  %2047 = vmatpush.bf16.msra.mxu3 %v2012_v59 }
 0x237   :  { %v985_v54 = vpop.f32.mrf.mxu0  ;;  %1531 = vmatpush.bf16.msrb.mxu1 %v2011_v60  ;;  %2048 = vmatpush.bf16.msra.mxu3 %v2011_v60 }
 0x238   :  { %v1003_v2 = vmul.f32 %v985_v54, %v985_v54 }
 0x23a   :  { %v1006_v5 = vadd.f32 %v1003_v2, %v1000_v4  ;;  %v2008_v4 = vld [vmem:[%s2739_s21 + $0x18] sm:$0xff] }
 0x23f   :  { %v987_v55 = vpop.f32.mrf.mxu0 }
 0x240   :  { %v1164_v56 = vpack.c.bf16 %v987_v55, %v985_v54  ;;  %v1004_v10 = vmul.f32 %v987_v55, %v987_v55 }
 0x242   :  { %1896 = vmatmul.msk.bf16.gmra.mxu1 %vm200_vm0, %v1164_v56  ;;  %v1007_v12 = vadd.f32 %v1004_v10, %v1001_v18 }
 0x247   :  { %v990_v61 = vpop.f32.mrf.mxu0 }
 0x248   :  { %v1008_v63 = vmul.f32 %v990_v61, %v990_v61 }
 0x24a   :  { %v1011_v0 = vadd.f32 %v1008_v63, %v1005_v62  ;;  %v2010_v62 = vld [vmem:[%s2739_s21 + $0x28] sm:$0xff]  ;;  %v2009_v63 = vld [vmem:[%s2739_s21 + $0x20] sm:$0xff] }
 0x24b   :  { %1532 = vmatpush.bf16.msrb.mxu1 %v2010_v62  ;;  %2049 = vmatpush.bf16.msra.mxu3 %v2010_v62 }
 0x24c   :  { %v1014_v3 = vmax.f32 %v1011_v0, 1e-08 }
 0x24e   :  { %2106 = vrsqrt.f32 %v1014_v3  ;;  %vm1024_vm13 = vcmp.eq.f32.partialorder %v1014_v3, inf  ;;  %v1027_v46 = vand.u32 2147483648, %v1014_v3  ;;  %vm1026_vm15 = vcmp.eq.f32.partialorder %v1014_v3, 0.0 }
 0x24f   :  { %v992_v1 = vpop.f32.mrf.mxu0  ;;  %1533 = vmatpush.bf16.msrb.mxu1 %v2009_v63  ;;  %2050 = vmatpush.bf16.msra.mxu3 %v2009_v63 }
 0x250   :  { %v1009_v6 = vmul.f32 %v992_v1, %v992_v1  ;;  %v1165_v7 = vpack.c.bf16 %v992_v1, %v990_v61 }
 0x252   :  { %v1012_v8 = vadd.f32 %v1009_v6, %v1006_v5  ;;  %1897 = vmatmul.msk.bf16.gmra.mxu1 %vm200_vm0, %v1165_v7  ;;  %v2007_v7 = vld [vmem:[%s2739_s21 + $0x10] sm:$0xff] }
 0x253   :  { %1534 = vmatpush.bf16.msrb.mxu1 %v2008_v4  ;;  %2051 = vmatpush.bf16.msra.mxu3 %v2008_v4 }
 0x254   :  { %v2107_v9 = vpop.eup %2106  ;;  %v1015_v11 = vmax.f32 %v1012_v8, 1e-08 }
 0x255   :  { %v1018_v13 = vmul.f32 %v2107_v9, %v1014_v3 }
 0x256   :  { %2108 = vrsqrt.f32 %v1015_v11  ;;  %vm1036_vm14 = vcmp.eq.f32.partialorder %v1015_v11, inf  ;;  %v1039_v41 = vand.u32 2147483648, %v1015_v11  ;;  %vm1038_vm1 = vcmp.eq.f32.partialorder %v1015_v11, 0.0 }
 0x257   :  { %v995_v14 = vpop.f32.mrf.mxu0  ;;  %v1019_v15 = vmul.f32 %v2107_v9, %v1018_v13  ;;  %1535 = vmatpush.bf16.msrb.mxu1 %v2007_v7  ;;  %2052 = vmatpush.bf16.msra.mxu3 %v2007_v7  ;;  %v2006_v13 = vld [vmem:[%s2739_s21 + $0x8] sm:$0xff] }
 0x258   :  { %v1010_v17 = vmul.f32 %v995_v14, %v995_v14  ;;  %v1166_v16 = vpack.c.bf16 %v995_v14, %v995_v14 }
 0x259   :  { %v1020_v19 = vmul.f32 0.5, %v1019_v15 }
 0x25a   :  { %v1013_v20 = vadd.f32 %v1010_v17, %v1007_v12  ;;  %v2005_v12 = vld [vmem:[%s2739_s21] sm:$0xff] }
 0x25b   :  { %v1021_v25 = vsub.f32 1.5, %v1020_v19  ;;  %1536 = vmatpush.bf16.msrb.mxu1 %v2006_v13  ;;  %2053 = vmatpush.bf16.msra.mxu3 %v2006_v13 }
 0x25c   :  { %v2109_v27 = vpop.eup %2108  ;;  %v1016_v29 = vmax.f32 %v1013_v20, 1e-08 }
 0x25d   :  { %v1030_v26 = vmul.f32 %v2109_v27, %v1015_v11  ;;  %v1022_v30 = vmul.f32 %v2107_v9, %v1021_v25 }
 0x25e   :  { %2110 = vrsqrt.f32 %v1016_v29  ;;  %vm1048_vm2 = vcmp.eq.f32.partialorder %v1016_v29, inf  ;;  %v1051_v51 = vand.u32 2147483648, %v1016_v29  ;;  %vm1050_vm3 = vcmp.eq.f32.partialorder %v1016_v29, 0.0 }
 0x25f   :  { %v997_v49 = vpop.f32.mrf.mxu0  ;;  %v1031_v32 = vmul.f32 %v2109_v27, %v1030_v26  ;;  %v1023_v34 = vmul.f32 %v1022_v30, %v1014_v3  ;;  %1537 = vmatpush.bf16.msrb.mxu1 %v2005_v12  ;;  %2054 = vmatpush.bf16.msra.mxu3 %v2005_v12 }
 0x261   :  { %v1032_v33 = vmul.f32 0.5, %v1031_v32  ;;  %v1025_v38 = vsel %vm1024_vm13, %v1014_v3, %v1023_v34 }
 0x262   :  { %1898 = vmatmul.msk.bf16.gmra.mxu1 %vm200_vm0, %v1166_v16  ;;  %v1028_v43 = vsel %vm1026_vm15, %v1027_v46, %v1025_v38 }
 0x263   :  { %v1033_v48 = vsub.f32 1.5, %v1032_v33 }
 0x264   :  { %v2111_v36 = vpop.eup %2110 }
 0x265   :  { %v1034_v37 = vmul.f32 %v2109_v27, %v1033_v48  ;;  %v1042_v21 = vmul.f32 %v2111_v36, %v1016_v29 }
 0x267   :  { %v1035_v35 = vmul.f32 %v1034_v37, %v1015_v11  ;;  %v1043_v22 = vmul.f32 %v2111_v36, %v1042_v21 }
 0x269   :  { %v1037_v39 = vsel %vm1036_vm14, %v1015_v11, %v1035_v35  ;;  %v1044_v42 = vmul.f32 0.5, %v1043_v22 }
 0x26a   :  { %v1040_v44 = vsel %vm1038_vm1, %v1039_v41, %v1037_v39 }
 0x26b   :  { %v1127_v45 = vpack.c.bf16 %v1040_v44, %v1028_v43  ;;  %v1045_v23 = vsub.f32 1.5, %v1044_v42 }
 0x26d   :  { %1888 = vmatmul.msk.bf16.vlgmr.msrb.gmra.mxu2 %vm200_vm0, %v1127_v45  ;;  %v1046_v47 = vmul.f32 %v2111_v36, %v1045_v23 }
 0x26f   :  { %v1047_v40 = vmul.f32 %v1046_v47, %v1016_v29 }
 0x271   :  { %v1049_v50 = vsel %vm1048_vm2, %v1016_v29, %v1047_v40 }
 0x272   :  { %v1052_v57 = vsel %vm1050_vm3, %v1051_v51, %v1049_v50  ;;  %v2004_v50 = vld [vmem:[%s2741_s20] sm:$0xff] }
 0x273   :  { %v1128_v52 = vpack.c.bf16 %v1052_v57, %v1052_v57  ;;  %1400 = vmatpush.bf16.msra.mxu2 %v2004_v50 }
 0x27d   :  { %1889 = vmatmul.msk.bf16.gmra.mxu2 %vm200_vm0, %v1128_v52  ;;  %v2080_v52 = vld [vmem:[%s2735_s18] ss:$0 sm:$0xff] }
 0x29f   :  { %v2575_v53 = vpop.f32.mrf.mxu1 }
 0x2a0   :  { %v1221_v2 = vmul.f32 %v2575_v53, %v2575_v53 }
 0x2a7   :  { %v2577_v54 = vpop.f32.mrf.mxu1 }
 0x2a8   :  { %v1222_v10 = vmul.f32 %v2577_v54, %v2577_v54 }
 0x2af   :  { %v2579_v55 = vpop.f32.mrf.mxu1 }
 0x2b0   :  { %v1223_v27 = vmul.f32 %v2579_v55, %v2579_v55 }
 0x2b7   :  { %v2581_v56 = vpop.f32.mrf.mxu1 }
 0x2b8   :  { %v1224_v0 = vmul.f32 %v2581_v56, %v2581_v56 }
 0x2ba   :  { %v1227_v1 = vadd.f32 %v1224_v0, %v1221_v2 }
 0x2bf   :  { %v2583_v58 = vpop.f32.mrf.mxu1 }
 0x2c0   :  { %v1225_v8 = vmul.f32 %v2583_v58, %v2583_v58 }
 0x2c2   :  { %v1228_v18 = vadd.f32 %v1225_v8, %v1222_v10 }
 0x2c7   :  { %v2591_v61 = vpop.f32.mrf.mxu1 }
 0x2c8   :  { %v1226_v19 = vmul.f32 %v2591_v61, %v2591_v61 }
 0x2ca   :  { %v1229_v49 = vadd.f32 %v1226_v19, %v1223_v27 }
 0x2cf   :  { %v2603_v3 = vpop.f32.mrf.mxu1 }
 0x2d0   :  { %v1230_v5 = vmul.f32 %v2603_v3, %v2603_v3 }
 0x2d2   :  { %v1233_v6 = vadd.f32 %v1230_v5, %v1227_v1  ;;  %v1124_v1 = vadd.f32 %v2080_v52, %v2559_v24 }
 0x2d4   :  { %v1236_v9 = vmax.f32 %v1233_v6, 1e-08  ;;  %v1125_v6 = vadd.f32 %v2080_v52, %v2561_v31  ;;  %v1126_v31 = vadd.f32 %v2080_v52, %v2563_v28 }
 0x2d6   :  { %2112 = vrsqrt.f32 %v1236_v9  ;;  %vm1246_vm4 = vcmp.eq.f32.partialorder %v1236_v9, inf  ;;  %v1249_v22 = vand.u32 2147483648, %v1236_v9  ;;  %vm1248_vm5 = vcmp.eq.f32.partialorder %v1236_v9, 0.0 }
 0x2d7   :  { %v2617_v11 = vpop.f32.mrf.mxu1 }
 0x2d8   :  { %v1231_v14 = vmul.f32 %v2617_v11, %v2617_v11 }
 0x2da   :  { %v1234_v15 = vadd.f32 %v1231_v14, %v1228_v18 }
 0x2dc   :  { %v2113_v17 = vpop.eup %2112  ;;  %v1237_v20 = vmax.f32 %v1234_v15, 1e-08 }
 0x2dd   :  { %v1240_v25 = vmul.f32 %v2113_v17, %v1236_v9 }
 0x2de   :  { %2114 = vrsqrt.f32 %v1237_v20  ;;  %vm1258_vm6 = vcmp.eq.f32.partialorder %v1237_v20, inf  ;;  %v1261_v51 = vand.u32 2147483648, %v1237_v20  ;;  %vm1260_vm7 = vcmp.eq.f32.partialorder %v1237_v20, 0.0 }
 0x2df   :  { %v1241_v29 = vmul.f32 %v2113_v17, %v1240_v25  ;;  %v2631_v26 = vpop.f32.mrf.mxu1 }
 0x2e0   :  { %v1232_v30 = vmul.f32 %v2631_v26, %v2631_v26 }
 0x2e1   :  { %v1242_v32 = vmul.f32 0.5, %v1241_v29 }
 0x2e2   :  { %v1235_v16 = vadd.f32 %v1232_v30, %v1229_v49 }
 0x2e3   :  { %v1243_v33 = vsub.f32 1.5, %v1242_v32 }
 0x2e4   :  { %v2115_v34 = vpop.eup %2114  ;;  %v1238_v48 = vmax.f32 %v1235_v16, 1e-08 }
 0x2e5   :  { %v1244_v36 = vmul.f32 %v2113_v17, %v1243_v33  ;;  %v1252_v37 = vmul.f32 %v2115_v34, %v1237_v20 }
 0x2e6   :  { %2116 = vrsqrt.f32 %v1238_v48  ;;  %vm1270_vm8 = vcmp.eq.f32.partialorder %v1238_v48, inf  ;;  %vm1272_vm9 = vcmp.eq.f32.partialorder %v1238_v48, 0.0 }
 0x2e7   :  { %v1245_v21 = vmul.f32 %v1244_v36, %v1236_v9  ;;  %v1253_v38 = vmul.f32 %v2115_v34, %v1252_v37  ;;  %v1219_v35 = vpop.f32.mrf.mxu1 }
 0x2e9   :  { %v1247_v46 = vsel %vm1246_vm4, %v1236_v9, %v1245_v21  ;;  %v1254_v41 = vmul.f32 0.5, %v1253_v38  ;;  %v1273_v9 = vand.u32 2147483648, %v1238_v48 }
 0x2ea   :  { %v1250_v39 = vsel %vm1248_vm5, %v1249_v22, %v1247_v46 }
 0x2eb   :  { %v1899_v42 = vmul.f32 -1.442695, %v1250_v39  ;;  %v1255_v43 = vsub.f32 1.5, %v1254_v41 }
 0x2ec   :  { %v2117_v44 = vpop.eup %2116 }
 0x2ed   :  { %2118 = vpow2.f32 %v1899_v42  ;;  %v1256_v45 = vmul.f32 %v2115_v34, %v1255_v43  ;;  %v1264_v23 = vmul.f32 %v2117_v44, %v1238_v48 }
 0x2ef   :  { %v1257_v47 = vmul.f32 %v1256_v45, %v1237_v20  ;;  %v1265_v40 = vmul.f32 %v2117_v44, %v1264_v23 }
 0x2f0   :  { %v1150_v57 = vpop.f32.mrf.mxu2 }
 0x2f1   :  { %v1259_v59 = vsel %vm1258_vm6, %v1237_v20, %v1257_v47  ;;  %v1266_v60 = vmul.f32 0.5, %v1265_v40  ;;  %v1159_v8 = vadd.f32 %v1150_v57, %v1124_v1 }
 0x2f2   :  { %v1262_v62 = vsel %vm1260_vm7, %v1261_v51, %v1259_v59 }
 0x2f3   :  { %v2119_v63 = vpop.eup %2118  ;;  %v1900_v0 = vmul.f32 -1.442695, %v1262_v62  ;;  %v1267_v2 = vsub.f32 1.5, %v1266_v60  ;;  %v1341_v17 = vmax.f32 %v1159_v8, 0.0 }
 0x2f4   :  { %v1284_v4 = vadd.f32 1.0, %v2119_v63 }
 0x2f5   :  { %2120 = vpow2.f32 %v1900_v0  ;;  %v1268_v5 = vmul.f32 %v2117_v44, %v1267_v2 }
 0x2f6   :  { %2122 = vrcp.f32 %v1284_v4  ;;  %v1298_v37 = vand.u32 2147483648, %v1284_v4  ;;  %vm1292_vm11 = vweird.f32 %v1284_v4  ;;  %v1296_v35 = vand.u32 2147483647, %v1284_v4 }
 0x2f7   :  { %v1269_v7 = vmul.f32 %v1268_v5, %v1238_v48 }
 0x2f8   :  { %v1152_v10 = vpop.f32.mrf.mxu2  ;;  %v1299_v39 = vor.u32 1.1754944e-38, %v1298_v37  ;;  %vm1297_vm14 = vcmp.eq.f32.partialorder %v1296_v35, 8.507059e+37 }
 0x2f9   :  { %v1271_v13 = vsel %vm1270_vm8, %v1238_v48, %v1269_v7  ;;  %v1160_v18 = vadd.f32 %v1152_v10, %v1125_v6 }
 0x2fa   :  { %v1274_v14 = vsel %vm1272_vm9, %v1273_v9, %v1271_v13 }
 0x2fb   :  { %v2121_v15 = vpop.eup %2120  ;;  %v1901_v12 = vmul.f32 -1.442695, %v1274_v14  ;;  %v1342_v19 = vmax.f32 %v1160_v18, 0.0 }
 0x2fc   :  { %v2123_v20 = vpop.eup %2122  ;;  %v1285_v24 = vadd.f32 1.0, %v2121_v15 }
 0x2fd   :  { %v1288_v25 = vmul.f32 %v2123_v20, %v1284_v4  ;;  %2124 = vpow2.f32 %v1901_v12  ;;  %v1480_v27 = vpack.c.bf16 %v1342_v19, %v1341_v17  ;;  %vm1293_vm10 = vweird.f32 %v2123_v20 }
 0x2fe   :  { %2126 = vrcp.f32 %v1285_v24  ;;  %vm1294_vm12 = vmor %vm1292_vm11, %vm1293_vm10  ;;  %v1313_v46 = vand.u32 2147483648, %v1285_v24  ;;  %v1311_v43 = vand.u32 2147483647, %v1285_v24  ;;  %vm1307_vm15 = vweird.f32 %v1285_v24 }
 0x2ff   :  { %v1289_v29 = vsub.f32 1.0, %v1288_v25  ;;  %1538 = vmatmul.bf16.vlgmr.msrb.gmra.mxu1 %v1480_v27 }
 0x300   :  { %v1155_v49 = vpop.f32.mrf.mxu2  ;;  %v1314_v47 = vor.u32 1.1754944e-38, %v1313_v46  ;;  %vm1312_vm2 = vcmp.eq.f32.partialorder %v1311_v43, 8.507059e+37 }
 0x301   :  { %v1290_v30 = vmul.f32 %v2123_v20, %v1289_v29  ;;  %v1161_v32 = vadd.f32 %v1155_v49, %v1126_v31 }
 0x303   :  { %v2125_v16 = vpop.eup %2124  ;;  %v1343_v33 = vmax.f32 %v1161_v32, 0.0  ;;  %v1291_v48 = vadd.f32 %v2123_v20, %v1290_v30 }
 0x304   :  { %v2127_v34 = vpop.eup %2126  ;;  %v1286_v36 = vadd.f32 1.0, %v2125_v16 }
 0x305   :  { %v1303_v21 = vmul.f32 %v2127_v34, %v1285_v24  ;;  %v1481_v38 = vpack.c.bf16 %v1343_v33, %v1343_v33  ;;  %v1295_v28 = vsel %vm1294_vm12, %v2123_v20, %v1291_v48  ;;  %vm1308_vm13 = vweird.f32 %v2127_v34 }
 0x306   :  { %2128 = vrcp.f32 %v1286_v36  ;;  %v1300_v44 = vsel %vm1297_vm14, %v1299_v39, %v1295_v28  ;;  %vm1309_vm1 = vmor %vm1307_vm15, %vm1308_vm13  ;;  %v1328_v1 = vand.u32 2147483648, %v1286_v36  ;;  %vm1322_vm4 = vweird.f32 %v1286_v36 }
 0x307   :  { %v1304_v22 = vsub.f32 1.0, %v1303_v21  ;;  %1543 = vmatmul.bf16.vlgmr.msra.gmra.mxu3 %v1481_v38  ;;  %v1332_v51 = vmul.f32 %v1300_v44, %v2575_v53  ;;  %v1338_v52 = vmul.f32 %v1300_v44, %v2603_v3  ;;  %v1326_v5 = vand.u32 2147483647, %v1286_v36 }
 0x308   :  { %v1157_v41 = vpop.f32.mrf.mxu2  ;;  %v1329_v6 = vor.u32 1.1754944e-38, %v1328_v1  ;;  %vm1663_vm13 = vcmask 125952  }
 0x309   :  { %v1305_v42 = vmul.f32 %v2127_v34, %v1304_v22  ;;  %vm1327_vm6 = vcmp.eq.f32.partialorder %v1326_v5, 8.507059e+37 }
 0x30b   :  { %v1306_v45 = vadd.f32 %v2127_v34, %v1305_v42 }
 0x30c   :  { %v2129_v23 = vpop.eup %2128 }
 0x30d   :  { %v1310_v40 = vsel %vm1309_vm1, %v2127_v34, %v1306_v45  ;;  %v1318_v50 = vmul.f32 %v2129_v23, %v1286_v36  ;;  %vm1323_vm3 = vweird.f32 %v2129_v23 }
 0x30e   :  { %v1315_v57 = vsel %vm1312_vm2, %v1314_v47, %v1310_v40  ;;  %vm1324_vm5 = vmor %vm1322_vm4, %vm1323_vm3 }
 0x30f   :  { %v1333_v59 = vmul.f32 %v1315_v57, %v2577_v54  ;;  %v1339_v60 = vmul.f32 %v1315_v57, %v2617_v11  ;;  %v1319_v62 = vsub.f32 1.0, %v1318_v50  ;;  %v1335_v11 = vmul.f32 %v1300_v44, %v2581_v56  ;;  %v2014_v56 = vld [vmem:[%s2743_s24] sm:$0xff] }
 0x310   :  { %v1336_v9 = vmul.f32 %v1315_v57, %v2583_v58  ;;  %1622 = vmatpush.bf16.msrb.mxu3 %v2014_v56 }
 0x311   :  { %v1367_v63 = vpack.c.bf16 %v1333_v59, %v1332_v51  ;;  %v1370_v0 = vpack.c.bf16 %v1339_v60, %v1338_v52  ;;  %v1320_v2 = vmul.f32 %v2129_v23, %v1319_v62 }
 0x313   :  { %v1321_v4 = vadd.f32 %v2129_v23, %v1320_v2  ;;  %1906 = vmatmul.msk.bf16.vlgmr.msra.gmra.mxu2 %vm200_vm0, %v1367_v63 }
 0x315   :  { %v1325_v53 = vsel %vm1324_vm5, %v2129_v23, %v1321_v4 }
 0x316   :  { %v1330_v3 = vsel %vm1327_vm6, %v1329_v6, %v1325_v53 }
 0x317   :  { %v1334_v54 = vmul.f32 %v1330_v3, %v2579_v55  ;;  %v1337_v8 = vmul.f32 %v1330_v3, %v2591_v61  ;;  %v1340_v13 = vmul.f32 %v1330_v3, %v2631_v26  ;;  %v2013_v55 = vld [vmem:[%s2742_s22] sm:$0xff] }
 0x318   :  { %1575 = vmatpush.bf16.msrb.mxu0 %v2013_v55 }
 0x319   :  { %v1368_v7 = vpack.c.bf16 %v1335_v11, %v1334_v54  ;;  %v1369_v10 = vpack.c.bf16 %v1337_v8, %v1336_v9  ;;  %v1371_v18 = vpack.c.bf16 %v1340_v13, %v1340_v13 }
 0x323   :  { %1907 = vmatmul.msk.bf16.gmra.mxu2 %vm200_vm0, %v1368_v7 }
 0x333   :  { %1908 = vmatmul.msk.bf16.gmra.mxu2 %vm200_vm0, %v1369_v10 }
 0x343   :  { %1909 = vmatmul.msk.bf16.gmra.mxu2 %vm200_vm0, %v1370_v0 }
 0x353   :  { %1910 = vmatmul.msk.bf16.gmra.mxu2 %vm200_vm0, %v1371_v18 }
 0x38a   :  { %v2664_v58 = vpop.f32.mrf.mxu3 }
 0x392   :  { %v1546_v61 = vpop.f32.mrf.mxu3 }
 0x396   :  { %v1402_v14 = vpop.f32.mrf.mxu2 }
 0x397   :  { %v1426_v31 = vmul.f32 %v1402_v14, %v1402_v14 }
 0x39e   :  { %v1404_v15 = vpop.f32.mrf.mxu2 }
 0x39f   :  { %v1589_v12 = vpack.c.bf16 %v1404_v15, %v1402_v14  ;;  %v1427_v34 = vmul.f32 %v1404_v15, %v1404_v15 }
 0x3a1   :  { %1953 = vmatmul.msk.bf16.vlgmr.msrb.gmra.mxu3 %vm200_vm0, %v1589_v12 }
 0x3a6   :  { %v1407_v26 = vpop.f32.mrf.mxu2 }
 0x3a7   :  { %v1428_v41 = vmul.f32 %v1407_v26, %v1407_v26 }
 0x3ae   :  { %v1409_v17 = vpop.f32.mrf.mxu2 }
 0x3af   :  { %v1590_v19 = vpack.c.bf16 %v1409_v17, %v1407_v26  ;;  %v1429_v27 = vmul.f32 %v1409_v17, %v1409_v17 }
 0x3b1   :  { %1954 = vmatmul.msk.bf16.gmra.mxu3 %vm200_vm0, %v1590_v19  ;;  %v1432_v49 = vadd.f32 %v1429_v27, %v1426_v31 }
 0x3b6   :  { %v1412_v20 = vpop.f32.mrf.mxu2 }
 0x3b7   :  { %v1430_v16 = vmul.f32 %v1412_v20, %v1412_v20 }
 0x3b9   :  { %v1433_v36 = vadd.f32 %v1430_v16, %v1427_v34 }
 0x3be   :  { %v1414_v24 = vpop.f32.mrf.mxu2 }
 0x3bf   :  { %v1591_v25 = vpack.c.bf16 %v1414_v24, %v1412_v20  ;;  %v1431_v22 = vmul.f32 %v1414_v24, %v1414_v24 }
 0x3c1   :  { %1955 = vmatmul.msk.bf16.gmra.mxu3 %vm200_vm0, %v1591_v25  ;;  %v1434_v43 = vadd.f32 %v1431_v22, %v1428_v41 }
 0x3c6   :  { %v1417_v29 = vpop.f32.mrf.mxu2 }
 0x3c7   :  { %v1435_v30 = vmul.f32 %v1417_v29, %v1417_v29 }
 0x3c9   :  { %v1438_v32 = vadd.f32 %v1435_v30, %v1432_v49 }
 0x3cb   :  { %v1441_v33 = vmax.f32 %v1438_v32, 1e-08 }
 0x3cd   :  { %2130 = vrsqrt.f32 %v1441_v33  ;;  %vm1451_vm7 = vcmp.eq.f32.partialorder %v1441_v33, inf  ;;  %v1454_v3 = vand.u32 2147483648, %v1441_v33  ;;  %vm1453_vm9 = vcmp.eq.f32.partialorder %v1441_v33, 0.0 }
 0x3ce   :  { %v1419_v48 = vpop.f32.mrf.mxu2 }
 0x3cf   :  { %v1436_v37 = vmul.f32 %v1419_v48, %v1419_v48  ;;  %v1592_v21 = vpack.c.bf16 %v1419_v48, %v1417_v29  ;;  %v1539_v48 = vpop.f32.mrf.mxu1 }
 0x3d1   :  { %v1439_v38 = vadd.f32 %v1436_v37, %v1433_v36  ;;  %1956 = vmatmul.msk.bf16.gmra.mxu3 %vm200_vm0, %v1592_v21 }
 0x3d3   :  { %v2131_v35 = vpop.eup %2130  ;;  %v1442_v28 = vmax.f32 %v1439_v38, 1e-08  ;;  %v2081_v38 = vld [vmem:[%s2778_s0] ss:$0 sm:$0xff] }
 0x3d4   :  { %v1445_v46 = vmul.f32 %v2131_v35, %v1441_v33 }
 0x3d5   :  { %2132 = vrsqrt.f32 %v1442_v28  ;;  %vm1463_vm8 = vcmp.eq.f32.partialorder %v1442_v28, inf  ;;  %v1466_v54 = vand.u32 2147483648, %v1442_v28  ;;  %vm1465_vm10 = vcmp.eq.f32.partialorder %v1442_v28, 0.0 }
 0x3d6   :  { %v1422_v39 = vpop.f32.mrf.mxu2  ;;  %v1446_v42 = vmul.f32 %v2131_v35, %v1445_v46 }
 0x3d7   :  { %v1437_v44 = vmul.f32 %v1422_v39, %v1422_v39  ;;  %v1593_v60 = vpack.c.bf16 %v1422_v39, %v1422_v39  ;;  %v1541_v22 = vpop.f32.mrf.mxu1 }
 0x3d8   :  { %v1447_v45 = vmul.f32 0.5, %v1446_v42  ;;  %v1552_v46 = vadd.f32 %v2081_v38, %v1541_v22 }
 0x3d9   :  { %v1440_v23 = vadd.f32 %v1437_v44, %v1434_v43  ;;  %v1553_v44 = vadd.f32 %v2081_v38, %v2664_v58 }
 0x3da   :  { %v1448_v47 = vsub.f32 1.5, %v1447_v45 }
 0x3db   :  { %v2133_v40 = vpop.eup %2132  ;;  %v1443_v50 = vmax.f32 %v1440_v23, 1e-08 }
 0x3dc   :  { %v1457_v51 = vmul.f32 %v2133_v40, %v1442_v28  ;;  %v1449_v52 = vmul.f32 %v2131_v35, %v1448_v47 }
 0x3dd   :  { %2134 = vrsqrt.f32 %v1443_v50  ;;  %vm1475_vm11 = vcmp.eq.f32.partialorder %v1443_v50, inf  ;;  %v1478_v61 = vand.u32 2147483648, %v1443_v50  ;;  %vm1477_vm12 = vcmp.eq.f32.partialorder %v1443_v50, 0.0 }
 0x3de   :  { %v1424_v57 = vpop.f32.mrf.mxu2  ;;  %v1458_v59 = vmul.f32 %v2133_v40, %v1457_v51  ;;  %v1450_v63 = vmul.f32 %v1449_v52, %v1441_v33 }
 0x3e0   :  { %v1459_v62 = vmul.f32 0.5, %v1458_v59  ;;  %v1452_v5 = vsel %vm1451_vm7, %v1441_v33, %v1450_v63 }
 0x3e1   :  { %1957 = vmatmul.msk.bf16.gmra.mxu3 %vm200_vm0, %v1593_v60  ;;  %v1455_v8 = vsel %vm1453_vm9, %v1454_v3, %v1452_v5 }
 0x3e2   :  { %v1460_v0 = vsub.f32 1.5, %v1459_v62 }
 0x3e3   :  { %v2135_v2 = vpop.eup %2134 }
 0x3e4   :  { %v1461_v4 = vmul.f32 %v2133_v40, %v1460_v0  ;;  %v1469_v1 = vmul.f32 %v2135_v2, %v1443_v50 }
 0x3e6   :  { %v1462_v53 = vmul.f32 %v1461_v4, %v1442_v28  ;;  %v1470_v6 = vmul.f32 %v2135_v2, %v1469_v1 }
 0x3e8   :  { %v1464_v11 = vsel %vm1463_vm8, %v1442_v28, %v1462_v53  ;;  %v1471_v7 = vmul.f32 0.5, %v1470_v6  ;;  %v1551_v28 = vadd.f32 %v2081_v38, %v1539_v48 }
 0x3e9   :  { %v1467_v9 = vsel %vm1465_vm10, %v1466_v54, %v1464_v11 }
 0x3ea   :  { %v1554_v10 = vpack.c.bf16 %v1467_v9, %v1455_v8  ;;  %v1472_v13 = vsub.f32 1.5, %v1471_v7 }
 0x3ec   :  { %1947 = vmatmul.msk.bf16.vlgmr.msrb.gmra.mxu0 %vm200_vm0, %v1554_v10  ;;  %v1473_v18 = vmul.f32 %v2135_v2, %v1472_v13 }
 0x3ee   :  { %v1474_v55 = vmul.f32 %v1473_v18, %v1443_v50 }
 0x3f0   :  { %v1476_v56 = vsel %vm1475_vm11, %v1443_v50, %v1474_v55 }
 0x3f1   :  { %v1479_v14 = vsel %vm1477_vm12, %v1478_v61, %v1476_v56 }
 0x3f2   :  { %v1555_v15 = vpack.c.bf16 %v1479_v14, %v1479_v14 }
 0x3fc   :  { %1948 = vmatmul.msk.bf16.gmra.mxu0 %vm200_vm0, %v1555_v15 }
 0x424   :  { %v1624_v12 = vpop.f32.mrf.mxu3 }
 0x425   :  { %v1654_v26 = vpack.c.bf16 %v1624_v12, %v1624_v12 }
 0x427   :  { %1664 = vst.msk [vmem:[%s2744_s26] sm:$0xf] %vm1663_vm13, %v1654_v26 }
 0x42c   :  { %v1626_v17 = vpop.f32.mrf.mxu3 }
 0x42d   :  { %v1655_v19 = vpack.c.bf16 %v1626_v17, %v1626_v17 }
 0x42f   :  { %1665 = vst.msk [vmem:[%s2744_s26 + $0x4] sm:$0xf] %vm1663_vm13, %v1655_v19 }
 0x434   :  { %v1629_v20 = vpop.f32.mrf.mxu3 }
 0x435   :  { %v1656_v24 = vpack.c.bf16 %v1629_v20, %v1629_v20 }
 0x437   :  { %1666 = vst.msk [vmem:[%s2744_s26 + $0x8] sm:$0xf] %vm1663_vm13, %v1656_v24 }
 0x43c   :  { %v1631_v25 = vpop.f32.mrf.mxu3 }
 0x43d   :  { %v1657_v27 = vpack.c.bf16 %v1631_v25, %v1631_v25 }
 0x43f   :  { %1667 = vst.msk [vmem:[%s2744_s26 + $0xc] sm:$0xf] %vm1663_vm13, %v1657_v27 }
 0x444   :  { %v1634_v31 = vpop.f32.mrf.mxu3 }
 0x445   :  { %v1658_v29 = vpack.c.bf16 %v1634_v31, %v1634_v31 }
 0x447   :  { %1668 = vst.msk [vmem:[%s2744_s26 + $0x10] sm:$0xf] %vm1663_vm13, %v1658_v29 }
 0x44c   :  { %v1636_v49 = vpop.f32.mrf.mxu3 }
 0x44d   :  { %v1659_v30 = vpack.c.bf16 %v1636_v49, %v1636_v49 }
 0x44f   :  { %1669 = vst.msk [vmem:[%s2744_s26 + $0x14] sm:$0xf] %vm1663_vm13, %v1659_v30 }
 0x454   :  { %v1639_v32 = vpop.f32.mrf.mxu3 }
 0x455   :  { %v1660_v16 = vpack.c.bf16 %v1639_v32, %v1639_v32 }
 0x457   :  { %1670 = vst.msk [vmem:[%s2744_s26 + $0x18] sm:$0xf] %vm1663_vm13, %v1660_v16 }
 0x45c   :  { %v1641_v33 = vpop.f32.mrf.mxu3 }
 0x45d   :  { %v1661_v34 = vpack.c.bf16 %v1641_v33, %v1641_v33 }
 0x45f   :  { %1671 = vst.msk [vmem:[%s2744_s26 + $0x1c] sm:$0xf] %vm1663_vm13, %v1661_v34 }
 0x464   :  { %v1644_v36 = vpop.f32.mrf.mxu3 }
 0x465   :  { %v1662_v37 = vpack.c.bf16 %v1644_v36, %v1644_v36 }
 0x467   :  { %1672 = vst.msk [vmem:[%s2744_s26 + $0x20] sm:$0xf] %vm1663_vm13, %v1662_v37 }
 0x469   :  { %v1577_v21 = vpop.f32.mrf.mxu0 }
 0x46a   :  { %v1586_v39 = vadd.f32 %v1577_v21, %v1551_v28 }
 0x46c   :  { %v1646_v35 = vpop.f32.mrf.mxu3 }
 0x471   :  { %v1579_v41 = vpop.f32.mrf.mxu0 }
 0x472   :  { %v1587_v42 = vadd.f32 %v1579_v41, %v1552_v46 }
 0x474   :  { %v2034_v43 = vpack.c.bf16 %v1587_v42, %v1586_v39 }
 0x476   :  { %2035 = vst [vmem:[%s2745_s25] sm:$0xff] %v2034_v43  }
 0x479   :  { %v1582_v45 = vpop.f32.mrf.mxu0 }
 0x47a   :  { %v1588_v23 = vadd.f32 %v1582_v45, %v1553_v44 }
 0x47c   :  { %v1650_v47 = vpack.c.bf16 %v1588_v23, %v1588_v23 }
 0x47e   :  { %1653 = vst [vmem:[%s2745_s25 + $0x8] sm:$0xf] %v1650_v47 }
 0x481   :  { %v1584_v40 = vpop.f32.mrf.mxu0 }

// kernel: forward.17
= control target key start
LH: loop header
LB: loop body
LE: loop exit
PB: predicated region body
PF: predicated region fallthrough
CT: control target
= control target key end

     0   :  { %v1642_v0 = vmov 0   ;;  %vm130_vm0 = vcmask 130048   ;;  %v1643_v42 = vmov 16.0   ;;  %vm519_vm10 = vcmask 261120   ;;  %s2285_s4 = inlined_call_operand.vmem [shape: f32[8,1], index: 4, kind: input, shape index: {}]   ;;  %s2286_s1 = inlined_call_operand.vmem [shape: bf16[3,8,16], index: 1, kind: input, shape index: {}]   ;;  %s2287_s0 = inlined_call_operand.vmem [shape: bf16[8,128], index: 0, kind: input, shape index: {}]   ;;  %s2288_s2 = inlined_call_operand.vmem [shape: f32[8,128], index: 2, kind: input, shape index: {}]   ;;  %s2289_s3 = inlined_call_operand.vmem [shape: f32[3,8,16], index: 3, kind: input, shape index: {}]   ;;  %s2290_s5 = inlined_call_operand.vmem [shape: f32[1,128], index: 5, kind: input, shape index: {}]   ;;  %s2291_s6 = inlined_call_operand.vmem [shape: f32[1,128], index: 6, kind: input, shape index: {}]   ;;  %s2292_s8 = inlined_call_operand.vmem [shape: bf16[128,512], index: 8, kind: input, shape index: {}]   ;;  %s2293_s7 = inlined_call_operand.vmem [shape: bf16[16,32], index: 7, kind: input, shape index: {}]   ;;  %s2294_s9 = inlined_call_operand.vmem [shape: bf16[32,512], index: 9, kind: input, shape index: {}]   ;;  %s2295_s10 = inlined_call_operand.vmem [shape: f32[1,512], index: 10, kind: input, shape index: {}]   ;;  %s2296_s11 = inlined_call_operand.vmem [shape: bf16[32,32], index: 11, kind: input, shape index: {}]   ;;  %s2297_s13 = inlined_call_operand.vmem [shape: bf16[512,128], index: 13, kind: input, shape index: {}]   ;;  %s2298_s12 = inlined_call_operand.vmem [shape: bf16[32,32], index: 12, kind: input, shape index: {}]   ;;  %s2299_s15 = inlined_call_operand.vmem [shape: f32[1,128], index: 15, kind: input, shape index: {}]   ;;  %s2300_s16 = inlined_call_operand.vmem [shape: bf16[32,16], index: 16, kind: input, shape index: {}]   ;;  %s2301_s14 = inlined_call_operand.vmem [shape: bf16[32,128], index: 14, kind: input, shape index: {}]   ;;  %s2302_s17 = inlined_call_operand.vmem [shape: f32[1,128], index: 17, kind: input, shape index: {}]   ;;  %s2303_s18 = inlined_call_operand.vmem [shape: f32[1,128], index: 18, kind: input, shape index: {}]   ;;  %s2304_s20 = inlined_call_operand.vmem [shape: bf16[3,8,16], index: 20, kind: output, shape index: {1}]   ;;  %s2305_s19 = inlined_call_operand.vmem [shape: bf16[8,128], index: 19, kind: output, shape index: {0}]  }
   0x1   :  { %2308 = sst [smem:[#allocation2_spill]] %s2285_s4  ;;  %1616 = vset.pattern.permute.xlu0 %v1642_v0  ;;  %v1558_v30 = vld [vmem:[%s2292_s8 + $0xe4] sm:$0xf]  ;;  %v1313_v31 = vld [vmem:[%s2292_s8 + $0xf0] sm:$0xf0]  ;;  %1622 = vrcp.f32 %v1643_v42 }
   0x2   :  { %2309 = sst [smem:[#allocation3_spill]] %s2286_s1  ;;  %v1319_v32 = vld [vmem:[%s2292_s8 + $0xe8] sm:$0xf]  ;;  %v1316_v33 = vor.u32 %v1558_v30, %v1313_v31  ;;  %v1561_v34 = vld [vmem:[%s2292_s8 + $0xf4] sm:$0xf0] }
   0x3   :  { %2310 = sst [smem:[#allocation4_spill]] %s2287_s0  ;;  %v1559_v35 = vld [vmem:[%s2292_s8 + $0xec] sm:$0xf]  ;;  %v1321_v36 = vld [vmem:[%s2292_s8 + $0xf8] sm:$0xf0]  ;;  %v1320_v37 = vor.u32 %v1561_v34, %v1319_v32 }
   0x4   :  { %2311 = sst [smem:[#allocation5_spill]] %s2288_s2  ;;  %v1324_v38 = vor.u32 %v1559_v35, %v1321_v36  ;;  %426 = vmatpush.bf16.msra.mxu2 %v1316_v33  ;;  %v1554_v39 = vld [vmem:[%s2292_s8 + $0xc4] sm:$0xf]  ;;  %v1297_v40 = vld [vmem:[%s2292_s8 + $0xd0] sm:$0xf0] }
   0x5   :  { %2312 = sst [smem:[#allocation6_spill]] %s2289_s3  ;;  %439 = vmatpush.bf16.msra.mxu3 %v1320_v37  ;;  %v1303_v41 = vld [vmem:[%s2292_s8 + $0xc8] sm:$0xf]  ;;  %v1300_v43 = vor.u32 %v1554_v39, %v1297_v40  ;;  %v1557_v44 = vld [vmem:[%s2292_s8 + $0xd4] sm:$0xf0] }
   0x6   :  { %2313 = sst [smem:[#allocation7_spill]] %s2305_s19  ;;  %452 = vmatpush.bf16.msra.mxu0 %v1324_v38  ;;  %v1555_v45 = vld [vmem:[%s2292_s8 + $0xcc] sm:$0xf]  ;;  %v1305_v46 = vld [vmem:[%s2292_s8 + $0xd8] sm:$0xf0]  ;;  %v1304_v47 = vor.u32 %v1557_v44, %v1303_v41 }
   0x7   :  { %s2314_s23 = sld [smem:[#allocation2_spill]]  ;;  %v1308_v48 = vor.u32 %v1555_v45, %v1305_v46  ;;  %v1550_v49 = vld [vmem:[%s2292_s8 + $0xa4] sm:$0xf]  ;;  %v1281_v50 = vld [vmem:[%s2292_s8 + $0xb0] sm:$0xf0]  ;;  %v1845_v58 = vpop.eup %1622 }
   0x8   :  { %s2315_s25 = sld [smem:[#allocation3_spill]]  ;;  %427 = vmatpush.bf16.msra.mxu2 %v1300_v43  ;;  %v1287_v51 = vld [vmem:[%s2292_s8 + $0xa8] sm:$0xf]  ;;  %v1284_v52 = vor.u32 %v1550_v49, %v1281_v50  ;;  %v1553_v53 = vld [vmem:[%s2292_s8 + $0xb4] sm:$0xf0]  ;;  %vm139_vm1 = vweird.f32 %v1845_v58 }
   0x9   :  { %s2316_s27 = sld [smem:[#allocation4_spill]]  ;;  %440 = vmatpush.bf16.msra.mxu3 %v1304_v47  ;;  %v1551_v54 = vld [vmem:[%s2292_s8 + $0xac] sm:$0xf]  ;;  %v1289_v55 = vld [vmem:[%s2292_s8 + $0xb8] sm:$0xf0]  ;;  %v1288_v56 = vor.u32 %v1553_v53, %v1287_v51 }
   0xa   :  { %s2317_s4 = sld [smem:[#allocation5_spill]]  ;;  %453 = vmatpush.bf16.msra.mxu0 %v1308_v48  ;;  %v1292_v57 = vor.u32 %v1551_v54, %v1289_v55  ;;  %v1546_v59 = vld [vmem:[%s2292_s8 + $0x84] sm:$0xf]  ;;  %v1265_v60 = vld [vmem:[%s2292_s8 + $0x90] sm:$0xf0] }
   0xb   :  { %s2318_s22 = sld [smem:[#allocation6_spill]]  ;;  %v1271_v61 = vld [vmem:[%s2292_s8 + $0x88] sm:$0xf]  ;;  %v1268_v62 = vor.u32 %v1546_v59, %v1265_v60  ;;  %v1549_v63 = vld [vmem:[%s2292_s8 + $0x94] sm:$0xf0] }
   0xc   :  { %428 = vmatpush.bf16.msra.mxu2 %v1284_v52  ;;  %v1547_v0 = vld [vmem:[%s2292_s8 + $0x8c] sm:$0xf]  ;;  %v1311_v31 = vld [vmem:[%s2292_s8 + $0xe0] sm:$0xf]  ;;  %v1560_v32 = vld [vmem:[%s2292_s8 + $0xec] sm:$0xf0] }
   0xd   :  { %v65_v1 = vld [vmem:[%s2314_s23] sm:$0xff]  ;;  %441 = vmatpush.bf16.msra.mxu3 %v1288_v56  ;;  %v1312_v34 = vor.u32 %v1560_v32, %v1311_v31  ;;  %v1217_v36 = vld [vmem:[%s2292_s8 + $0x30] sm:$0xf0]  ;;  %v1223_v38 = vld [vmem:[%s2292_s8 + $0x28] sm:$0xf]  ;;  %s2319_s29 = sld [smem:[#allocation7_spill]] }
   0xe   :  { %71 = vperm.xlu0 %1616, %v65_v1   ;;  %v1611_v2 = vld [vmem:[%s2315_s25] sm:$0xff]   ;;  %v78_v4 = vld [vmem:[%s2315_s25 + $0x8] sm:$0xf]  ;;  %454 = vmatpush.bf16.msra.mxu0 %v1292_v57  ;;  %v1273_v1 = vld [vmem:[%s2292_s8 + $0x98] sm:$0xf0] }
   0xf   :  { %v66_v3 = vld [vmem:[%s2316_s27] sm:$0xf]  ;;  %v1612_v9 = vunpack.c.l.bf16 %v1611_v2  ;;  %v1613_v10 = vunpack.c.h.bf16 %v1611_v2  ;;  %v81_v12 = vunpack.c.l.bf16 %v78_v4  ;;  %v135_v2 = vmul.f32 16.0, %v1845_v58  ;;  %v1534_v35 = vld [vmem:[%s2292_s8 + $0x24] sm:$0xf] }
  0x10   :  { %v68_v5 = vld [vmem:[%s2317_s4] sm:$0xff]  ;;  %v67_v11 = vunpack.c.l.bf16 %v66_v3  ;;  %v1272_v3 = vor.u32 %v1549_v63, %v1271_v61  ;;  %v1276_v4 = vor.u32 %v1547_v0, %v1273_v1  ;;  %429 = vmatpush.bf16.msra.mxu2 %v1268_v62  ;;  %v1220_v37 = vor.u32 %v1534_v35, %v1217_v36  ;;  %v1537_v39 = vld [vmem:[%s2292_s8 + $0x34] sm:$0xf0]  ;;  %v1535_v40 = vld [vmem:[%s2292_s8 + $0x2c] sm:$0xf] }
  0x11   :  { %v82_v6 = vld [vmem:[%s2318_s22] sm:$0xff]  ;;  %v83_v7 = vld [vmem:[%s2318_s22 + $0x8] sm:$0xff]  ;;  %v84_v8 = vld [vmem:[%s2318_s22 + $0x10] sm:$0xff]  ;;  %v1224_v42 = vor.u32 %v1537_v39, %v1223_v38 }
  0x12   :  { %442 = vmatpush.bf16.msra.mxu3 %v1272_v3  ;;  %455 = vmatpush.bf16.msra.mxu0 %v1276_v4  ;;  %v1225_v43 = vld [vmem:[%s2292_s8 + $0x38] sm:$0xf0]  ;;  %v1295_v44 = vld [vmem:[%s2292_s8 + $0xc0] sm:$0xf]  ;;  %v1556_v45 = vld [vmem:[%s2292_s8 + $0xcc] sm:$0xf0] }
  0x13   :  { %v1228_v46 = vor.u32 %v1535_v40, %v1225_v43  ;;  %v1296_v47 = vor.u32 %v1556_v45, %v1295_v44  ;;  %v1530_v48 = vld [vmem:[%s2292_s8 + $0x4] sm:$0xf]  ;;  %v1201_v49 = vld [vmem:[%s2292_s8 + $0x10] sm:$0xf0]  ;;  %v1207_v50 = vld [vmem:[%s2292_s8 + $0x8] sm:$0xf] }
  0x14   :  { %v1204_v51 = vor.u32 %v1530_v48, %v1201_v49  ;;  %v1533_v52 = vld [vmem:[%s2292_s8 + $0x14] sm:$0xf0]  ;;  %v1531_v53 = vld [vmem:[%s2292_s8 + $0xc] sm:$0xf]  ;;  %v1209_v54 = vld [vmem:[%s2292_s8 + $0x18] sm:$0xf0] }
  0x15   :  { %v1208_v55 = vor.u32 %v1533_v52, %v1207_v50  ;;  %v1212_v56 = vor.u32 %v1531_v53, %v1209_v54  ;;  %v1279_v57 = vld [vmem:[%s2292_s8 + $0xa0] sm:$0xf]  ;;  %v1552_v59 = vld [vmem:[%s2292_s8 + $0xac] sm:$0xf0]  ;;  %v1566_v52 = vld [vmem:[%s2294_s9 + $0x24] sm:$0xf] }
  0x16   :  { %v1280_v61 = vor.u32 %v1552_v59, %v1279_v57  ;;  %v1548_v4 = vld [vmem:[%s2292_s8 + $0x8c] sm:$0xf0]  ;;  %v1345_v54 = vld [vmem:[%s2294_s9 + $0x30] sm:$0xf0] }
  0x17   :  { %v1568_v48 = vld [vmem:[%s2294_s9 + $0x2c] sm:$0xf0]  ;;  %v1348_v57 = vor.u32 %v1566_v52, %v1345_v54  ;;  %v1579_v52 = vld [vmem:[%s2297_s13 + $0x28] sm:$0xff] }
  0x18   :  { %v1595_v54 = vld [vmem:[%s2297_s13 + $0xa8] sm:$0xff] }
  0x80   :  { %v72_v13 = vpop.permute.xlu0 %71 }
  0x81   :  { %v74_v14 = vmul.f32 %v72_v13, %v68_v5  ;;  %v85_v15 = vmul.f32 %v82_v6, %v72_v13  ;;  %v86_v16 = vmul.f32 %v83_v7, %v72_v13  ;;  %v87_v17 = vmul.f32 %v84_v8, %v72_v13  ;;  %v1542_v5 = vld [vmem:[%s2292_s8 + $0x64] sm:$0xf]  ;;  %v1249_v6 = vld [vmem:[%s2292_s8 + $0x70] sm:$0xf0]  ;;  %v1255_v7 = vld [vmem:[%s2292_s8 + $0x68] sm:$0xf] }
  0x82   :  { %v1252_v8 = vor.u32 %v1542_v5, %v1249_v6 }
  0x83   :  { %v1773_v18 = vadd.f32 %v1612_v9, %v85_v15  ;;  %v1775_v19 = vadd.f32 %v1613_v10, %v86_v16  ;;  %v1777_v20 = vadd.f32 %v74_v14, %v67_v11  ;;  %v1779_v21 = vadd.f32 %v87_v17, %v81_v12  ;;  %v1545_v9 = vld [vmem:[%s2292_s8 + $0x74] sm:$0xf0]  ;;  %v1543_v10 = vld [vmem:[%s2292_s8 + $0x6c] sm:$0xf]  ;;  %v1257_v11 = vld [vmem:[%s2292_s8 + $0x78] sm:$0xf0] }
  0x84   :  { %v136_v12 = vsub.f32 1.0, %v135_v2  ;;  %v1256_v13 = vor.u32 %v1545_v9, %v1255_v7  ;;  %v1260_v14 = vor.u32 %v1543_v10, %v1257_v11  ;;  %430 = vmatpush.bf16.msra.mxu2 %v1252_v8  ;;  %v1529_v15 = vld [vmem:[%s2293_s7] sm:$0xff]  ;;  %v1233_v17 = vld [vmem:[%s2292_s8 + $0x50] sm:$0xf0]  ;;  %v1544_v9 = vld [vmem:[%s2292_s8 + $0x6c] sm:$0xf0] }
  0x85   :  { %93 = vadd.xlane.f32.xlu1 %v1777_v20  ;;  %v124_v22 = vmul.f32 %v1773_v18, %v1773_v18  ;;  %v125_v23 = vmul.f32 %v1775_v19, %v1775_v19  ;;  %v127_v25 = vmul.f32 %v1779_v21, %v1779_v21  ;;  %v96_v27 = vmul.f32 %v1777_v20, %v1777_v20  ;;  %v1538_v16 = vld [vmem:[%s2292_s8 + $0x44] sm:$0xf]  ;;  %v1247_v8 = vld [vmem:[%s2292_s8 + $0x60] sm:$0xf] }
  0x86   :  { %443 = vmatpush.bf16.msra.mxu3 %v1256_v13  ;;  %456 = vmatpush.bf16.msra.mxu0 %v1260_v14  ;;  %v1248_v11 = vor.u32 %v1544_v9, %v1247_v8  ;;  %v1540_v13 = vld [vmem:[%s2292_s8 + $0x4c] sm:$0xf0]  ;;  %v1337_v8 = vld [vmem:[%s2294_s9 + $0x18] sm:$0xf0] }
  0x87   :  { %v126_v24 = vadd.f32 %v125_v23, %v124_v22  ;;  %v1236_v22 = vor.u32 %v1538_v16, %v1233_v17  ;;  %v1239_v23 = vld [vmem:[%s2292_s8 + $0x48] sm:$0xf]  ;;  %223 = vmatpush.bf16.msra.mxu1 %v1529_v15  ;;  %v1215_v17 = vld [vmem:[%s2292_s8 + $0x20] sm:$0xf] }
  0x89   :  { %v128_v26 = vadd.f32 %v127_v25, %v126_v24  ;;  %v1541_v24 = vld [vmem:[%s2292_s8 + $0x54] sm:$0xf0]  ;;  %v1539_v25 = vld [vmem:[%s2292_s8 + $0x4c] sm:$0xf]  ;;  %431 = vmatpush.bf16.msra.mxu2 %v1236_v22  ;;  %v1536_v22 = vld [vmem:[%s2292_s8 + $0x2c] sm:$0xf0] }
  0x8b   :  { %v129_v28 = vmax.f32 %v128_v26, 1e-08  ;;  %v137_v26 = vmul.f32 %v1845_v58, %v136_v12  ;;  %413 = vmatpush.bf16.msrb.mxu1 %v1312_v34  ;;  %v1231_v12 = vld [vmem:[%s2292_s8 + $0x40] sm:$0xf] }
  0x8c   :  { %v1232_v15 = vor.u32 %v1540_v13, %v1231_v12 }
  0x8d   :  { %97 = vadd.xlane.f32.xlu1 %v96_v27  ;;  %v131_v29 = vsel %vm130_vm0, %v129_v28, 0.0  ;;  %v1240_v27 = vor.u32 %v1541_v24, %v1239_v23  ;;  %v1241_v28 = vld [vmem:[%s2292_s8 + $0x58] sm:$0xf0]  ;;  %v138_v41 = vadd.f32 %v1845_v58, %v137_v26  ;;  %432 = vmatpush.bf16.msra.mxu2 %v1220_v37  ;;  %v1216_v26 = vor.u32 %v1536_v22, %v1215_v17  ;;  %v1571_v17 = vld [vmem:[%s2296_s11 + $0x8] sm:$0xff] }
  0x8e   :  { %132 = vadd.xlane.f32.xlu0 %v131_v29  ;;  %v1244_v30 = vor.u32 %v1539_v25, %v1241_v28  ;;  %v1199_v28 = vld [vmem:[%s2292_s8] sm:$0xf] }
  0x8f   :  { %444 = vmatpush.bf16.msra.mxu3 %v1240_v27  ;;  %v1967_v60 = vsel %vm139_vm1, %v1845_v58, %v138_v41  ;;  %414 = vmatpush.bf16.msrb.mxu1 %v1296_v47  ;;  %v1263_v58 = vld [vmem:[%s2292_s8 + $0x80] sm:$0xf] }
  0x90   :  { %457 = vmatpush.bf16.msra.mxu0 %v1244_v30  ;;  %v1264_v6 = vor.u32 %v1548_v4, %v1263_v58  ;;  %v1343_v47 = vld [vmem:[%s2294_s9 + $0x20] sm:$0xf]  ;;  %v1329_v58 = vld [vmem:[%s2294_s9 + $0x10] sm:$0xf0]  ;;  %v1335_v4 = vld [vmem:[%s2294_s9 + $0x8] sm:$0xf] }
  0x91   :  { %433 = vmatpush.bf16.msra.mxu2 %v1204_v51  ;;  %v1344_v49 = vor.u32 %v1568_v48, %v1343_v47  ;;  %v1564_v51 = vld [vmem:[%s2294_s9 + $0xc] sm:$0xf0]  ;;  %v1589_v47 = vld [vmem:[%s2297_s13 + $0x78] sm:$0xff] }
  0x92   :  { %v1597_v48 = vld [vmem:[%s2297_s13 + $0xb8] sm:$0xff] }
  0x93   :  { %445 = vmatpush.bf16.msra.mxu3 %v1224_v42  ;;  %415 = vmatpush.bf16.msrb.mxu1 %v1280_v61  ;;  %v1617_v42 = vld [vmem:[%s2290_s5] ss:$0 sm:$0xff]  ;;  %v1567_v61 = vld [vmem:[%s2294_s9 + $0x2c] sm:$0xf] }
  0x94   :  { %458 = vmatpush.bf16.msra.mxu0 %v1228_v46 }
  0x95   :  { %542 = vmatpush.bf16.msrb.mxu2 %v1348_v57  ;;  %v1594_v57 = vld [vmem:[%s2297_s13 + $0xa0] sm:$0xff] }
  0x97   :  { %446 = vmatpush.bf16.msra.mxu3 %v1208_v55  ;;  %416 = vmatpush.bf16.msrb.mxu1 %v1264_v6  ;;  %v1351_v55 = vld [vmem:[%s2294_s9 + $0x28] sm:$0xf]  ;;  %v1565_v6 = vld [vmem:[%s2294_s9 + $0x14] sm:$0xf0] }
  0x98   :  { %459 = vmatpush.bf16.msra.mxu0 %v1212_v56  ;;  %v1569_v56 = vld [vmem:[%s2294_s9 + $0x34] sm:$0xf0] }
  0x99   :  { %v1352_v59 = vor.u32 %v1569_v56, %v1351_v55  ;;  %v1578_v55 = vld [vmem:[%s2297_s13 + $0x20] sm:$0xff] }
  0x9a   :  { %v1586_v56 = vld [vmem:[%s2297_s13 + $0x60] sm:$0xff] }
  0x9b   :  { %417 = vmatpush.bf16.msrb.mxu1 %v1248_v11  ;;  %555 = vmatpush.bf16.msrb.mxu3 %v1352_v59 }
  0x9f   :  { %418 = vmatpush.bf16.msrb.mxu1 %v1232_v15 }
  0xa3   :  { %419 = vmatpush.bf16.msrb.mxu1 %v1216_v26 }
  0xf8   :  { %v94_v29 = vpop.xlane.xlu1 %93 }
  0xf9   :  { %v1912_v33 = vmul.f32 0.01, %v94_v29  ;;  %v1532_v29 = vld [vmem:[%s2292_s8 + $0xc] sm:$0xf0] }
  0xfa   :  { %v1200_v34 = vor.u32 %v1532_v29, %v1199_v28 }
  0xfb   :  { %v100_v63 = vmul.f32 %v1912_v33, %v1912_v33  ;;  %v103_v41 = vsub.f32 %v1777_v20, %v1912_v33 }
  0xfc   :  { %420 = vmatpush.bf16.msrb.mxu1 %v1200_v34 }
 0x100   :  { %v98_v62 = vpop.xlane.xlu1 %97 }
 0x101   :  { %v99_v0 = vmul.f32 0.01, %v98_v62  ;;  %v133_v1 = vpop.xlane.xlu0 %132  ;;  %v1353_v62 = vld [vmem:[%s2294_s9 + $0x38] sm:$0xf0] }
 0x102   :  { %v141_v2 = vmul.f32 %v1967_v60, %v133_v1 }
 0x103   :  { %v101_v3 = vsub.f32 %v99_v0, %v100_v63  ;;  %v2064_v63 = vld [vmem:[%s2295_s10] sm:$0xf]  ;;  %v1356_v0 = vor.u32 %v1567_v61, %v1353_v62  ;;  %v1577_v61 = vld [vmem:[%s2297_s13 + $0x18] sm:$0xff] }
 0x104   :  { %1624 = vrsqrt.f32 %v141_v2  ;;  %vm148_vm3 = vweird.f32 %v141_v2  ;;  %v469_v1 = vperm.slane %v2064_v63, 3  ;;  %v1585_v62 = vld [vmem:[%s2297_s13 + $0x58] sm:$0xff] }
 0x105   :  { %v102_v5 = vmax.f32 %v101_v3, 0.0  ;;  %568 = vmatpush.bf16.msrb.mxu0 %v1356_v0  ;;  %v1562_v3 = vld [vmem:[%s2294_s9 + $0x4] sm:$0xf]  ;;  %v1593_v0 = vld [vmem:[%s2297_s13 + $0x98] sm:$0xff] }
 0x107   :  { %v104_v7 = vadd.f32 1e-05, %v102_v5  ;;  %v1332_v5 = vor.u32 %v1562_v3, %v1329_v58  ;;  %v1584_v3 = vld [vmem:[%s2297_s13 + $0x50] sm:$0xff] }
 0x108   :  { %v1592_v58 = vld [vmem:[%s2297_s13 + $0x90] sm:$0xff] }
 0x109   :  { %1626 = vrsqrt.f32 %v104_v7  ;;  %vm111_vm6 = vweird.f32 %v104_v7  ;;  %543 = vmatpush.bf16.msrb.mxu2 %v1332_v5  ;;  %v1583_v5 = vld [vmem:[%s2297_s13 + $0x48] sm:$0xff] }
 0x10a   :  { %v1625_v10 = vpop.eup %1624 }
 0x10b   :  { %v143_v14 = vmul.f32 %v1625_v10, %v141_v2  ;;  %vm149_vm2 = vweird.f32 %v1625_v10 }
 0x10c   :  { %vm150_vm4 = vmor %vm148_vm3, %vm149_vm2 }
 0x10d   :  { %v144_v16 = vmul.f32 %v1625_v10, %v143_v14 }
 0x10f   :  { %v1627_v23 = vpop.eup %1626  ;;  %v145_v24 = vmul.f32 0.5, %v144_v16 }
 0x110   :  { %v106_v25 = vmul.f32 %v1627_v23, %v104_v7  ;;  %vm112_vm5 = vweird.f32 %v1627_v23  ;;  %v1563_v7 = vld [vmem:[%s2294_s9 + $0xc] sm:$0xf] }
 0x111   :  { %v146_v27 = vsub.f32 1.5, %v145_v24  ;;  %vm113_vm7 = vmor %vm111_vm6, %vm112_vm5  ;;  %v1340_v11 = vor.u32 %v1563_v7, %v1337_v8  ;;  %v1582_v7 = vld [vmem:[%s2297_s13 + $0x40] sm:$0xff]  ;;  %vm1179_vm6 = vcmask 125952  }
 0x112   :  { %v107_v30 = vmul.f32 %v1627_v23, %v106_v25  ;;  %v1570_v25 = vld [vmem:[%s2296_s11] sm:$0xff] }
 0x113   :  { %v147_v31 = vmul.f32 %v1625_v10, %v146_v27  ;;  %569 = vmatpush.bf16.msrb.mxu0 %v1340_v11  ;;  %v1590_v8 = vld [vmem:[%s2297_s13 + $0x80] sm:$0xff] }
 0x114   :  { %v108_v32 = vmul.f32 0.5, %v107_v30 }
 0x115   :  { %v151_v35 = vsel %vm150_vm4, %v1625_v10, %v147_v31  ;;  %v1336_v10 = vor.u32 %v1565_v6, %v1335_v4  ;;  %v1574_v4 = vld [vmem:[%s2297_s13] sm:$0xff]  ;;  %v1591_v6 = vld [vmem:[%s2297_s13 + $0x88] sm:$0xff] }
 0x116   :  { %v109_v36 = vsub.f32 1.5, %v108_v32  ;;  %v2003_v37 = vmul.f32 %v151_v35, %v1773_v18  ;;  %v2006_v38 = vmul.f32 %v151_v35, %v1775_v19  ;;  %v1618_v19 = vld [vmem:[%s2291_s6] ss:$0 sm:$0xff]  ;;  %v2024_v20 = vmul.f32 %v151_v35, %v1779_v21 }
 0x117   :  { %v1327_v21 = vld [vmem:[%s2294_s9] sm:$0xf]  ;;  %556 = vmatpush.bf16.msrb.mxu3 %v1336_v10 }
 0x118   :  { %v110_v39 = vmul.f32 %v1627_v23, %v109_v36  ;;  %v202_v40 = vpack.c.bf16 %v2006_v38, %v2003_v37  ;;  %v203_v33 = vpack.c.bf16 %v2024_v20, %v2024_v20  ;;  %v1328_v53 = vor.u32 %v1564_v51, %v1327_v21  ;;  %v1588_v21 = vld [vmem:[%s2297_s13 + $0x70] sm:$0xff] }
 0x119   :  { %v1596_v51 = vld [vmem:[%s2297_s13 + $0xb0] sm:$0xff] }
 0x11a   :  { %v114_v43 = vsel %vm113_vm7, %v1627_v23, %v110_v39  ;;  %1195 = vmatmul.msk.bf16.vlgmr.msra.gmra.mxu1 %vm130_vm0, %v202_v40 }
 0x11b   :  { %v115_v18 = vmul.f32 %v114_v43, %v103_v41  ;;  %529 = vmatpush.bf16.msra.mxu1 %v1344_v49  ;;  %v1580_v49 = vld [vmem:[%s2297_s13 + $0x30] sm:$0xff] }
 0x11d   :  { %v119_v44 = vmul.f32 %v1617_v42, %v115_v18 }
 0x11f   :  { %v2019_v45 = vadd.f32 %v1618_v19, %v119_v44  ;;  %530 = vmatpush.bf16.msra.mxu1 %v1328_v53  ;;  %v1587_v53 = vld [vmem:[%s2297_s13 + $0x68] sm:$0xff] }
 0x121   :  { %v252_v46 = vpack.c.bf16 %v2019_v45, %v2019_v45 }
 0x123   :  { %434 = vmatmul.bf16.vlgmr.msra.gmra.mxu2 %v252_v46  ;;  %447 = vmatmul.bf16.vlgmr.msra.gmra.mxu3 %v252_v46 }
 0x124   :  { %460 = vmatmul.bf16.vlgmr.msra.gmra.mxu0 %v252_v46 }
 0x125   :  { %1003 = vmatpush.bf16.msra.mxu0 %v1589_v47 }
 0x129   :  { %1004 = vmatpush.bf16.msra.mxu0 %v1588_v21 }
 0x12a   :  { %1196 = vmatmul.msk.bf16.gmra.mxu1 %vm130_vm0, %v203_v33  ;;  %v1581_v33 = vld [vmem:[%s2297_s13 + $0x38] sm:$0xff] }
 0x12b   :  { %990 = vmatpush.bf16.msra.mxu3 %v1581_v33 }
 0x12d   :  { %1005 = vmatpush.bf16.msra.mxu0 %v1587_v53 }
 0x12f   :  { %991 = vmatpush.bf16.msra.mxu3 %v1580_v49 }
 0x131   :  { %1006 = vmatpush.bf16.msra.mxu0 %v1586_v56 }
 0x133   :  { %992 = vmatpush.bf16.msra.mxu3 %v1579_v52  ;;  %v1573_v52 = vld [vmem:[%s2298_s12 + $0x8] sm:$0xff] }
 0x134   :  { %764 = vmatpush.bf16.msra.mxu2 %v1573_v52 }
 0x135   :  { %1007 = vmatpush.bf16.msra.mxu0 %v1585_v62  ;;  %v1605_v62 = vld [vmem:[%s2297_s13 + $0xf8] sm:$0xff] }
 0x137   :  { %993 = vmatpush.bf16.msra.mxu3 %v1578_v55  ;;  %v1572_v55 = vld [vmem:[%s2298_s12] sm:$0xff] }
 0x138   :  { %765 = vmatpush.bf16.msra.mxu2 %v1572_v55 }
 0x139   :  { %1008 = vmatpush.bf16.msra.mxu0 %v1584_v3  ;;  %v1602_v3 = vld [vmem:[%s2297_s13 + $0xe0] sm:$0xff] }
 0x13a   :  { %421 = vmatmul.bf16.vlgmr.msrb.gmra.mxu1 %v252_v46 }
 0x13b   :  { %605 = vmatpush.bf16.msrb.mxu1 %v1571_v17  ;;  %994 = vmatpush.bf16.msra.mxu3 %v1577_v61 }
 0x13d   :  { %1009 = vmatpush.bf16.msra.mxu0 %v1583_v5 }
 0x13f   :  { %606 = vmatpush.bf16.msrb.mxu1 %v1570_v25 }
 0x141   :  { %1010 = vmatpush.bf16.msra.mxu0 %v1582_v7 }
 0x197   :  { %v2035_v50 = vpop.f32.mrf.mxu1 }
 0x198   :  { %v234_v14 = vmul.f32 %v2035_v50, %v2035_v50 }
 0x19f   :  { %v2067_v2 = vpop.f32.mrf.mxu1 }
 0x1a0   :  { %v235_v13 = vmul.f32 %v2067_v2, %v2067_v2  ;;  %v579_v59 = vpack.c.bf16 %v2067_v2, %v2035_v50  ;;  %v1576_v50 = vld [vmem:[%s2297_s13 + $0x10] sm:$0xff]  ;;  %v1575_v2 = vld [vmem:[%s2297_s13 + $0x8] sm:$0xff] }
 0x1a1   :  { %v461_v9 = vpop.f32.mrf.mxu0  ;;  %995 = vmatpush.bf16.msra.mxu3 %v1576_v50  ;;  %v1603_v50 = vld [vmem:[%s2297_s13 + $0xe8] sm:$0xff] }
 0x1a2   :  { %v2087_v12 = vadd.f32 %v469_v1, %v461_v9  ;;  %v236_v23 = vadd.f32 %v235_v13, %v234_v14  ;;  %v466_v9 = vperm.slane %v2064_v63, 0  ;;  %v467_v13 = vperm.slane %v2064_v63, 1 }
 0x1a5   :  { %996 = vmatpush.bf16.msra.mxu3 %v1575_v2 }
 0x1a6   :  { %v2093_v15 = vpop.f32.mrf.mxu2  ;;  %v2095_v16 = vpop.f32.mrf.mxu3 }
 0x1a7   :  { %v2100_v22 = vpop.f32.mrf.mxu1  ;;  %v475_v25 = vadd.f32 %v467_v13, %v2093_v15 }
 0x1a8   :  { %v237_v24 = vmul.f32 %v2100_v22, %v2100_v22  ;;  %v580_v1 = vpack.c.bf16 %v2100_v22, %v2100_v22  ;;  %v468_v22 = vperm.slane %v2064_v63, 2 }
 0x1a9   :  { %v463_v26 = vpop.f32.mrf.mxu0  ;;  %997 = vmatpush.bf16.msra.mxu3 %v1574_v4 }
 0x1aa   :  { %v238_v27 = vadd.f32 %v237_v24, %v236_v23 }
 0x1ac   :  { %v239_v28 = vmax.f32 %v238_v27, 1e-08  ;;  %v476_v27 = vadd.f32 %v468_v22, %v2095_v16  ;;  %v1598_v22 = vld [vmem:[%s2297_s13 + $0xc0] sm:$0xff] }
 0x1ae   :  { %1628 = vrsqrt.f32 %v239_v28  ;;  %v437_v29 = vpop.f32.mrf.mxu2  ;;  %v450_v30 = vpop.f32.mrf.mxu3  ;;  %vm247_vm8 = vcmp.eq.f32.partialorder %v239_v28, inf  ;;  %v250_v18 = vand.u32 2147483648, %v239_v28  ;;  %vm249_vm9 = vcmp.eq.f32.partialorder %v239_v28, 0.0 }
 0x1af   :  { %v232_v31 = vpop.f32.mrf.mxu1 }
 0x1b4   :  { %v1629_v32 = vpop.eup %1628 }
 0x1b5   :  { %v241_v34 = vmul.f32 %v1629_v32, %v239_v28 }
 0x1b7   :  { %v2107_v35 = vpop.f32.mrf.mxu1  ;;  %v242_v36 = vmul.f32 %v1629_v32, %v241_v34 }
 0x1b8   :  { %v474_v10 = vadd.f32 %v466_v9, %v2107_v35 }
 0x1b9   :  { %v243_v39 = vmul.f32 0.5, %v242_v36 }
 0x1bb   :  { %v244_v40 = vsub.f32 1.5, %v243_v39 }
 0x1bd   :  { %v245_v41 = vmul.f32 %v1629_v32, %v244_v40 }
 0x1bf   :  { %v424_v42 = vpop.f32.mrf.mxu1  ;;  %v246_v43 = vmul.f32 %v245_v41, %v239_v28 }
 0x1c1   :  { %v248_v19 = vsel %vm247_vm8, %v239_v28, %v246_v43 }
 0x1c2   :  { %v251_v44 = vsel %vm249_vm9, %v250_v18, %v248_v19 }
 0x1c3   :  { %v478_v46 = vpack.c.bf16 %v251_v44, %v251_v44 }
 0x1c5   :  { %1357 = vmatmul.msk.bf16.vlgmr.msra.gmra.mxu1 %vm519_vm10, %v478_v46  ;;  %1358 = vmatmul.msk.bf16.vlgmr.msrb.gmra.mxu2 %vm519_vm10, %v478_v46 }
 0x1c6   :  { %1359 = vmatmul.msk.bf16.vlgmr.msrb.gmra.mxu3 %vm519_vm10, %v478_v46  ;;  %1360 = vmatmul.msk.bf16.vlgmr.msrb.gmra.mxu0 %vm519_vm10, %v478_v46 }
 0x1c7   :  { %1016 = vmatpush.bf16.msra.mxu1 %v1597_v48  ;;  %1029 = vmatpush.bf16.msrb.mxu2 %v1605_v62 }
 0x1cb   :  { %1017 = vmatpush.bf16.msra.mxu1 %v1596_v51 }
 0x1cf   :  { %1018 = vmatpush.bf16.msra.mxu1 %v1595_v54 }
 0x1d3   :  { %1019 = vmatpush.bf16.msra.mxu1 %v1594_v57 }
 0x1d5   :  { %1369 = vmatmul.msk.bf16.vlgmr.msrb.gmra.mxu1 %vm519_vm10, %v579_v59 }
 0x1d7   :  { %1020 = vmatpush.bf16.msra.mxu1 %v1593_v0  ;;  %v1604_v0 = vld [vmem:[%s2297_s13 + $0xf0] sm:$0xff] }
 0x1d8   :  { %1030 = vmatpush.bf16.msrb.mxu2 %v1604_v0 }
 0x1db   :  { %1021 = vmatpush.bf16.msra.mxu1 %v1592_v58  ;;  %v1601_v58 = vld [vmem:[%s2297_s13 + $0xd8] sm:$0xff] }
 0x1dc   :  { %1031 = vmatpush.bf16.msrb.mxu2 %v1603_v50 }
 0x1df   :  { %1022 = vmatpush.bf16.msra.mxu1 %v1591_v6  ;;  %v1600_v6 = vld [vmem:[%s2297_s13 + $0xd0] sm:$0xff] }
 0x1e0   :  { %1032 = vmatpush.bf16.msrb.mxu2 %v1602_v3 }
 0x1e3   :  { %1023 = vmatpush.bf16.msra.mxu1 %v1590_v8 }
 0x1e4   :  { %1033 = vmatpush.bf16.msrb.mxu2 %v1601_v58 }
 0x1e5   :  { %1370 = vmatmul.msk.bf16.gmra.mxu1 %vm519_vm10, %v580_v1 }
 0x1e8   :  { %1034 = vmatpush.bf16.msrb.mxu2 %v1600_v6 }
 0x242   :  { %v532_v11 = vpop.f32.mrf.mxu1 }
 0x243   :  { %v575_v14 = vadd.f32 %v532_v11, %v474_v10  ;;  %v571_v17 = vpop.f32.mrf.mxu0  ;;  %v1599_v11 = vld [vmem:[%s2297_s13 + $0xc8] sm:$0xff] }
 0x244   :  { %v2196_v23 = vadd.f32 %v571_v17, %v2087_v12  ;;  %1035 = vmatpush.bf16.msrb.mxu2 %v1599_v11 }
 0x245   :  { %v657_v24 = vmax.f32 %v575_v14, 0.0 }
 0x247   :  { %v794_v26 = vpack.c.bf16 %v657_v24, %v657_v24 }
 0x248   :  { %v545_v28 = vpop.f32.mrf.mxu2  ;;  %1036 = vmatpush.bf16.msrb.mxu2 %v1598_v22 }
 0x249   :  { %v576_v29 = vadd.f32 %v545_v28, %v475_v25  ;;  %v558_v30 = vpop.f32.mrf.mxu3  ;;  %998 = vmatmul.bf16.vlgmr.msra.gmra.mxu3 %v794_v26 }
 0x24a   :  { %v577_v31 = vadd.f32 %v558_v30, %v476_v27  ;;  %v534_v32 = vpop.f32.mrf.mxu1  ;;  %v660_v30 = vmax.f32 %v2196_v23, 0.0  ;;  %v1607_v23 = vld [vmem:[%s2301_s14 + $0x8] sm:$0xff] }
 0x24b   :  { %v658_v34 = vmax.f32 %v576_v29, 0.0  ;;  %v573_v35 = vpop.f32.mrf.mxu0  ;;  %1068 = vmatpush.bf16.msrb.mxu3 %v1607_v23 }
 0x24c   :  { %v659_v36 = vmax.f32 %v577_v31, 0.0  ;;  %v797_v31 = vpack.c.bf16 %v660_v30, %v660_v30 }
 0x24d   :  { %v795_v39 = vpack.c.bf16 %v658_v34, %v658_v34 }
 0x24e   :  { %v796_v63 = vpack.c.bf16 %v659_v36, %v659_v36 }
 0x24f   :  { %1011 = vmatmul.bf16.vlgmr.msra.gmra.mxu0 %v795_v39 }
 0x250   :  { %1024 = vmatmul.bf16.vlgmr.msra.gmra.mxu1 %v796_v63  ;;  %v547_v12 = vpop.f32.mrf.mxu2 }
 0x251   :  { %v560_v40 = vpop.f32.mrf.mxu3 }
 0x252   :  { %v2200_v41 = vpop.f32.mrf.mxu1 }
 0x253   :  { %v617_v16 = vmul.f32 %v2200_v41, %v2200_v41 }
 0x25a   :  { %v610_v15 = vpop.f32.mrf.mxu1 }
 0x25b   :  { %v618_v42 = vmul.f32 %v610_v15, %v610_v15 }
 0x25d   :  { %v619_v18 = vadd.f32 %v618_v42, %v617_v16  ;;  %v1606_v16 = vld [vmem:[%s2301_s14] sm:$0xff] }
 0x25e   :  { %1069 = vmatpush.bf16.msrb.mxu3 %v1606_v16 }
 0x262   :  { %v2204_v43 = vpop.f32.mrf.mxu1 }
 0x263   :  { %v620_v19 = vmul.f32 %v2204_v43, %v2204_v43 }
 0x265   :  { %v621_v44 = vadd.f32 %v620_v19, %v619_v18 }
 0x267   :  { %v622_v46 = vmax.f32 %v621_v44, 1e-08 }
 0x269   :  { %1630 = vrsqrt.f32 %v622_v46  ;;  %vm630_vm11 = vcmp.eq.f32.partialorder %v622_v46, inf  ;;  %v633_v56 = vand.u32 2147483648, %v622_v46  ;;  %vm632_vm12 = vcmp.eq.f32.partialorder %v622_v46, 0.0 }
 0x26a   :  { %v615_v33 = vpop.f32.mrf.mxu1 }
 0x26f   :  { %v1631_v47 = vpop.eup %1630 }
 0x270   :  { %v624_v48 = vmul.f32 %v1631_v47, %v622_v46 }
 0x272   :  { %v625_v49 = vmul.f32 %v1631_v47, %v624_v48 }
 0x274   :  { %v626_v21 = vmul.f32 0.5, %v625_v49 }
 0x276   :  { %v627_v51 = vsub.f32 1.5, %v626_v21 }
 0x278   :  { %v628_v53 = vmul.f32 %v1631_v47, %v627_v51 }
 0x27a   :  { %v629_v54 = vmul.f32 %v628_v53, %v622_v46 }
 0x27c   :  { %v631_v57 = vsel %vm630_vm11, %v622_v46, %v629_v54 }
 0x27d   :  { %v634_v59 = vsel %vm632_vm12, %v633_v56, %v631_v57 }
 0x27e   :  { %v1371_v61 = vmul.f32 -1.442695, %v634_v59 }
 0x280   :  { %1632 = vpow2.f32 %v1371_v61 }
 0x286   :  { %v1633_v1 = vpop.eup %1632 }
 0x287   :  { %v638_v2 = vadd.f32 1.0, %v1633_v1 }
 0x289   :  { %1634 = vrcp.f32 %v638_v2  ;;  %v650_v8 = vand.u32 2147483648, %v638_v2  ;;  %v648_v10 = vand.u32 2147483647, %v638_v2  ;;  %vm644_vm14 = vweird.f32 %v638_v2 }
 0x28b   :  { %v651_v14 = vor.u32 1.1754944e-38, %v650_v8  ;;  %vm649_vm1 = vcmp.eq.f32.partialorder %v648_v10, 8.507059e+37 }
 0x28f   :  { %v1635_v4 = vpop.eup %1634 }
 0x290   :  { %v640_v5 = vmul.f32 %v1635_v4, %v638_v2  ;;  %vm645_vm13 = vweird.f32 %v1635_v4 }
 0x291   :  { %vm646_vm15 = vmor %vm644_vm14, %vm645_vm13 }
 0x292   :  { %v641_v7 = vsub.f32 1.0, %v640_v5 }
 0x294   :  { %v642_v9 = vmul.f32 %v1635_v4, %v641_v7 }
 0x296   :  { %v643_v13 = vadd.f32 %v1635_v4, %v642_v9 }
 0x298   :  { %v647_v17 = vsel %vm646_vm15, %v1635_v4, %v643_v13 }
 0x299   :  { %v652_v24 = vsel %vm649_vm1, %v651_v14, %v647_v17 }
 0x29a   :  { %v654_v25 = vmul.f32 %v652_v24, %v2200_v41  ;;  %v655_v26 = vmul.f32 %v652_v24, %v610_v15  ;;  %v656_v28 = vmul.f32 %v652_v24, %v2204_v43  ;;  %v1609_v41 = vld [vmem:[%s2300_s16 + $0x8] sm:$0xff]  ;;  %v1608_v15 = vld [vmem:[%s2300_s16] sm:$0xff] }
 0x29b   :  { %1102 = vmatpush.bf16.msrb.mxu0 %v1609_v41 }
 0x29c   :  { %v738_v27 = vpack.c.bf16 %v655_v26, %v654_v25  ;;  %v739_v29 = vpack.c.bf16 %v656_v28, %v656_v28  ;;  %v1619_v25 = vld [vmem:[%s2299_s15] ss:$0 sm:$0xff] }
 0x29e   :  { %1380 = vmatmul.msk.bf16.vlgmr.msra.gmra.mxu2 %vm519_vm10, %v738_v27 }
 0x29f   :  { %1103 = vmatpush.bf16.msrb.mxu0 %v1608_v15 }
 0x2ae   :  { %1381 = vmatmul.msk.bf16.gmra.mxu2 %vm519_vm10, %v739_v29 }
 0x2be   :  { %1037 = vmatmul.bf16.vlgmr.msrb.gmra.mxu2 %v797_v31 }
 0x2cc   :  { %v999_v32 = vpop.f32.mrf.mxu3  ;;  %v1012_v34 = vpop.f32.mrf.mxu0 }
 0x2cd   :  { %v1013_v35 = vadd.f32 %v1012_v34, %v999_v32  ;;  %v1025_v36 = vpop.f32.mrf.mxu1 }
 0x2cf   :  { %v1026_v39 = vadd.f32 %v1025_v36, %v1013_v35 }
 0x2d4   :  { %v1001_v63 = vpop.f32.mrf.mxu3  ;;  %v1014_v12 = vpop.f32.mrf.mxu0 }
 0x2d5   :  { %v1027_v40 = vpop.f32.mrf.mxu1 }
 0x321   :  { %v767_v42 = vpop.f32.mrf.mxu2 }
 0x322   :  { %v776_v44 = vmul.f32 %v767_v42, %v767_v42 }
 0x329   :  { %v769_v43 = vpop.f32.mrf.mxu2 }
 0x32a   :  { %v1076_v18 = vpack.c.bf16 %v769_v43, %v767_v42  ;;  %v777_v19 = vmul.f32 %v769_v43, %v769_v43 }
 0x32c   :  { %1527 = vmatmul.msk.bf16.vlgmr.msrb.gmra.mxu0 %vm519_vm10, %v1076_v18  ;;  %v778_v33 = vadd.f32 %v777_v19, %v776_v44 }
 0x331   :  { %v772_v46 = vpop.f32.mrf.mxu2 }
 0x332   :  { %v779_v47 = vmul.f32 %v772_v46, %v772_v46  ;;  %v1077_v51 = vpack.c.bf16 %v772_v46, %v772_v46 }
 0x334   :  { %v780_v48 = vadd.f32 %v779_v47, %v778_v33 }
 0x336   :  { %v781_v49 = vmax.f32 %v780_v48, 1e-08 }
 0x338   :  { %1636 = vrsqrt.f32 %v781_v49  ;;  %vm789_vm2 = vcmp.eq.f32.partialorder %v781_v49, inf  ;;  %v792_v50 = vand.u32 2147483648, %v781_v49  ;;  %vm791_vm3 = vcmp.eq.f32.partialorder %v781_v49, 0.0 }
 0x339   :  { %v774_v21 = vpop.f32.mrf.mxu2 }
 0x33c   :  { %1528 = vmatmul.msk.bf16.gmra.mxu0 %vm519_vm10, %v1077_v51 }
 0x33e   :  { %v1637_v52 = vpop.eup %1636 }
 0x33f   :  { %v783_v53 = vmul.f32 %v1637_v52, %v781_v49 }
 0x341   :  { %v1038_v54 = vpop.f32.mrf.mxu2  ;;  %v784_v55 = vmul.f32 %v1637_v52, %v783_v53  ;;  %v1620_v53 = vld [vmem:[%s2302_s17] ss:$0 sm:$0xff] }
 0x342   :  { %v1039_v56 = vadd.f32 %v1038_v54, %v1026_v39 }
 0x343   :  { %v785_v57 = vmul.f32 0.5, %v784_v55  ;;  %v1621_v55 = vld [vmem:[%s2303_s18] ss:$0 sm:$0xff] }
 0x345   :  { %v786_v59 = vsub.f32 1.5, %v785_v57 }
 0x347   :  { %v787_v61 = vmul.f32 %v1637_v52, %v786_v59 }
 0x349   :  { %v1040_v62 = vpop.f32.mrf.mxu2  ;;  %v788_v0 = vmul.f32 %v787_v61, %v781_v49 }
 0x34b   :  { %v790_v1 = vsel %vm789_vm2, %v781_v49, %v788_v0 }
 0x34c   :  { %v793_v2 = vsel %vm791_vm3, %v792_v50, %v790_v1 }
 0x34d   :  { %v1046_v3 = vpack.c.bf16 %v793_v2, %v793_v2 }
 0x34f   :  { %1518 = vmatmul.msk.bf16.vlgmr.msrb.gmra.mxu3 %vm519_vm10, %v1046_v3 }
 0x3a9   :  { %v1105_v58 = vpop.f32.mrf.mxu0 }
 0x3aa   :  { %v1115_v6 = vadd.f32 %v1105_v58, %v2003_v37 }
 0x3ac   :  { %v1151_v9 = vmul.f32 %v1115_v6, %v1115_v6 }
 0x3b1   :  { %v1107_v4 = vpop.f32.mrf.mxu0 }
 0x3b2   :  { %v1116_v5 = vadd.f32 %v1107_v4, %v2006_v38  ;;  %v1045_v38 = vadd.f32 %v1619_v25, %v1039_v56 }
 0x3b4   :  { %v1152_v7 = vmul.f32 %v1116_v5, %v1116_v5 }
 0x3b6   :  { %v1153_v11 = vadd.f32 %v1152_v7, %v1151_v9 }
 0x3b9   :  { %v1110_v8 = vpop.f32.mrf.mxu0 }
 0x3ba   :  { %v1117_v10 = vadd.f32 %v1110_v8, %v2024_v20 }
 0x3bc   :  { %v1154_v13 = vmul.f32 %v1117_v10, %v1117_v10 }
 0x3be   :  { %v1155_v14 = vadd.f32 %v1154_v13, %v1153_v11 }
 0x3c0   :  { %v1156_v17 = vmax.f32 %v1155_v14, 1e-08 }
 0x3c1   :  { %v1112_v22 = vpop.f32.mrf.mxu0 }
 0x3c2   :  { %v1157_v24 = vsel %vm130_vm0, %v1156_v17, 0.0 }
 0x3c3   :  { %1158 = vadd.xlane.f32.xlu1 %v1157_v24 }
 0x3d2   :  { %v1071_v26 = vpop.f32.mrf.mxu3 }
 0x3d3   :  { %v1075_v37 = vadd.f32 %v1071_v26, %v1045_v38 }
 0x3d5   :  { %v1114_v27 = vadd.f32 %v1075_v37, %v2019_v45 }
 0x3d7   :  { %1120 = vadd.xlane.f32.xlu2 %v1114_v27  ;;  %v1123_v20 = vmul.f32 %v1114_v27, %v1114_v27 }
 0x3da   :  { %v1073_v28 = vpop.f32.mrf.mxu3 }
 0x3df   :  { %1124 = vadd.xlane.f32.xlu2 %v1123_v20 }
 0x436   :  { %v1159_v29 = vpop.xlane.xlu1 %1158 }
 0x437   :  { %v1160_v30 = vmul.f32 %v1159_v29, %v1967_v60 }
 0x439   :  { %1638 = vrsqrt.f32 %v1160_v30  ;;  %vm1167_vm4 = vweird.f32 %v1160_v30 }
 0x43f   :  { %v1639_v31 = vpop.eup %1638 }
 0x440   :  { %v1162_v32 = vmul.f32 %v1639_v31, %v1160_v30  ;;  %vm1168_vm0 = vweird.f32 %v1639_v31 }
 0x441   :  { %vm1169_vm5 = vmor %vm1167_vm4, %vm1168_vm0 }
 0x442   :  { %v1163_v34 = vmul.f32 %v1639_v31, %v1162_v32 }
 0x444   :  { %v1164_v35 = vmul.f32 0.5, %v1163_v34 }
 0x446   :  { %v1165_v36 = vsub.f32 1.5, %v1164_v35 }
 0x448   :  { %v1166_v39 = vmul.f32 %v1639_v31, %v1165_v36 }
 0x44a   :  { %v1170_v63 = vsel %vm1169_vm5, %v1639_v31, %v1166_v39  ;;  %v1121_v12 = vpop.xlane.xlu2 %1120 }
 0x44b   :  { %v1171_v45 = vmul.f32 %v1170_v63, %v1115_v6  ;;  %v1172_v40 = vmul.f32 %v1170_v63, %v1116_v5  ;;  %v1173_v41 = vmul.f32 %v1170_v63, %v1117_v10  ;;  %v1122_v60 = vmul.f32 0.01, %v1121_v12 }
 0x44d   :  { %v1176_v15 = vpack.c.bf16 %v1171_v45, %v1171_v45  ;;  %v1177_v23 = vpack.c.bf16 %v1172_v40, %v1172_v40  ;;  %v1178_v42 = vpack.c.bf16 %v1173_v41, %v1173_v41  ;;  %v1127_v43 = vmul.f32 %v1122_v60, %v1122_v60 }
 0x44e   :  { %v1130_v52 = vsub.f32 %v1114_v27, %v1122_v60 }
 0x44f   :  { %1180 = vst.msk [vmem:[%s2304_s20] sm:$0xf] %vm1179_vm6, %v1176_v15 }
 0x450   :  { %1181 = vst.msk [vmem:[%s2304_s20 + $0x4] sm:$0xf] %vm1179_vm6, %v1177_v23 }
 0x451   :  { %1182 = vst.msk [vmem:[%s2304_s20 + $0x8] sm:$0xf] %vm1179_vm6, %v1178_v42 }
 0x452   :  { %v1125_v16 = vpop.xlane.xlu2 %1124 }
 0x453   :  { %v1126_v18 = vmul.f32 0.01, %v1125_v16 }
 0x455   :  { %v1128_v19 = vsub.f32 %v1126_v18, %v1127_v43 }
 0x457   :  { %v1129_v44 = vmax.f32 %v1128_v19, 0.0 }
 0x459   :  { %v1131_v46 = vadd.f32 1e-05, %v1129_v44 }
 0x45b   :  { %1640 = vrsqrt.f32 %v1131_v46  ;;  %vm1138_vm8 = vweird.f32 %v1131_v46 }
 0x461   :  { %v1641_v33 = vpop.eup %1640 }
 0x462   :  { %v1133_v47 = vmul.f32 %v1641_v33, %v1131_v46  ;;  %vm1139_vm7 = vweird.f32 %v1641_v33 }
 0x463   :  { %vm1140_vm9 = vmor %vm1138_vm8, %vm1139_vm7 }
 0x464   :  { %v1134_v48 = vmul.f32 %v1641_v33, %v1133_v47 }
 0x466   :  { %v1135_v49 = vmul.f32 0.5, %v1134_v48 }
 0x468   :  { %v1136_v21 = vsub.f32 1.5, %v1135_v49 }
 0x46a   :  { %v1137_v51 = vmul.f32 %v1641_v33, %v1136_v21 }
 0x46c   :  { %v1141_v54 = vsel %vm1140_vm9, %v1641_v33, %v1137_v51 }
 0x46d   :  { %v1142_v56 = vmul.f32 %v1141_v54, %v1130_v52 }
 0x46f   :  { %v1146_v57 = vmul.f32 %v1620_v53, %v1142_v56 }
 0x471   :  { %v1150_v59 = vadd.f32 %v1621_v55, %v1146_v57 }
 0x473   :  { %v1174_v61 = vpack.c.bf16 %v1150_v59, %v1150_v59 }
 0x475   :  { %1175 = vst [vmem:[%s2319_s29] sm:$0xf] %v1174_v61 }

// kernel: forward.22
= control target key start
LH: loop header
LB: loop body
LE: loop exit
PB: predicated region body
PF: predicated region fallthrough
CT: control target
= control target key end

     0   :  { %v2157_v2 = vmov 0   ;;  %vm203_vm0 = vcmask 130048   ;;  %vm584_vm1 = vcmask 1041408   ;;  %vm712_vm2 = vcmask 1040384   ;;  %s2758_s6 = inlined_call_operand.vmem [shape: bf16[16,33], index: 6, kind: input, shape index: {}]   ;;  %s2759_s8 = inlined_call_operand.vmem [shape: bf16[16,33], index: 8, kind: input, shape index: {}]   ;;  %s2760_s3 = inlined_call_operand.vmem [shape: bf16[3,24,16], index: 3, kind: input, shape index: {}]   ;;  %s2761_s5 = inlined_call_operand.vmem [shape: bf16[3,24,16], index: 5, kind: input, shape index: {}]   ;;  %s2762_s4 = inlined_call_operand.vmem [shape: bf16[3,24,1], index: 4, kind: input, shape index: {}]   ;;  %s2763_s9 = inlined_call_operand.vmem [shape: bf16[128,128], index: 9, kind: input, shape index: {}]   ;;  %s2764_s11 = inlined_call_operand.vmem [shape: bf16[128,128], index: 11, kind: input, shape index: {}]   ;;  %s2765_s10 = inlined_call_operand.vmem [shape: bf16[52,128], index: 10, kind: input, shape index: {}]   ;;  %s2766_s14 = inlined_call_operand.vmem [shape: bf16[33,16], index: 14, kind: input, shape index: {}]   ;;  %s2767_s1 = inlined_call_operand.vmem [shape: bf16[24,52], index: 1, kind: input, shape index: {}]   ;;  %s2768_s0 = inlined_call_operand.vmem [shape: bf16[24,128], index: 0, kind: input, shape index: {}]   ;;  %s2769_s12 = inlined_call_operand.vmem [shape: bf16[33,128], index: 12, kind: input, shape index: {}]   ;;  %s2770_s2 = inlined_call_operand.vmem [shape: bf16[24,128], index: 2, kind: input, shape index: {}]   ;;  %s2771_s13 = inlined_call_operand.vmem [shape: f32[1,128], index: 13, kind: input, shape index: {}]   ;;  %s2772_s7 = inlined_call_operand.vmem [shape: bf16[1,33], index: 7, kind: input, shape index: {}]   ;;  %s2773_s16 = inlined_call_operand.vmem [shape: bf16[128,128], index: 16, kind: input, shape index: {}]   ;;  %s2774_s18 = inlined_call_operand.vmem [shape: f32[1,128], index: 18, kind: input, shape index: {}]   ;;  %s2775_s15 = inlined_call_operand.vmem [shape: bf16[16,16], index: 15, kind: input, shape index: {}]   ;;  %s2776_s19 = inlined_call_operand.vmem [shape: bf16[16,16], index: 19, kind: input, shape index: {}]   ;;  %s2777_s17 = inlined_call_operand.vmem [shape: bf16[16,128], index: 17, kind: input, shape index: {}]   ;;  %s2778_s21 = inlined_call_operand.vmem [shape: bf16[128,128], index: 21, kind: input, shape index: {}]   ;;  %s2779_s23 = inlined_call_operand.vmem [shape: f32[1,128], index: 23, kind: input, shape index: {}]   ;;  %s2780_s20 = inlined_call_operand.vmem [shape: bf16[16,16], index: 20, kind: input, shape index: {}]   ;;  %s2781_s22 = inlined_call_operand.vmem [shape: bf16[16,128], index: 22, kind: input, shape index: {}]   ;;  %s2782_s24 = inlined_call_operand.vmem [shape: bf16[16,16], index: 24, kind: input, shape index: {}]   ;;  %s2783_s26 = inlined_call_operand.vmem [shape: bf16[3,24,16], index: 26, kind: output, shape index: {1}]   ;;  %s2784_s25 = inlined_call_operand.vmem [shape: bf16[24,128], index: 25, kind: output, shape index: {0}]  }
   0x1   :  { %2794 = sst [smem:[#allocation2_spill]] %s2758_s6  ;;  %2077 = vset.pattern.permute.xlu0 %v2157_v2  ;;  %2088 = vset.pattern.permute.xlu1 %v2157_v2  ;;  %v714_v50 = vsel %vm712_vm2, 65535, %v2157_v2  ;;  %vm577_vm3 = vcmask 424960   ;;  %vm705_vm4 = vcmask 269312  }
   0x2   :  { %2795 = sst [smem:[#allocation3_spill]] %s2759_s8  ;;  %2099 = vset.pattern.permute.xlu2 %v2157_v2 }
   0x3   :  { %2796 = sst [smem:[#allocation4_spill]] %s2760_s3 }
   0x4   :  { %2797 = sst [smem:[#allocation5_spill]] %s2761_s5 }
   0x5   :  { %2798 = sst [smem:[#allocation6_spill]] %s2762_s4 }
   0x6   :  { %2799 = sst [smem:[#allocation7_spill]] %s2763_s9 }
   0x7   :  { %2800 = sst [smem:[#allocation8_spill]] %s2764_s11 }
   0x8   :  { %2801 = sst [smem:[#allocation9_spill]] %s2765_s10 }
   0x9   :  { %2802 = sst [smem:[#allocation10_spill]] %s2766_s14 }
   0xa   :  { %2803 = sst [smem:[#allocation11_spill]] %s2767_s1 }
   0xb   :  { %2804 = sst [smem:[#allocation12_spill]] %s2768_s0 }
   0xc   :  { %2805 = sst [smem:[#allocation13_spill]] %s2779_s23 }
   0xd   :  { %s2806_s10 = sld [smem:[#allocation2_spill]] }
   0xe   :  { %s2807_s23 = sld [smem:[#allocation3_spill]] }
   0xf   :  { %s2808_s29 = sld [smem:[#allocation4_spill]] }
  0x10   :  { %s2809_s0 = sld [smem:[#allocation5_spill]] }
  0x11   :  { %s2810_s11 = sld [smem:[#allocation6_spill]] }
  0x12   :  { %s2811_s6 = sld [smem:[#allocation7_spill]] }
  0x13   :  { %v1989_v0 = vld [vmem:[%s2806_s10] sm:$0xff]  ;;  %s2812_s1 = sld [smem:[#allocation8_spill]] }
  0x14   :  { %v1990_v1 = vld [vmem:[%s2807_s23] sm:$0xff]  ;;  %226 = vmatpush.bf16.msra.mxu0 %v1989_v0  ;;  %s2813_s5 = sld [smem:[#allocation9_spill]] }
  0x15   :  { %v1981_v3 = vld [vmem:[%s2808_s29] sm:$0xff]  ;;  %377 = vmatpush.bf16.msra.mxu1 %v1990_v1  ;;  %v1982_v21 = vld [vmem:[%s2808_s29 + $0x8] sm:$0xff]  ;;  %v1983_v24 = vld [vmem:[%s2808_s29 + $0x10] sm:$0xff]  ;;  %s2814_s14 = sld [smem:[#allocation10_spill]] }
  0x16   :  { %v1985_v4 = vld [vmem:[%s2809_s0] sm:$0xff]  ;;  %v1986_v22 = vld [vmem:[%s2809_s0 + $0x8] sm:$0xff]  ;;  %v1987_v25 = vld [vmem:[%s2809_s0 + $0x10] sm:$0xff]  ;;  %s2815_s10 = sld [smem:[#allocation11_spill]] }
  0x17   :  { %v2037_v5 = vld [vmem:[%s2810_s11] sm:$0xff]   ;;  %v2057_v8 = vld [vmem:[%s2810_s11 + $0x8] sm:$0xff]   ;;  %1717 = vmatmul.msk.bf16.vlgmr.msra.gmra.mxu0 %vm203_vm0, %v1981_v3  ;;  %v2058_v10 = vld [vmem:[%s2810_s11 + $0x10] sm:$0xff]   ;;  %s2816_s28 = sld [smem:[#allocation12_spill]] }
  0x18   :  { %v2038_v6 = vunpack.c.l.bf16 %v2037_v5  ;;  %v2039_v7 = vunpack.c.h.bf16 %v2037_v5  ;;  %1742 = vmatmul.msk.bf16.vlgmr.msra.gmra.mxu1 %vm203_vm0, %v1985_v4  ;;  %v2042_v11 = vunpack.c.l.bf16 %v2057_v8  ;;  %v2043_v12 = vunpack.c.h.bf16 %v2057_v8  ;;  %v2059_v15 = vld [vmem:[%s2810_s11 + $0x18] sm:$0xff]   ;;  %v1997_v26 = vld [vmem:[%s2811_s6 + $0x30] sm:$0xff]  ;;  %v1996_v28 = vld [vmem:[%s2811_s6 + $0x28] sm:$0xff] }
  0x19   :  { %v2046_v13 = vunpack.c.l.bf16 %v2058_v10  ;;  %v2047_v14 = vunpack.c.h.bf16 %v2058_v10  ;;  %v2050_v18 = vunpack.c.l.bf16 %v2059_v15  ;;  %v2051_v19 = vunpack.c.h.bf16 %v2059_v15  ;;  %v1998_v23 = vld [vmem:[%s2811_s6 + $0x38] sm:$0xff]  ;;  %v2359_v30 = vld [vmem:[%s2812_s1 + $0x30] sm:$0xff]  ;;  %v1995_v33 = vld [vmem:[%s2811_s6 + $0x20] sm:$0xff] }
  0x1a   :  { %v2078_v9 = vpack.i.bf16 %v2039_v7, %v2038_v6  ;;  %v2083_v17 = vpack.i.bf16 %v2043_v12, %v2042_v11  ;;  %524 = vmatpush.bf16.msra.mxu2 %v1998_v23  ;;  %v2347_v27 = vld [vmem:[%s2812_s1 + $0x38] sm:$0xff]  ;;  %v109_v34 = vld [vmem:[%s2810_s11 + $0x20] sm:$0xf]  ;;  %v2371_v36 = vld [vmem:[%s2812_s1 + $0x28] sm:$0xff] }
  0x1b   :  { %v2089_v16 = vpack.i.bf16 %v2047_v14, %v2046_v13  ;;  %v2094_v20 = vpack.i.bf16 %v2051_v19, %v2050_v18  ;;  %v146_v29 = vld [vmem:[%s2813_s5 + $0x18] sm:$0x3]  ;;  %667 = vmatpush.bf16.msrb.mxu0 %v2347_v27  ;;  %v260_v37 = vunpack.c.l.bf16 %v109_v34  ;;  %v2001_v38 = vld [vmem:[%s2813_s5 + $0x10] sm:$0xff]  ;;  %v2006_v40 = vld [vmem:[%s2812_s1 + $0x20] sm:$0xff] }
  0x1c   :  { %2079 = vperm.xlu0 %2077, %v2078_v9   ;;  %v569_v31 = vunpack.c.l.b16 %v146_v29  ;;  %v1994_v39 = vld [vmem:[%s2811_s6 + $0x18] sm:$0xff]  ;;  %v2000_v43 = vld [vmem:[%s2813_s5 + $0x8] sm:$0xff]  ;;  %v1993_v44 = vld [vmem:[%s2811_s6 + $0x10] sm:$0xff] }
  0x1d   :  { %2090 = vperm.xlu1 %2088, %v2089_v16   ;;  %304 = vperm.xlu2 %2099, %v260_v37   ;;  %v1984_v41 = vld [vmem:[%s2808_s29 + $0x18] sm:$0xff]  ;;  %v173_v46 = vld [vmem:[%s2814_s14 + $0x10] sm:$0x1]  ;;  %v1999_v47 = vld [vmem:[%s2813_s5] sm:$0xff] }
  0x1e   :  { %525 = vmatpush.bf16.msra.mxu2 %v1997_v26  ;;  %v573_v32 = vpack.c.b16 %v569_v31, %v569_v31  ;;  %v1988_v42 = vld [vmem:[%s2809_s0 + $0x18] sm:$0xff]  ;;  %v753_v48 = vunpack.c.l.b16 %v173_v46  ;;  %v1992_v49 = vld [vmem:[%s2811_s6 + $0x8] sm:$0xff]  ;;  %v2004_v51 = vld [vmem:[%s2812_s1 + $0x10] sm:$0xff] }
  0x1f   :  { %668 = vmatpush.bf16.msrb.mxu0 %v2359_v30  ;;  %v2005_v45 = vld [vmem:[%s2812_s1 + $0x18] sm:$0xff]  ;;  %v1979_v53 = vld [vmem:[%s2815_s10] sm:$0xff]  ;;  %v2003_v58 = vld [vmem:[%s2812_s1 + $0x8] sm:$0xff] }
  0x20   :  { %v586_v35 = vsel %vm584_vm1, %v573_v32, 0  ;;  %v756_v52 = vpack.c.b16 %v753_v48, %v753_v48  ;;  %v100_v54 = vld [vmem:[%s2808_s29 + $0x20] sm:$0xf]  ;;  %v2013_v61 = vld [vmem:[%s2814_s14 + $0x8] sm:$0xff]  ;;  %v167_v7 = vld [vmem:[%s2769_s12 + $0x10] sm:$0x1] }
  0x21   :  { %592 = vmatpush.bf16.msra.mxu3 %v586_v35  ;;  %v118_v55 = vld [vmem:[%s2809_s0 + $0x20] sm:$0xf]  ;;  %v191_v59 = vunpack.c.l.b16 %v100_v54  ;;  %v88_v2 = vld [vmem:[%s2815_s10 + $0x8] sm:$0xf]  ;;  %v699_v10 = vunpack.c.l.b16 %v167_v7 }
  0x22   :  { %526 = vmatpush.bf16.msra.mxu2 %v1996_v28  ;;  %v775_v56 = vand.u32 %v756_v52, %v714_v50  ;;  %v1991_v57 = vld [vmem:[%s2811_s6] sm:$0xff]  ;;  %v343_v60 = vunpack.c.l.b16 %v118_v55  ;;  %v553_v3 = vunpack.c.l.b16 %v88_v2  ;;  %v85_v4 = vld [vmem:[%s2816_s28 + $0x8] sm:$0xf]  ;;  %s2817_s6 = sld [smem:[#allocation13_spill]] }
  0x23   :  { %669 = vmatpush.bf16.msrb.mxu0 %v2371_v36  ;;  %v1978_v62 = vld [vmem:[%s2816_s28] sm:$0xff]  ;;  %v196_v0 = vpack.c.b16 %v191_v59, %v191_v59  ;;  %v471_v6 = vunpack.c.l.b16 %v85_v4  ;;  %v702_v11 = vpack.c.b16 %v699_v10, %v699_v10  ;;  %v91_v13 = vld [vmem:[%s2770_s2 + $0x8] sm:$0xf] }
  0x24   :  { %2084 = vperm.xlu0 %2077, %v2083_v17   ;;  %v2002_v63 = vld [vmem:[%s2812_s1] sm:$0xff]  ;;  %v348_v1 = vpack.c.b16 %v343_v60, %v343_v60  ;;  %v555_v5 = vpack.c.b16 %v553_v3, %v553_v3  ;;  %v614_v14 = vunpack.c.l.b16 %v91_v13 }
  0x25   :  { %2095 = vperm.xlu1 %2088, %v2094_v20   ;;  %593 = vmatpush.bf16.msra.mxu3 %v2001_v38  ;;  %v473_v8 = vpack.c.b16 %v471_v6, %v471_v6  ;;  %v1980_v9 = vld [vmem:[%s2770_s2] sm:$0xff]  ;;  %v716_v12 = vand.u32 %v714_v50, %v702_v11 }
  0x26   :  { %527 = vmatpush.bf16.msra.mxu2 %v1995_v33  ;;  %v616_v15 = vpack.c.b16 %v614_v14, %v614_v14  ;;  %v2012_v16 = vld [vmem:[%s2814_s14] sm:$0xff] }
  0x27   :  { %1718 = vmatmul.msk.bf16.gmra.mxu0 %vm203_vm0, %v1982_v21  ;;  %v121_v17 = vld [vmem:[%s2772_s7] sm:$0x1] }
  0x28   :  { %1743 = vmatmul.msk.bf16.gmra.mxu1 %vm203_vm0, %v1986_v22  ;;  %670 = vmatpush.bf16.msrb.mxu0 %v2006_v40  ;;  %v261_v18 = vunpack.c.l.bf16 %v121_v17  ;;  %v2010_v6 = vld [vmem:[%s2769_s12] sm:$0xff] }
  0x29   :  { %594 = vmatpush.bf16.msra.mxu3 %v2000_v43 }
  0x2a   :  { %528 = vmatpush.bf16.msra.mxu2 %v1994_v39  ;;  %v2465_v21 = vperm.slane %v261_v18, 0 }
  0x2c   :  { %671 = vmatpush.bf16.msrb.mxu0 %v2005_v45 }
  0x2d   :  { %595 = vmatpush.bf16.msra.mxu3 %v1999_v47 }
  0x2e   :  { %529 = vmatpush.bf16.msra.mxu2 %v1993_v44 }
  0x30   :  { %672 = vmatpush.bf16.msrb.mxu0 %v2004_v51  ;;  %1799 = vmatmul.msk.bf16.vlgmr.msra.gmra.mxu3 %vm577_vm3, %v1979_v53 }
  0x31   :  { %782 = vmatpush.bf16.msrb.mxu3 %v775_v56 }
  0x32   :  { %530 = vmatpush.bf16.msra.mxu2 %v1992_v49 }
  0x34   :  { %673 = vmatpush.bf16.msrb.mxu0 %v2003_v58 }
  0x35   :  { %783 = vmatpush.bf16.msrb.mxu3 %v2013_v61 }
  0x36   :  { %531 = vmatpush.bf16.msra.mxu2 %v1991_v57 }
  0x37   :  { %1719 = vmatmul.msk.bf16.gmra.mxu0 %vm203_vm0, %v1983_v24 }
  0x38   :  { %1744 = vmatmul.msk.bf16.gmra.mxu1 %vm203_vm0, %v1987_v25  ;;  %674 = vmatpush.bf16.msrb.mxu0 %v2002_v63 }
  0x39   :  { %532 = vmatmul.bf16.vlgmr.msra.gmra.mxu2 %v1978_v62  ;;  %784 = vmatpush.bf16.msrb.mxu3 %v2012_v16 }
  0x3a   :  { %2060 = vmatpush.bf16.msrb.mxu2 %v2347_v27 }
  0x3e   :  { %2061 = vmatpush.bf16.msrb.mxu2 %v2359_v30 }
  0x40   :  { %1800 = vmatmul.msk.bf16.gmra.mxu3 %vm577_vm3, %v555_v5 }
  0x42   :  { %2062 = vmatpush.bf16.msrb.mxu2 %v2371_v36 }
  0x46   :  { %2063 = vmatpush.bf16.msrb.mxu2 %v2006_v40 }
  0x47   :  { %1720 = vmatmul.msk.bf16.gmra.mxu0 %vm203_vm0, %v1984_v41 }
  0x48   :  { %1745 = vmatmul.msk.bf16.gmra.mxu1 %vm203_vm0, %v1988_v42 }
  0x49   :  { %537 = vmatmul.bf16.gmra.mxu2 %v473_v8 }
  0x4a   :  { %2064 = vmatpush.bf16.msrb.mxu2 %v2005_v45 }
  0x4e   :  { %2065 = vmatpush.bf16.msrb.mxu2 %v2004_v51 }
  0x52   :  { %2066 = vmatpush.bf16.msrb.mxu2 %v2003_v58 }
  0x56   :  { %2067 = vmatpush.bf16.msrb.mxu2 %v2002_v63 }
  0x57   :  { %1721 = vmatmul.msk.bf16.gmra.mxu0 %vm203_vm0, %v196_v0 }
  0x58   :  { %1746 = vmatmul.msk.bf16.gmra.mxu1 %vm203_vm0, %v348_v1  ;;  %v2011_v1 = vld [vmem:[%s2769_s12 + $0x8] sm:$0xff] }
  0x59   :  { %680 = vmatmul.bf16.vlgmr.msrb.gmra.mxu2 %v616_v15 }
  0x5a   :  { %723 = vmatpush.bf16.msra.mxu2 %v716_v12 }
  0x5e   :  { %724 = vmatpush.bf16.msra.mxu2 %v2011_v1 }
  0x62   :  { %725 = vmatpush.bf16.msra.mxu2 %v2010_v6 }
  0x67   :  { %675 = vmatmul.bf16.vlgmr.msrb.gmra.mxu0 %v1980_v9 }
  0x8e   :  { %v2080_v19 = vpop.permute.xlu0 %2079 }
  0x8f   :  { %v2081_v20 = vunpack.i.l.bf16 %v2080_v19  ;;  %v2082_v24 = vunpack.i.h.bf16 %v2080_v19  ;;  %v2091_v47 = vpop.permute.xlu1 %2090  ;;  %v305_v19 = vpop.permute.xlu2 %304 }
  0x90   :  { %v2092_v49 = vunpack.i.l.bf16 %v2091_v47  ;;  %v2093_v52 = vunpack.i.h.bf16 %v2091_v47 }
  0x91   :  { %v308_v25 = vmul.f32 %v2081_v20, %v2465_v21  ;;  %v309_v26 = vmul.f32 %v2082_v24, %v2465_v21 }
  0x92   :  { %v312_v53 = vmul.f32 %v2092_v49, %v2465_v21  ;;  %v313_v54 = vmul.f32 %v2093_v52, %v2465_v21 }
  0x94   :  { %v228_v22 = vpop.f32.mrf.mxu0 }
  0x95   :  { %v379_v23 = vpop.f32.mrf.mxu1  ;;  %v317_v27 = vadd.f32 %v308_v25, %v228_v22 }
  0x96   :  { %v2085_v34 = vpop.permute.xlu0 %2084 }
  0x97   :  { %v403_v31 = vadd.f32 %v379_v23, %v317_v27  ;;  %v2086_v37 = vunpack.i.l.bf16 %v2085_v34  ;;  %v2087_v38 = vunpack.i.h.bf16 %v2085_v34  ;;  %v2096_v56 = vpop.permute.xlu1 %2095 }
  0x98   :  { %v2097_v61 = vunpack.i.l.bf16 %v2096_v56  ;;  %v2098_v8 = vunpack.i.h.bf16 %v2096_v56 }
  0x99   :  { %v310_v39 = vmul.f32 %v2086_v37, %v2465_v21  ;;  %v311_v41 = vmul.f32 %v2087_v38, %v2465_v21  ;;  %v412_v7 = vmul.f32 %v403_v31, %v403_v31 }
  0x9a   :  { %v314_v0 = vmul.f32 %v2097_v61, %v2465_v21  ;;  %v315_v13 = vmul.f32 %v2098_v8, %v2465_v21 }
  0x9c   :  { %v230_v28 = vpop.f32.mrf.mxu0 }
  0x9d   :  { %v381_v29 = vpop.f32.mrf.mxu1  ;;  %v318_v30 = vadd.f32 %v309_v26, %v230_v28  ;;  %v316_v26 = vmul.f32 %v2465_v21, %v305_v19 }
  0x9f   :  { %v404_v32 = vadd.f32 %v381_v29, %v318_v30 }
  0xa1   :  { %v739_v33 = vpack.c.bf16 %v404_v32, %v403_v31  ;;  %v413_v20 = vmul.f32 %v404_v32, %v404_v32  ;;  %v2492_v31 = vld [vmem:[%s2771_s13] ss:$0 sm:$0xff] }
  0xa3   :  { %1855 = vmatmul.msk.bf16.vlgmr.msrb.gmra.mxu3 %vm705_vm4, %v739_v33 }
  0xa4   :  { %v233_v35 = vpop.f32.mrf.mxu0 }
  0xa5   :  { %v384_v36 = vpop.f32.mrf.mxu1  ;;  %v319_v40 = vadd.f32 %v310_v39, %v233_v35 }
  0xa7   :  { %v405_v45 = vadd.f32 %v384_v36, %v319_v40 }
  0xa9   :  { %v414_v37 = vmul.f32 %v405_v45, %v405_v45 }
  0xac   :  { %v235_v42 = vpop.f32.mrf.mxu0 }
  0xad   :  { %v386_v43 = vpop.f32.mrf.mxu1  ;;  %v320_v44 = vadd.f32 %v311_v41, %v235_v42 }
  0xaf   :  { %v406_v46 = vadd.f32 %v386_v43, %v320_v44 }
  0xb1   :  { %v740_v48 = vpack.c.bf16 %v406_v46, %v405_v45  ;;  %v415_v4 = vmul.f32 %v406_v46, %v406_v46 }
  0xb3   :  { %1856 = vmatmul.msk.bf16.gmra.mxu3 %vm705_vm4, %v740_v48  ;;  %v418_v10 = vadd.f32 %v415_v4, %v412_v7  ;;  %v597_v28 = vpop.f32.mrf.mxu3 }
  0xb4   :  { %v238_v50 = vpop.f32.mrf.mxu0 }
  0xb5   :  { %v389_v51 = vpop.f32.mrf.mxu1  ;;  %v321_v55 = vadd.f32 %v312_v53, %v238_v50 }
  0xb7   :  { %v407_v60 = vadd.f32 %v389_v51, %v321_v55 }
  0xb9   :  { %v416_v16 = vmul.f32 %v407_v60, %v407_v60 }
  0xbb   :  { %v419_v23 = vadd.f32 %v416_v16, %v413_v20  ;;  %v2498_v53 = vpop.f32.mrf.mxu3 }
  0xbc   :  { %v240_v57 = vpop.f32.mrf.mxu0  ;;  %v533_v38 = vpop.f32.mrf.mxu2 }
  0xbd   :  { %v391_v58 = vpop.f32.mrf.mxu1  ;;  %v322_v59 = vadd.f32 %v313_v54, %v240_v57  ;;  %v545_v40 = vadd.f32 %v2492_v31, %v533_v38  ;;  %v2017_v38 = vld [vmem:[%s2773_s16 + $0x10] sm:$0xff] }
  0xbf   :  { %v408_v62 = vadd.f32 %v391_v58, %v322_v59  ;;  %v2496_v44 = vadd.f32 %v597_v28, %v545_v40 }
  0xc1   :  { %v741_v63 = vpack.c.bf16 %v408_v62, %v407_v60  ;;  %v417_v33 = vmul.f32 %v408_v62, %v408_v62 }
  0xc3   :  { %1857 = vmatmul.msk.bf16.gmra.mxu3 %vm705_vm4, %v741_v63  ;;  %v420_v41 = vadd.f32 %v417_v33, %v414_v37  ;;  %v602_v63 = vpop.f32.mrf.mxu3  ;;  %v2018_v37 = vld [vmem:[%s2773_s16 + $0x18] sm:$0xff] }
  0xc4   :  { %v243_v2 = vpop.f32.mrf.mxu0  ;;  %v2500_v54 = vpop.f32.mrf.mxu2 }
  0xc5   :  { %v394_v3 = vpop.f32.mrf.mxu1  ;;  %v323_v5 = vadd.f32 %v314_v0, %v243_v2 }
  0xc7   :  { %v409_v9 = vadd.f32 %v394_v3, %v323_v5 }
  0xc9   :  { %v421_v11 = vmul.f32 %v409_v9, %v409_v9 }
  0xcb   :  { %v424_v12 = vadd.f32 %v421_v11, %v418_v10 }
  0xcc   :  { %v245_v14 = vpop.f32.mrf.mxu0  ;;  %v538_v0 = vpop.f32.mrf.mxu2 }
  0xcd   :  { %v396_v15 = vpop.f32.mrf.mxu1  ;;  %v2484_v17 = vmax.f32 %v424_v12, 1e-08  ;;  %v324_v18 = vadd.f32 %v315_v13, %v245_v14  ;;  %v547_v4 = vadd.f32 %v2492_v31, %v538_v0 }
  0xcf   :  { %2103 = vrsqrt.f32 %v2484_v17  ;;  %v410_v22 = vadd.f32 %v396_v15, %v324_v18  ;;  %vm437_vm5 = vcmp.eq.f32.partialorder %v2484_v17, inf  ;;  %vm439_vm6 = vcmp.eq.f32.partialorder %v2484_v17, 0.0  ;;  %v604_v15 = vpop.f32.mrf.mxu3 }
  0xd0   :  { %v440_v5 = vand.u32 2147483648, %v2484_v17 }
  0xd1   :  { %v422_v24 = vmul.f32 %v410_v22, %v410_v22  ;;  %v742_v25 = vpack.c.bf16 %v410_v22, %v409_v9  ;;  %v608_v9 = vadd.f32 %v602_v63, %v547_v4 }
  0xd3   :  { %v425_v27 = vadd.f32 %v422_v24, %v419_v23  ;;  %1858 = vmatmul.msk.bf16.gmra.mxu3 %vm705_vm4, %v742_v25 }
  0xd4   :  { %v248_v29 = vpop.f32.mrf.mxu0  ;;  %v540_v16 = vpop.f32.mrf.mxu2 }
  0xd5   :  { %v399_v30 = vpop.f32.mrf.mxu1  ;;  %v2104_v32 = vpop.eup %2103  ;;  %v428_v34 = vmax.f32 %v425_v27, 1e-08  ;;  %v325_v35 = vadd.f32 %v316_v26, %v248_v29 }
  0xd6   :  { %v431_v36 = vmul.f32 %v2104_v32, %v2484_v17 }
  0xd7   :  { %2105 = vrsqrt.f32 %v428_v34  ;;  %v411_v21 = vadd.f32 %v399_v30, %v325_v35  ;;  %vm449_vm7 = vcmp.eq.f32.partialorder %v428_v34, inf  ;;  %v452_v6 = vand.u32 2147483648, %v428_v34  ;;  %v2022_v30 = vld [vmem:[%s2773_s16 + $0x38] sm:$0xff]  ;;  %v2019_v35 = vld [vmem:[%s2773_s16 + $0x20] sm:$0xff] }
  0xd8   :  { %v432_v39 = vmul.f32 %v2104_v32, %v431_v36  ;;  %vm451_vm8 = vcmp.eq.f32.partialorder %v428_v34, 0.0  ;;  %1119 = vmatpush.bf16.msrb.mxu1 %v2022_v30 }
  0xd9   :  { %v423_v42 = vmul.f32 %v411_v21, %v411_v21  ;;  %v743_v45 = vpack.c.bf16 %v411_v21, %v411_v21 }
  0xda   :  { %v433_v43 = vmul.f32 0.5, %v432_v39 }
  0xdb   :  { %v426_v46 = vadd.f32 %v423_v42, %v420_v41 }
  0xdc   :  { %v250_v47 = vpop.f32.mrf.mxu0  ;;  %v434_v49 = vsub.f32 1.5, %v433_v43  ;;  %v2016_v43 = vld [vmem:[%s2773_s16 + $0x8] sm:$0xff] }
  0xdd   :  { %v401_v48 = vpop.f32.mrf.mxu1  ;;  %v2106_v50 = vpop.eup %2105  ;;  %v429_v51 = vmax.f32 %v426_v46, 1e-08 }
  0xde   :  { %v443_v52 = vmul.f32 %v2106_v50, %v428_v34  ;;  %v435_v55 = vmul.f32 %v2104_v32, %v434_v49  ;;  %v2021_v32 = vld [vmem:[%s2773_s16 + $0x30] sm:$0xff]  ;;  %v2015_v49 = vld [vmem:[%s2773_s16] sm:$0xff] }
  0xdf   :  { %2107 = vrsqrt.f32 %v429_v51  ;;  %vm461_vm9 = vcmp.eq.f32.partialorder %v429_v51, inf  ;;  %v464_v20 = vand.u32 2147483648, %v429_v51  ;;  %vm463_vm10 = vcmp.eq.f32.partialorder %v429_v51, 0.0  ;;  %1120 = vmatpush.bf16.msrb.mxu1 %v2021_v32 }
  0xe0   :  { %v444_v56 = vmul.f32 %v2106_v50, %v443_v52  ;;  %v436_v58 = vmul.f32 %v435_v55, %v2484_v17 }
  0xe2   :  { %v445_v57 = vmul.f32 0.5, %v444_v56  ;;  %v438_v1 = vsel %vm437_vm5, %v2484_v17, %v436_v58  ;;  %v681_v17 = vpop.f32.mrf.mxu2 }
  0xe3   :  { %1859 = vmatmul.msk.bf16.gmra.mxu3 %vm705_vm4, %v743_v45  ;;  %v441_v10 = vsel %vm439_vm6, %v440_v5, %v438_v1  ;;  %v2510_v23 = vadd.f32 %v681_v17, %v608_v9 }
  0xe4   :  { %v446_v59 = vsub.f32 1.5, %v445_v57 }
  0xe5   :  { %v2108_v60 = vpop.eup %2107 }
  0xe6   :  { %v447_v61 = vmul.f32 %v2106_v50, %v446_v59  ;;  %v455_v62 = vmul.f32 %v2108_v60, %v429_v51 }
  0xe8   :  { %v448_v2 = vmul.f32 %v447_v61, %v428_v34  ;;  %v456_v3 = vmul.f32 %v2108_v60, %v455_v62 }
  0xea   :  { %v450_v7 = vsel %vm449_vm7, %v428_v34, %v448_v2  ;;  %v457_v8 = vmul.f32 0.5, %v456_v3  ;;  %v683_v25 = vpop.f32.mrf.mxu2  ;;  %v2020_v34 = vld [vmem:[%s2773_s16 + $0x28] sm:$0xff]  ;;  %v676_v3 = vpop.f32.mrf.mxu0 }
  0xeb   :  { %v453_v11 = vsel %vm451_vm8, %v452_v6, %v450_v7  ;;  %1121 = vmatpush.bf16.msrb.mxu1 %v2020_v34  ;;  %v685_v32 = vadd.f32 %v676_v3, %v2496_v44 }
  0xec   :  { %v688_v12 = vpack.c.bf16 %v453_v11, %v441_v10  ;;  %v458_v13 = vsub.f32 1.5, %v457_v8 }
  0xee   :  { %1845 = vmatmul.msk.bf16.vlgmr.msra.gmra.mxu2 %vm705_vm4, %v688_v12  ;;  %v459_v14 = vmul.f32 %v2108_v60, %v458_v13  ;;  %v546_v12 = vadd.f32 %v2492_v31, %v2500_v54  ;;  %v2014_v54 = vld [vmem:[%s2775_s15] sm:$0xff] }
  0xef   :  { %1122 = vmatpush.bf16.msrb.mxu1 %v2019_v35  ;;  %989 = vmatpush.bf16.msra.mxu0 %v2014_v54 }
  0xf0   :  { %v460_v18 = vmul.f32 %v459_v14, %v429_v51 }
  0xf2   :  { %v462_v19 = vsel %vm461_vm9, %v429_v51, %v460_v18 }
  0xf3   :  { %v465_v22 = vsel %vm463_vm10, %v464_v20, %v462_v19  ;;  %1123 = vmatpush.bf16.msrb.mxu1 %v2018_v37 }
  0xf4   :  { %v689_v24 = vpack.c.bf16 %v465_v22, %v465_v22  ;;  %v607_v22 = vadd.f32 %v2498_v53, %v546_v12 }
  0xf7   :  { %1124 = vmatpush.bf16.msrb.mxu1 %v2017_v38 }
  0xfb   :  { %1125 = vmatpush.bf16.msrb.mxu1 %v2016_v43 }
  0xfe   :  { %1846 = vmatmul.msk.bf16.gmra.mxu2 %vm705_vm4, %v689_v24  ;;  %v678_v24 = vpop.f32.mrf.mxu0 }
  0xff   :  { %1126 = vmatpush.bf16.msrb.mxu1 %v2015_v49  ;;  %v686_v35 = vadd.f32 %v678_v24, %v607_v22 }
 0x126   :  { %v2513_v26 = vpop.f32.mrf.mxu3 }
 0x127   :  { %v810_v39 = vmul.f32 %v2513_v26, %v2513_v26 }
 0x12e   :  { %v2515_v27 = vpop.f32.mrf.mxu3 }
 0x12f   :  { %v811_v50 = vmul.f32 %v2515_v27, %v2515_v27 }
 0x136   :  { %v2517_v28 = vpop.f32.mrf.mxu3 }
 0x137   :  { %v812_v60 = vmul.f32 %v2517_v28, %v2517_v28 }
 0x13e   :  { %v2519_v29 = vpop.f32.mrf.mxu3 }
 0x13f   :  { %v813_v21 = vmul.f32 %v2519_v29, %v2519_v29 }
 0x141   :  { %v816_v41 = vadd.f32 %v813_v21, %v810_v39 }
 0x146   :  { %v2527_v33 = vpop.f32.mrf.mxu3 }
 0x147   :  { %v814_v47 = vmul.f32 %v2527_v33, %v2527_v33 }
 0x149   :  { %v817_v52 = vadd.f32 %v814_v47, %v811_v50 }
 0x14e   :  { %v2535_v36 = vpop.f32.mrf.mxu3 }
 0x14f   :  { %v815_v57 = vmul.f32 %v2535_v36, %v2535_v36 }
 0x151   :  { %v818_v63 = vadd.f32 %v815_v57, %v812_v60 }
 0x156   :  { %v2547_v40 = vpop.f32.mrf.mxu3 }
 0x157   :  { %v819_v42 = vmul.f32 %v2547_v40, %v2547_v40 }
 0x159   :  { %v822_v46 = vadd.f32 %v819_v42, %v816_v41 }
 0x15b   :  { %v825_v48 = vmax.f32 %v822_v46, 1e-08 }
 0x15d   :  { %2109 = vrsqrt.f32 %v825_v48  ;;  %vm835_vm11 = vcmp.eq.f32.partialorder %v825_v48, inf  ;;  %v838_v13 = vand.u32 2147483648, %v825_v48  ;;  %vm837_vm12 = vcmp.eq.f32.partialorder %v825_v48, 0.0 }
 0x15e   :  { %v2561_v51 = vpop.f32.mrf.mxu3 }
 0x15f   :  { %v820_v45 = vmul.f32 %v2561_v51, %v2561_v51 }
 0x161   :  { %v823_v55 = vadd.f32 %v820_v45, %v817_v52 }
 0x163   :  { %v2110_v56 = vpop.eup %2109  ;;  %v826_v58 = vmax.f32 %v823_v55, 1e-08 }
 0x164   :  { %v829_v59 = vmul.f32 %v2110_v56, %v825_v48 }
 0x165   :  { %2111 = vrsqrt.f32 %v826_v58  ;;  %vm847_vm13 = vcmp.eq.f32.partialorder %v826_v58, inf  ;;  %v850_v37 = vand.u32 2147483648, %v826_v58  ;;  %vm849_vm14 = vcmp.eq.f32.partialorder %v826_v58, 0.0 }
 0x166   :  { %v830_v61 = vmul.f32 %v2110_v56, %v829_v59  ;;  %v2569_v62 = vpop.f32.mrf.mxu3 }
 0x167   :  { %v821_v0 = vmul.f32 %v2569_v62, %v2569_v62 }
 0x168   :  { %v831_v1 = vmul.f32 0.5, %v830_v61 }
 0x169   :  { %v824_v2 = vadd.f32 %v821_v0, %v818_v63 }
 0x16a   :  { %v832_v4 = vsub.f32 1.5, %v831_v1 }
 0x16b   :  { %v2112_v5 = vpop.eup %2111  ;;  %v827_v6 = vmax.f32 %v824_v2, 1e-08 }
 0x16c   :  { %v833_v7 = vmul.f32 %v2110_v56, %v832_v4  ;;  %v841_v8 = vmul.f32 %v2112_v5, %v826_v58 }
 0x16d   :  { %2113 = vrsqrt.f32 %v827_v6  ;;  %vm859_vm15 = vcmp.eq.f32.partialorder %v827_v6, inf  ;;  %v862_v55 = vand.u32 2147483648, %v827_v6  ;;  %vm861_vm1 = vcmp.eq.f32.partialorder %v827_v6, 0.0 }
 0x16e   :  { %v834_v9 = vmul.f32 %v833_v7, %v825_v48  ;;  %v842_v10 = vmul.f32 %v2112_v5, %v841_v8  ;;  %v808_v11 = vpop.f32.mrf.mxu3 }
 0x170   :  { %v836_v14 = vsel %vm835_vm11, %v825_v48, %v834_v9  ;;  %v843_v15 = vmul.f32 0.5, %v842_v10 }
 0x171   :  { %v839_v16 = vsel %vm837_vm12, %v838_v13, %v836_v14  ;;  %v727_v18 = vpop.f32.mrf.mxu2 }
 0x172   :  { %v1860_v19 = vmul.f32 -1.442695, %v839_v16  ;;  %v844_v20 = vsub.f32 1.5, %v843_v15  ;;  %v736_v39 = vadd.f32 %v727_v18, %v685_v32 }
 0x173   :  { %v2114_v17 = vpop.eup %2113 }
 0x174   :  { %2115 = vpow2.f32 %v1860_v19  ;;  %v845_v25 = vmul.f32 %v2112_v5, %v844_v20  ;;  %v853_v30 = vmul.f32 %v2114_v17, %v827_v6  ;;  %v930_v49 = vmax.f32 %v736_v39, 0.0 }
 0x176   :  { %v846_v34 = vmul.f32 %v845_v25, %v826_v58  ;;  %v854_v31 = vmul.f32 %v2114_v17, %v853_v30 }
 0x178   :  { %v848_v21 = vsel %vm847_vm13, %v826_v58, %v846_v34  ;;  %v855_v38 = vmul.f32 0.5, %v854_v31 }
 0x179   :  { %v851_v53 = vsel %vm849_vm14, %v850_v37, %v848_v21  ;;  %v729_v41 = vpop.f32.mrf.mxu2 }
 0x17a   :  { %v2116_v42 = vpop.eup %2115  ;;  %v1861_v43 = vmul.f32 -1.442695, %v851_v53  ;;  %v856_v46 = vsub.f32 1.5, %v855_v38  ;;  %v737_v44 = vadd.f32 %v729_v41, %v686_v35 }
 0x17b   :  { %v873_v47 = vadd.f32 1.0, %v2116_v42 }
 0x17c   :  { %2117 = vpow2.f32 %v1861_v43  ;;  %v857_v48 = vmul.f32 %v2114_v17, %v856_v46  ;;  %v931_v50 = vmax.f32 %v737_v44, 0.0 }
 0x17d   :  { %2119 = vrcp.f32 %v873_v47  ;;  %v887_v10 = vand.u32 2147483648, %v873_v47  ;;  %vm881_vm3 = vweird.f32 %v873_v47  ;;  %v885_v12 = vand.u32 2147483647, %v873_v47 }
 0x17e   :  { %v858_v52 = vmul.f32 %v857_v48, %v827_v6  ;;  %v1069_v45 = vpack.c.bf16 %v931_v50, %v930_v49 }
 0x17f   :  { %v888_v18 = vor.u32 1.1754944e-38, %v887_v10  ;;  %vm886_vm6 = vcmp.eq.f32.partialorder %v885_v12, 8.507059e+37 }
 0x180   :  { %v860_v56 = vsel %vm859_vm15, %v827_v6, %v858_v52  ;;  %1127 = vmatmul.bf16.vlgmr.msrb.gmra.mxu1 %v1069_v45 }
 0x181   :  { %v863_v57 = vsel %vm861_vm1, %v862_v55, %v860_v56  ;;  %v732_v58 = vpop.f32.mrf.mxu2 }
 0x182   :  { %v2118_v59 = vpop.eup %2117  ;;  %v1862_v60 = vmul.f32 -1.442695, %v863_v57  ;;  %v738_v2 = vadd.f32 %v732_v58, %v2510_v23 }
 0x183   :  { %v2120_v61 = vpop.eup %2119  ;;  %v874_v63 = vadd.f32 1.0, %v2118_v59 }
 0x184   :  { %v877_v0 = vmul.f32 %v2120_v61, %v873_v47  ;;  %2121 = vpow2.f32 %v1862_v60  ;;  %v932_v7 = vmax.f32 %v738_v2, 0.0  ;;  %vm882_vm2 = vweird.f32 %v2120_v61 }
 0x185   :  { %2123 = vrcp.f32 %v874_v63  ;;  %vm883_vm4 = vmor %vm881_vm3, %vm882_vm2  ;;  %v902_v16 = vand.u32 2147483648, %v874_v63  ;;  %v900_v19 = vand.u32 2147483647, %v874_v63  ;;  %vm896_vm7 = vweird.f32 %v874_v63 }
 0x186   :  { %v878_v1 = vsub.f32 1.0, %v877_v0  ;;  %v1070_v14 = vpack.c.bf16 %v932_v7, %v932_v7 }
 0x187   :  { %v903_v24 = vor.u32 1.1754944e-38, %v902_v16  ;;  %vm901_vm9 = vcmp.eq.f32.partialorder %v900_v19, 8.507059e+37 }
 0x188   :  { %v879_v3 = vmul.f32 %v2120_v61, %v878_v1 }
 0x189   :  { %v734_v4 = vpop.f32.mrf.mxu2 }
 0x18a   :  { %v2122_v5 = vpop.eup %2121  ;;  %v880_v9 = vadd.f32 %v2120_v61, %v879_v3 }
 0x18b   :  { %v2124_v8 = vpop.eup %2123  ;;  %v875_v6 = vadd.f32 1.0, %v2122_v5 }
 0x18c   :  { %v892_v11 = vmul.f32 %v2124_v8, %v874_v63  ;;  %v884_v15 = vsel %vm883_vm4, %v2120_v61, %v880_v9  ;;  %vm897_vm5 = vweird.f32 %v2124_v8  ;;  %v2023_v63 = vld [vmem:[%s2777_s17] sm:$0xff] }
 0x18d   :  { %2125 = vrcp.f32 %v875_v6  ;;  %v889_v20 = vsel %vm886_vm6, %v888_v18, %v884_v15  ;;  %vm898_vm8 = vmor %vm896_vm7, %vm897_vm5  ;;  %v917_v41 = vand.u32 2147483648, %v875_v6  ;;  %vm911_vm11 = vweird.f32 %v875_v6  ;;  %1164 = vmatpush.bf16.msrb.mxu2 %v2023_v63 }
 0x18e   :  { %v893_v13 = vsub.f32 1.0, %v892_v11  ;;  %v921_v32 = vmul.f32 %v889_v20, %v2513_v26  ;;  %v927_v31 = vmul.f32 %v889_v20, %v2547_v40  ;;  %v915_v42 = vand.u32 2147483647, %v875_v6 }
 0x18f   :  { %v918_v43 = vor.u32 1.1754944e-38, %v917_v41 }
 0x190   :  { %v894_v23 = vmul.f32 %v2124_v8, %v893_v13  ;;  %1132 = vmatmul.bf16.gmra.mxu1 %v1070_v14  ;;  %vm916_vm13 = vcmp.eq.f32.partialorder %v915_v42, 8.507059e+37 }
 0x192   :  { %v895_v17 = vadd.f32 %v2124_v8, %v894_v23 }
 0x193   :  { %v2126_v22 = vpop.eup %2125 }
 0x194   :  { %v899_v25 = vsel %vm898_vm8, %v2124_v8, %v895_v17  ;;  %v907_v30 = vmul.f32 %v2126_v22, %v875_v6  ;;  %vm912_vm10 = vweird.f32 %v2126_v22 }
 0x195   :  { %v904_v34 = vsel %vm901_vm9, %v903_v24, %v899_v25  ;;  %vm913_vm12 = vmor %vm911_vm11, %vm912_vm10 }
 0x196   :  { %v922_v54 = vmul.f32 %v904_v34, %v2515_v27  ;;  %v928_v35 = vmul.f32 %v904_v34, %v2561_v51  ;;  %v908_v37 = vsub.f32 1.0, %v907_v30  ;;  %v924_v51 = vmul.f32 %v889_v20, %v2519_v29 }
 0x197   :  { %v925_v47 = vmul.f32 %v904_v34, %v2527_v33 }
 0x198   :  { %v956_v21 = vpack.c.bf16 %v922_v54, %v921_v32  ;;  %v959_v38 = vpack.c.bf16 %v928_v35, %v927_v31  ;;  %v909_v39 = vmul.f32 %v2126_v22, %v908_v37 }
 0x19a   :  { %v910_v53 = vadd.f32 %v2126_v22, %v909_v39  ;;  %1867 = vmatmul.msk.bf16.vlgmr.msra.gmra.mxu0 %vm203_vm0, %v956_v21 }
 0x19c   :  { %v914_v26 = vsel %vm913_vm12, %v2126_v22, %v910_v53 }
 0x19d   :  { %v919_v40 = vsel %vm916_vm13, %v918_v43, %v914_v26 }
 0x19e   :  { %v923_v27 = vmul.f32 %v919_v40, %v2517_v28  ;;  %v926_v44 = vmul.f32 %v919_v40, %v2535_v36  ;;  %v929_v49 = vmul.f32 %v919_v40, %v2569_v62  ;;  %v2024_v28 = vld [vmem:[%s2776_s19] sm:$0xff] }
 0x19f   :  { %1211 = vmatpush.bf16.msra.mxu1 %v2024_v28 }
 0x1a0   :  { %v957_v46 = vpack.c.bf16 %v924_v51, %v923_v27  ;;  %v958_v48 = vpack.c.bf16 %v926_v44, %v925_v47  ;;  %v960_v50 = vpack.c.bf16 %v929_v49, %v929_v49 }
 0x1aa   :  { %1868 = vmatmul.msk.bf16.gmra.mxu0 %vm203_vm0, %v957_v46 }
 0x1ba   :  { %1869 = vmatmul.msk.bf16.gmra.mxu0 %vm203_vm0, %v958_v48 }
 0x1ca   :  { %1870 = vmatmul.msk.bf16.gmra.mxu0 %vm203_vm0, %v959_v38 }
 0x1da   :  { %1871 = vmatmul.msk.bf16.gmra.mxu0 %vm203_vm0, %v960_v50 }
 0x1fd   :  { %v2598_v29 = vpop.f32.mrf.mxu1 }
 0x205   :  { %v2600_v36 = vpop.f32.mrf.mxu1 }
 0x20d   :  { %v2602_v33 = vpop.f32.mrf.mxu1 }
 0x215   :  { %v1135_v52 = vpop.f32.mrf.mxu1 }
 0x217   :  { %v991_v45 = vpop.f32.mrf.mxu0 }
 0x218   :  { %v1015_v1 = vmul.f32 %v991_v45, %v991_v45 }
 0x21f   :  { %v993_v55 = vpop.f32.mrf.mxu0 }
 0x220   :  { %v1178_v56 = vpack.c.bf16 %v993_v55, %v991_v45  ;;  %v1016_v9 = vmul.f32 %v993_v55, %v993_v55 }
 0x222   :  { %1914 = vmatmul.msk.bf16.vlgmr.msra.gmra.mxu1 %vm203_vm0, %v1178_v56 }
 0x227   :  { %v996_v62 = vpop.f32.mrf.mxu0 }
 0x228   :  { %v1017_v23 = vmul.f32 %v996_v62, %v996_v62 }
 0x22f   :  { %v998_v57 = vpop.f32.mrf.mxu0 }
 0x230   :  { %v1179_v58 = vpack.c.bf16 %v998_v57, %v996_v62  ;;  %v1018_v0 = vmul.f32 %v998_v57, %v998_v57 }
 0x232   :  { %1915 = vmatmul.msk.bf16.gmra.mxu1 %vm203_vm0, %v1179_v58  ;;  %v1021_v3 = vadd.f32 %v1018_v0, %v1015_v1  ;;  %v2033_v0 = vld [vmem:[%s2778_s21 + $0x38] sm:$0xff]  ;;  %v2032_v1 = vld [vmem:[%s2778_s21 + $0x30] sm:$0xff] }
 0x233   :  { %1546 = vmatpush.bf16.msrb.mxu1 %v2033_v0  ;;  %2068 = vmatpush.bf16.msra.mxu3 %v2033_v0 }
 0x237   :  { %v1001_v59 = vpop.f32.mrf.mxu0  ;;  %1547 = vmatpush.bf16.msrb.mxu1 %v2032_v1  ;;  %2069 = vmatpush.bf16.msra.mxu3 %v2032_v1 }
 0x238   :  { %v1019_v7 = vmul.f32 %v1001_v59, %v1001_v59 }
 0x23a   :  { %v1022_v10 = vadd.f32 %v1019_v7, %v1016_v9  ;;  %v2029_v9 = vld [vmem:[%s2778_s21 + $0x18] sm:$0xff] }
 0x23f   :  { %v1003_v60 = vpop.f32.mrf.mxu0 }
 0x240   :  { %v1180_v61 = vpack.c.bf16 %v1003_v60, %v1001_v59  ;;  %v1020_v15 = vmul.f32 %v1003_v60, %v1003_v60 }
 0x242   :  { %1916 = vmatmul.msk.bf16.gmra.mxu1 %vm203_vm0, %v1180_v61  ;;  %v1023_v17 = vadd.f32 %v1020_v15, %v1017_v23 }
 0x247   :  { %v1006_v2 = vpop.f32.mrf.mxu0 }
 0x248   :  { %v1024_v4 = vmul.f32 %v1006_v2, %v1006_v2 }
 0x24a   :  { %v1027_v5 = vadd.f32 %v1024_v4, %v1021_v3  ;;  %v2031_v3 = vld [vmem:[%s2778_s21 + $0x28] sm:$0xff]  ;;  %v2030_v4 = vld [vmem:[%s2778_s21 + $0x20] sm:$0xff] }
 0x24b   :  { %1548 = vmatpush.bf16.msrb.mxu1 %v2031_v3  ;;  %2070 = vmatpush.bf16.msra.mxu3 %v2031_v3 }
 0x24c   :  { %v1030_v8 = vmax.f32 %v1027_v5, 1e-08 }
 0x24e   :  { %2127 = vrsqrt.f32 %v1030_v8  ;;  %vm1040_vm14 = vcmp.eq.f32.partialorder %v1030_v8, inf  ;;  %v1043_v51 = vand.u32 2147483648, %v1030_v8  ;;  %vm1042_vm1 = vcmp.eq.f32.partialorder %v1030_v8, 0.0 }
 0x24f   :  { %v1008_v6 = vpop.f32.mrf.mxu0  ;;  %1549 = vmatpush.bf16.msrb.mxu1 %v2030_v4  ;;  %2071 = vmatpush.bf16.msra.mxu3 %v2030_v4 }
 0x250   :  { %v1025_v11 = vmul.f32 %v1008_v6, %v1008_v6  ;;  %v1181_v12 = vpack.c.bf16 %v1008_v6, %v1006_v2 }
 0x252   :  { %v1028_v13 = vadd.f32 %v1025_v11, %v1022_v10  ;;  %1917 = vmatmul.msk.bf16.gmra.mxu1 %vm203_vm0, %v1181_v12  ;;  %v2028_v12 = vld [vmem:[%s2778_s21 + $0x10] sm:$0xff] }
 0x253   :  { %1550 = vmatpush.bf16.msrb.mxu1 %v2029_v9  ;;  %2072 = vmatpush.bf16.msra.mxu3 %v2029_v9 }
 0x254   :  { %v2128_v14 = vpop.eup %2127  ;;  %v1031_v16 = vmax.f32 %v1028_v13, 1e-08 }
 0x255   :  { %v1034_v18 = vmul.f32 %v2128_v14, %v1030_v8 }
 0x256   :  { %2129 = vrsqrt.f32 %v1031_v16  ;;  %vm1052_vm15 = vcmp.eq.f32.partialorder %v1031_v16, inf  ;;  %v1055_v46 = vand.u32 2147483648, %v1031_v16  ;;  %vm1054_vm2 = vcmp.eq.f32.partialorder %v1031_v16, 0.0 }
 0x257   :  { %v1011_v19 = vpop.f32.mrf.mxu0  ;;  %v1035_v20 = vmul.f32 %v2128_v14, %v1034_v18  ;;  %1551 = vmatpush.bf16.msrb.mxu1 %v2028_v12  ;;  %2073 = vmatpush.bf16.msra.mxu3 %v2028_v12  ;;  %v2027_v18 = vld [vmem:[%s2778_s21 + $0x8] sm:$0xff] }
 0x258   :  { %v1026_v22 = vmul.f32 %v1011_v19, %v1011_v19  ;;  %v1182_v21 = vpack.c.bf16 %v1011_v19, %v1011_v19 }
 0x259   :  { %v1036_v24 = vmul.f32 0.5, %v1035_v20 }
 0x25a   :  { %v1029_v25 = vadd.f32 %v1026_v22, %v1023_v17  ;;  %v2026_v17 = vld [vmem:[%s2778_s21] sm:$0xff] }
 0x25b   :  { %v1037_v30 = vsub.f32 1.5, %v1036_v24  ;;  %1552 = vmatpush.bf16.msrb.mxu1 %v2027_v18  ;;  %2074 = vmatpush.bf16.msra.mxu3 %v2027_v18 }
 0x25c   :  { %v2130_v32 = vpop.eup %2129  ;;  %v1032_v34 = vmax.f32 %v1029_v25, 1e-08 }
 0x25d   :  { %v1046_v31 = vmul.f32 %v2130_v32, %v1031_v16  ;;  %v1038_v35 = vmul.f32 %v2128_v14, %v1037_v30 }
 0x25e   :  { %2131 = vrsqrt.f32 %v1032_v34  ;;  %vm1064_vm3 = vcmp.eq.f32.partialorder %v1032_v34, inf  ;;  %v1067_v56 = vand.u32 2147483648, %v1032_v34  ;;  %vm1066_vm4 = vcmp.eq.f32.partialorder %v1032_v34, 0.0 }
 0x25f   :  { %v1013_v54 = vpop.f32.mrf.mxu0  ;;  %v1047_v37 = vmul.f32 %v2130_v32, %v1046_v31  ;;  %v1039_v39 = vmul.f32 %v1038_v35, %v1030_v8  ;;  %1553 = vmatpush.bf16.msrb.mxu1 %v2026_v17  ;;  %2075 = vmatpush.bf16.msra.mxu3 %v2026_v17 }
 0x261   :  { %v1048_v38 = vmul.f32 0.5, %v1047_v37  ;;  %v1041_v43 = vsel %vm1040_vm14, %v1030_v8, %v1039_v39 }
 0x262   :  { %1918 = vmatmul.msk.bf16.gmra.mxu1 %vm203_vm0, %v1182_v21  ;;  %v1044_v48 = vsel %vm1042_vm1, %v1043_v51, %v1041_v43 }
 0x263   :  { %v1049_v53 = vsub.f32 1.5, %v1048_v38 }
 0x264   :  { %v2132_v41 = vpop.eup %2131 }
 0x265   :  { %v1050_v42 = vmul.f32 %v2130_v32, %v1049_v53  ;;  %v1058_v26 = vmul.f32 %v2132_v41, %v1032_v34 }
 0x267   :  { %v1051_v40 = vmul.f32 %v1050_v42, %v1031_v16  ;;  %v1059_v27 = vmul.f32 %v2132_v41, %v1058_v26 }
 0x269   :  { %v1053_v44 = vsel %vm1052_vm15, %v1031_v16, %v1051_v40  ;;  %v1060_v47 = vmul.f32 0.5, %v1059_v27 }
 0x26a   :  { %v1056_v49 = vsel %vm1054_vm2, %v1055_v46, %v1053_v44 }
 0x26b   :  { %v1143_v50 = vpack.c.bf16 %v1056_v49, %v1044_v48  ;;  %v1061_v28 = vsub.f32 1.5, %v1060_v47 }
 0x26d   :  { %1908 = vmatmul.msk.bf16.vlgmr.msrb.gmra.mxu2 %vm203_vm0, %v1143_v50  ;;  %v1062_v52 = vmul.f32 %v2132_v41, %v1061_v28 }
 0x26f   :  { %v1063_v45 = vmul.f32 %v1062_v52, %v1032_v34 }
 0x271   :  { %v1065_v55 = vsel %vm1064_vm3, %v1032_v34, %v1063_v45 }
 0x272   :  { %v1068_v62 = vsel %vm1066_vm4, %v1067_v56, %v1065_v55  ;;  %v2025_v55 = vld [vmem:[%s2780_s20] sm:$0xff] }
 0x273   :  { %v1144_v57 = vpack.c.bf16 %v1068_v62, %v1068_v62  ;;  %1416 = vmatpush.bf16.msra.mxu2 %v2025_v55 }
 0x27d   :  { %1909 = vmatmul.msk.bf16.gmra.mxu2 %vm203_vm0, %v1144_v57  ;;  %v2101_v57 = vld [vmem:[%s2774_s18] ss:$0 sm:$0xff] }
 0x29f   :  { %v2614_v58 = vpop.f32.mrf.mxu1 }
 0x2a0   :  { %v1237_v7 = vmul.f32 %v2614_v58, %v2614_v58 }
 0x2a7   :  { %v2616_v59 = vpop.f32.mrf.mxu1 }
 0x2a8   :  { %v1238_v15 = vmul.f32 %v2616_v59, %v2616_v59 }
 0x2af   :  { %v2618_v60 = vpop.f32.mrf.mxu1 }
 0x2b0   :  { %v1239_v32 = vmul.f32 %v2618_v60, %v2618_v60 }
 0x2b7   :  { %v2620_v61 = vpop.f32.mrf.mxu1 }
 0x2b8   :  { %v1240_v5 = vmul.f32 %v2620_v61, %v2620_v61 }
 0x2ba   :  { %v1243_v6 = vadd.f32 %v1240_v5, %v1237_v7 }
 0x2bf   :  { %v2622_v63 = vpop.f32.mrf.mxu1 }
 0x2c0   :  { %v1241_v13 = vmul.f32 %v2622_v63, %v2622_v63 }
 0x2c2   :  { %v1244_v23 = vadd.f32 %v1241_v13, %v1238_v15 }
 0x2c7   :  { %v2630_v2 = vpop.f32.mrf.mxu1 }
 0x2c8   :  { %v1242_v24 = vmul.f32 %v2630_v2, %v2630_v2 }
 0x2ca   :  { %v1245_v54 = vadd.f32 %v1242_v24, %v1239_v32 }
 0x2cf   :  { %v2642_v8 = vpop.f32.mrf.mxu1 }
 0x2d0   :  { %v1246_v10 = vmul.f32 %v2642_v8, %v2642_v8 }
 0x2d2   :  { %v1249_v11 = vadd.f32 %v1246_v10, %v1243_v6  ;;  %v1140_v6 = vadd.f32 %v2101_v57, %v2598_v29 }
 0x2d4   :  { %v1252_v14 = vmax.f32 %v1249_v11, 1e-08  ;;  %v1141_v11 = vadd.f32 %v2101_v57, %v2600_v36  ;;  %v1142_v36 = vadd.f32 %v2101_v57, %v2602_v33 }
 0x2d6   :  { %2133 = vrsqrt.f32 %v1252_v14  ;;  %vm1262_vm5 = vcmp.eq.f32.partialorder %v1252_v14, inf  ;;  %v1265_v27 = vand.u32 2147483648, %v1252_v14  ;;  %vm1264_vm6 = vcmp.eq.f32.partialorder %v1252_v14, 0.0 }
 0x2d7   :  { %v2656_v16 = vpop.f32.mrf.mxu1 }
 0x2d8   :  { %v1247_v19 = vmul.f32 %v2656_v16, %v2656_v16 }
 0x2da   :  { %v1250_v20 = vadd.f32 %v1247_v19, %v1244_v23 }
 0x2dc   :  { %v2134_v22 = vpop.eup %2133  ;;  %v1253_v25 = vmax.f32 %v1250_v20, 1e-08 }
 0x2dd   :  { %v1256_v30 = vmul.f32 %v2134_v22, %v1252_v14 }
 0x2de   :  { %2135 = vrsqrt.f32 %v1253_v25  ;;  %vm1274_vm7 = vcmp.eq.f32.partialorder %v1253_v25, inf  ;;  %v1277_v56 = vand.u32 2147483648, %v1253_v25  ;;  %vm1276_vm8 = vcmp.eq.f32.partialorder %v1253_v25, 0.0 }
 0x2df   :  { %v1257_v34 = vmul.f32 %v2134_v22, %v1256_v30  ;;  %v2670_v31 = vpop.f32.mrf.mxu1 }
 0x2e0   :  { %v1248_v35 = vmul.f32 %v2670_v31, %v2670_v31 }
 0x2e1   :  { %v1258_v37 = vmul.f32 0.5, %v1257_v34 }
 0x2e2   :  { %v1251_v21 = vadd.f32 %v1248_v35, %v1245_v54 }
 0x2e3   :  { %v1259_v38 = vsub.f32 1.5, %v1258_v37 }
 0x2e4   :  { %v2136_v39 = vpop.eup %2135  ;;  %v1254_v53 = vmax.f32 %v1251_v21, 1e-08 }
 0x2e5   :  { %v1260_v41 = vmul.f32 %v2134_v22, %v1259_v38  ;;  %v1268_v42 = vmul.f32 %v2136_v39, %v1253_v25 }
 0x2e6   :  { %2137 = vrsqrt.f32 %v1254_v53  ;;  %vm1286_vm9 = vcmp.eq.f32.partialorder %v1254_v53, inf  ;;  %vm1288_vm10 = vcmp.eq.f32.partialorder %v1254_v53, 0.0 }
 0x2e7   :  { %v1261_v26 = vmul.f32 %v1260_v41, %v1252_v14  ;;  %v1269_v43 = vmul.f32 %v2136_v39, %v1268_v42  ;;  %v1235_v40 = vpop.f32.mrf.mxu1 }
 0x2e9   :  { %v1263_v51 = vsel %vm1262_vm5, %v1252_v14, %v1261_v26  ;;  %v1270_v46 = vmul.f32 0.5, %v1269_v43  ;;  %v1289_v14 = vand.u32 2147483648, %v1254_v53 }
 0x2ea   :  { %v1266_v44 = vsel %vm1264_vm6, %v1265_v27, %v1263_v51 }
 0x2eb   :  { %v1919_v47 = vmul.f32 -1.442695, %v1266_v44  ;;  %v1271_v48 = vsub.f32 1.5, %v1270_v46 }
 0x2ec   :  { %v2138_v49 = vpop.eup %2137 }
 0x2ed   :  { %2139 = vpow2.f32 %v1919_v47  ;;  %v1272_v50 = vmul.f32 %v2136_v39, %v1271_v48  ;;  %v1280_v28 = vmul.f32 %v2138_v49, %v1254_v53 }
 0x2ef   :  { %v1273_v52 = vmul.f32 %v1272_v50, %v1253_v25  ;;  %v1281_v45 = vmul.f32 %v2138_v49, %v1280_v28 }
 0x2f0   :  { %v1166_v62 = vpop.f32.mrf.mxu2 }
 0x2f1   :  { %v1275_v0 = vsel %vm1274_vm7, %v1253_v25, %v1273_v52  ;;  %v1282_v1 = vmul.f32 0.5, %v1281_v45  ;;  %v1175_v13 = vadd.f32 %v1166_v62, %v1140_v6 }
 0x2f2   :  { %v1278_v3 = vsel %vm1276_vm8, %v1277_v56, %v1275_v0 }
 0x2f3   :  { %v2140_v4 = vpop.eup %2139  ;;  %v1920_v5 = vmul.f32 -1.442695, %v1278_v3  ;;  %v1283_v7 = vsub.f32 1.5, %v1282_v1  ;;  %v1357_v22 = vmax.f32 %v1175_v13, 0.0 }
 0x2f4   :  { %v1300_v9 = vadd.f32 1.0, %v2140_v4 }
 0x2f5   :  { %2141 = vpow2.f32 %v1920_v5  ;;  %v1284_v10 = vmul.f32 %v2138_v49, %v1283_v7 }
 0x2f6   :  { %2143 = vrcp.f32 %v1300_v9  ;;  %v1314_v42 = vand.u32 2147483648, %v1300_v9  ;;  %vm1308_vm12 = vweird.f32 %v1300_v9  ;;  %v1312_v40 = vand.u32 2147483647, %v1300_v9 }
 0x2f7   :  { %v1285_v12 = vmul.f32 %v1284_v10, %v1254_v53 }
 0x2f8   :  { %v1168_v15 = vpop.f32.mrf.mxu2  ;;  %v1315_v44 = vor.u32 1.1754944e-38, %v1314_v42  ;;  %vm1313_vm15 = vcmp.eq.f32.partialorder %v1312_v40, 8.507059e+37 }
 0x2f9   :  { %v1287_v18 = vsel %vm1286_vm9, %v1254_v53, %v1285_v12  ;;  %v1176_v23 = vadd.f32 %v1168_v15, %v1141_v11 }
 0x2fa   :  { %v1290_v19 = vsel %vm1288_vm10, %v1289_v14, %v1287_v18 }
 0x2fb   :  { %v2142_v20 = vpop.eup %2141  ;;  %v1921_v17 = vmul.f32 -1.442695, %v1290_v19  ;;  %v1358_v24 = vmax.f32 %v1176_v23, 0.0 }
 0x2fc   :  { %v2144_v25 = vpop.eup %2143  ;;  %v1301_v29 = vadd.f32 1.0, %v2142_v20 }
 0x2fd   :  { %v1304_v30 = vmul.f32 %v2144_v25, %v1300_v9  ;;  %2145 = vpow2.f32 %v1921_v17  ;;  %v1496_v32 = vpack.c.bf16 %v1358_v24, %v1357_v22  ;;  %vm1309_vm11 = vweird.f32 %v2144_v25 }
 0x2fe   :  { %2147 = vrcp.f32 %v1301_v29  ;;  %vm1310_vm13 = vmor %vm1308_vm12, %vm1309_vm11  ;;  %v1329_v51 = vand.u32 2147483648, %v1301_v29  ;;  %v1327_v48 = vand.u32 2147483647, %v1301_v29  ;;  %vm1323_vm1 = vweird.f32 %v1301_v29 }
 0x2ff   :  { %v1305_v34 = vsub.f32 1.0, %v1304_v30  ;;  %1554 = vmatmul.bf16.vlgmr.msrb.gmra.mxu1 %v1496_v32 }
 0x300   :  { %v1171_v54 = vpop.f32.mrf.mxu2  ;;  %v1330_v52 = vor.u32 1.1754944e-38, %v1329_v51  ;;  %vm1328_vm3 = vcmp.eq.f32.partialorder %v1327_v48, 8.507059e+37 }
 0x301   :  { %v1306_v35 = vmul.f32 %v2144_v25, %v1305_v34  ;;  %v1177_v37 = vadd.f32 %v1171_v54, %v1142_v36 }
 0x303   :  { %v2146_v21 = vpop.eup %2145  ;;  %v1359_v38 = vmax.f32 %v1177_v37, 0.0  ;;  %v1307_v53 = vadd.f32 %v2144_v25, %v1306_v35 }
 0x304   :  { %v2148_v39 = vpop.eup %2147  ;;  %v1302_v41 = vadd.f32 1.0, %v2146_v21 }
 0x305   :  { %v1319_v26 = vmul.f32 %v2148_v39, %v1301_v29  ;;  %v1497_v43 = vpack.c.bf16 %v1359_v38, %v1359_v38  ;;  %v1311_v33 = vsel %vm1310_vm13, %v2144_v25, %v1307_v53  ;;  %vm1324_vm14 = vweird.f32 %v2148_v39 }
 0x306   :  { %2149 = vrcp.f32 %v1302_v41  ;;  %v1316_v49 = vsel %vm1313_vm15, %v1315_v44, %v1311_v33  ;;  %vm1325_vm2 = vmor %vm1323_vm1, %vm1324_vm14  ;;  %v1344_v6 = vand.u32 2147483648, %v1302_v41  ;;  %vm1338_vm5 = vweird.f32 %v1302_v41 }
 0x307   :  { %v1320_v27 = vsub.f32 1.0, %v1319_v26  ;;  %1559 = vmatmul.bf16.vlgmr.msra.gmra.mxu3 %v1497_v43  ;;  %v1348_v56 = vmul.f32 %v1316_v49, %v2614_v58  ;;  %v1354_v57 = vmul.f32 %v1316_v49, %v2642_v8  ;;  %v1342_v10 = vand.u32 2147483647, %v1302_v41 }
 0x308   :  { %v1173_v46 = vpop.f32.mrf.mxu2  ;;  %v1345_v11 = vor.u32 1.1754944e-38, %v1344_v6  ;;  %vm1679_vm14 = vcmask 125952  }
 0x309   :  { %v1321_v47 = vmul.f32 %v2148_v39, %v1320_v27  ;;  %vm1343_vm7 = vcmp.eq.f32.partialorder %v1342_v10, 8.507059e+37 }
 0x30b   :  { %v1322_v50 = vadd.f32 %v2148_v39, %v1321_v47 }
 0x30c   :  { %v2150_v28 = vpop.eup %2149 }
 0x30d   :  { %v1326_v45 = vsel %vm1325_vm2, %v2148_v39, %v1322_v50  ;;  %v1334_v55 = vmul.f32 %v2150_v28, %v1302_v41  ;;  %vm1339_vm4 = vweird.f32 %v2150_v28 }
 0x30e   :  { %v1331_v62 = vsel %vm1328_vm3, %v1330_v52, %v1326_v45  ;;  %vm1340_vm6 = vmor %vm1338_vm5, %vm1339_vm4 }
 0x30f   :  { %v1349_v0 = vmul.f32 %v1331_v62, %v2616_v59  ;;  %v1355_v1 = vmul.f32 %v1331_v62, %v2656_v16  ;;  %v1335_v3 = vsub.f32 1.0, %v1334_v55  ;;  %v1351_v16 = vmul.f32 %v1316_v49, %v2620_v61  ;;  %v2035_v61 = vld [vmem:[%s2782_s24] sm:$0xff] }
 0x310   :  { %v1352_v14 = vmul.f32 %v1331_v62, %v2622_v63  ;;  %1638 = vmatpush.bf16.msrb.mxu3 %v2035_v61 }
 0x311   :  { %v1383_v4 = vpack.c.bf16 %v1349_v0, %v1348_v56  ;;  %v1386_v5 = vpack.c.bf16 %v1355_v1, %v1354_v57  ;;  %v1336_v7 = vmul.f32 %v2150_v28, %v1335_v3 }
 0x313   :  { %v1337_v9 = vadd.f32 %v2150_v28, %v1336_v7  ;;  %1926 = vmatmul.msk.bf16.vlgmr.msra.gmra.mxu2 %vm203_vm0, %v1383_v4 }
 0x315   :  { %v1341_v58 = vsel %vm1340_vm6, %v2150_v28, %v1337_v9 }
 0x316   :  { %v1346_v8 = vsel %vm1343_vm7, %v1345_v11, %v1341_v58 }
 0x317   :  { %v1350_v59 = vmul.f32 %v1346_v8, %v2618_v60  ;;  %v1353_v13 = vmul.f32 %v1346_v8, %v2630_v2  ;;  %v1356_v18 = vmul.f32 %v1346_v8, %v2670_v31  ;;  %v2034_v60 = vld [vmem:[%s2781_s22] sm:$0xff] }
 0x318   :  { %1591 = vmatpush.bf16.msrb.mxu0 %v2034_v60 }
 0x319   :  { %v1384_v12 = vpack.c.bf16 %v1351_v16, %v1350_v59  ;;  %v1385_v15 = vpack.c.bf16 %v1353_v13, %v1352_v14  ;;  %v1387_v23 = vpack.c.bf16 %v1356_v18, %v1356_v18 }
 0x323   :  { %1927 = vmatmul.msk.bf16.gmra.mxu2 %vm203_vm0, %v1384_v12 }
 0x333   :  { %1928 = vmatmul.msk.bf16.gmra.mxu2 %vm203_vm0, %v1385_v15 }
 0x343   :  { %1929 = vmatmul.msk.bf16.gmra.mxu2 %vm203_vm0, %v1386_v5 }
 0x353   :  { %1930 = vmatmul.msk.bf16.gmra.mxu2 %vm203_vm0, %v1387_v23 }
 0x38a   :  { %v2703_v63 = vpop.f32.mrf.mxu3 }
 0x392   :  { %v1562_v2 = vpop.f32.mrf.mxu3 }
 0x396   :  { %v1418_v19 = vpop.f32.mrf.mxu2 }
 0x397   :  { %v1442_v36 = vmul.f32 %v1418_v19, %v1418_v19 }
 0x39e   :  { %v1420_v20 = vpop.f32.mrf.mxu2 }
 0x39f   :  { %v1605_v17 = vpack.c.bf16 %v1420_v20, %v1418_v19  ;;  %v1443_v39 = vmul.f32 %v1420_v20, %v1420_v20 }
 0x3a1   :  { %1973 = vmatmul.msk.bf16.vlgmr.msrb.gmra.mxu3 %vm203_vm0, %v1605_v17 }
 0x3a6   :  { %v1423_v31 = vpop.f32.mrf.mxu2 }
 0x3a7   :  { %v1444_v46 = vmul.f32 %v1423_v31, %v1423_v31 }
 0x3ae   :  { %v1425_v22 = vpop.f32.mrf.mxu2 }
 0x3af   :  { %v1606_v24 = vpack.c.bf16 %v1425_v22, %v1423_v31  ;;  %v1445_v32 = vmul.f32 %v1425_v22, %v1425_v22 }
 0x3b1   :  { %1974 = vmatmul.msk.bf16.gmra.mxu3 %vm203_vm0, %v1606_v24  ;;  %v1448_v54 = vadd.f32 %v1445_v32, %v1442_v36 }
 0x3b6   :  { %v1428_v25 = vpop.f32.mrf.mxu2 }
 0x3b7   :  { %v1446_v21 = vmul.f32 %v1428_v25, %v1428_v25 }
 0x3b9   :  { %v1449_v41 = vadd.f32 %v1446_v21, %v1443_v39 }
 0x3be   :  { %v1430_v29 = vpop.f32.mrf.mxu2 }
 0x3bf   :  { %v1607_v30 = vpack.c.bf16 %v1430_v29, %v1428_v25  ;;  %v1447_v27 = vmul.f32 %v1430_v29, %v1430_v29 }
 0x3c1   :  { %1975 = vmatmul.msk.bf16.gmra.mxu3 %vm203_vm0, %v1607_v30  ;;  %v1450_v48 = vadd.f32 %v1447_v27, %v1444_v46 }
 0x3c6   :  { %v1433_v34 = vpop.f32.mrf.mxu2 }
 0x3c7   :  { %v1451_v35 = vmul.f32 %v1433_v34, %v1433_v34 }
 0x3c9   :  { %v1454_v37 = vadd.f32 %v1451_v35, %v1448_v54 }
 0x3cb   :  { %v1457_v38 = vmax.f32 %v1454_v37, 1e-08 }
 0x3cd   :  { %2151 = vrsqrt.f32 %v1457_v38  ;;  %vm1467_vm8 = vcmp.eq.f32.partialorder %v1457_v38, inf  ;;  %v1470_v8 = vand.u32 2147483648, %v1457_v38  ;;  %vm1469_vm10 = vcmp.eq.f32.partialorder %v1457_v38, 0.0 }
 0x3ce   :  { %v1435_v53 = vpop.f32.mrf.mxu2 }
 0x3cf   :  { %v1452_v42 = vmul.f32 %v1435_v53, %v1435_v53  ;;  %v1608_v26 = vpack.c.bf16 %v1435_v53, %v1433_v34  ;;  %v1555_v53 = vpop.f32.mrf.mxu1 }
 0x3d1   :  { %v1455_v43 = vadd.f32 %v1452_v42, %v1449_v41  ;;  %1976 = vmatmul.msk.bf16.gmra.mxu3 %vm203_vm0, %v1608_v26 }
 0x3d3   :  { %v2152_v40 = vpop.eup %2151  ;;  %v1458_v33 = vmax.f32 %v1455_v43, 1e-08  ;;  %v2102_v43 = vld [vmem:[%s2817_s6] ss:$0 sm:$0xff] }
 0x3d4   :  { %v1461_v51 = vmul.f32 %v2152_v40, %v1457_v38 }
 0x3d5   :  { %2153 = vrsqrt.f32 %v1458_v33  ;;  %vm1479_vm9 = vcmp.eq.f32.partialorder %v1458_v33, inf  ;;  %v1482_v59 = vand.u32 2147483648, %v1458_v33  ;;  %vm1481_vm11 = vcmp.eq.f32.partialorder %v1458_v33, 0.0 }
 0x3d6   :  { %v1438_v44 = vpop.f32.mrf.mxu2  ;;  %v1462_v47 = vmul.f32 %v2152_v40, %v1461_v51 }
 0x3d7   :  { %v1453_v49 = vmul.f32 %v1438_v44, %v1438_v44  ;;  %v1609_v1 = vpack.c.bf16 %v1438_v44, %v1438_v44  ;;  %v1557_v27 = vpop.f32.mrf.mxu1 }
 0x3d8   :  { %v1463_v50 = vmul.f32 0.5, %v1462_v47  ;;  %v1568_v51 = vadd.f32 %v2102_v43, %v1557_v27 }
 0x3d9   :  { %v1456_v28 = vadd.f32 %v1453_v49, %v1450_v48  ;;  %v1569_v49 = vadd.f32 %v2102_v43, %v2703_v63 }
 0x3da   :  { %v1464_v52 = vsub.f32 1.5, %v1463_v50 }
 0x3db   :  { %v2154_v45 = vpop.eup %2153  ;;  %v1459_v55 = vmax.f32 %v1456_v28, 1e-08 }
 0x3dc   :  { %v1473_v56 = vmul.f32 %v2154_v45, %v1458_v33  ;;  %v1465_v57 = vmul.f32 %v2152_v40, %v1464_v52 }
 0x3dd   :  { %2155 = vrsqrt.f32 %v1459_v55  ;;  %vm1491_vm12 = vcmp.eq.f32.partialorder %v1459_v55, inf  ;;  %v1494_v2 = vand.u32 2147483648, %v1459_v55  ;;  %vm1493_vm13 = vcmp.eq.f32.partialorder %v1459_v55, 0.0 }
 0x3de   :  { %v1440_v62 = vpop.f32.mrf.mxu2  ;;  %v1474_v0 = vmul.f32 %v2154_v45, %v1473_v56  ;;  %v1466_v4 = vmul.f32 %v1465_v57, %v1457_v38 }
 0x3e0   :  { %v1475_v3 = vmul.f32 0.5, %v1474_v0  ;;  %v1468_v10 = vsel %vm1467_vm8, %v1457_v38, %v1466_v4 }
 0x3e1   :  { %1977 = vmatmul.msk.bf16.gmra.mxu3 %vm203_vm0, %v1609_v1  ;;  %v1471_v13 = vsel %vm1469_vm10, %v1470_v8, %v1468_v10 }
 0x3e2   :  { %v1476_v5 = vsub.f32 1.5, %v1475_v3 }
 0x3e3   :  { %v2156_v7 = vpop.eup %2155 }
 0x3e4   :  { %v1477_v9 = vmul.f32 %v2154_v45, %v1476_v5  ;;  %v1485_v6 = vmul.f32 %v2156_v7, %v1459_v55 }
 0x3e6   :  { %v1478_v58 = vmul.f32 %v1477_v9, %v1458_v33  ;;  %v1486_v11 = vmul.f32 %v2156_v7, %v1485_v6 }
 0x3e8   :  { %v1480_v16 = vsel %vm1479_vm9, %v1458_v33, %v1478_v58  ;;  %v1487_v12 = vmul.f32 0.5, %v1486_v11  ;;  %v1567_v33 = vadd.f32 %v2102_v43, %v1555_v53 }
 0x3e9   :  { %v1483_v14 = vsel %vm1481_vm11, %v1482_v59, %v1480_v16 }
 0x3ea   :  { %v1570_v15 = vpack.c.bf16 %v1483_v14, %v1471_v13  ;;  %v1488_v18 = vsub.f32 1.5, %v1487_v12 }
 0x3ec   :  { %1967 = vmatmul.msk.bf16.vlgmr.msrb.gmra.mxu0 %vm203_vm0, %v1570_v15  ;;  %v1489_v23 = vmul.f32 %v2156_v7, %v1488_v18 }
 0x3ee   :  { %v1490_v60 = vmul.f32 %v1489_v23, %v1459_v55 }
 0x3f0   :  { %v1492_v61 = vsel %vm1491_vm12, %v1459_v55, %v1490_v60 }
 0x3f1   :  { %v1495_v19 = vsel %vm1493_vm13, %v1494_v2, %v1492_v61 }
 0x3f2   :  { %v1571_v20 = vpack.c.bf16 %v1495_v19, %v1495_v19 }
 0x3fc   :  { %1968 = vmatmul.msk.bf16.gmra.mxu0 %vm203_vm0, %v1571_v20 }
 0x424   :  { %v1640_v17 = vpop.f32.mrf.mxu3 }
 0x425   :  { %v1670_v31 = vpack.c.bf16 %v1640_v17, %v1640_v17 }
 0x427   :  { %1680 = vst.msk [vmem:[%s2783_s26] sm:$0xf] %vm1679_vm14, %v1670_v31 }
 0x42c   :  { %v1642_v22 = vpop.f32.mrf.mxu3 }
 0x42d   :  { %v1671_v24 = vpack.c.bf16 %v1642_v22, %v1642_v22 }
 0x42f   :  { %1681 = vst.msk [vmem:[%s2783_s26 + $0x4] sm:$0xf] %vm1679_vm14, %v1671_v24 }
 0x434   :  { %v1645_v25 = vpop.f32.mrf.mxu3 }
 0x435   :  { %v1672_v29 = vpack.c.bf16 %v1645_v25, %v1645_v25 }
 0x437   :  { %1682 = vst.msk [vmem:[%s2783_s26 + $0x8] sm:$0xf] %vm1679_vm14, %v1672_v29 }
 0x43c   :  { %v1647_v30 = vpop.f32.mrf.mxu3 }
 0x43d   :  { %v1673_v32 = vpack.c.bf16 %v1647_v30, %v1647_v30 }
 0x43f   :  { %1683 = vst.msk [vmem:[%s2783_s26 + $0xc] sm:$0xf] %vm1679_vm14, %v1673_v32 }
 0x444   :  { %v1650_v36 = vpop.f32.mrf.mxu3 }
 0x445   :  { %v1674_v34 = vpack.c.bf16 %v1650_v36, %v1650_v36 }
 0x447   :  { %1684 = vst.msk [vmem:[%s2783_s26 + $0x10] sm:$0xf] %vm1679_vm14, %v1674_v34 }
 0x44c   :  { %v1652_v54 = vpop.f32.mrf.mxu3 }
 0x44d   :  { %v1675_v35 = vpack.c.bf16 %v1652_v54, %v1652_v54 }
 0x44f   :  { %1685 = vst.msk [vmem:[%s2783_s26 + $0x14] sm:$0xf] %vm1679_vm14, %v1675_v35 }
 0x454   :  { %v1655_v37 = vpop.f32.mrf.mxu3 }
 0x455   :  { %v1676_v21 = vpack.c.bf16 %v1655_v37, %v1655_v37 }
 0x457   :  { %1686 = vst.msk [vmem:[%s2783_s26 + $0x18] sm:$0xf] %vm1679_vm14, %v1676_v21 }
 0x45c   :  { %v1657_v38 = vpop.f32.mrf.mxu3 }
 0x45d   :  { %v1677_v39 = vpack.c.bf16 %v1657_v38, %v1657_v38 }
 0x45f   :  { %1687 = vst.msk [vmem:[%s2783_s26 + $0x1c] sm:$0xf] %vm1679_vm14, %v1677_v39 }
 0x464   :  { %v1660_v41 = vpop.f32.mrf.mxu3 }
 0x465   :  { %v1678_v42 = vpack.c.bf16 %v1660_v41, %v1660_v41 }
 0x467   :  { %1688 = vst.msk [vmem:[%s2783_s26 + $0x20] sm:$0xf] %vm1679_vm14, %v1678_v42 }
 0x469   :  { %v1593_v26 = vpop.f32.mrf.mxu0 }
 0x46a   :  { %v1602_v44 = vadd.f32 %v1593_v26, %v1567_v33 }
 0x46c   :  { %v1662_v40 = vpop.f32.mrf.mxu3 }
 0x471   :  { %v1595_v46 = vpop.f32.mrf.mxu0 }
 0x472   :  { %v1603_v47 = vadd.f32 %v1595_v46, %v1568_v51 }
 0x474   :  { %v2055_v48 = vpack.c.bf16 %v1603_v47, %v1602_v44 }
 0x476   :  { %2056 = vst [vmem:[%s2784_s25] sm:$0xff] %v2055_v48  }
 0x479   :  { %v1598_v50 = vpop.f32.mrf.mxu0 }
 0x47a   :  { %v1604_v28 = vadd.f32 %v1598_v50, %v1569_v49 }
 0x47c   :  { %v1666_v52 = vpack.c.bf16 %v1604_v28, %v1604_v28 }
 0x47e   :  { %1669 = vst [vmem:[%s2784_s25 + $0x8] sm:$0xf] %v1666_v52 }
 0x481   :  { %v1600_v45 = vpop.f32.mrf.mxu0 }

// kernel: forward.27
= control target key start
LH: loop header
LB: loop body
LE: loop exit
PB: predicated region body
PF: predicated region fallthrough
CT: control target
= control target key end

     0   :  { %s2769_s0 = inlined_call_operand.vmem [shape: bf16[8,128], index: 0, kind: input, shape index: {}]   ;;  %s2770_s1 = inlined_call_operand.vmem [shape: bf16[3,8,16], index: 1, kind: input, shape index: {}]   ;;  %s2771_s2 = inlined_call_operand.vmem [shape: f32[8,128], index: 2, kind: input, shape index: {}]   ;;  %s2772_s3 = inlined_call_operand.vmem [shape: f32[3,8,16], index: 3, kind: input, shape index: {}]   ;;  %s2773_s4 = inlined_call_operand.vmem [shape: f32[8,1], index: 4, kind: input, shape index: {}]   ;;  %s2774_s5 = inlined_call_operand.vmem [shape: f32[1,128], index: 5, kind: input, shape index: {}]   ;;  %s2775_s6 = inlined_call_operand.vmem [shape: f32[1,128], index: 6, kind: input, shape index: {}]   ;;  %s2776_s7 = inlined_call_operand.vmem [shape: bf16[16,32], index: 7, kind: input, shape index: {}]   ;;  %s2777_s8 = inlined_call_operand.vmem [shape: bf16[128,512], index: 8, kind: input, shape index: {}]   ;;  %s2778_s9 = inlined_call_operand.vmem [shape: bf16[32,512], index: 9, kind: input, shape index: {}]   ;;  %s2779_s10 = inlined_call_operand.vmem [shape: f32[1,512], index: 10, kind: input, shape index: {}]   ;;  %s2780_s11 = inlined_call_operand.vmem [shape: bf16[32,32], index: 11, kind: input, shape index: {}]   ;;  %s2781_s12 = inlined_call_operand.vmem [shape: bf16[32,32], index: 12, kind: input, shape index: {}]   ;;  %s2782_s13 = inlined_call_operand.vmem [shape: bf16[512,128], index: 13, kind: input, shape index: {}]   ;;  %s2783_s14 = inlined_call_operand.vmem [shape: bf16[32,128], index: 14, kind: input, shape index: {}]   ;;  %s2784_s15 = inlined_call_operand.vmem [shape: f32[1,128], index: 15, kind: input, shape index: {}]   ;;  %s2785_s16 = inlined_call_operand.vmem [shape: bf16[32,16], index: 16, kind: input, shape index: {}]   ;;  %s2786_s17 = inlined_call_operand.vmem [shape: f32[1,128], index: 17, kind: input, shape index: {}]   ;;  %s2787_s18 = inlined_call_operand.vmem [shape: f32[1,128], index: 18, kind: input, shape index: {}]   ;;  %s2788_s19 = inlined_call_operand.vmem [shape: bf16[16,16], index: 19, kind: input, shape index: {}]   ;;  %s2789_s20 = inlined_call_operand.vmem [shape: bf16[128,128], index: 20, kind: input, shape index: {}]   ;;  %s2790_s21 = inlined_call_operand.vmem [shape: bf16[16,128], index: 21, kind: input, shape index: {}]   ;;  %s2791_s22 = inlined_call_operand.vmem [shape: f32[1,128], index: 22, kind: input, shape index: {}]   ;;  %s2792_s23 = inlined_call_operand.hbm [shape: bf16[8,128], index: 23, kind: output, shape index: {0}]   ;;  %s2793_s24 = inlined_call_operand.hbm [shape: bf16[3,8,16], index: 24, kind: output, shape index: {1}]   ;;  %s2794_s25 = inlined_call_operand.hbm [shape: f32[8,128], index: 25, kind: output, shape index: {2}]   ;;  %s2795_s26 = inlined_call_operand.hbm [shape: f32[8,128], index: 26, kind: output, shape index: {3}]  }
   0x1   :  { %2800 = sst [smem:[#allocation12_spill]] %s2769_s0 }
   0x2   :  { %2801 = sst [smem:[#allocation13_spill]] %s2770_s1 }
   0x3   :  { %2802 = sst [smem:[#allocation14_spill]] %s2771_s2 }
   0x4   :  { %2803 = sst [smem:[#allocation15_spill]] %s2772_s3 }
   0x5   :  { %2804 = sst [smem:[#allocation16_spill]] %s2773_s4 }
   0x6   :  { %2805 = sst [smem:[#allocation17_spill]] %s2774_s5 }
   0x7   :  { %2806 = sst [smem:[#allocation18_spill]] %s2775_s6 }
   0x8   :  { %2807 = sst [smem:[#allocation19_spill]] %s2776_s7 }
   0x9   :  { %2808 = sst [smem:[#allocation20_spill]] %s2777_s8 }
   0xa   :  { %2809 = sst [smem:[#allocation21_spill]] %s2778_s9 }
   0xb   :  { %2810 = sst [smem:[#allocation22_spill]] %s2779_s10 }
   0xc   :  { %2811 = sst [smem:[#allocation23_spill]] %s2795_s26 }
   0xd   :  { %32 = vsyncpa [#allocation3], 0 }
   0xe   :  { %33 = vsyncpa [#allocation5], 0  ;;  %s2812_s7 = sld [smem:[#allocation16_spill]]  ;;  %v2060_v1 = vmov 0  }
   0xf   :  { %1925 = vset.pattern.permute.xlu0 %v2060_v1 }
  0x14   :  { %v82_v0 = vld [vmem:[%s2812_s7] sm:$0xff] }
  0x15   :  { %88 = vperm.xlu0 %1925, %v82_v0  }
  0x16   :  { %34 = vsyncpa [#allocation8], 0  ;;  %s2813_s4 = sld [smem:[#allocation13_spill]]  ;;  %vm147_vm0 = vcmask 130048   ;;  %v2061_v42 = vmov 16.0   ;;  %vm536_vm10 = vcmask 261120  }
  0x17   :  { %s2814_s9 = sld [smem:[#allocation12_spill]]  ;;  %1932 = vrcp.f32 %v2061_v42  ;;  %s1393_s8 = sshll.u32 %s2793_s24, 4  ;;  %s1394_s8 = int_to_ptr.hbm [resolvable:$true] %s1393_s8 }
  0x18   :  { %s2815_s6 = sld [smem:[#allocation14_spill]]  ;;  %s1407_s10 = sshll.u32 %s2794_s25, 4  ;;  %s1408_s10 = int_to_ptr.hbm [resolvable:$true] %s1407_s10 }
  0x19   :  { %s2816_s3 = sld [smem:[#allocation15_spill]] }
  0x1a   :  { %s2817_s29 = sld [smem:[#allocation20_spill]] }
  0x1b   :  { %s2818_s0 = sld [smem:[#allocation19_spill]] }
  0x1c   :  { %v1914_v2 = vld [vmem:[%s2813_s4] sm:$0xff]   ;;  %v95_v4 = vld [vmem:[%s2813_s4 + $0x8] sm:$0xf]  ;;  %s2819_s7 = sld [smem:[#allocation17_spill]]  ;;  %s2064_s4 = smov 4  }
  0x1d   :  { %v83_v3 = vld [vmem:[%s2814_s9] sm:$0xf]  ;;  %v1915_v9 = vunpack.c.l.bf16 %v1914_v2  ;;  %v1916_v10 = vunpack.c.h.bf16 %v1914_v2  ;;  %v98_v12 = vunpack.c.l.bf16 %v95_v4  ;;  %v2299_v58 = vpop.eup %1932  ;;  %s2820_s26 = sld [smem:[#allocation18_spill]] }
  0x1e   :  { %v85_v5 = vld [vmem:[%s2815_s6] sm:$0xff]  ;;  %v84_v11 = vunpack.c.l.bf16 %v83_v3  ;;  %v152_v2 = vmul.f32 16.0, %v2299_v58  ;;  %vm156_vm1 = vweird.f32 %v2299_v58  ;;  %s2821_s9 = sld [smem:[#allocation21_spill]]  ;;  %s2066_s6 = smov [#allocation6]  }
  0x1f   :  { %v99_v6 = vld [vmem:[%s2816_s3] sm:$0xff]  ;;  %v100_v7 = vld [vmem:[%s2816_s3 + $0x8] sm:$0xff]  ;;  %v101_v8 = vld [vmem:[%s2816_s3 + $0x10] sm:$0xff]  ;;  %s2822_s1 = sld [smem:[#allocation22_spill]] }
  0x20   :  { %v1561_v30 = vld [vmem:[%s2817_s29 + $0xe0] sm:$0xf]  ;;  %v1853_v31 = vld [vmem:[%s2817_s29 + $0xec] sm:$0xf0]  ;;  %v1851_v32 = vld [vmem:[%s2817_s29 + $0xe4] sm:$0xf] }
  0x21   :  { %v1562_v33 = vor.u32 %v1853_v31, %v1561_v30  ;;  %v1563_v34 = vld [vmem:[%s2817_s29 + $0xf0] sm:$0xf0]  ;;  %v1569_v35 = vld [vmem:[%s2817_s29 + $0xe8] sm:$0xf]  ;;  %v1854_v36 = vld [vmem:[%s2817_s29 + $0xf4] sm:$0xf0] }
  0x22   :  { %v1566_v37 = vor.u32 %v1851_v32, %v1563_v34  ;;  %v1570_v38 = vor.u32 %v1854_v36, %v1569_v35  ;;  %v1545_v39 = vld [vmem:[%s2817_s29 + $0xc0] sm:$0xf]  ;;  %v1849_v40 = vld [vmem:[%s2817_s29 + $0xcc] sm:$0xf0]  ;;  %v1847_v41 = vld [vmem:[%s2817_s29 + $0xc4] sm:$0xf] }
  0x23   :  { %430 = vmatpush.bf16.msra.mxu1 %v1562_v33  ;;  %v1546_v43 = vor.u32 %v1849_v40, %v1545_v39  ;;  %v1547_v44 = vld [vmem:[%s2817_s29 + $0xd0] sm:$0xf0]  ;;  %v1553_v45 = vld [vmem:[%s2817_s29 + $0xc8] sm:$0xf]  ;;  %v1850_v46 = vld [vmem:[%s2817_s29 + $0xd4] sm:$0xf0] }
  0x24   :  { %443 = vmatpush.bf16.msra.mxu2 %v1566_v37  ;;  %456 = vmatpush.bf16.msra.mxu3 %v1570_v38  ;;  %v1550_v47 = vor.u32 %v1847_v41, %v1547_v44  ;;  %v1554_v48 = vor.u32 %v1850_v46, %v1553_v45  ;;  %v1529_v49 = vld [vmem:[%s2817_s29 + $0xa0] sm:$0xf]  ;;  %v1845_v50 = vld [vmem:[%s2817_s29 + $0xac] sm:$0xf0]  ;;  %v1843_v51 = vld [vmem:[%s2817_s29 + $0xa4] sm:$0xf] }
  0x25   :  { %v1530_v52 = vor.u32 %v1845_v50, %v1529_v49  ;;  %v1531_v53 = vld [vmem:[%s2817_s29 + $0xb0] sm:$0xf0]  ;;  %v1537_v54 = vld [vmem:[%s2817_s29 + $0xa8] sm:$0xf]  ;;  %v1846_v55 = vld [vmem:[%s2817_s29 + $0xb4] sm:$0xf0] }
  0x26   :  { %v1534_v56 = vor.u32 %v1843_v51, %v1531_v53  ;;  %v1538_v57 = vor.u32 %v1846_v55, %v1537_v54  ;;  %v1513_v59 = vld [vmem:[%s2817_s29 + $0x80] sm:$0xf]  ;;  %v1841_v60 = vld [vmem:[%s2817_s29 + $0x8c] sm:$0xf0]  ;;  %v1839_v61 = vld [vmem:[%s2817_s29 + $0x84] sm:$0xf] }
  0x27   :  { %431 = vmatpush.bf16.msra.mxu1 %v1546_v43  ;;  %v1514_v62 = vor.u32 %v1841_v60, %v1513_v59  ;;  %v1515_v63 = vld [vmem:[%s2817_s29 + $0x90] sm:$0xf0]  ;;  %v1521_v0 = vld [vmem:[%s2817_s29 + $0x88] sm:$0xf]  ;;  %v1842_v1 = vld [vmem:[%s2817_s29 + $0x94] sm:$0xf0] }
  0x28   :  { %444 = vmatpush.bf16.msra.mxu2 %v1550_v47  ;;  %457 = vmatpush.bf16.msra.mxu3 %v1554_v48  ;;  %v1518_v3 = vor.u32 %v1839_v61, %v1515_v63  ;;  %v1522_v4 = vor.u32 %v1842_v1, %v1521_v0  ;;  %v1852_v31 = vld [vmem:[%s2817_s29 + $0xec] sm:$0xf]  ;;  %v1571_v32 = vld [vmem:[%s2817_s29 + $0xf8] sm:$0xf0]  ;;  %v1465_v35 = vld [vmem:[%s2817_s29 + $0x20] sm:$0xf] }
  0x29   :  { %v1574_v34 = vor.u32 %v1852_v31, %v1571_v32  ;;  %v1829_v36 = vld [vmem:[%s2817_s29 + $0x2c] sm:$0xf0]  ;;  %v1827_v38 = vld [vmem:[%s2817_s29 + $0x24] sm:$0xf]  ;;  %v1467_v39 = vld [vmem:[%s2817_s29 + $0x30] sm:$0xf0] }
  0x2a   :  { %v1466_v37 = vor.u32 %v1829_v36, %v1465_v35  ;;  %v1473_v40 = vld [vmem:[%s2817_s29 + $0x28] sm:$0xf]  ;;  %v1470_v42 = vor.u32 %v1827_v38, %v1467_v39  ;;  %v1830_v43 = vld [vmem:[%s2817_s29 + $0x34] sm:$0xf0]  ;;  %v1848_v44 = vld [vmem:[%s2817_s29 + $0xcc] sm:$0xf] }
  0x2b   :  { %432 = vmatpush.bf16.msra.mxu1 %v1530_v52  ;;  %v1555_v45 = vld [vmem:[%s2817_s29 + $0xd8] sm:$0xf0]  ;;  %v1474_v46 = vor.u32 %v1830_v43, %v1473_v40  ;;  %v1449_v48 = vld [vmem:[%s2817_s29] sm:$0xf]  ;;  %v1825_v49 = vld [vmem:[%s2817_s29 + $0xc] sm:$0xf0] }
  0x2c   :  { %445 = vmatpush.bf16.msra.mxu2 %v1534_v56  ;;  %458 = vmatpush.bf16.msra.mxu3 %v1538_v57  ;;  %v1558_v47 = vor.u32 %v1848_v44, %v1555_v45  ;;  %v1823_v50 = vld [vmem:[%s2817_s29 + $0x4] sm:$0xf]  ;;  %v1450_v51 = vor.u32 %v1825_v49, %v1449_v48  ;;  %v1451_v52 = vld [vmem:[%s2817_s29 + $0x10] sm:$0xf0]  ;;  %v1457_v53 = vld [vmem:[%s2817_s29 + $0x8] sm:$0xf] }
  0x2d   :  { %v1826_v54 = vld [vmem:[%s2817_s29 + $0x14] sm:$0xf0]  ;;  %v1454_v55 = vor.u32 %v1823_v50, %v1451_v52  ;;  %v1844_v63 = vld [vmem:[%s2817_s29 + $0xac] sm:$0xf]  ;;  %v1539_v0 = vld [vmem:[%s2817_s29 + $0xb8] sm:$0xf0] }
  0x2e   :  { %v1458_v56 = vor.u32 %v1826_v54, %v1457_v53  ;;  %v1542_v1 = vor.u32 %v1844_v63, %v1539_v0  ;;  %v1861_v48 = vld [vmem:[%s2821_s9 + $0x2c] sm:$0xf0]  ;;  %v1859_v52 = vld [vmem:[%s2821_s9 + $0x24] sm:$0xf]  ;;  %v1595_v54 = vld [vmem:[%s2821_s9 + $0x30] sm:$0xf0] }
  0x2f   :  { %433 = vmatpush.bf16.msra.mxu1 %v1514_v62 }
  0x30   :  { %446 = vmatpush.bf16.msra.mxu2 %v1518_v3  ;;  %459 = vmatpush.bf16.msra.mxu3 %v1522_v4  ;;  %v1840_v3 = vld [vmem:[%s2817_s29 + $0x8c] sm:$0xf]  ;;  %v1523_v4 = vld [vmem:[%s2817_s29 + $0x98] sm:$0xf0] }
  0x87   :  { %v89_v13 = vpop.permute.xlu0 %88 }
  0x88   :  { %v91_v14 = vmul.f32 %v89_v13, %v85_v5  ;;  %v102_v15 = vmul.f32 %v99_v6, %v89_v13  ;;  %v103_v16 = vmul.f32 %v100_v7, %v89_v13  ;;  %v104_v17 = vmul.f32 %v101_v8, %v89_v13  ;;  %v1497_v5 = vld [vmem:[%s2817_s29 + $0x60] sm:$0xf]  ;;  %v1837_v6 = vld [vmem:[%s2817_s29 + $0x6c] sm:$0xf0]  ;;  %v1835_v7 = vld [vmem:[%s2817_s29 + $0x64] sm:$0xf] }
  0x89   :  { %v1498_v8 = vor.u32 %v1837_v6, %v1497_v5  ;;  %v1526_v6 = vor.u32 %v1840_v3, %v1523_v4 }
  0x8a   :  { %v2227_v18 = vadd.f32 %v1915_v9, %v102_v15  ;;  %v2229_v19 = vadd.f32 %v1916_v10, %v103_v16  ;;  %v2231_v20 = vadd.f32 %v91_v14, %v84_v11  ;;  %v2233_v21 = vadd.f32 %v104_v17, %v98_v12  ;;  %v1499_v9 = vld [vmem:[%s2817_s29 + $0x70] sm:$0xf0]  ;;  %v1505_v10 = vld [vmem:[%s2817_s29 + $0x68] sm:$0xf]  ;;  %v1838_v11 = vld [vmem:[%s2817_s29 + $0x74] sm:$0xf0] }
  0x8b   :  { %v153_v12 = vsub.f32 1.0, %v152_v2  ;;  %v1502_v13 = vor.u32 %v1835_v7, %v1499_v9  ;;  %v1506_v14 = vor.u32 %v1838_v11, %v1505_v10  ;;  %434 = vmatpush.bf16.msra.mxu1 %v1498_v8  ;;  %v1822_v15 = vld [vmem:[%s2818_s0] sm:$0xff]  ;;  %v1833_v17 = vld [vmem:[%s2817_s29 + $0x4c] sm:$0xf0]  ;;  %v1836_v8 = vld [vmem:[%s2817_s29 + $0x6c] sm:$0xf] }
  0x8c   :  { %110 = vadd.xlane.f32.xlu1 %v2231_v20  ;;  %v141_v22 = vmul.f32 %v2227_v18, %v2227_v18  ;;  %v142_v23 = vmul.f32 %v2229_v19, %v2229_v19  ;;  %v144_v25 = vmul.f32 %v2233_v21, %v2233_v21  ;;  %v113_v27 = vmul.f32 %v2231_v20, %v2231_v20  ;;  %v1481_v16 = vld [vmem:[%s2817_s29 + $0x40] sm:$0xf]  ;;  %v1507_v9 = vld [vmem:[%s2817_s29 + $0x78] sm:$0xf0]  ;;  %s2065_s0 = smov [#allocation2]  }
  0x8d   :  { %447 = vmatpush.bf16.msra.mxu2 %v1502_v13  ;;  %460 = vmatpush.bf16.msra.mxu3 %v1506_v14  ;;  %v1510_v11 = vor.u32 %v1836_v8, %v1507_v9  ;;  %v1491_v13 = vld [vmem:[%s2817_s29 + $0x58] sm:$0xf0]  ;;  %s1381_s30 = sshll.u32 %s2065_s0, 4  ;;  %s1382_s30 = int_to_ptr.vmem [resolvable:$true] %s1381_s30 }
  0x8e   :  { %v143_v24 = vadd.f32 %v142_v23, %v141_v22  ;;  %v1482_v22 = vor.u32 %v1833_v17, %v1481_v16  ;;  %v1831_v23 = vld [vmem:[%s2817_s29 + $0x44] sm:$0xf]  ;;  %240 = vmatpush.bf16.msra.mxu0 %v1822_v15  ;;  %v1828_v17 = vld [vmem:[%s2817_s29 + $0x2c] sm:$0xf] }
  0x90   :  { %v145_v26 = vadd.f32 %v144_v25, %v143_v24  ;;  %v1483_v24 = vld [vmem:[%s2817_s29 + $0x50] sm:$0xf0]  ;;  %v1489_v25 = vld [vmem:[%s2817_s29 + $0x48] sm:$0xf]  ;;  %435 = vmatpush.bf16.msra.mxu1 %v1482_v22  ;;  %v1475_v22 = vld [vmem:[%s2817_s29 + $0x38] sm:$0xf0] }
  0x92   :  { %v146_v28 = vmax.f32 %v145_v26, 1e-08  ;;  %v154_v26 = vmul.f32 %v2299_v58, %v153_v12  ;;  %469 = vmatpush.bf16.msrb.mxu0 %v1574_v34  ;;  %v1832_v12 = vld [vmem:[%s2817_s29 + $0x4c] sm:$0xf] }
  0x93   :  { %v1494_v15 = vor.u32 %v1832_v12, %v1491_v13  ;;  %v1864_v13 = vld [vmem:[%s2780_s11 + $0x8] sm:$0xff] }
  0x94   :  { %114 = vadd.xlane.f32.xlu1 %v113_v27  ;;  %v148_v29 = vsel %vm147_vm0, %v146_v28, 0.0  ;;  %v1486_v27 = vor.u32 %v1831_v23, %v1483_v24  ;;  %v1834_v28 = vld [vmem:[%s2817_s29 + $0x54] sm:$0xf0]  ;;  %v155_v41 = vadd.f32 %v2299_v58, %v154_v26  ;;  %436 = vmatpush.bf16.msra.mxu1 %v1466_v37  ;;  %v1478_v26 = vor.u32 %v1828_v17, %v1475_v22 }
  0x95   :  { %149 = vadd.xlane.f32.xlu0 %v148_v29  ;;  %v1490_v30 = vor.u32 %v1834_v28, %v1489_v25  ;;  %v1824_v28 = vld [vmem:[%s2817_s29 + $0xc] sm:$0xf] }
  0x96   :  { %448 = vmatpush.bf16.msra.mxu2 %v1486_v27  ;;  %v2413_v57 = vsel %vm156_vm1, %v2299_v58, %v155_v41  ;;  %470 = vmatpush.bf16.msrb.mxu0 %v1558_v47  ;;  %v1593_v47 = vld [vmem:[%s2821_s9 + $0x20] sm:$0xf] }
  0x97   :  { %461 = vmatpush.bf16.msra.mxu3 %v1490_v30  ;;  %v1594_v49 = vor.u32 %v1861_v48, %v1593_v47  ;;  %v1882_v47 = vld [vmem:[%s2782_s13 + $0x78] sm:$0xff] }
  0x98   :  { %437 = vmatpush.bf16.msra.mxu1 %v1450_v51  ;;  %v1857_v51 = vld [vmem:[%s2821_s9 + $0xc] sm:$0xf0]  ;;  %v1890_v48 = vld [vmem:[%s2782_s13 + $0xb8] sm:$0xff] }
  0x9a   :  { %449 = vmatpush.bf16.msra.mxu2 %v1470_v42  ;;  %471 = vmatpush.bf16.msrb.mxu0 %v1542_v1  ;;  %v1926_v42 = vld [vmem:[%s2819_s7] ss:$0 sm:$0xff]  ;;  %v1579_v1 = vld [vmem:[%s2821_s9 + $0x10] sm:$0xf0] }
  0x9b   :  { %462 = vmatpush.bf16.msra.mxu3 %v1474_v46 }
  0x9c   :  { %546 = vmatpush.bf16.msrb.mxu1 %v1594_v49  ;;  %v1873_v49 = vld [vmem:[%s2782_s13 + $0x30] sm:$0xff] }
  0x9e   :  { %450 = vmatpush.bf16.msra.mxu2 %v1454_v55  ;;  %472 = vmatpush.bf16.msrb.mxu0 %v1526_v6  ;;  %v1601_v55 = vld [vmem:[%s2821_s9 + $0x28] sm:$0xf]  ;;  %v1856_v6 = vld [vmem:[%s2821_s9 + $0xc] sm:$0xf] }
  0x9f   :  { %463 = vmatpush.bf16.msra.mxu3 %v1458_v56  ;;  %v1862_v56 = vld [vmem:[%s2821_s9 + $0x34] sm:$0xf0] }
  0xa2   :  { %473 = vmatpush.bf16.msrb.mxu0 %v1510_v11 }
  0xa6   :  { %474 = vmatpush.bf16.msrb.mxu0 %v1494_v15 }
  0xaa   :  { %475 = vmatpush.bf16.msrb.mxu0 %v1478_v26 }
  0xff   :  { %v111_v29 = vpop.xlane.xlu1 %110 }
 0x100   :  { %v2366_v33 = vmul.f32 0.01, %v111_v29  ;;  %v1459_v29 = vld [vmem:[%s2817_s29 + $0x18] sm:$0xf0]  ;;  %s2823_s29 = sld [smem:[#allocation23_spill]] }
 0x101   :  { %v1462_v34 = vor.u32 %v1824_v28, %v1459_v29  ;;  %v2556_v29 = vld [vmem:[%s2822_s1] sm:$0xf]  ;;  %s1405_s1 = sshll.u32 %s2066_s6, 4  ;;  %s1406_s1 = int_to_ptr.vmem [resolvable:$true] %s1405_s1 }
 0x102   :  { %v117_v60 = vmul.f32 %v2366_v33, %v2366_v33  ;;  %v120_v41 = vsub.f32 %v2231_v20, %v2366_v33 }
 0x103   :  { %476 = vmatpush.bf16.msrb.mxu0 %v1462_v34 }
 0x107   :  { %v115_v59 = vpop.xlane.xlu1 %114 }
 0x108   :  { %v116_v61 = vmul.f32 0.01, %v115_v59  ;;  %v150_v62 = vpop.xlane.xlu0 %149  ;;  %v1598_v59 = vor.u32 %v1859_v52, %v1595_v54  ;;  %v1872_v52 = vld [vmem:[%s2782_s13 + $0x28] sm:$0xff] }
 0x109   :  { %v158_v58 = vmul.f32 %v2413_v57, %v150_v62  ;;  %v1603_v62 = vld [vmem:[%s2821_s9 + $0x38] sm:$0xf0]  ;;  %v1888_v54 = vld [vmem:[%s2782_s13 + $0xa8] sm:$0xff] }
 0x10a   :  { %v118_v2 = vsub.f32 %v116_v61, %v117_v60  ;;  %v1602_v60 = vor.u32 %v1862_v56, %v1601_v55  ;;  %v1860_v61 = vld [vmem:[%s2821_s9 + $0x2c] sm:$0xf]  ;;  %559 = vmatpush.bf16.msrb.mxu2 %v1598_v59  ;;  %v1871_v55 = vld [vmem:[%s2782_s13 + $0x20] sm:$0xff] }
 0x10b   :  { %1934 = vrsqrt.f32 %v158_v58  ;;  %vm165_vm3 = vweird.f32 %v158_v58  ;;  %v1606_v63 = vor.u32 %v1860_v61, %v1603_v62  ;;  %v1879_v56 = vld [vmem:[%s2782_s13 + $0x60] sm:$0xff]  ;;  %v1870_v61 = vld [vmem:[%s2782_s13 + $0x18] sm:$0xff] }
 0x10c   :  { %v119_v5 = vmax.f32 %v118_v2, 0.0  ;;  %572 = vmatpush.bf16.msrb.mxu3 %v1602_v60  ;;  %v1585_v2 = vld [vmem:[%s2821_s9 + $0x8] sm:$0xf]  ;;  %v1887_v59 = vld [vmem:[%s2782_s13 + $0xa0] sm:$0xff]  ;;  %v1878_v62 = vld [vmem:[%s2782_s13 + $0x58] sm:$0xff] }
 0x10e   :  { %v121_v7 = vadd.f32 1e-05, %v119_v5  ;;  %v1858_v5 = vld [vmem:[%s2821_s9 + $0x14] sm:$0xf0] }
 0x10f   :  { %v1586_v8 = vor.u32 %v1858_v5, %v1585_v2  ;;  %v1885_v2 = vld [vmem:[%s2782_s13 + $0x90] sm:$0xff]  ;;  %v1876_v5 = vld [vmem:[%s2782_s13 + $0x48] sm:$0xff] }
 0x110   :  { %1936 = vrsqrt.f32 %v121_v7  ;;  %vm128_vm6 = vweird.f32 %v121_v7 }
 0x111   :  { %v1935_v10 = vpop.eup %1934  ;;  %573 = vmatpush.bf16.msrb.mxu3 %v1586_v8  ;;  %v1883_v8 = vld [vmem:[%s2782_s13 + $0x80] sm:$0xff] }
 0x112   :  { %v160_v14 = vmul.f32 %v1935_v10, %v158_v58  ;;  %vm166_vm2 = vweird.f32 %v1935_v10  ;;  %v1855_v58 = vld [vmem:[%s2821_s9 + $0x4] sm:$0xf] }
 0x113   :  { %vm167_vm4 = vmor %vm165_vm3, %vm166_vm2  ;;  %v1582_v4 = vor.u32 %v1855_v58, %v1579_v1  ;;  %v1868_v58 = vld [vmem:[%s2782_s13 + $0x8] sm:$0xff]  ;;  %v1877_v1 = vld [vmem:[%s2782_s13 + $0x50] sm:$0xff] }
 0x114   :  { %v161_v16 = vmul.f32 %v1935_v10, %v160_v14 }
 0x115   :  { %560 = vmatpush.bf16.msrb.mxu2 %v1582_v4  ;;  %v1867_v4 = vld [vmem:[%s2782_s13] sm:$0xff] }
 0x116   :  { %v1937_v23 = vpop.eup %1936  ;;  %v162_v24 = vmul.f32 0.5, %v161_v16 }
 0x117   :  { %v123_v25 = vmul.f32 %v1937_v23, %v121_v7  ;;  %vm129_vm5 = vweird.f32 %v1937_v23  ;;  %v1587_v7 = vld [vmem:[%s2821_s9 + $0x18] sm:$0xf0] }
 0x118   :  { %v163_v27 = vsub.f32 1.5, %v162_v24  ;;  %vm130_vm7 = vmor %vm128_vm6, %vm129_vm5  ;;  %v1590_v9 = vor.u32 %v1856_v6, %v1587_v7  ;;  %v1884_v6 = vld [vmem:[%s2782_s13 + $0x88] sm:$0xff]  ;;  %v1875_v7 = vld [vmem:[%s2782_s13 + $0x40] sm:$0xff] }
 0x119   :  { %v124_v30 = vmul.f32 %v1937_v23, %v123_v25 }
 0x11a   :  { %v164_v31 = vmul.f32 %v1935_v10, %v163_v27 }
 0x11b   :  { %v125_v32 = vmul.f32 0.5, %v124_v30 }
 0x11c   :  { %v168_v35 = vsel %vm167_vm4, %v1935_v10, %v164_v31  ;;  %v486_v31 = vperm.slane %v2556_v29, 3 }
 0x11d   :  { %v126_v36 = vsub.f32 1.5, %v125_v32  ;;  %v2455_v37 = vmul.f32 %v168_v35, %v2227_v18  ;;  %v2458_v38 = vmul.f32 %v168_v35, %v2229_v19  ;;  %v1927_v19 = vld [vmem:[%s2820_s26] ss:$0 sm:$0xff]  ;;  %v2476_v20 = vmul.f32 %v168_v35, %v2233_v21  ;;  %s2062_s26 = smov [#allocation4]  }
 0x11e   :  { %v1577_v21 = vld [vmem:[%s2821_s9] sm:$0xf]  ;;  %s1383_s9 = sshll.u32 %s2792_s23, 4  ;;  %s1384_s9 = int_to_ptr.hbm [resolvable:$true] %s1383_s9 }
 0x11f   :  { %v127_v39 = vmul.f32 %v1937_v23, %v126_v36  ;;  %v219_v40 = vpack.c.bf16 %v2458_v38, %v2455_v37  ;;  %v220_v33 = vpack.c.bf16 %v2476_v20, %v2476_v20  ;;  %v1578_v53 = vor.u32 %v1857_v51, %v1577_v21  ;;  %v1881_v21 = vld [vmem:[%s2782_s13 + $0x70] sm:$0xff] }
 0x120   :  { %v1889_v51 = vld [vmem:[%s2782_s13 + $0xb0] sm:$0xff] }
 0x121   :  { %v131_v43 = vsel %vm130_vm7, %v1937_v23, %v127_v39  ;;  %1445 = vmatmul.msk.bf16.vlgmr.msra.gmra.mxu0 %vm147_vm0, %v219_v40  ;;  %547 = vmatpush.bf16.msrb.mxu1 %v1578_v53  ;;  %v1863_v23 = vld [vmem:[%s2780_s11] sm:$0xff]  ;;  %v1880_v53 = vld [vmem:[%s2782_s13 + $0x68] sm:$0xff]  ;;  %vm1196_vm7 = vcmask 125952   ;;  %s2067_s11 = smov [#allocation7]  }
 0x122   :  { %v132_v18 = vmul.f32 %v131_v43, %v120_v41  ;;  %585 = vmatpush.bf16.msra.mxu0 %v1606_v63  ;;  %v1886_v63 = vld [vmem:[%s2782_s13 + $0x98] sm:$0xff] }
 0x124   :  { %v136_v44 = vmul.f32 %v1926_v42, %v132_v18 }
 0x126   :  { %v2471_v45 = vadd.f32 %v1927_v19, %v136_v44  ;;  %586 = vmatpush.bf16.msra.mxu0 %v1590_v9  ;;  %v483_v9 = vperm.slane %v2556_v29, 0 }
 0x128   :  { %v269_v46 = vpack.c.bf16 %v2471_v45, %v2471_v45 }
 0x12a   :  { %438 = vmatmul.bf16.vlgmr.msra.gmra.mxu1 %v269_v46  ;;  %451 = vmatmul.bf16.vlgmr.msra.gmra.mxu2 %v269_v46 }
 0x12b   :  { %464 = vmatmul.bf16.vlgmr.msra.gmra.mxu3 %v269_v46  ;;  %622 = vmatpush.bf16.msra.mxu1 %v1864_v13  ;;  %v484_v13 = vperm.slane %v2556_v29, 1 }
 0x12f   :  { %623 = vmatpush.bf16.msra.mxu1 %v1863_v23 }
 0x131   :  { %1446 = vmatmul.msk.bf16.gmra.mxu0 %vm147_vm0, %v220_v33  ;;  %v1874_v33 = vld [vmem:[%s2782_s13 + $0x38] sm:$0xff] }
 0x132   :  { %1007 = vmatpush.bf16.msra.mxu3 %v1874_v33 }
 0x136   :  { %1008 = vmatpush.bf16.msra.mxu3 %v1873_v49 }
 0x13a   :  { %1009 = vmatpush.bf16.msra.mxu3 %v1872_v52  ;;  %v1866_v52 = vld [vmem:[%s2781_s12 + $0x8] sm:$0xff] }
 0x13b   :  { %781 = vmatpush.bf16.msra.mxu2 %v1866_v52 }
 0x13e   :  { %1010 = vmatpush.bf16.msra.mxu3 %v1871_v55  ;;  %v1865_v55 = vld [vmem:[%s2781_s12] sm:$0xff] }
 0x13f   :  { %782 = vmatpush.bf16.msra.mxu2 %v1865_v55 }
 0x141   :  { %477 = vmatmul.bf16.vlgmr.msrb.gmra.mxu0 %v269_v46 }
 0x142   :  { %1020 = vmatpush.bf16.msrb.mxu0 %v1882_v47  ;;  %1011 = vmatpush.bf16.msra.mxu3 %v1870_v61 }
 0x146   :  { %1021 = vmatpush.bf16.msrb.mxu0 %v1881_v21 }
 0x14a   :  { %1022 = vmatpush.bf16.msrb.mxu0 %v1880_v53 }
 0x14e   :  { %1023 = vmatpush.bf16.msrb.mxu0 %v1879_v56 }
 0x152   :  { %1024 = vmatpush.bf16.msrb.mxu0 %v1878_v62  ;;  %v1898_v62 = vld [vmem:[%s2782_s13 + $0xf8] sm:$0xff] }
 0x156   :  { %1025 = vmatpush.bf16.msrb.mxu0 %v1877_v1  ;;  %v1895_v1 = vld [vmem:[%s2782_s13 + $0xe0] sm:$0xff] }
 0x15a   :  { %1026 = vmatpush.bf16.msrb.mxu0 %v1876_v5 }
 0x15e   :  { %1027 = vmatpush.bf16.msrb.mxu0 %v1875_v7 }
 0x19e   :  { %v2487_v50 = vpop.f32.mrf.mxu0 }
 0x19f   :  { %v251_v11 = vmul.f32 %v2487_v50, %v2487_v50 }
 0x1a6   :  { %v2513_v0 = vpop.f32.mrf.mxu0 }
 0x1a7   :  { %v2524_v3 = vpop.f32.mrf.mxu1  ;;  %v252_v10 = vmul.f32 %v2513_v0, %v2513_v0  ;;  %v596_v60 = vpack.c.bf16 %v2513_v0, %v2487_v50  ;;  %v1869_v50 = vld [vmem:[%s2782_s13 + $0x10] sm:$0xff] }
 0x1a8   :  { %1012 = vmatpush.bf16.msra.mxu3 %v1869_v50  ;;  %v1896_v50 = vld [vmem:[%s2782_s13 + $0xe8] sm:$0xff] }
 0x1a9   :  { %v253_v16 = vadd.f32 %v252_v10, %v251_v11  ;;  %v491_v10 = vadd.f32 %v483_v9, %v2524_v3 }
 0x1ac   :  { %1013 = vmatpush.bf16.msra.mxu3 %v1868_v58 }
 0x1ad   :  { %v2539_v12 = vpop.f32.mrf.mxu2 }
 0x1ae   :  { %v2544_v14 = vpop.f32.mrf.mxu3  ;;  %v2546_v15 = vpop.f32.mrf.mxu0 }
 0x1af   :  { %v254_v17 = vmul.f32 %v2546_v15, %v2546_v15  ;;  %v441_v22 = vpop.f32.mrf.mxu1  ;;  %v597_v0 = vpack.c.bf16 %v2546_v15, %v2546_v15 }
 0x1b0   :  { %1014 = vmatpush.bf16.msra.mxu3 %v1867_v4 }
 0x1b1   :  { %v255_v24 = vadd.f32 %v254_v17, %v253_v16  ;;  %v485_v17 = vperm.slane %v2556_v29, 2 }
 0x1b3   :  { %v256_v25 = vmax.f32 %v255_v24, 1e-08  ;;  %v492_v24 = vadd.f32 %v484_v13, %v2539_v12 }
 0x1b5   :  { %1938 = vrsqrt.f32 %v256_v25  ;;  %v454_v26 = vpop.f32.mrf.mxu2  ;;  %vm264_vm8 = vcmp.eq.f32.partialorder %v256_v25, inf  ;;  %v267_v18 = vand.u32 2147483648, %v256_v25  ;;  %vm266_vm9 = vcmp.eq.f32.partialorder %v256_v25, 0.0 }
 0x1b6   :  { %v467_v27 = vpop.f32.mrf.mxu3  ;;  %v249_v28 = vpop.f32.mrf.mxu0  ;;  %v493_v26 = vadd.f32 %v485_v17, %v2544_v14  ;;  %v1891_v17 = vld [vmem:[%s2782_s13 + $0xc0] sm:$0xff] }
 0x1bb   :  { %v1939_v30 = vpop.eup %1938 }
 0x1bc   :  { %v258_v32 = vmul.f32 %v1939_v30, %v256_v25 }
 0x1be   :  { %v478_v34 = vpop.f32.mrf.mxu0  ;;  %v259_v35 = vmul.f32 %v1939_v30, %v258_v32 }
 0x1bf   :  { %v2559_v36 = vadd.f32 %v486_v31, %v478_v34 }
 0x1c0   :  { %v260_v39 = vmul.f32 0.5, %v259_v35 }
 0x1c2   :  { %v261_v40 = vsub.f32 1.5, %v260_v39 }
 0x1c4   :  { %v262_v41 = vmul.f32 %v1939_v30, %v261_v40 }
 0x1c6   :  { %v480_v42 = vpop.f32.mrf.mxu0  ;;  %v263_v43 = vmul.f32 %v262_v41, %v256_v25 }
 0x1c8   :  { %v265_v19 = vsel %vm264_vm8, %v256_v25, %v263_v43 }
 0x1c9   :  { %v268_v44 = vsel %vm266_vm9, %v267_v18, %v265_v19 }
 0x1ca   :  { %v495_v46 = vpack.c.bf16 %v268_v44, %v268_v44 }
 0x1cc   :  { %1607 = vmatmul.msk.bf16.vlgmr.msrb.gmra.mxu1 %vm536_vm10, %v495_v46  ;;  %1608 = vmatmul.msk.bf16.vlgmr.msrb.gmra.mxu2 %vm536_vm10, %v495_v46 }
 0x1cd   :  { %1609 = vmatmul.msk.bf16.vlgmr.msrb.gmra.mxu3 %vm536_vm10, %v495_v46  ;;  %1610 = vmatmul.msk.bf16.vlgmr.msra.gmra.mxu0 %vm536_vm10, %v495_v46 }
 0x1ce   :  { %1033 = vmatpush.bf16.msrb.mxu1 %v1890_v48  ;;  %1046 = vmatpush.bf16.msrb.mxu2 %v1898_v62 }
 0x1d2   :  { %1034 = vmatpush.bf16.msrb.mxu1 %v1889_v51 }
 0x1d6   :  { %1035 = vmatpush.bf16.msrb.mxu1 %v1888_v54 }
 0x1da   :  { %1036 = vmatpush.bf16.msrb.mxu1 %v1887_v59 }
 0x1dc   :  { %1619 = vmatmul.msk.bf16.vlgmr.msra.gmra.mxu1 %vm536_vm10, %v596_v60 }
 0x1de   :  { %1037 = vmatpush.bf16.msrb.mxu1 %v1886_v63  ;;  %v1897_v63 = vld [vmem:[%s2782_s13 + $0xf0] sm:$0xff] }
 0x1df   :  { %1047 = vmatpush.bf16.msrb.mxu2 %v1897_v63 }
 0x1e2   :  { %1038 = vmatpush.bf16.msrb.mxu1 %v1885_v2  ;;  %v1894_v2 = vld [vmem:[%s2782_s13 + $0xd8] sm:$0xff] }
 0x1e3   :  { %1048 = vmatpush.bf16.msrb.mxu2 %v1896_v50 }
 0x1e6   :  { %1039 = vmatpush.bf16.msrb.mxu1 %v1884_v6  ;;  %v1893_v6 = vld [vmem:[%s2782_s13 + $0xd0] sm:$0xff] }
 0x1e7   :  { %1049 = vmatpush.bf16.msrb.mxu2 %v1895_v1 }
 0x1ea   :  { %1040 = vmatpush.bf16.msrb.mxu1 %v1883_v8 }
 0x1eb   :  { %1050 = vmatpush.bf16.msrb.mxu2 %v1894_v2 }
 0x1ec   :  { %1620 = vmatmul.msk.bf16.gmra.mxu1 %vm536_vm10, %v597_v0 }
 0x1ef   :  { %1051 = vmatpush.bf16.msrb.mxu2 %v1893_v6 }
 0x249   :  { %v549_v11 = vpop.f32.mrf.mxu1 }
 0x24a   :  { %v592_v15 = vadd.f32 %v549_v11, %v491_v10  ;;  %v588_v16 = vpop.f32.mrf.mxu0  ;;  %v1892_v11 = vld [vmem:[%s2782_s13 + $0xc8] sm:$0xff]  ;;  %s1416_s13 = sshll.u32 %s2067_s11, 4  ;;  %s1417_s13 = int_to_ptr.vmem [resolvable:$true] %s1416_s13 }
 0x24b   :  { %v2648_v22 = vadd.f32 %v588_v16, %v2559_v36  ;;  %1052 = vmatpush.bf16.msrb.mxu2 %v1892_v11 }
 0x24c   :  { %v674_v23 = vmax.f32 %v592_v15, 0.0 }
 0x24e   :  { %v811_v25 = vpack.c.bf16 %v674_v23, %v674_v23 }
 0x24f   :  { %v562_v27 = vpop.f32.mrf.mxu2  ;;  %1053 = vmatpush.bf16.msrb.mxu2 %v1891_v17 }
 0x250   :  { %v593_v28 = vadd.f32 %v562_v27, %v492_v24  ;;  %v575_v30 = vpop.f32.mrf.mxu3  ;;  %1015 = vmatmul.bf16.vlgmr.msra.gmra.mxu3 %v811_v25 }
 0x251   :  { %v594_v3 = vadd.f32 %v575_v30, %v493_v26  ;;  %v551_v31 = vpop.f32.mrf.mxu1  ;;  %v1902_v30 = vld [vmem:[%s2785_s16 + $0x8] sm:$0xff] }
 0x252   :  { %v675_v32 = vmax.f32 %v593_v28, 0.0  ;;  %v590_v34 = vpop.f32.mrf.mxu0  ;;  %1119 = vmatpush.bf16.msra.mxu0 %v1902_v30  ;;  %v1911_v30 = vld [vmem:[%s2789_s20 + $0x38] sm:$0xff] }
 0x253   :  { %v676_v35 = vmax.f32 %v594_v3, 0.0  ;;  %v677_v3 = vmax.f32 %v2648_v22, 0.0  ;;  %v1900_v22 = vld [vmem:[%s2783_s14 + $0x8] sm:$0xff] }
 0x254   :  { %v812_v39 = vpack.c.bf16 %v675_v32, %v675_v32  ;;  %1085 = vmatpush.bf16.msrb.mxu3 %v1900_v22 }
 0x255   :  { %v813_v29 = vpack.c.bf16 %v676_v35, %v676_v35  ;;  %v814_v31 = vpack.c.bf16 %v677_v3, %v677_v3 }
 0x256   :  { %1028 = vmatmul.bf16.vlgmr.msrb.gmra.mxu0 %v812_v39 }
 0x257   :  { %1041 = vmatmul.bf16.vlgmr.msrb.gmra.mxu1 %v813_v29  ;;  %v564_v36 = vpop.f32.mrf.mxu2 }
 0x258   :  { %v577_v40 = vpop.f32.mrf.mxu3 }
 0x259   :  { %v625_v41 = vpop.f32.mrf.mxu1 }
 0x25a   :  { %v634_v43 = vmul.f32 %v625_v41, %v625_v41 }
 0x261   :  { %v627_v12 = vpop.f32.mrf.mxu1 }
 0x262   :  { %v635_v42 = vmul.f32 %v627_v12, %v627_v12 }
 0x264   :  { %v636_v18 = vadd.f32 %v635_v42, %v634_v43 }
 0x269   :  { %v630_v14 = vpop.f32.mrf.mxu1 }
 0x26a   :  { %v637_v19 = vmul.f32 %v630_v14, %v630_v14 }
 0x26c   :  { %v638_v44 = vadd.f32 %v637_v19, %v636_v18 }
 0x26e   :  { %v639_v46 = vmax.f32 %v638_v44, 1e-08 }
 0x270   :  { %1940 = vrsqrt.f32 %v639_v46  ;;  %vm647_vm11 = vcmp.eq.f32.partialorder %v639_v46, inf  ;;  %v650_v56 = vand.u32 2147483648, %v639_v46  ;;  %vm649_vm12 = vcmp.eq.f32.partialorder %v639_v46, 0.0 }
 0x271   :  { %v632_v33 = vpop.f32.mrf.mxu1 }
 0x276   :  { %v1941_v47 = vpop.eup %1940 }
 0x277   :  { %v641_v48 = vmul.f32 %v1941_v47, %v639_v46 }
 0x279   :  { %v642_v49 = vmul.f32 %v1941_v47, %v641_v48 }
 0x27b   :  { %v643_v21 = vmul.f32 0.5, %v642_v49 }
 0x27d   :  { %v644_v51 = vsub.f32 1.5, %v643_v21 }
 0x27f   :  { %v645_v53 = vmul.f32 %v1941_v47, %v644_v51 }
 0x281   :  { %v646_v54 = vmul.f32 %v645_v53, %v639_v46 }
 0x283   :  { %v648_v59 = vsel %vm647_vm11, %v639_v46, %v646_v54 }
 0x284   :  { %v651_v60 = vsel %vm649_vm12, %v650_v56, %v648_v59 }
 0x285   :  { %v1621_v61 = vmul.f32 -1.442695, %v651_v60 }
 0x287   :  { %1942 = vpow2.f32 %v1621_v61 }
 0x28d   :  { %v1943_v0 = vpop.eup %1942 }
 0x28e   :  { %v655_v58 = vadd.f32 1.0, %v1943_v0 }
 0x290   :  { %1944 = vrcp.f32 %v655_v58  ;;  %v667_v8 = vand.u32 2147483648, %v655_v58  ;;  %v665_v10 = vand.u32 2147483647, %v655_v58  ;;  %vm661_vm14 = vweird.f32 %v655_v58 }
 0x292   :  { %v668_v15 = vor.u32 1.1754944e-38, %v667_v8  ;;  %vm666_vm1 = vcmp.eq.f32.partialorder %v665_v10, 8.507059e+37 }
 0x296   :  { %v1945_v4 = vpop.eup %1944 }
 0x297   :  { %v657_v5 = vmul.f32 %v1945_v4, %v655_v58  ;;  %vm662_vm13 = vweird.f32 %v1945_v4 }
 0x298   :  { %vm663_vm15 = vmor %vm661_vm14, %vm662_vm13 }
 0x299   :  { %v658_v7 = vsub.f32 1.0, %v657_v5 }
 0x29b   :  { %v659_v9 = vmul.f32 %v1945_v4, %v658_v7 }
 0x29d   :  { %v660_v13 = vadd.f32 %v1945_v4, %v659_v9 }
 0x29f   :  { %v664_v16 = vsel %vm663_vm15, %v1945_v4, %v660_v13 }
 0x2a0   :  { %v669_v23 = vsel %vm666_vm1, %v668_v15, %v664_v16 }
 0x2a1   :  { %v671_v24 = vmul.f32 %v669_v23, %v625_v41  ;;  %v672_v25 = vmul.f32 %v669_v23, %v627_v12  ;;  %v673_v27 = vmul.f32 %v669_v23, %v630_v14  ;;  %v1901_v12 = vld [vmem:[%s2785_s16] sm:$0xff] }
 0x2a2   :  { %1120 = vmatpush.bf16.msra.mxu0 %v1901_v12  ;;  %v1899_v14 = vld [vmem:[%s2783_s14] sm:$0xff]  ;;  %v1905_v12 = vld [vmem:[%s2789_s20 + $0x8] sm:$0xff] }
 0x2a3   :  { %v755_v26 = vpack.c.bf16 %v672_v25, %v671_v24  ;;  %v756_v28 = vpack.c.bf16 %v673_v27, %v673_v27  ;;  %1086 = vmatpush.bf16.msrb.mxu3 %v1899_v14  ;;  %v1928_v24 = vld [vmem:[%s2784_s15] ss:$0 sm:$0xff]  ;;  %s1391_s15 = sshll.u32 %s2062_s26, 4  ;;  %s1392_s15 = int_to_ptr.vmem [resolvable:$true] %s1391_s15 }
 0x2a5   :  { %1630 = vmatmul.msk.bf16.vlgmr.msra.gmra.mxu2 %vm536_vm10, %v755_v26 }
 0x2a6   :  { %1318 = vmatpush.bf16.msra.mxu2 %v1911_v30 }
 0x2b5   :  { %1631 = vmatmul.msk.bf16.gmra.mxu2 %vm536_vm10, %v756_v28  ;;  %v1903_v28 = vld [vmem:[%s2788_s19] sm:$0xff] }
 0x2b6   :  { %1241 = vmatpush.bf16.msra.mxu1 %v1903_v28 }
 0x2c5   :  { %1054 = vmatmul.bf16.vlgmr.msrb.gmra.mxu2 %v814_v31 }
 0x2d3   :  { %v1016_v32 = vpop.f32.mrf.mxu3  ;;  %v1029_v34 = vpop.f32.mrf.mxu0 }
 0x2d4   :  { %v1030_v35 = vadd.f32 %v1029_v34, %v1016_v32  ;;  %v1042_v39 = vpop.f32.mrf.mxu1  ;;  %v1909_v32 = vld [vmem:[%s2789_s20 + $0x28] sm:$0xff]  ;;  %v1908_v34 = vld [vmem:[%s2789_s20 + $0x20] sm:$0xff] }
 0x2d6   :  { %v1043_v29 = vadd.f32 %v1042_v39, %v1030_v35 }
 0x2db   :  { %v1018_v36 = vpop.f32.mrf.mxu3  ;;  %v1031_v40 = vpop.f32.mrf.mxu0 }
 0x2dc   :  { %v1044_v41 = vpop.f32.mrf.mxu1  ;;  %v1906_v40 = vld [vmem:[%s2789_s20 + $0x10] sm:$0xff] }
 0x328   :  { %v784_v42 = vpop.f32.mrf.mxu2 }
 0x329   :  { %v793_v44 = vmul.f32 %v784_v42, %v784_v42 }
 0x330   :  { %v786_v43 = vpop.f32.mrf.mxu2 }
 0x331   :  { %v1093_v18 = vpack.c.bf16 %v786_v43, %v784_v42  ;;  %v794_v19 = vmul.f32 %v786_v43, %v786_v43 }
 0x333   :  { %1777 = vmatmul.msk.bf16.vlgmr.msra.gmra.mxu0 %vm536_vm10, %v1093_v18  ;;  %v795_v33 = vadd.f32 %v794_v19, %v793_v44 }
 0x338   :  { %v789_v46 = vpop.f32.mrf.mxu2 }
 0x339   :  { %v796_v47 = vmul.f32 %v789_v46, %v789_v46  ;;  %v1094_v51 = vpack.c.bf16 %v789_v46, %v789_v46  ;;  %v1904_v46 = vld [vmem:[%s2789_s20] sm:$0xff] }
 0x33b   :  { %v797_v48 = vadd.f32 %v796_v47, %v795_v33 }
 0x33d   :  { %v798_v49 = vmax.f32 %v797_v48, 1e-08 }
 0x33f   :  { %1946 = vrsqrt.f32 %v798_v49  ;;  %vm806_vm2 = vcmp.eq.f32.partialorder %v798_v49, inf  ;;  %v809_v50 = vand.u32 2147483648, %v798_v49  ;;  %vm808_vm3 = vcmp.eq.f32.partialorder %v798_v49, 0.0 }
 0x340   :  { %v791_v21 = vpop.f32.mrf.mxu2 }
 0x343   :  { %1778 = vmatmul.msk.bf16.gmra.mxu0 %vm536_vm10, %v1094_v51 }
 0x345   :  { %v1947_v52 = vpop.eup %1946 }
 0x346   :  { %v800_v53 = vmul.f32 %v1947_v52, %v798_v49 }
 0x348   :  { %v1055_v54 = vpop.f32.mrf.mxu2  ;;  %v801_v55 = vmul.f32 %v1947_v52, %v800_v53 }
 0x349   :  { %v1056_v56 = vadd.f32 %v1055_v54, %v1043_v29  ;;  %v1907_v29 = vld [vmem:[%s2789_s20 + $0x18] sm:$0xff] }
 0x34a   :  { %v802_v59 = vmul.f32 0.5, %v801_v55 }
 0x34c   :  { %v803_v60 = vsub.f32 1.5, %v802_v59 }
 0x34e   :  { %v804_v61 = vmul.f32 %v1947_v52, %v803_v60 }
 0x350   :  { %v1057_v62 = vpop.f32.mrf.mxu2  ;;  %v805_v63 = vmul.f32 %v804_v61, %v798_v49 }
 0x352   :  { %v807_v0 = vsel %vm806_vm2, %v798_v49, %v805_v63 }
 0x353   :  { %v810_v58 = vsel %vm808_vm3, %v809_v50, %v807_v0  ;;  %v1929_v0 = vld [vmem:[%s2786_s17] ss:$0 sm:$0xff] }
 0x354   :  { %v1063_v1 = vpack.c.bf16 %v810_v58, %v810_v58 }
 0x356   :  { %1768 = vmatmul.msk.bf16.vlgmr.msrb.gmra.mxu3 %vm536_vm10, %v1063_v1 }
 0x3b0   :  { %v1122_v2 = vpop.f32.mrf.mxu0 }
 0x3b1   :  { %v1132_v6 = vadd.f32 %v1122_v2, %v2455_v37  ;;  %v1930_v2 = vld [vmem:[%s2787_s18] ss:$0 sm:$0xff] }
 0x3b3   :  { %v1168_v9 = vmul.f32 %v1132_v6, %v1132_v6 }
 0x3b8   :  { %v1124_v4 = vpop.f32.mrf.mxu0 }
 0x3b9   :  { %v1133_v5 = vadd.f32 %v1124_v4, %v2458_v38  ;;  %v1062_v38 = vadd.f32 %v1928_v24, %v1056_v56 }
 0x3bb   :  { %v1169_v7 = vmul.f32 %v1133_v5, %v1133_v5 }
 0x3bd   :  { %v1170_v13 = vadd.f32 %v1169_v7, %v1168_v9  ;;  %v1912_v7 = vld [vmem:[%s2790_s21] sm:$0xff] }
 0x3be   :  { %1352 = vmatpush.bf16.msra.mxu3 %v1912_v7 }
 0x3c0   :  { %v1127_v8 = vpop.f32.mrf.mxu0 }
 0x3c1   :  { %v1134_v10 = vadd.f32 %v1127_v8, %v2476_v20 }
 0x3c3   :  { %v1171_v11 = vmul.f32 %v1134_v10, %v1134_v10 }
 0x3c5   :  { %v1172_v15 = vadd.f32 %v1171_v11, %v1170_v13 }
 0x3c7   :  { %v1173_v16 = vmax.f32 %v1172_v15, 1e-08 }
 0x3c8   :  { %v1129_v17 = vpop.f32.mrf.mxu0 }
 0x3c9   :  { %v1174_v23 = vsel %vm147_vm0, %v1173_v16, 0.0 }
 0x3ca   :  { %1175 = vadd.xlane.f32.xlu2 %v1174_v23 }
 0x3d9   :  { %v1088_v25 = vpop.f32.mrf.mxu3 }
 0x3da   :  { %v1092_v37 = vadd.f32 %v1088_v25, %v1062_v38 }
 0x3dc   :  { %v2708_v26 = vadd.f32 %v1092_v37, %v2471_v45  ;;  %v1910_v45 = vld [vmem:[%s2789_s20 + $0x30] sm:$0xff]  ;;  %s1418_s20 = sshll.u32 %s2823_s29, 4  ;;  %s1419_s20 = int_to_ptr.hbm [resolvable:$true] %s1418_s20 }
 0x3dd   :  { %1319 = vmatpush.bf16.msra.mxu2 %v1910_v45 }
 0x3de   :  { %1137 = vadd.xlane.f32.xlu2 %v2708_v26  ;;  %v1140_v20 = vmul.f32 %v2708_v26, %v2708_v26 }
 0x3e0   :  { %1141 = vadd.xlane.f32.xlu1 %v1140_v20 }
 0x3e1   :  { %v1090_v27 = vpop.f32.mrf.mxu3  ;;  %1320 = vmatpush.bf16.msra.mxu2 %v1909_v32 }
 0x3e5   :  { %1321 = vmatpush.bf16.msra.mxu2 %v1908_v34 }
 0x3e9   :  { %1322 = vmatpush.bf16.msra.mxu2 %v1907_v29 }
 0x3ed   :  { %1323 = vmatpush.bf16.msra.mxu2 %v1906_v40 }
 0x3f1   :  { %1324 = vmatpush.bf16.msra.mxu2 %v1905_v12 }
 0x3f5   :  { %1325 = vmatpush.bf16.msra.mxu2 %v1904_v46 }
 0x43d   :  { %v1176_v3 = vpop.xlane.xlu2 %1175 }
 0x43e   :  { %v1177_v31 = vmul.f32 %v1176_v3, %v2413_v57 }
 0x440   :  { %1948 = vrsqrt.f32 %v1177_v31  ;;  %vm1184_vm5 = vweird.f32 %v1177_v31 }
 0x446   :  { %v1949_v35 = vpop.eup %1948 }
 0x447   :  { %v1179_v39 = vmul.f32 %v1949_v35, %v1177_v31  ;;  %vm1185_vm4 = vweird.f32 %v1949_v35 }
 0x448   :  { %vm1186_vm6 = vmor %vm1184_vm5, %vm1185_vm4 }
 0x449   :  { %v1180_v36 = vmul.f32 %v1949_v35, %v1179_v39  ;;  %v1931_v39 = vld [vmem:[%s2791_s22] ss:$0 sm:$0xff]  ;;  %s2063_s22 = smov 64  }
 0x44b   :  { %v1181_v57 = vmul.f32 0.5, %v1180_v36 }
 0x44d   :  { %v1182_v41 = vsub.f32 1.5, %v1181_v57 }
 0x44f   :  { %v1183_v42 = vmul.f32 %v1949_v35, %v1182_v41 }
 0x451   :  { %v1187_v22 = vsel %vm1186_vm6, %v1949_v35, %v1183_v42  ;;  %v1138_v43 = vpop.xlane.xlu2 %1137  ;;  %v1360_v35 = vlaneseq }
 0x452   :  { %v1188_v14 = vmul.f32 %v1187_v22, %v1132_v6  ;;  %v1189_v18 = vmul.f32 %v1187_v22, %v1133_v5  ;;  %v1139_v19 = vmul.f32 0.01, %v1138_v43  ;;  %v1190_v44 = vmul.f32 %v1187_v22, %v1134_v10 }
 0x453   :  { %v1142_v33 = vpop.xlane.xlu1 %1141  ;;  %v1361_v29 = vand.u32 127, %v1360_v35 }
 0x454   :  { %v1144_v47 = vmul.f32 %v1139_v19, %v1139_v19  ;;  %v1143_v48 = vmul.f32 0.01, %v1142_v33  ;;  %v1221_v49 = vpack.c.bf16 %v1189_v18, %v1188_v14  ;;  %v1193_v21 = vpack.c.bf16 %v1188_v14, %v1188_v14 }
 0x455   :  { %v1194_v51 = vpack.c.bf16 %v1189_v18, %v1189_v18  ;;  %v1195_v52 = vpack.c.bf16 %v1190_v44, %v1190_v44  ;;  %v1147_v50 = vsub.f32 %v2708_v26, %v1139_v19  ;;  %vm1362_vm13 = vcmp.lt.s32.totalorder %v1361_v29, 33 }
 0x456   :  { %v1145_v53 = vsub.f32 %v1143_v48, %v1144_v47  ;;  %1783 = vmatmul.msk.bf16.vlgmr.msra.gmra.mxu1 %vm147_vm0, %v1221_v49  ;;  %1197 = vst.msk [vmem:[#allocation4] sm:$0xf] %vm1196_vm7, %v1193_v21 }
 0x457   :  { %1198 = vst.msk [vmem:[#allocation4 + $0x4] sm:$0xf] %vm1196_vm7, %v1194_v51 }
 0x458   :  { %v1146_v54 = vmax.f32 %v1145_v53, 0.0  ;;  %1199 = vst.msk [vmem:[#allocation4 + $0x8] sm:$0xf] %vm1196_vm7, %v1195_v52 }
 0x459   :  { %1399 = dma.vmem_to_hbm [thread:$0]  %s1392_s15, 192, %s1394_s8, [#allocation5], %s2063_s22, %s2063_s22, %s2064_s4  }
 0x45a   :  { %v1148_v55 = vadd.f32 1e-05, %v1146_v54 }
 0x45c   :  { %1950 = vrsqrt.f32 %v1148_v55  ;;  %vm1155_vm9 = vweird.f32 %v1148_v55 }
 0x462   :  { %v1951_v56 = vpop.eup %1950 }
 0x463   :  { %v1150_v59 = vmul.f32 %v1951_v56, %v1148_v55  ;;  %vm1156_vm8 = vweird.f32 %v1951_v56 }
 0x464   :  { %vm1157_vm10 = vmor %vm1155_vm9, %vm1156_vm8 }
 0x465   :  { %v1151_v60 = vmul.f32 %v1951_v56, %v1150_v59 }
 0x466   :  { %1784 = vmatmul.msk.bf16.gmra.mxu1 %vm147_vm0, %v1195_v52 }
 0x467   :  { %v1152_v61 = vmul.f32 0.5, %v1151_v60 }
 0x469   :  { %v1153_v62 = vsub.f32 1.5, %v1152_v61 }
 0x46b   :  { %v1154_v63 = vmul.f32 %v1951_v56, %v1153_v62 }
 0x46d   :  { %v1158_v58 = vsel %vm1157_vm10, %v1951_v56, %v1154_v63 }
 0x46e   :  { %v1159_v1 = vmul.f32 %v1158_v58, %v1147_v50 }
 0x470   :  { %v1163_v4 = vmul.f32 %v1929_v0, %v1159_v1 }
 0x472   :  { %v1167_v5 = vadd.f32 %v1930_v2, %v1163_v4 }
 0x474   :  { %v1191_v6 = vpack.c.bf16 %v1167_v5, %v1167_v5 }
 0x476   :  { %1326 = vmatmul.bf16.vlgmr.msra.gmra.mxu2 %v1191_v6  ;;  %1192 = vst [vmem:[#allocation2] sm:$0xf] %v1191_v6 }
 0x477   :  { %1386 = dma.vmem_to_hbm [thread:$0]  %s1382_s30, 64, %s1384_s9, [#allocation3]  }
 0x4d3   :  { %v1243_v8 = vpop.f32.mrf.mxu1 }
 0x4d4   :  { %v1252_v11 = vmul.f32 %v1243_v8, %v1243_v8 }
 0x4db   :  { %v1245_v9 = vpop.f32.mrf.mxu1 }
 0x4dc   :  { %v1253_v10 = vmul.f32 %v1245_v9, %v1245_v9 }
 0x4de   :  { %v1254_v15 = vadd.f32 %v1253_v10, %v1252_v11 }
 0x4e3   :  { %v1248_v13 = vpop.f32.mrf.mxu1 }
 0x4e4   :  { %v1255_v16 = vmul.f32 %v1248_v13, %v1248_v13 }
 0x4e6   :  { %v1256_v17 = vadd.f32 %v1255_v16, %v1254_v15 }
 0x4e8   :  { %v1257_v23 = vmax.f32 %v1256_v17, 1e-08 }
 0x4ea   :  { %1952 = vrsqrt.f32 %v1257_v23  ;;  %vm1265_vm11 = vcmp.eq.f32.partialorder %v1257_v23, inf  ;;  %v1268_v45 = vand.u32 2147483648, %v1257_v23  ;;  %vm1267_vm12 = vcmp.eq.f32.partialorder %v1257_v23, 0.0 }
 0x4eb   :  { %v1250_v24 = vpop.f32.mrf.mxu1 }
 0x4f0   :  { %v1953_v38 = vpop.eup %1952 }
 0x4f1   :  { %v1259_v25 = vmul.f32 %v1953_v38, %v1257_v23 }
 0x4f3   :  { %v1260_v37 = vmul.f32 %v1953_v38, %v1259_v25 }
 0x4f5   :  { %v1261_v26 = vmul.f32 0.5, %v1260_v37 }
 0x4f7   :  { %v1262_v20 = vsub.f32 1.5, %v1261_v26 }
 0x4f9   :  { %v1327_v27 = vpop.f32.mrf.mxu2  ;;  %v1263_v28 = vmul.f32 %v1953_v38, %v1262_v20 }
 0x4fa   :  { %v1334_v36 = vadd.f32 %v1931_v39, %v1327_v27 }
 0x4fb   :  { %v1264_v30 = vmul.f32 %v1263_v28, %v1257_v23 }
 0x4fd   :  { %v1266_v3 = vsel %vm1265_vm11, %v1257_v23, %v1264_v30 }
 0x4fe   :  { %v1269_v31 = vsel %vm1267_vm12, %v1268_v45, %v1266_v3 }
 0x4ff   :  { %v1335_v32 = vpack.c.bf16 %v1269_v31, %v1269_v31 }
 0x501   :  { %v1329_v34 = vpop.f32.mrf.mxu2  ;;  %1821 = vmatmul.msk.bf16.vlgmr.msra.gmra.mxu3 %vm147_vm0, %v1335_v32 }
 0x584   :  { %v1354_v57 = vpop.f32.mrf.mxu3 }
 0x585   :  { %v1358_v40 = vadd.f32 %v1354_v57, %v1334_v36 }
 0x587   :  { %1359 = vst [vmem:[#allocation6] sm:$0xff] %v1358_v40  ;;  %v1363_v41 = vsel %vm1362_vm13, %v1358_v40, -1e+30 }
 0x588   :  { %1364 = vmax.xlane.f32.xlu2 %v1363_v41  ;;  %1410 = dma.vmem_to_hbm [thread:$0]  %s1406_s1, 128, %s1408_s10, [#allocation5]  }
 0x58c   :  { %v1356_v12 = vpop.f32.mrf.mxu3 }
 0x5fb   :  { %v1365_v42 = vpop.xlane.xlu2 %1364 }
 0x5fc   :  { %v1366_v22 = vsub.f32 %v1363_v41, %v1365_v42 }
 0x5fe   :  { %v1367_v43 = vmul.f32 1.442695, %v1366_v22 }
 0x600   :  { %1954 = vpow2.f32 %v1367_v43 }
 0x606   :  { %v1955_v14 = vpop.eup %1954 }
 0x607   :  { %1369 = vadd.xlane.f32.xlu1 %v1955_v14 }
 0x67a   :  { %v1370_v18 = vpop.xlane.xlu1 %1369 }
 0x67b   :  { %1956 = vlog2.f32 %v1370_v18 }
 0x681   :  { %v1957_v19 = vpop.eup %1956 }
 0x682   :  { %v1372_v44 = vmul.f32 0.6931472, %v1957_v19 }
 0x684   :  { %v1373_v46 = vadd.f32 %v1372_v44, %v1365_v42 }
 0x686   :  { %v1374_v33 = vsub.f32 %v1358_v40, %v1373_v46 }
 0x688   :  { %1375 = vst [vmem:[#allocation7] sm:$0xff] %v1374_v33 }
 0x689   :  { %1421 = dma.vmem_to_hbm [thread:$0]  %s1417_s13, 128, %s1419_s20, [#allocation8]  }
 0x68a   :  { %2054 = dma.done.wait [#allocation3], 64  }
 0x68b   :  { %2055 = vsyncadd [#allocation3], 4294967232 }
 0x68c   :  { %2056 = dma.done.wait [#allocation5], 320  }
 0x68d   :  { %2057 = vsyncadd [#allocation5], 4294966976 }
 0x68e   :  { %2058 = dma.done.wait [#allocation8], 128  }
 0x68f   :  { %2059 = vsyncadd [#allocation8], 4294967168 }
 0x690   :  { %1438 = vsyncpa [#allocation3], 1 }
 0x691   :  { %1439 = vsyncpa [#allocation5], 1 }
 0x692   :  { %1440 = vsyncpa [#allocation8], 1 }

</bundles_post_ra>
